<compile_context>
chip_gen: v7x
topology: tpu7x:2x2x1
jax: 0.10.0
libtpu: 0.0.40
codegen_flags: <defaults>
</compile_context>

<pallas_src>
import functools
import math

import jax
import jax.numpy as jnp
from jax.experimental import pallas as pl
from jax.experimental.pallas import tpu as pltpu


# ----------------------------- small config (mirrors LSTMConfig) ----------------------
VOCAB_SIZE = 256
EMBEDDING_DIM = 130          # chosen so size_list has exactly NUM_LSTM_BLOCK entries
HIDDEN_SIZE = 32
NUM_LSTM_LAYER = 2
NUM_LSTM_BLOCK = 4
PAD_TOKEN_ID = 0
EMBED_SCALE = 1.0            # Gemma3TextScaledWordEmbedding default embed_scale
SEQ_LEN = 8
BATCH = 2
DTYPE = jnp.float32

H = HIDDEN_SIZE
G = 4 * H                                        # 128 gate lanes
NUM_GLOBAL_LAYERS = NUM_LSTM_BLOCK * NUM_LSTM_LAYER   # 8

# ---- packed 128-lane slab layout (all offsets are multiples of 8 -> tile aligned) ----
TABLE_ROWS = VOCAB_SIZE                          # rows [0,256): emb@W_ih00 + b00 table
WHH0_OFF = TABLE_ROWS                            # rows [256,288): W_hh of block0/layer0
L1_BASE = WHH0_OFF + H                           # 288: start of layers L=1..7
BIAS_PAD = 8
L_STRIDE = H + H + BIAS_PAD                      # 72 rows per layer (W_ih, W_hh, bias)
SLAB_ROWS = L1_BASE + (NUM_GLOBAL_LAYERS - 1) * L_STRIDE     # 792
FC_B_OFF = H                                     # fc slab: weight rows [0,32), bias row 32
FC_SLAB_ROWS = H + BIAS_PAD                      # 40


def compute_size_list():
    """Exact reproduction of LSTMTextModel.__init__ size_list logic."""
    delta = (EMBEDDING_DIM - HIDDEN_SIZE) // (NUM_LSTM_BLOCK - 1)
    lst = [i if i + delta < EMBEDDING_DIM else EMBEDDING_DIM
           for i in range(HIDDEN_SIZE, EMBEDDING_DIM, delta)]
    size_list = list(reversed(lst))
    assert len(size_list) == NUM_LSTM_BLOCK, size_list
    return size_list


# ----------------------------------- fused Pallas kernel ------------------------------
def fused_forward_kernel(ids_ref, slab_ref, fc_ref, out_ref, ys_ref, *, seq_len, batch):
    """Whole LSTMTextModel forward on VMEM/SMEM-resident tensors.

      ids_ref  : (B*T,)  int32, SMEM, batch-major flat (row = b*T + t)
      slab_ref : (SLAB_ROWS, 4H) f32, VMEM   (gather table + all W_ih/W_hh/bias)
      fc_ref   : (FC_SLAB_ROWS, V) f32, VMEM (fc weight folded with last projection)
      out_ref  : (B*T, V) f32, VMEM, batch-major rows
      ys_ref   : (B*T, H) f32 scratch, last layer's hidden states, batch-major rows
    Gate columns are pre-reordered to [i | f | o | g].
    """
    T, B = seq_len, batch
    H3 = 3 * H
    f32 = jnp.float32

    # ---- embedding gather: block-0/layer-0 gate inputs (bias already folded in) ------
    gx0 = []
    for t in range(T):
        rows = [slab_ref[pl.ds(ids_ref[b * T + t], 1), :] for b in range(B)]
        gx0.append(jnp.concatenate(rows, axis=0))            # (B, 4H)

    # h/c carried per layer index across blocks (matches hn/cn chaining in the module).
    h = [jnp.zeros((B, H), f32) for _ in range(NUM_LSTM_LAYER)]
    c = [jnp.zeros((B, H), f32) for _ in range(NUM_LSTM_LAYER)]

    h_in = None                      # previous layer's per-timestep hidden outputs
    for blk in range(NUM_LSTM_BLOCK):
        for layer in range(NUM_LSTM_LAYER):
            L = blk * NUM_LSTM_LAYER + layer
            if L == 0:
                wih = None
                bias = None
                whh = slab_ref[pl.ds(WHH0_OFF, H), :]            # (H, 4H)
            else:
                base = L1_BASE + (L - 1) * L_STRIDE
                wih = slab_ref[pl.ds(base, H), :]                # (H, 4H), proj folded
                whh = slab_ref[pl.ds(base + H, H), :]            # (H, 4H)
                bias = slab_ref[pl.ds(base + 2 * H, 1), :]       # (1, 4H)

            h_l, c_l = h[layer], c[layer]
            last = (L == NUM_GLOBAL_LAYERS - 1)
            h_out = []
            for t in range(T):                                   # static unroll
                if L == 0:
                    gx = gx0[t]                                  # gathered row, bias folded
                else:
                    gx = jnp.dot(h_in[t], wih,
                                 preferred_element_type=f32) + bias
                g = gx + jnp.dot(h_l, whh, preferred_element_type=f32)   # (B, 4H)
                s = jax.nn.sigmoid(g[:, :H3])                    # [i | f | o]
                gg = jnp.tanh(g[:, H3:])                         # g
                c_l = s[:, H:2 * H] * c_l + s[:, :H] * gg
                h_l = s[:, 2 * H:H3] * jnp.tanh(c_l)
                h_out.append(h_l)
                if last:
                    # store final-layer hidden state batch-major (row = b*T + t)
                    for b in range(B):
                        ys_ref[pl.ds(b * T + t, 1), :] = h_l[b:b + 1, :]
            h[layer], c[layer] = h_l, c_l
            h_in = h_out

    # ---- final fc (last block's projection folded in); output already batch-major ----
    act = ys_ref[...]                                            # (B*T, H)
    fc_w = fc_ref[pl.ds(0, H), :]                                # (H, V)
    fc_b = fc_ref[pl.ds(FC_B_OFF, 1), :]                         # (1, V)
    out_ref[...] = (jnp.dot(act, fc_w, preferred_element_type=f32) + fc_b
                    ).astype(out_ref.dtype)


# ----------------------------------- model forward ------------------------------------
def model_forward(packed, input_ids):
    B, T = input_ids.shape
    ids_flat = input_ids.reshape(-1).astype(jnp.int32)           # batch-major flat ids

    kernel = functools.partial(fused_forward_kernel, seq_len=T, batch=B)
    logits = pl.pallas_call(
        kernel,
        out_shape=jax.ShapeDtypeStruct((B * T, VOCAB_SIZE), DTYPE),
        in_specs=[
            pl.BlockSpec(memory_space=pltpu.MemorySpace.SMEM),   # ids
            pl.BlockSpec(memory_space=pltpu.MemorySpace.VMEM),   # packed 128-lane slab
            pl.BlockSpec(memory_space=pltpu.MemorySpace.VMEM),   # packed fc slab
        ],
        out_specs=pl.BlockSpec(memory_space=pltpu.MemorySpace.VMEM),
        scratch_shapes=[pltpu.VMEM((B * T, HIDDEN_SIZE), jnp.float32)],
    )(ids_flat, packed["slab"], packed["fc_slab"])

    # batch-major rows -> (B, T, V) is a pure reshape (no transpose).
    return logits.reshape(B, T, VOCAB_SIZE)


# --------------------------- parameter packing / folding -------------------------------
def _reorder_gates(w):
    """PyTorch gate column order [i, f, g, o] -> kernel order [i, f, o, g]."""
    return jnp.concatenate([w[..., :2 * H], w[..., 3 * H:], w[..., 2 * H:3 * H]],
                           axis=-1)


def pack_params(params):
    blocks = params["blocks"]
    wih = [[_reorder_gates(blocks[b]["wih_t"][l]) for l in range(NUM_LSTM_LAYER)]
           for b in range(NUM_LSTM_BLOCK)]
    whh = [[_reorder_gates(blocks[b]["whh_t"][l]) for l in range(NUM_LSTM_LAYER)]
           for b in range(NUM_LSTM_BLOCK)]
    bias = [[_reorder_gates(blocks[b]["bias"][l]) for l in range(NUM_LSTM_LAYER)]
            for b in range(NUM_LSTM_BLOCK)]

    # Fold embed scale + block-0/layer-0 input projection + its bias into a gather table.
    table = (params["embedding"] * EMBED_SCALE) @ wih[0][0] + bias[0][0]   # (V, 4H)

    def pad_bias(b, width):
        return jnp.zeros((BIAS_PAD, width), DTYPE).at[0].set(b[0])

    rows = [table, whh[0][0]]
    for Lg in range(1, NUM_GLOBAL_LAYERS):
        b, l = divmod(Lg, NUM_LSTM_LAYER)
        if l == 0:
            # fold previous block's project_back1 into this layer's input weights
            w_in = blocks[b - 1]["proj_wt"] @ wih[b][0]
            b_in = blocks[b - 1]["proj_b"] @ wih[b][0] + bias[b][0]
        else:
            w_in = wih[b][l]
            b_in = bias[b][l]
        rows += [w_in, whh[b][l], pad_bias(b_in, G)]
    slab = jnp.concatenate(rows, axis=0)
    assert slab.shape == (SLAB_ROWS, G), slab.shape

    # fold last block's projection into fc
    last = blocks[-1]
    fc_w = last["proj_wt"] @ params["fc_wt"]
    fc_b = last["proj_b"] @ params["fc_wt"] + params["fc_b"]
    fc_slab = jnp.concatenate([fc_w, pad_bias(fc_b, VOCAB_SIZE)], axis=0)
    assert fc_slab.shape == (FC_SLAB_ROWS, VOCAB_SIZE), fc_slab.shape

    return dict(slab=slab, fc_slab=fc_slab)


# --------------------------- deterministic parameter init ------------------------------
def init_params(key):
    size_list = compute_size_list()              # [130, 96, 64, 32]
    keys = iter(jax.random.split(key, 256))

    def uni(shape, scale):
        return jax.random.uniform(next(keys), shape, DTYPE, -scale, scale)

    emb = jax.random.normal(next(keys), (VOCAB_SIZE, EMBEDDING_DIM), DTYPE) * 0.02
    emb = emb.at[PAD_TOKEN_ID].set(0.0)          # padding_idx row is zero

    k = 1.0 / math.sqrt(H)
    blocks = []
    for bi in range(NUM_LSTM_BLOCK):
        in_size = size_list[bi]
        out_size = size_list[bi + 1] if bi != NUM_LSTM_BLOCK - 1 else HIDDEN_SIZE
        wih_t, whh_t, bias = [], [], []
        for layer in range(NUM_LSTM_LAYER):
            d_in = in_size if layer == 0 else H
            wih_t.append(uni((d_in, 4 * H), k))                   # weight_ih_l{l}.T
            whh_t.append(uni((H, 4 * H), k))                      # weight_hh_l{l}.T
            bias.append(uni((1, 4 * H), k) + uni((1, 4 * H), k))  # b_ih + b_hh
        kp = 1.0 / math.sqrt(H)
        blocks.append(dict(wih_t=wih_t, whh_t=whh_t, bias=bias,
                           proj_wt=uni((H, out_size), kp),
                           proj_b=uni((1, out_size), kp)))

    kf = 1.0 / math.sqrt(HIDDEN_SIZE)
    fc_wt = uni((HIDDEN_SIZE, VOCAB_SIZE), kf)
    fc_b = uni((1, VOCAB_SIZE), kf)
    return dict(embedding=emb, blocks=blocks, fc_wt=fc_wt, fc_b=fc_b)


# ----------------------------- pure-JAX reference (for check) --------------------------
def ref_lstm_layer(x_tbd, wih_t, whh_t, b, h0, c0):
    T = x_tbd.shape[0]
    h, c = h0, c0
    ys = []
    for t in range(T):
        gates = x_tbd[t] @ wih_t + h @ whh_t + b
        i = jax.nn.sigmoid(gates[:, :H])
        f = jax.nn.sigmoid(gates[:, H:2 * H])
        g = jnp.tanh(gates[:, 2 * H:3 * H])
        o = jax.nn.sigmoid(gates[:, 3 * H:])
        c = f * c + i * g
        h = o * jnp.tanh(c)
        ys.append(h)
    return jnp.stack(ys), h, c


def ref_forward(params, input_ids):
    B, T = input_ids.shape
    x = jnp.take(params["embedding"], input_ids, axis=0) * EMBED_SCALE
    hn = jnp.zeros((NUM_LSTM_LAYER, B, HIDDEN_SIZE), x.dtype)
    cn = jnp.zeros((NUM_LSTM_LAYER, B, HIDDEN_SIZE), x.dtype)
    for blk in params["blocks"]:
        xt = jnp.transpose(x, (1, 0, 2))
        hns, cns = [], []
        for layer in range(NUM_LSTM_LAYER):
            xt, h_l, c_l = ref_lstm_layer(xt, blk["wih_t"][layer], blk["whh_t"][layer],
                                          blk["bias"][layer], hn[layer], cn[layer])
            hns.append(h_l)
            cns.append(c_l)
        hn, cn = jnp.stack(hns), jnp.stack(cns)
        x = jnp.transpose(xt, (1, 0, 2)) @ blk["proj_wt"] + blk["proj_b"]
    # dropout is identity in eval
    return x @ params["fc_wt"] + params["fc_b"]


# --------------------------------------- main -------------------------------------------
if __name__ == "__main__":
    key = jax.random.PRNGKey(0)
    pkey, ikey = jax.random.split(key)
    params = init_params(pkey)
    packed = pack_params(params)
    input_ids = jax.random.randint(ikey, (BATCH, SEQ_LEN), 0, VOCAB_SIZE, dtype=jnp.int32)

    logits = jax.jit(model_forward)(packed, input_ids)
    logits = jax.block_until_ready(logits)
    assert logits.shape == (BATCH, SEQ_LEN, VOCAB_SIZE)

    ref = jax.block_until_ready(jax.jit(ref_forward)(params, input_ids))
    max_err = float(jnp.abs(logits - ref).max())
    assert jnp.allclose(logits, ref, atol=1e-3, rtol=1e-3), max_err

    print("KERNEL_OK")
</pallas_src>

<mosaic_0001>
module attributes {stable_mosaic.version = 11 : i64} {
  func.func @fused_forward_kernel(%arg0: memref<16xi32, #tpu.memory_space<smem>>, %arg1: memref<792x128xf32, #tpu.memory_space<vmem>>, %arg2: memref<40x256xf32, #tpu.memory_space<vmem>>, %arg3: memref<16x256xf32, #tpu.memory_space<vmem>>, %arg4: memref<16x32xf32, #tpu.memory_space<vmem>>) attributes {dimension_semantics = [], scalar_prefetch = 0 : i64, scratch_operands = 1 : i64, tpu.core_type = #tpu.core_type<tc>} {
    %c0 = arith.constant 0 : index
    %0 = memref.load %arg0[%c0] : memref<16xi32, #tpu.memory_space<smem>>
    %1 = arith.index_cast %0 : i32 to index
    %c0_0 = arith.constant 0 : index
    %2 = vector.load %arg1[%1, %c0_0] : memref<792x128xf32, #tpu.memory_space<vmem>>, vector<1x128xf32>
    %c8 = arith.constant 8 : index
    %3 = memref.load %arg0[%c8] : memref<16xi32, #tpu.memory_space<smem>>
    %4 = arith.index_cast %3 : i32 to index
    %c0_1 = arith.constant 0 : index
    %5 = vector.load %arg1[%4, %c0_1] : memref<792x128xf32, #tpu.memory_space<vmem>>, vector<1x128xf32>
    %6 = tpu.concatenate %2, %5 in 0 : vector<1x128xf32>, vector<1x128xf32> -> vector<2x128xf32>
    %c1 = arith.constant 1 : index
    %7 = memref.load %arg0[%c1] : memref<16xi32, #tpu.memory_space<smem>>
    %8 = arith.index_cast %7 : i32 to index
    %c0_2 = arith.constant 0 : index
    %9 = vector.load %arg1[%8, %c0_2] : memref<792x128xf32, #tpu.memory_space<vmem>>, vector<1x128xf32>
    %c9 = arith.constant 9 : index
    %10 = memref.load %arg0[%c9] : memref<16xi32, #tpu.memory_space<smem>>
    %11 = arith.index_cast %10 : i32 to index
    %c0_3 = arith.constant 0 : index
    %12 = vector.load %arg1[%11, %c0_3] : memref<792x128xf32, #tpu.memory_space<vmem>>, vector<1x128xf32>
    %13 = tpu.concatenate %9, %12 in 0 : vector<1x128xf32>, vector<1x128xf32> -> vector<2x128xf32>
    %c2 = arith.constant 2 : index
    %14 = memref.load %arg0[%c2] : memref<16xi32, #tpu.memory_space<smem>>
    %15 = arith.index_cast %14 : i32 to index
    %c0_4 = arith.constant 0 : index
    %16 = vector.load %arg1[%15, %c0_4] : memref<792x128xf32, #tpu.memory_space<vmem>>, vector<1x128xf32>
    %c10 = arith.constant 10 : index
    %17 = memref.load %arg0[%c10] : memref<16xi32, #tpu.memory_space<smem>>
    %18 = arith.index_cast %17 : i32 to index
    %c0_5 = arith.constant 0 : index
    %19 = vector.load %arg1[%18, %c0_5] : memref<792x128xf32, #tpu.memory_space<vmem>>, vector<1x128xf32>
    %20 = tpu.concatenate %16, %19 in 0 : vector<1x128xf32>, vector<1x128xf32> -> vector<2x128xf32>
    %c3 = arith.constant 3 : index
    %21 = memref.load %arg0[%c3] : memref<16xi32, #tpu.memory_space<smem>>
    %22 = arith.index_cast %21 : i32 to index
    %c0_6 = arith.constant 0 : index
    %23 = vector.load %arg1[%22, %c0_6] : memref<792x128xf32, #tpu.memory_space<vmem>>, vector<1x128xf32>
    %c11 = arith.constant 11 : index
    %24 = memref.load %arg0[%c11] : memref<16xi32, #tpu.memory_space<smem>>
    %25 = arith.index_cast %24 : i32 to index
    %c0_7 = arith.constant 0 : index
    %26 = vector.load %arg1[%25, %c0_7] : memref<792x128xf32, #tpu.memory_space<vmem>>, vector<1x128xf32>
    %27 = tpu.concatenate %23, %26 in 0 : vector<1x128xf32>, vector<1x128xf32> -> vector<2x128xf32>
    %c4 = arith.constant 4 : index
    %28 = memref.load %arg0[%c4] : memref<16xi32, #tpu.memory_space<smem>>
    %29 = arith.index_cast %28 : i32 to index
    %c0_8 = arith.constant 0 : index
    %30 = vector.load %arg1[%29, %c0_8] : memref<792x128xf32, #tpu.memory_space<vmem>>, vector<1x128xf32>
    %c12 = arith.constant 12 : index
    %31 = memref.load %arg0[%c12] : memref<16xi32, #tpu.memory_space<smem>>
    %32 = arith.index_cast %31 : i32 to index
    %c0_9 = arith.constant 0 : index
    %33 = vector.load %arg1[%32, %c0_9] : memref<792x128xf32, #tpu.memory_space<vmem>>, vector<1x128xf32>
    %34 = tpu.concatenate %30, %33 in 0 : vector<1x128xf32>, vector<1x128xf32> -> vector<2x128xf32>
    %c5 = arith.constant 5 : index
    %35 = memref.load %arg0[%c5] : memref<16xi32, #tpu.memory_space<smem>>
    %36 = arith.index_cast %35 : i32 to index
    %c0_10 = arith.constant 0 : index
    %37 = vector.load %arg1[%36, %c0_10] : memref<792x128xf32, #tpu.memory_space<vmem>>, vector<1x128xf32>
    %c13 = arith.constant 13 : index
    %38 = memref.load %arg0[%c13] : memref<16xi32, #tpu.memory_space<smem>>
    %39 = arith.index_cast %38 : i32 to index
    %c0_11 = arith.constant 0 : index
    %40 = vector.load %arg1[%39, %c0_11] : memref<792x128xf32, #tpu.memory_space<vmem>>, vector<1x128xf32>
    %41 = tpu.concatenate %37, %40 in 0 : vector<1x128xf32>, vector<1x128xf32> -> vector<2x128xf32>
    %c6 = arith.constant 6 : index
    %42 = memref.load %arg0[%c6] : memref<16xi32, #tpu.memory_space<smem>>
    %43 = arith.index_cast %42 : i32 to index
    %c0_12 = arith.constant 0 : index
    %44 = vector.load %arg1[%43, %c0_12] : memref<792x128xf32, #tpu.memory_space<vmem>>, vector<1x128xf32>
    %c14 = arith.constant 14 : index
    %45 = memref.load %arg0[%c14] : memref<16xi32, #tpu.memory_space<smem>>
    %46 = arith.index_cast %45 : i32 to index
    %c0_13 = arith.constant 0 : index
    %47 = vector.load %arg1[%46, %c0_13] : memref<792x128xf32, #tpu.memory_space<vmem>>, vector<1x128xf32>
    %48 = tpu.concatenate %44, %47 in 0 : vector<1x128xf32>, vector<1x128xf32> -> vector<2x128xf32>
    %c7 = arith.constant 7 : index
    %49 = memref.load %arg0[%c7] : memref<16xi32, #tpu.memory_space<smem>>
    %50 = arith.index_cast %49 : i32 to index
    %c0_14 = arith.constant 0 : index
    %51 = vector.load %arg1[%50, %c0_14] : memref<792x128xf32, #tpu.memory_space<vmem>>, vector<1x128xf32>
    %c15 = arith.constant 15 : index
    %52 = memref.load %arg0[%c15] : memref<16xi32, #tpu.memory_space<smem>>
    %53 = arith.index_cast %52 : i32 to index
    %c0_15 = arith.constant 0 : index
    %54 = vector.load %arg1[%53, %c0_15] : memref<792x128xf32, #tpu.memory_space<vmem>>, vector<1x128xf32>
    %55 = tpu.concatenate %51, %54 in 0 : vector<1x128xf32>, vector<1x128xf32> -> vector<2x128xf32>
    %cst = arith.constant 0.000000e+00 : f32
    %56 = vector.broadcast %cst : f32 to vector<2x32xf32>
    %cst_16 = arith.constant 0.000000e+00 : f32
    %57 = vector.broadcast %cst_16 : f32 to vector<2x32xf32>
    %cst_17 = arith.constant 0.000000e+00 : f32
    %58 = vector.broadcast %cst_17 : f32 to vector<2x32xf32>
    %cst_18 = arith.constant 0.000000e+00 : f32
    %59 = vector.broadcast %cst_18 : f32 to vector<2x32xf32>
    %c256 = arith.constant 256 : index
    %c0_19 = arith.constant 0 : index
    %60 = vector.load %arg1[%c256, %c0_19] : memref<792x128xf32, #tpu.memory_space<vmem>>, vector<32x128xf32>
    %cst_20 = arith.constant dense<0.000000e+00> : vector<2x128xf32>
    %61 = tpu.matmul %56, %60, %cst_20 {dimension_numbers = #tpu.dot_dimension_numbers<[1], [0], [0], [1], [0, 0, 1, 1], [], []>} : vector<2x32xf32>, vector<32x128xf32>, vector<2x128xf32> -> vector<2x128xf32>
    %62 = arith.addf %6, %61 : vector<2x128xf32>
    %63 = vector.extract_strided_slice %62 {offsets = [0, 0], sizes = [2, 96], strides = [1, 1]} : vector<2x128xf32> to vector<2x96xf32>
    %64 = arith.negf %63 : vector<2x96xf32>
    %65 = math.exp %64 : vector<2x96xf32>
    %cst_21 = arith.constant 1.000000e+00 : f32
    %66 = vector.broadcast %cst_21 : f32 to vector<2x96xf32>
    %67 = arith.addf %66, %65 : vector<2x96xf32>
    %68 = arith.divf %66, %67 : vector<2x96xf32>
    %69 = vector.extract_strided_slice %62 {offsets = [0, 96], sizes = [2, 32], strides = [1, 1]} : vector<2x128xf32> to vector<2x32xf32>
    %70 = math.tanh %69 : vector<2x32xf32>
    %71 = vector.extract_strided_slice %68 {offsets = [0, 32], sizes = [2, 32], strides = [1, 1]} : vector<2x96xf32> to vector<2x32xf32>
    %72 = arith.mulf %71, %58 : vector<2x32xf32>
    %73 = vector.extract_strided_slice %68 {offsets = [0, 0], sizes = [2, 32], strides = [1, 1]} : vector<2x96xf32> to vector<2x32xf32>
    %74 = arith.mulf %73, %70 : vector<2x32xf32>
    %75 = arith.addf %72, %74 : vector<2x32xf32>
    %76 = vector.extract_strided_slice %68 {offsets = [0, 64], sizes = [2, 32], strides = [1, 1]} : vector<2x96xf32> to vector<2x32xf32>
    %77 = math.tanh %75 : vector<2x32xf32>
    %78 = arith.mulf %76, %77 : vector<2x32xf32>
    %cst_22 = arith.constant dense<0.000000e+00> : vector<2x128xf32>
    %79 = tpu.matmul %78, %60, %cst_22 {dimension_numbers = #tpu.dot_dimension_numbers<[1], [0], [0], [1], [0, 0, 1, 1], [], []>} : vector<2x32xf32>, vector<32x128xf32>, vector<2x128xf32> -> vector<2x128xf32>
    %80 = arith.addf %13, %79 : vector<2x128xf32>
    %81 = vector.extract_strided_slice %80 {offsets = [0, 0], sizes = [2, 96], strides = [1, 1]} : vector<2x128xf32> to vector<2x96xf32>
    %82 = arith.negf %81 : vector<2x96xf32>
    %83 = math.exp %82 : vector<2x96xf32>
    %cst_23 = arith.constant 1.000000e+00 : f32
    %84 = vector.broadcast %cst_23 : f32 to vector<2x96xf32>
    %85 = arith.addf %84, %83 : vector<2x96xf32>
    %86 = arith.divf %84, %85 : vector<2x96xf32>
    %87 = vector.extract_strided_slice %80 {offsets = [0, 96], sizes = [2, 32], strides = [1, 1]} : vector<2x128xf32> to vector<2x32xf32>
    %88 = math.tanh %87 : vector<2x32xf32>
    %89 = vector.extract_strided_slice %86 {offsets = [0, 32], sizes = [2, 32], strides = [1, 1]} : vector<2x96xf32> to vector<2x32xf32>
    %90 = arith.mulf %89, %75 : vector<2x32xf32>
    %91 = vector.extract_strided_slice %86 {offsets = [0, 0], sizes = [2, 32], strides = [1, 1]} : vector<2x96xf32> to vector<2x32xf32>
    %92 = arith.mulf %91, %88 : vector<2x32xf32>
    %93 = arith.addf %90, %92 : vector<2x32xf32>
    %94 = vector.extract_strided_slice %86 {offsets = [0, 64], sizes = [2, 32], strides = [1, 1]} : vector<2x96xf32> to vector<2x32xf32>
    %95 = math.tanh %93 : vector<2x32xf32>
    %96 = arith.mulf %94, %95 : vector<2x32xf32>
    %cst_24 = arith.constant dense<0.000000e+00> : vector<2x128xf32>
    %97 = tpu.matmul %96, %60, %cst_24 {dimension_numbers = #tpu.dot_dimension_numbers<[1], [0], [0], [1], [0, 0, 1, 1], [], []>} : vector<2x32xf32>, vector<32x128xf32>, vector<2x128xf32> -> vector<2x128xf32>
    %98 = arith.addf %20, %97 : vector<2x128xf32>
    %99 = vector.extract_strided_slice %98 {offsets = [0, 0], sizes = [2, 96], strides = [1, 1]} : vector<2x128xf32> to vector<2x96xf32>
    %100 = arith.negf %99 : vector<2x96xf32>
    %101 = math.exp %100 : vector<2x96xf32>
    %cst_25 = arith.constant 1.000000e+00 : f32
    %102 = vector.broadcast %cst_25 : f32 to vector<2x96xf32>
    %103 = arith.addf %102, %101 : vector<2x96xf32>
    %104 = arith.divf %102, %103 : vector<2x96xf32>
    %105 = vector.extract_strided_slice %98 {offsets = [0, 96], sizes = [2, 32], strides = [1, 1]} : vector<2x128xf32> to vector<2x32xf32>
    %106 = math.tanh %105 : vector<2x32xf32>
    %107 = vector.extract_strided_slice %104 {offsets = [0, 32], sizes = [2, 32], strides = [1, 1]} : vector<2x96xf32> to vector<2x32xf32>
    %108 = arith.mulf %107, %93 : vector<2x32xf32>
    %109 = vector.extract_strided_slice %104 {offsets = [0, 0], sizes = [2, 32], strides = [1, 1]} : vector<2x96xf32> to vector<2x32xf32>
    %110 = arith.mulf %109, %106 : vector<2x32xf32>
    %111 = arith.addf %108, %110 : vector<2x32xf32>
    %112 = vector.extract_strided_slice %104 {offsets = [0, 64], sizes = [2, 32], strides = [1, 1]} : vector<2x96xf32> to vector<2x32xf32>
    %113 = math.tanh %111 : vector<2x32xf32>
    %114 = arith.mulf %112, %113 : vector<2x32xf32>
    %cst_26 = arith.constant dense<0.000000e+00> : vector<2x128xf32>
    %115 = tpu.matmul %114, %60, %cst_26 {dimension_numbers = #tpu.dot_dimension_numbers<[1], [0], [0], [1], [0, 0, 1, 1], [], []>} : vector<2x32xf32>, vector<32x128xf32>, vector<2x128xf32> -> vector<2x128xf32>
    %116 = arith.addf %27, %115 : vector<2x128xf32>
    %117 = vector.extract_strided_slice %116 {offsets = [0, 0], sizes = [2, 96], strides = [1, 1]} : vector<2x128xf32> to vector<2x96xf32>
    %118 = arith.negf %117 : vector<2x96xf32>
    %119 = math.exp %118 : vector<2x96xf32>
    %cst_27 = arith.constant 1.000000e+00 : f32
    %120 = vector.broadcast %cst_27 : f32 to vector<2x96xf32>
    %121 = arith.addf %120, %119 : vector<2x96xf32>
    %122 = arith.divf %120, %121 : vector<2x96xf32>
    %123 = vector.extract_strided_slice %116 {offsets = [0, 96], sizes = [2, 32], strides = [1, 1]} : vector<2x128xf32> to vector<2x32xf32>
    %124 = math.tanh %123 : vector<2x32xf32>
    %125 = vector.extract_strided_slice %122 {offsets = [0, 32], sizes = [2, 32], strides = [1, 1]} : vector<2x96xf32> to vector<2x32xf32>
    %126 = arith.mulf %125, %111 : vector<2x32xf32>
    %127 = vector.extract_strided_slice %122 {offsets = [0, 0], sizes = [2, 32], strides = [1, 1]} : vector<2x96xf32> to vector<2x32xf32>
    %128 = arith.mulf %127, %124 : vector<2x32xf32>
    %129 = arith.addf %126, %128 : vector<2x32xf32>
    %130 = vector.extract_strided_slice %122 {offsets = [0, 64], sizes = [2, 32], strides = [1, 1]} : vector<2x96xf32> to vector<2x32xf32>
    %131 = math.tanh %129 : vector<2x32xf32>
    %132 = arith.mulf %130, %131 : vector<2x32xf32>
    %cst_28 = arith.constant dense<0.000000e+00> : vector<2x128xf32>
    %133 = tpu.matmul %132, %60, %cst_28 {dimension_numbers = #tpu.dot_dimension_numbers<[1], [0], [0], [1], [0, 0, 1, 1], [], []>} : vector<2x32xf32>, vector<32x128xf32>, vector<2x128xf32> -> vector<2x128xf32>
    %134 = arith.addf %34, %133 : vector<2x128xf32>
    %135 = vector.extract_strided_slice %134 {offsets = [0, 0], sizes = [2, 96], strides = [1, 1]} : vector<2x128xf32> to vector<2x96xf32>
    %136 = arith.negf %135 : vector<2x96xf32>
    %137 = math.exp %136 : vector<2x96xf32>
    %cst_29 = arith.constant 1.000000e+00 : f32
    %138 = vector.broadcast %cst_29 : f32 to vector<2x96xf32>
    %139 = arith.addf %138, %137 : vector<2x96xf32>
    %140 = arith.divf %138, %139 : vector<2x96xf32>
    %141 = vector.extract_strided_slice %134 {offsets = [0, 96], sizes = [2, 32], strides = [1, 1]} : vector<2x128xf32> to vector<2x32xf32>
    %142 = math.tanh %141 : vector<2x32xf32>
    %143 = vector.extract_strided_slice %140 {offsets = [0, 32], sizes = [2, 32], strides = [1, 1]} : vector<2x96xf32> to vector<2x32xf32>
    %144 = arith.mulf %143, %129 : vector<2x32xf32>
    %145 = vector.extract_strided_slice %140 {offsets = [0, 0], sizes = [2, 32], strides = [1, 1]} : vector<2x96xf32> to vector<2x32xf32>
    %146 = arith.mulf %145, %142 : vector<2x32xf32>
    %147 = arith.addf %144, %146 : vector<2x32xf32>
    %148 = vector.extract_strided_slice %140 {offsets = [0, 64], sizes = [2, 32], strides = [1, 1]} : vector<2x96xf32> to vector<2x32xf32>
    %149 = math.tanh %147 : vector<2x32xf32>
    %150 = arith.mulf %148, %149 : vector<2x32xf32>
    %cst_30 = arith.constant dense<0.000000e+00> : vector<2x128xf32>
    %151 = tpu.matmul %150, %60, %cst_30 {dimension_numbers = #tpu.dot_dimension_numbers<[1], [0], [0], [1], [0, 0, 1, 1], [], []>} : vector<2x32xf32>, vector<32x128xf32>, vector<2x128xf32> -> vector<2x128xf32>
    %152 = arith.addf %41, %151 : vector<2x128xf32>
    %153 = vector.extract_strided_slice %152 {offsets = [0, 0], sizes = [2, 96], strides = [1, 1]} : vector<2x128xf32> to vector<2x96xf32>
    %154 = arith.negf %153 : vector<2x96xf32>
    %155 = math.exp %154 : vector<2x96xf32>
    %cst_31 = arith.constant 1.000000e+00 : f32
    %156 = vector.broadcast %cst_31 : f32 to vector<2x96xf32>
    %157 = arith.addf %156, %155 : vector<2x96xf32>
    %158 = arith.divf %156, %157 : vector<2x96xf32>
    %159 = vector.extract_strided_slice %152 {offsets = [0, 96], sizes = [2, 32], strides = [1, 1]} : vector<2x128xf32> to vector<2x32xf32>
    %160 = math.tanh %159 : vector<2x32xf32>
    %161 = vector.extract_strided_slice %158 {offsets = [0, 32], sizes = [2, 32], strides = [1, 1]} : vector<2x96xf32> to vector<2x32xf32>
    %162 = arith.mulf %161, %147 : vector<2x32xf32>
    %163 = vector.extract_strided_slice %158 {offsets = [0, 0], sizes = [2, 32], strides = [1, 1]} : vector<2x96xf32> to vector<2x32xf32>
    %164 = arith.mulf %163, %160 : vector<2x32xf32>
    %165 = arith.addf %162, %164 : vector<2x32xf32>
    %166 = vector.extract_strided_slice %158 {offsets = [0, 64], sizes = [2, 32], strides = [1, 1]} : vector<2x96xf32> to vector<2x32xf32>
    %167 = math.tanh %165 : vector<2x32xf32>
    %168 = arith.mulf %166, %167 : vector<2x32xf32>
    %cst_32 = arith.constant dense<0.000000e+00> : vector<2x128xf32>
    %169 = tpu.matmul %168, %60, %cst_32 {dimension_numbers = #tpu.dot_dimension_numbers<[1], [0], [0], [1], [0, 0, 1, 1], [], []>} : vector<2x32xf32>, vector<32x128xf32>, vector<2x128xf32> -> vector<2x128xf32>
    %170 = arith.addf %48, %169 : vector<2x128xf32>
    %171 = vector.extract_strided_slice %170 {offsets = [0, 0], sizes = [2, 96], strides = [1, 1]} : vector<2x128xf32> to vector<2x96xf32>
    %172 = arith.negf %171 : vector<2x96xf32>
    %173 = math.exp %172 : vector<2x96xf32>
    %cst_33 = arith.constant 1.000000e+00 : f32
    %174 = vector.broadcast %cst_33 : f32 to vector<2x96xf32>
    %175 = arith.addf %174, %173 : vector<2x96xf32>
    %176 = arith.divf %174, %175 : vector<2x96xf32>
    %177 = vector.extract_strided_slice %170 {offsets = [0, 96], sizes = [2, 32], strides = [1, 1]} : vector<2x128xf32> to vector<2x32xf32>
    %178 = math.tanh %177 : vector<2x32xf32>
    %179 = vector.extract_strided_slice %176 {offsets = [0, 32], sizes = [2, 32], strides = [1, 1]} : vector<2x96xf32> to vector<2x32xf32>
    %180 = arith.mulf %179, %165 : vector<2x32xf32>
    %181 = vector.extract_strided_slice %176 {offsets = [0, 0], sizes = [2, 32], strides = [1, 1]} : vector<2x96xf32> to vector<2x32xf32>
    %182 = arith.mulf %181, %178 : vector<2x32xf32>
    %183 = arith.addf %180, %182 : vector<2x32xf32>
    %184 = vector.extract_strided_slice %176 {offsets = [0, 64], sizes = [2, 32], strides = [1, 1]} : vector<2x96xf32> to vector<2x32xf32>
    %185 = math.tanh %183 : vector<2x32xf32>
    %186 = arith.mulf %184, %185 : vector<2x32xf32>
    %cst_34 = arith.constant dense<0.000000e+00> : vector<2x128xf32>
    %187 = tpu.matmul %186, %60, %cst_34 {dimension_numbers = #tpu.dot_dimension_numbers<[1], [0], [0], [1], [0, 0, 1, 1], [], []>} : vector<2x32xf32>, vector<32x128xf32>, vector<2x128xf32> -> vector<2x128xf32>
    %188 = arith.addf %55, %187 : vector<2x128xf32>
    %189 = vector.extract_strided_slice %188 {offsets = [0, 0], sizes = [2, 96], strides = [1, 1]} : vector<2x128xf32> to vector<2x96xf32>
    %190 = arith.negf %189 : vector<2x96xf32>
    %191 = math.exp %190 : vector<2x96xf32>
    %cst_35 = arith.constant 1.000000e+00 : f32
    %192 = vector.broadcast %cst_35 : f32 to vector<2x96xf32>
    %193 = arith.addf %192, %191 : vector<2x96xf32>
    %194 = arith.divf %192, %193 : vector<2x96xf32>
    %195 = vector.extract_strided_slice %188 {offsets = [0, 96], sizes = [2, 32], strides = [1, 1]} : vector<2x128xf32> to vector<2x32xf32>
    %196 = math.tanh %195 : vector<2x32xf32>
    %197 = vector.extract_strided_slice %194 {offsets = [0, 32], sizes = [2, 32], strides = [1, 1]} : vector<2x96xf32> to vector<2x32xf32>
    %198 = arith.mulf %197, %183 : vector<2x32xf32>
    %199 = vector.extract_strided_slice %194 {offsets = [0, 0], sizes = [2, 32], strides = [1, 1]} : vector<2x96xf32> to vector<2x32xf32>
    %200 = arith.mulf %199, %196 : vector<2x32xf32>
    %201 = arith.addf %198, %200 : vector<2x32xf32>
    %202 = vector.extract_strided_slice %194 {offsets = [0, 64], sizes = [2, 32], strides = [1, 1]} : vector<2x96xf32> to vector<2x32xf32>
    %203 = math.tanh %201 : vector<2x32xf32>
    %204 = arith.mulf %202, %203 : vector<2x32xf32>
    %c288 = arith.constant 288 : index
    %c0_36 = arith.constant 0 : index
    %205 = vector.load %arg1[%c288, %c0_36] : memref<792x128xf32, #tpu.memory_space<vmem>>, vector<32x128xf32>
    %c320 = arith.constant 320 : index
    %c0_37 = arith.constant 0 : index
    %206 = vector.load %arg1[%c320, %c0_37] : memref<792x128xf32, #tpu.memory_space<vmem>>, vector<32x128xf32>
    %c352 = arith.constant 352 : index
    %c0_38 = arith.constant 0 : index
    %207 = vector.load %arg1[%c352, %c0_38] : memref<792x128xf32, #tpu.memory_space<vmem>>, vector<1x128xf32>
    %cst_39 = arith.constant dense<0.000000e+00> : vector<2x128xf32>
    %208 = tpu.matmul %78, %205, %cst_39 {dimension_numbers = #tpu.dot_dimension_numbers<[1], [0], [0], [1], [0, 0, 1, 1], [], []>} : vector<2x32xf32>, vector<32x128xf32>, vector<2x128xf32> -> vector<2x128xf32>
    %209 = vector.broadcast %207 : vector<1x128xf32> to vector<2x128xf32>
    %210 = arith.addf %208, %209 : vector<2x128xf32>
    %cst_40 = arith.constant dense<0.000000e+00> : vector<2x128xf32>
    %211 = tpu.matmul %57, %206, %cst_40 {dimension_numbers = #tpu.dot_dimension_numbers<[1], [0], [0], [1], [0, 0, 1, 1], [], []>} : vector<2x32xf32>, vector<32x128xf32>, vector<2x128xf32> -> vector<2x128xf32>
    %212 = arith.addf %210, %211 : vector<2x128xf32>
    %213 = vector.extract_strided_slice %212 {offsets = [0, 0], sizes = [2, 96], strides = [1, 1]} : vector<2x128xf32> to vector<2x96xf32>
    %214 = arith.negf %213 : vector<2x96xf32>
    %215 = math.exp %214 : vector<2x96xf32>
    %cst_41 = arith.constant 1.000000e+00 : f32
    %216 = vector.broadcast %cst_41 : f32 to vector<2x96xf32>
    %217 = arith.addf %216, %215 : vector<2x96xf32>
    %218 = arith.divf %216, %217 : vector<2x96xf32>
    %219 = vector.extract_strided_slice %212 {offsets = [0, 96], sizes = [2, 32], strides = [1, 1]} : vector<2x128xf32> to vector<2x32xf32>
    %220 = math.tanh %219 : vector<2x32xf32>
    %221 = vector.extract_strided_slice %218 {offsets = [0, 32], sizes = [2, 32], strides = [1, 1]} : vector<2x96xf32> to vector<2x32xf32>
    %222 = arith.mulf %221, %59 : vector<2x32xf32>
    %223 = vector.extract_strided_slice %218 {offsets = [0, 0], sizes = [2, 32], strides = [1, 1]} : vector<2x96xf32> to vector<2x32xf32>
    %224 = arith.mulf %223, %220 : vector<2x32xf32>
    %225 = arith.addf %222, %224 : vector<2x32xf32>
    %226 = vector.extract_strided_slice %218 {offsets = [0, 64], sizes = [2, 32], strides = [1, 1]} : vector<2x96xf32> to vector<2x32xf32>
    %227 = math.tanh %225 : vector<2x32xf32>
    %228 = arith.mulf %226, %227 : vector<2x32xf32>
    %cst_42 = arith.constant dense<0.000000e+00> : vector<2x128xf32>
    %229 = tpu.matmul %96, %205, %cst_42 {dimension_numbers = #tpu.dot_dimension_numbers<[1], [0], [0], [1], [0, 0, 1, 1], [], []>} : vector<2x32xf32>, vector<32x128xf32>, vector<2x128xf32> -> vector<2x128xf32>
    %230 = vector.broadcast %207 : vector<1x128xf32> to vector<2x128xf32>
    %231 = arith.addf %229, %230 : vector<2x128xf32>
    %cst_43 = arith.constant dense<0.000000e+00> : vector<2x128xf32>
    %232 = tpu.matmul %228, %206, %cst_43 {dimension_numbers = #tpu.dot_dimension_numbers<[1], [0], [0], [1], [0, 0, 1, 1], [], []>} : vector<2x32xf32>, vector<32x128xf32>, vector<2x128xf32> -> vector<2x128xf32>
    %233 = arith.addf %231, %232 : vector<2x128xf32>
    %234 = vector.extract_strided_slice %233 {offsets = [0, 0], sizes = [2, 96], strides = [1, 1]} : vector<2x128xf32> to vector<2x96xf32>
    %235 = arith.negf %234 : vector<2x96xf32>
    %236 = math.exp %235 : vector<2x96xf32>
    %cst_44 = arith.constant 1.000000e+00 : f32
    %237 = vector.broadcast %cst_44 : f32 to vector<2x96xf32>
    %238 = arith.addf %237, %236 : vector<2x96xf32>
    %239 = arith.divf %237, %238 : vector<2x96xf32>
    %240 = vector.extract_strided_slice %233 {offsets = [0, 96], sizes = [2, 32], strides = [1, 1]} : vector<2x128xf32> to vector<2x32xf32>
    %241 = math.tanh %240 : vector<2x32xf32>
    %242 = vector.extract_strided_slice %239 {offsets = [0, 32], sizes = [2, 32], strides = [1, 1]} : vector<2x96xf32> to vector<2x32xf32>
    %243 = arith.mulf %242, %225 : vector<2x32xf32>
    %244 = vector.extract_strided_slice %239 {offsets = [0, 0], sizes = [2, 32], strides = [1, 1]} : vector<2x96xf32> to vector<2x32xf32>
    %245 = arith.mulf %244, %241 : vector<2x32xf32>
    %246 = arith.addf %243, %245 : vector<2x32xf32>
    %247 = vector.extract_strided_slice %239 {offsets = [0, 64], sizes = [2, 32], strides = [1, 1]} : vector<2x96xf32> to vector<2x32xf32>
    %248 = math.tanh %246 : vector<2x32xf32>
    %249 = arith.mulf %247, %248 : vector<2x32xf32>
    %cst_45 = arith.constant dense<0.000000e+00> : vector<2x128xf32>
    %250 = tpu.matmul %114, %205, %cst_45 {dimension_numbers = #tpu.dot_dimension_numbers<[1], [0], [0], [1], [0, 0, 1, 1], [], []>} : vector<2x32xf32>, vector<32x128xf32>, vector<2x128xf32> -> vector<2x128xf32>
    %251 = vector.broadcast %207 : vector<1x128xf32> to vector<2x128xf32>
    %252 = arith.addf %250, %251 : vector<2x128xf32>
    %cst_46 = arith.constant dense<0.000000e+00> : vector<2x128xf32>
    %253 = tpu.matmul %249, %206, %cst_46 {dimension_numbers = #tpu.dot_dimension_numbers<[1], [0], [0], [1], [0, 0, 1, 1], [], []>} : vector<2x32xf32>, vector<32x128xf32>, vector<2x128xf32> -> vector<2x128xf32>
    %254 = arith.addf %252, %253 : vector<2x128xf32>
    %255 = vector.extract_strided_slice %254 {offsets = [0, 0], sizes = [2, 96], strides = [1, 1]} : vector<2x128xf32> to vector<2x96xf32>
    %256 = arith.negf %255 : vector<2x96xf32>
    %257 = math.exp %256 : vector<2x96xf32>
    %cst_47 = arith.constant 1.000000e+00 : f32
    %258 = vector.broadcast %cst_47 : f32 to vector<2x96xf32>
    %259 = arith.addf %258, %257 : vector<2x96xf32>
    %260 = arith.divf %258, %259 : vector<2x96xf32>
    %261 = vector.extract_strided_slice %254 {offsets = [0, 96], sizes = [2, 32], strides = [1, 1]} : vector<2x128xf32> to vector<2x32xf32>
    %262 = math.tanh %261 : vector<2x32xf32>
    %263 = vector.extract_strided_slice %260 {offsets = [0, 32], sizes = [2, 32], strides = [1, 1]} : vector<2x96xf32> to vector<2x32xf32>
    %264 = arith.mulf %263, %246 : vector<2x32xf32>
    %265 = vector.extract_strided_slice %260 {offsets = [0, 0], sizes = [2, 32], strides = [1, 1]} : vector<2x96xf32> to vector<2x32xf32>
    %266 = arith.mulf %265, %262 : vector<2x32xf32>
    %267 = arith.addf %264, %266 : vector<2x32xf32>
    %268 = vector.extract_strided_slice %260 {offsets = [0, 64], sizes = [2, 32], strides = [1, 1]} : vector<2x96xf32> to vector<2x32xf32>
    %269 = math.tanh %267 : vector<2x32xf32>
    %270 = arith.mulf %268, %269 : vector<2x32xf32>
    %cst_48 = arith.constant dense<0.000000e+00> : vector<2x128xf32>
    %271 = tpu.matmul %132, %205, %cst_48 {dimension_numbers = #tpu.dot_dimension_numbers<[1], [0], [0], [1], [0, 0, 1, 1], [], []>} : vector<2x32xf32>, vector<32x128xf32>, vector<2x128xf32> -> vector<2x128xf32>
    %272 = vector.broadcast %207 : vector<1x128xf32> to vector<2x128xf32>
    %273 = arith.addf %271, %272 : vector<2x128xf32>
    %cst_49 = arith.constant dense<0.000000e+00> : vector<2x128xf32>
    %274 = tpu.matmul %270, %206, %cst_49 {dimension_numbers = #tpu.dot_dimension_numbers<[1], [0], [0], [1], [0, 0, 1, 1], [], []>} : vector<2x32xf32>, vector<32x128xf32>, vector<2x128xf32> -> vector<2x128xf32>
    %275 = arith.addf %273, %274 : vector<2x128xf32>
    %276 = vector.extract_strided_slice %275 {offsets = [0, 0], sizes = [2, 96], strides = [1, 1]} : vector<2x128xf32> to vector<2x96xf32>
    %277 = arith.negf %276 : vector<2x96xf32>
    %278 = math.exp %277 : vector<2x96xf32>
    %cst_50 = arith.constant 1.000000e+00 : f32
    %279 = vector.broadcast %cst_50 : f32 to vector<2x96xf32>
    %280 = arith.addf %279, %278 : vector<2x96xf32>
    %281 = arith.divf %279, %280 : vector<2x96xf32>
    %282 = vector.extract_strided_slice %275 {offsets = [0, 96], sizes = [2, 32], strides = [1, 1]} : vector<2x128xf32> to vector<2x32xf32>
    %283 = math.tanh %282 : vector<2x32xf32>
    %284 = vector.extract_strided_slice %281 {offsets = [0, 32], sizes = [2, 32], strides = [1, 1]} : vector<2x96xf32> to vector<2x32xf32>
    %285 = arith.mulf %284, %267 : vector<2x32xf32>
    %286 = vector.extract_strided_slice %281 {offsets = [0, 0], sizes = [2, 32], strides = [1, 1]} : vector<2x96xf32> to vector<2x32xf32>
    %287 = arith.mulf %286, %283 : vector<2x32xf32>
    %288 = arith.addf %285, %287 : vector<2x32xf32>
    %289 = vector.extract_strided_slice %281 {offsets = [0, 64], sizes = [2, 32], strides = [1, 1]} : vector<2x96xf32> to vector<2x32xf32>
    %290 = math.tanh %288 : vector<2x32xf32>
    %291 = arith.mulf %289, %290 : vector<2x32xf32>
    %cst_51 = arith.constant dense<0.000000e+00> : vector<2x128xf32>
    %292 = tpu.matmul %150, %205, %cst_51 {dimension_numbers = #tpu.dot_dimension_numbers<[1], [0], [0], [1], [0, 0, 1, 1], [], []>} : vector<2x32xf32>, vector<32x128xf32>, vector<2x128xf32> -> vector<2x128xf32>
    %293 = vector.broadcast %207 : vector<1x128xf32> to vector<2x128xf32>
    %294 = arith.addf %292, %293 : vector<2x128xf32>
    %cst_52 = arith.constant dense<0.000000e+00> : vector<2x128xf32>
    %295 = tpu.matmul %291, %206, %cst_52 {dimension_numbers = #tpu.dot_dimension_numbers<[1], [0], [0], [1], [0, 0, 1, 1], [], []>} : vector<2x32xf32>, vector<32x128xf32>, vector<2x128xf32> -> vector<2x128xf32>
    %296 = arith.addf %294, %295 : vector<2x128xf32>
    %297 = vector.extract_strided_slice %296 {offsets = [0, 0], sizes = [2, 96], strides = [1, 1]} : vector<2x128xf32> to vector<2x96xf32>
    %298 = arith.negf %297 : vector<2x96xf32>
    %299 = math.exp %298 : vector<2x96xf32>
    %cst_53 = arith.constant 1.000000e+00 : f32
    %300 = vector.broadcast %cst_53 : f32 to vector<2x96xf32>
    %301 = arith.addf %300, %299 : vector<2x96xf32>
    %302 = arith.divf %300, %301 : vector<2x96xf32>
    %303 = vector.extract_strided_slice %296 {offsets = [0, 96], sizes = [2, 32], strides = [1, 1]} : vector<2x128xf32> to vector<2x32xf32>
    %304 = math.tanh %303 : vector<2x32xf32>
    %305 = vector.extract_strided_slice %302 {offsets = [0, 32], sizes = [2, 32], strides = [1, 1]} : vector<2x96xf32> to vector<2x32xf32>
    %306 = arith.mulf %305, %288 : vector<2x32xf32>
    %307 = vector.extract_strided_slice %302 {offsets = [0, 0], sizes = [2, 32], strides = [1, 1]} : vector<2x96xf32> to vector<2x32xf32>
    %308 = arith.mulf %307, %304 : vector<2x32xf32>
    %309 = arith.addf %306, %308 : vector<2x32xf32>
    %310 = vector.extract_strided_slice %302 {offsets = [0, 64], sizes = [2, 32], strides = [1, 1]} : vector<2x96xf32> to vector<2x32xf32>
    %311 = math.tanh %309 : vector<2x32xf32>
    %312 = arith.mulf %310, %311 : vector<2x32xf32>
    %cst_54 = arith.constant dense<0.000000e+00> : vector<2x128xf32>
    %313 = tpu.matmul %168, %205, %cst_54 {dimension_numbers = #tpu.dot_dimension_numbers<[1], [0], [0], [1], [0, 0, 1, 1], [], []>} : vector<2x32xf32>, vector<32x128xf32>, vector<2x128xf32> -> vector<2x128xf32>
    %314 = vector.broadcast %207 : vector<1x128xf32> to vector<2x128xf32>
    %315 = arith.addf %313, %314 : vector<2x128xf32>
    %cst_55 = arith.constant dense<0.000000e+00> : vector<2x128xf32>
    %316 = tpu.matmul %312, %206, %cst_55 {dimension_numbers = #tpu.dot_dimension_numbers<[1], [0], [0], [1], [0, 0, 1, 1], [], []>} : vector<2x32xf32>, vector<32x128xf32>, vector<2x128xf32> -> vector<2x128xf32>
    %317 = arith.addf %315, %316 : vector<2x128xf32>
    %318 = vector.extract_strided_slice %317 {offsets = [0, 0], sizes = [2, 96], strides = [1, 1]} : vector<2x128xf32> to vector<2x96xf32>
    %319 = arith.negf %318 : vector<2x96xf32>
    %320 = math.exp %319 : vector<2x96xf32>
    %cst_56 = arith.constant 1.000000e+00 : f32
    %321 = vector.broadcast %cst_56 : f32 to vector<2x96xf32>
    %322 = arith.addf %321, %320 : vector<2x96xf32>
    %323 = arith.divf %321, %322 : vector<2x96xf32>
    %324 = vector.extract_strided_slice %317 {offsets = [0, 96], sizes = [2, 32], strides = [1, 1]} : vector<2x128xf32> to vector<2x32xf32>
    %325 = math.tanh %324 : vector<2x32xf32>
    %326 = vector.extract_strided_slice %323 {offsets = [0, 32], sizes = [2, 32], strides = [1, 1]} : vector<2x96xf32> to vector<2x32xf32>
    %327 = arith.mulf %326, %309 : vector<2x32xf32>
    %328 = vector.extract_strided_slice %323 {offsets = [0, 0], sizes = [2, 32], strides = [1, 1]} : vector<2x96xf32> to vector<2x32xf32>
    %329 = arith.mulf %328, %325 : vector<2x32xf32>
    %330 = arith.addf %327, %329 : vector<2x32xf32>
    %331 = vector.extract_strided_slice %323 {offsets = [0, 64], sizes = [2, 32], strides = [1, 1]} : vector<2x96xf32> to vector<2x32xf32>
    %332 = math.tanh %330 : vector<2x32xf32>
    %333 = arith.mulf %331, %332 : vector<2x32xf32>
    %cst_57 = arith.constant dense<0.000000e+00> : vector<2x128xf32>
    %334 = tpu.matmul %186, %205, %cst_57 {dimension_numbers = #tpu.dot_dimension_numbers<[1], [0], [0], [1], [0, 0, 1, 1], [], []>} : vector<2x32xf32>, vector<32x128xf32>, vector<2x128xf32> -> vector<2x128xf32>
    %335 = vector.broadcast %207 : vector<1x128xf32> to vector<2x128xf32>
    %336 = arith.addf %334, %335 : vector<2x128xf32>
    %cst_58 = arith.constant dense<0.000000e+00> : vector<2x128xf32>
    %337 = tpu.matmul %333, %206, %cst_58 {dimension_numbers = #tpu.dot_dimension_numbers<[1], [0], [0], [1], [0, 0, 1, 1], [], []>} : vector<2x32xf32>, vector<32x128xf32>, vector<2x128xf32> -> vector<2x128xf32>
    %338 = arith.addf %336, %337 : vector<2x128xf32>
    %339 = vector.extract_strided_slice %338 {offsets = [0, 0], sizes = [2, 96], strides = [1, 1]} : vector<2x128xf32> to vector<2x96xf32>
    %340 = arith.negf %339 : vector<2x96xf32>
    %341 = math.exp %340 : vector<2x96xf32>
    %cst_59 = arith.constant 1.000000e+00 : f32
    %342 = vector.broadcast %cst_59 : f32 to vector<2x96xf32>
    %343 = arith.addf %342, %341 : vector<2x96xf32>
    %344 = arith.divf %342, %343 : vector<2x96xf32>
    %345 = vector.extract_strided_slice %338 {offsets = [0, 96], sizes = [2, 32], strides = [1, 1]} : vector<2x128xf32> to vector<2x32xf32>
    %346 = math.tanh %345 : vector<2x32xf32>
    %347 = vector.extract_strided_slice %344 {offsets = [0, 32], sizes = [2, 32], strides = [1, 1]} : vector<2x96xf32> to vector<2x32xf32>
    %348 = arith.mulf %347, %330 : vector<2x32xf32>
    %349 = vector.extract_strided_slice %344 {offsets = [0, 0], sizes = [2, 32], strides = [1, 1]} : vector<2x96xf32> to vector<2x32xf32>
    %350 = arith.mulf %349, %346 : vector<2x32xf32>
    %351 = arith.addf %348, %350 : vector<2x32xf32>
    %352 = vector.extract_strided_slice %344 {offsets = [0, 64], sizes = [2, 32], strides = [1, 1]} : vector<2x96xf32> to vector<2x32xf32>
    %353 = math.tanh %351 : vector<2x32xf32>
    %354 = arith.mulf %352, %353 : vector<2x32xf32>
    %cst_60 = arith.constant dense<0.000000e+00> : vector<2x128xf32>
    %355 = tpu.matmul %204, %205, %cst_60 {dimension_numbers = #tpu.dot_dimension_numbers<[1], [0], [0], [1], [0, 0, 1, 1], [], []>} : vector<2x32xf32>, vector<32x128xf32>, vector<2x128xf32> -> vector<2x128xf32>
    %356 = vector.broadcast %207 : vector<1x128xf32> to vector<2x128xf32>
    %357 = arith.addf %355, %356 : vector<2x128xf32>
    %cst_61 = arith.constant dense<0.000000e+00> : vector<2x128xf32>
    %358 = tpu.matmul %354, %206, %cst_61 {dimension_numbers = #tpu.dot_dimension_numbers<[1], [0], [0], [1], [0, 0, 1, 1], [], []>} : vector<2x32xf32>, vector<32x128xf32>, vector<2x128xf32> -> vector<2x128xf32>
    %359 = arith.addf %357, %358 : vector<2x128xf32>
    %360 = vector.extract_strided_slice %359 {offsets = [0, 0], sizes = [2, 96], strides = [1, 1]} : vector<2x128xf32> to vector<2x96xf32>
    %361 = arith.negf %360 : vector<2x96xf32>
    %362 = math.exp %361 : vector<2x96xf32>
    %cst_62 = arith.constant 1.000000e+00 : f32
    %363 = vector.broadcast %cst_62 : f32 to vector<2x96xf32>
    %364 = arith.addf %363, %362 : vector<2x96xf32>
    %365 = arith.divf %363, %364 : vector<2x96xf32>
    %366 = vector.extract_strided_slice %359 {offsets = [0, 96], sizes = [2, 32], strides = [1, 1]} : vector<2x128xf32> to vector<2x32xf32>
    %367 = math.tanh %366 : vector<2x32xf32>
    %368 = vector.extract_strided_slice %365 {offsets = [0, 32], sizes = [2, 32], strides = [1, 1]} : vector<2x96xf32> to vector<2x32xf32>
    %369 = arith.mulf %368, %351 : vector<2x32xf32>
    %370 = vector.extract_strided_slice %365 {offsets = [0, 0], sizes = [2, 32], strides = [1, 1]} : vector<2x96xf32> to vector<2x32xf32>
    %371 = arith.mulf %370, %367 : vector<2x32xf32>
    %372 = arith.addf %369, %371 : vector<2x32xf32>
    %373 = vector.extract_strided_slice %365 {offsets = [0, 64], sizes = [2, 32], strides = [1, 1]} : vector<2x96xf32> to vector<2x32xf32>
    %374 = math.tanh %372 : vector<2x32xf32>
    %375 = arith.mulf %373, %374 : vector<2x32xf32>
    %c360 = arith.constant 360 : index
    %c0_63 = arith.constant 0 : index
    %376 = vector.load %arg1[%c360, %c0_63] : memref<792x128xf32, #tpu.memory_space<vmem>>, vector<32x128xf32>
    %c392 = arith.constant 392 : index
    %c0_64 = arith.constant 0 : index
    %377 = vector.load %arg1[%c392, %c0_64] : memref<792x128xf32, #tpu.memory_space<vmem>>, vector<32x128xf32>
    %c424 = arith.constant 424 : index
    %c0_65 = arith.constant 0 : index
    %378 = vector.load %arg1[%c424, %c0_65] : memref<792x128xf32, #tpu.memory_space<vmem>>, vector<1x128xf32>
    %cst_66 = arith.constant dense<0.000000e+00> : vector<2x128xf32>
    %379 = tpu.matmul %228, %376, %cst_66 {dimension_numbers = #tpu.dot_dimension_numbers<[1], [0], [0], [1], [0, 0, 1, 1], [], []>} : vector<2x32xf32>, vector<32x128xf32>, vector<2x128xf32> -> vector<2x128xf32>
    %380 = vector.broadcast %378 : vector<1x128xf32> to vector<2x128xf32>
    %381 = arith.addf %379, %380 : vector<2x128xf32>
    %cst_67 = arith.constant dense<0.000000e+00> : vector<2x128xf32>
    %382 = tpu.matmul %204, %377, %cst_67 {dimension_numbers = #tpu.dot_dimension_numbers<[1], [0], [0], [1], [0, 0, 1, 1], [], []>} : vector<2x32xf32>, vector<32x128xf32>, vector<2x128xf32> -> vector<2x128xf32>
    %383 = arith.addf %381, %382 : vector<2x128xf32>
    %384 = vector.extract_strided_slice %383 {offsets = [0, 0], sizes = [2, 96], strides = [1, 1]} : vector<2x128xf32> to vector<2x96xf32>
    %385 = arith.negf %384 : vector<2x96xf32>
    %386 = math.exp %385 : vector<2x96xf32>
    %cst_68 = arith.constant 1.000000e+00 : f32
    %387 = vector.broadcast %cst_68 : f32 to vector<2x96xf32>
    %388 = arith.addf %387, %386 : vector<2x96xf32>
    %389 = arith.divf %387, %388 : vector<2x96xf32>
    %390 = vector.extract_strided_slice %383 {offsets = [0, 96], sizes = [2, 32], strides = [1, 1]} : vector<2x128xf32> to vector<2x32xf32>
    %391 = math.tanh %390 : vector<2x32xf32>
    %392 = vector.extract_strided_slice %389 {offsets = [0, 32], sizes = [2, 32], strides = [1, 1]} : vector<2x96xf32> to vector<2x32xf32>
    %393 = arith.mulf %392, %201 : vector<2x32xf32>
    %394 = vector.extract_strided_slice %389 {offsets = [0, 0], sizes = [2, 32], strides = [1, 1]} : vector<2x96xf32> to vector<2x32xf32>
    %395 = arith.mulf %394, %391 : vector<2x32xf32>
    %396 = arith.addf %393, %395 : vector<2x32xf32>
    %397 = vector.extract_strided_slice %389 {offsets = [0, 64], sizes = [2, 32], strides = [1, 1]} : vector<2x96xf32> to vector<2x32xf32>
    %398 = math.tanh %396 : vector<2x32xf32>
    %399 = arith.mulf %397, %398 : vector<2x32xf32>
    %cst_69 = arith.constant dense<0.000000e+00> : vector<2x128xf32>
    %400 = tpu.matmul %249, %376, %cst_69 {dimension_numbers = #tpu.dot_dimension_numbers<[1], [0], [0], [1], [0, 0, 1, 1], [], []>} : vector<2x32xf32>, vector<32x128xf32>, vector<2x128xf32> -> vector<2x128xf32>
    %401 = vector.broadcast %378 : vector<1x128xf32> to vector<2x128xf32>
    %402 = arith.addf %400, %401 : vector<2x128xf32>
    %cst_70 = arith.constant dense<0.000000e+00> : vector<2x128xf32>
    %403 = tpu.matmul %399, %377, %cst_70 {dimension_numbers = #tpu.dot_dimension_numbers<[1], [0], [0], [1], [0, 0, 1, 1], [], []>} : vector<2x32xf32>, vector<32x128xf32>, vector<2x128xf32> -> vector<2x128xf32>
    %404 = arith.addf %402, %403 : vector<2x128xf32>
    %405 = vector.extract_strided_slice %404 {offsets = [0, 0], sizes = [2, 96], strides = [1, 1]} : vector<2x128xf32> to vector<2x96xf32>
    %406 = arith.negf %405 : vector<2x96xf32>
    %407 = math.exp %406 : vector<2x96xf32>
    %cst_71 = arith.constant 1.000000e+00 : f32
    %408 = vector.broadcast %cst_71 : f32 to vector<2x96xf32>
    %409 = arith.addf %408, %407 : vector<2x96xf32>
    %410 = arith.divf %408, %409 : vector<2x96xf32>
    %411 = vector.extract_strided_slice %404 {offsets = [0, 96], sizes = [2, 32], strides = [1, 1]} : vector<2x128xf32> to vector<2x32xf32>
    %412 = math.tanh %411 : vector<2x32xf32>
    %413 = vector.extract_strided_slice %410 {offsets = [0, 32], sizes = [2, 32], strides = [1, 1]} : vector<2x96xf32> to vector<2x32xf32>
    %414 = arith.mulf %413, %396 : vector<2x32xf32>
    %415 = vector.extract_strided_slice %410 {offsets = [0, 0], sizes = [2, 32], strides = [1, 1]} : vector<2x96xf32> to vector<2x32xf32>
    %416 = arith.mulf %415, %412 : vector<2x32xf32>
    %417 = arith.addf %414, %416 : vector<2x32xf32>
    %418 = vector.extract_strided_slice %410 {offsets = [0, 64], sizes = [2, 32], strides = [1, 1]} : vector<2x96xf32> to vector<2x32xf32>
    %419 = math.tanh %417 : vector<2x32xf32>
    %420 = arith.mulf %418, %419 : vector<2x32xf32>
    %cst_72 = arith.constant dense<0.000000e+00> : vector<2x128xf32>
    %421 = tpu.matmul %270, %376, %cst_72 {dimension_numbers = #tpu.dot_dimension_numbers<[1], [0], [0], [1], [0, 0, 1, 1], [], []>} : vector<2x32xf32>, vector<32x128xf32>, vector<2x128xf32> -> vector<2x128xf32>
    %422 = vector.broadcast %378 : vector<1x128xf32> to vector<2x128xf32>
    %423 = arith.addf %421, %422 : vector<2x128xf32>
    %cst_73 = arith.constant dense<0.000000e+00> : vector<2x128xf32>
    %424 = tpu.matmul %420, %377, %cst_73 {dimension_numbers = #tpu.dot_dimension_numbers<[1], [0], [0], [1], [0, 0, 1, 1], [], []>} : vector<2x32xf32>, vector<32x128xf32>, vector<2x128xf32> -> vector<2x128xf32>
    %425 = arith.addf %423, %424 : vector<2x128xf32>
    %426 = vector.extract_strided_slice %425 {offsets = [0, 0], sizes = [2, 96], strides = [1, 1]} : vector<2x128xf32> to vector<2x96xf32>
    %427 = arith.negf %426 : vector<2x96xf32>
    %428 = math.exp %427 : vector<2x96xf32>
    %cst_74 = arith.constant 1.000000e+00 : f32
    %429 = vector.broadcast %cst_74 : f32 to vector<2x96xf32>
    %430 = arith.addf %429, %428 : vector<2x96xf32>
    %431 = arith.divf %429, %430 : vector<2x96xf32>
    %432 = vector.extract_strided_slice %425 {offsets = [0, 96], sizes = [2, 32], strides = [1, 1]} : vector<2x128xf32> to vector<2x32xf32>
    %433 = math.tanh %432 : vector<2x32xf32>
    %434 = vector.extract_strided_slice %431 {offsets = [0, 32], sizes = [2, 32], strides = [1, 1]} : vector<2x96xf32> to vector<2x32xf32>
    %435 = arith.mulf %434, %417 : vector<2x32xf32>
    %436 = vector.extract_strided_slice %431 {offsets = [0, 0], sizes = [2, 32], strides = [1, 1]} : vector<2x96xf32> to vector<2x32xf32>
    %437 = arith.mulf %436, %433 : vector<2x32xf32>
    %438 = arith.addf %435, %437 : vector<2x32xf32>
    %439 = vector.extract_strided_slice %431 {offsets = [0, 64], sizes = [2, 32], strides = [1, 1]} : vector<2x96xf32> to vector<2x32xf32>
    %440 = math.tanh %438 : vector<2x32xf32>
    %441 = arith.mulf %439, %440 : vector<2x32xf32>
    %cst_75 = arith.constant dense<0.000000e+00> : vector<2x128xf32>
    %442 = tpu.matmul %291, %376, %cst_75 {dimension_numbers = #tpu.dot_dimension_numbers<[1], [0], [0], [1], [0, 0, 1, 1], [], []>} : vector<2x32xf32>, vector<32x128xf32>, vector<2x128xf32> -> vector<2x128xf32>
    %443 = vector.broadcast %378 : vector<1x128xf32> to vector<2x128xf32>
    %444 = arith.addf %442, %443 : vector<2x128xf32>
    %cst_76 = arith.constant dense<0.000000e+00> : vector<2x128xf32>
    %445 = tpu.matmul %441, %377, %cst_76 {dimension_numbers = #tpu.dot_dimension_numbers<[1], [0], [0], [1], [0, 0, 1, 1], [], []>} : vector<2x32xf32>, vector<32x128xf32>, vector<2x128xf32> -> vector<2x128xf32>
    %446 = arith.addf %444, %445 : vector<2x128xf32>
    %447 = vector.extract_strided_slice %446 {offsets = [0, 0], sizes = [2, 96], strides = [1, 1]} : vector<2x128xf32> to vector<2x96xf32>
    %448 = arith.negf %447 : vector<2x96xf32>
    %449 = math.exp %448 : vector<2x96xf32>
    %cst_77 = arith.constant 1.000000e+00 : f32
    %450 = vector.broadcast %cst_77 : f32 to vector<2x96xf32>
    %451 = arith.addf %450, %449 : vector<2x96xf32>
    %452 = arith.divf %450, %451 : vector<2x96xf32>
    %453 = vector.extract_strided_slice %446 {offsets = [0, 96], sizes = [2, 32], strides = [1, 1]} : vector<2x128xf32> to vector<2x32xf32>
    %454 = math.tanh %453 : vector<2x32xf32>
    %455 = vector.extract_strided_slice %452 {offsets = [0, 32], sizes = [2, 32], strides = [1, 1]} : vector<2x96xf32> to vector<2x32xf32>
    %456 = arith.mulf %455, %438 : vector<2x32xf32>
    %457 = vector.extract_strided_slice %452 {offsets = [0, 0], sizes = [2, 32], strides = [1, 1]} : vector<2x96xf32> to vector<2x32xf32>
    %458 = arith.mulf %457, %454 : vector<2x32xf32>
    %459 = arith.addf %456, %458 : vector<2x32xf32>
    %460 = vector.extract_strided_slice %452 {offsets = [0, 64], sizes = [2, 32], strides = [1, 1]} : vector<2x96xf32> to vector<2x32xf32>
    %461 = math.tanh %459 : vector<2x32xf32>
    %462 = arith.mulf %460, %461 : vector<2x32xf32>
    %cst_78 = arith.constant dense<0.000000e+00> : vector<2x128xf32>
    %463 = tpu.matmul %312, %376, %cst_78 {dimension_numbers = #tpu.dot_dimension_numbers<[1], [0], [0], [1], [0, 0, 1, 1], [], []>} : vector<2x32xf32>, vector<32x128xf32>, vector<2x128xf32> -> vector<2x128xf32>
    %464 = vector.broadcast %378 : vector<1x128xf32> to vector<2x128xf32>
    %465 = arith.addf %463, %464 : vector<2x128xf32>
    %cst_79 = arith.constant dense<0.000000e+00> : vector<2x128xf32>
    %466 = tpu.matmul %462, %377, %cst_79 {dimension_numbers = #tpu.dot_dimension_numbers<[1], [0], [0], [1], [0, 0, 1, 1], [], []>} : vector<2x32xf32>, vector<32x128xf32>, vector<2x128xf32> -> vector<2x128xf32>
    %467 = arith.addf %465, %466 : vector<2x128xf32>
    %468 = vector.extract_strided_slice %467 {offsets = [0, 0], sizes = [2, 96], strides = [1, 1]} : vector<2x128xf32> to vector<2x96xf32>
    %469 = arith.negf %468 : vector<2x96xf32>
    %470 = math.exp %469 : vector<2x96xf32>
    %cst_80 = arith.constant 1.000000e+00 : f32
    %471 = vector.broadcast %cst_80 : f32 to vector<2x96xf32>
    %472 = arith.addf %471, %470 : vector<2x96xf32>
    %473 = arith.divf %471, %472 : vector<2x96xf32>
    %474 = vector.extract_strided_slice %467 {offsets = [0, 96], sizes = [2, 32], strides = [1, 1]} : vector<2x128xf32> to vector<2x32xf32>
    %475 = math.tanh %474 : vector<2x32xf32>
    %476 = vector.extract_strided_slice %473 {offsets = [0, 32], sizes = [2, 32], strides = [1, 1]} : vector<2x96xf32> to vector<2x32xf32>
    %477 = arith.mulf %476, %459 : vector<2x32xf32>
    %478 = vector.extract_strided_slice %473 {offsets = [0, 0], sizes = [2, 32], strides = [1, 1]} : vector<2x96xf32> to vector<2x32xf32>
    %479 = arith.mulf %478, %475 : vector<2x32xf32>
    %480 = arith.addf %477, %479 : vector<2x32xf32>
    %481 = vector.extract_strided_slice %473 {offsets = [0, 64], sizes = [2, 32], strides = [1, 1]} : vector<2x96xf32> to vector<2x32xf32>
    %482 = math.tanh %480 : vector<2x32xf32>
    %483 = arith.mulf %481, %482 : vector<2x32xf32>
    %cst_81 = arith.constant dense<0.000000e+00> : vector<2x128xf32>
    %484 = tpu.matmul %333, %376, %cst_81 {dimension_numbers = #tpu.dot_dimension_numbers<[1], [0], [0], [1], [0, 0, 1, 1], [], []>} : vector<2x32xf32>, vector<32x128xf32>, vector<2x128xf32> -> vector<2x128xf32>
    %485 = vector.broadcast %378 : vector<1x128xf32> to vector<2x128xf32>
    %486 = arith.addf %484, %485 : vector<2x128xf32>
    %cst_82 = arith.constant dense<0.000000e+00> : vector<2x128xf32>
    %487 = tpu.matmul %483, %377, %cst_82 {dimension_numbers = #tpu.dot_dimension_numbers<[1], [0], [0], [1], [0, 0, 1, 1], [], []>} : vector<2x32xf32>, vector<32x128xf32>, vector<2x128xf32> -> vector<2x128xf32>
    %488 = arith.addf %486, %487 : vector<2x128xf32>
    %489 = vector.extract_strided_slice %488 {offsets = [0, 0], sizes = [2, 96], strides = [1, 1]} : vector<2x128xf32> to vector<2x96xf32>
    %490 = arith.negf %489 : vector<2x96xf32>
    %491 = math.exp %490 : vector<2x96xf32>
    %cst_83 = arith.constant 1.000000e+00 : f32
    %492 = vector.broadcast %cst_83 : f32 to vector<2x96xf32>
    %493 = arith.addf %492, %491 : vector<2x96xf32>
    %494 = arith.divf %492, %493 : vector<2x96xf32>
    %495 = vector.extract_strided_slice %488 {offsets = [0, 96], sizes = [2, 32], strides = [1, 1]} : vector<2x128xf32> to vector<2x32xf32>
    %496 = math.tanh %495 : vector<2x32xf32>
    %497 = vector.extract_strided_slice %494 {offsets = [0, 32], sizes = [2, 32], strides = [1, 1]} : vector<2x96xf32> to vector<2x32xf32>
    %498 = arith.mulf %497, %480 : vector<2x32xf32>
    %499 = vector.extract_strided_slice %494 {offsets = [0, 0], sizes = [2, 32], strides = [1, 1]} : vector<2x96xf32> to vector<2x32xf32>
    %500 = arith.mulf %499, %496 : vector<2x32xf32>
    %501 = arith.addf %498, %500 : vector<2x32xf32>
    %502 = vector.extract_strided_slice %494 {offsets = [0, 64], sizes = [2, 32], strides = [1, 1]} : vector<2x96xf32> to vector<2x32xf32>
    %503 = math.tanh %501 : vector<2x32xf32>
    %504 = arith.mulf %502, %503 : vector<2x32xf32>
    %cst_84 = arith.constant dense<0.000000e+00> : vector<2x128xf32>
    %505 = tpu.matmul %354, %376, %cst_84 {dimension_numbers = #tpu.dot_dimension_numbers<[1], [0], [0], [1], [0, 0, 1, 1], [], []>} : vector<2x32xf32>, vector<32x128xf32>, vector<2x128xf32> -> vector<2x128xf32>
    %506 = vector.broadcast %378 : vector<1x128xf32> to vector<2x128xf32>
    %507 = arith.addf %505, %506 : vector<2x128xf32>
    %cst_85 = arith.constant dense<0.000000e+00> : vector<2x128xf32>
    %508 = tpu.matmul %504, %377, %cst_85 {dimension_numbers = #tpu.dot_dimension_numbers<[1], [0], [0], [1], [0, 0, 1, 1], [], []>} : vector<2x32xf32>, vector<32x128xf32>, vector<2x128xf32> -> vector<2x128xf32>
    %509 = arith.addf %507, %508 : vector<2x128xf32>
    %510 = vector.extract_strided_slice %509 {offsets = [0, 0], sizes = [2, 96], strides = [1, 1]} : vector<2x128xf32> to vector<2x96xf32>
    %511 = arith.negf %510 : vector<2x96xf32>
    %512 = math.exp %511 : vector<2x96xf32>
    %cst_86 = arith.constant 1.000000e+00 : f32
    %513 = vector.broadcast %cst_86 : f32 to vector<2x96xf32>
    %514 = arith.addf %513, %512 : vector<2x96xf32>
    %515 = arith.divf %513, %514 : vector<2x96xf32>
    %516 = vector.extract_strided_slice %509 {offsets = [0, 96], sizes = [2, 32], strides = [1, 1]} : vector<2x128xf32> to vector<2x32xf32>
    %517 = math.tanh %516 : vector<2x32xf32>
    %518 = vector.extract_strided_slice %515 {offsets = [0, 32], sizes = [2, 32], strides = [1, 1]} : vector<2x96xf32> to vector<2x32xf32>
    %519 = arith.mulf %518, %501 : vector<2x32xf32>
    %520 = vector.extract_strided_slice %515 {offsets = [0, 0], sizes = [2, 32], strides = [1, 1]} : vector<2x96xf32> to vector<2x32xf32>
    %521 = arith.mulf %520, %517 : vector<2x32xf32>
    %522 = arith.addf %519, %521 : vector<2x32xf32>
    %523 = vector.extract_strided_slice %515 {offsets = [0, 64], sizes = [2, 32], strides = [1, 1]} : vector<2x96xf32> to vector<2x32xf32>
    %524 = math.tanh %522 : vector<2x32xf32>
    %525 = arith.mulf %523, %524 : vector<2x32xf32>
    %cst_87 = arith.constant dense<0.000000e+00> : vector<2x128xf32>
    %526 = tpu.matmul %375, %376, %cst_87 {dimension_numbers = #tpu.dot_dimension_numbers<[1], [0], [0], [1], [0, 0, 1, 1], [], []>} : vector<2x32xf32>, vector<32x128xf32>, vector<2x128xf32> -> vector<2x128xf32>
    %527 = vector.broadcast %378 : vector<1x128xf32> to vector<2x128xf32>
    %528 = arith.addf %526, %527 : vector<2x128xf32>
    %cst_88 = arith.constant dense<0.000000e+00> : vector<2x128xf32>
    %529 = tpu.matmul %525, %377, %cst_88 {dimension_numbers = #tpu.dot_dimension_numbers<[1], [0], [0], [1], [0, 0, 1, 1], [], []>} : vector<2x32xf32>, vector<32x128xf32>, vector<2x128xf32> -> vector<2x128xf32>
    %530 = arith.addf %528, %529 : vector<2x128xf32>
    %531 = vector.extract_strided_slice %530 {offsets = [0, 0], sizes = [2, 96], strides = [1, 1]} : vector<2x128xf32> to vector<2x96xf32>
    %532 = arith.negf %531 : vector<2x96xf32>
    %533 = math.exp %532 : vector<2x96xf32>
    %cst_89 = arith.constant 1.000000e+00 : f32
    %534 = vector.broadcast %cst_89 : f32 to vector<2x96xf32>
    %535 = arith.addf %534, %533 : vector<2x96xf32>
    %536 = arith.divf %534, %535 : vector<2x96xf32>
    %537 = vector.extract_strided_slice %530 {offsets = [0, 96], sizes = [2, 32], strides = [1, 1]} : vector<2x128xf32> to vector<2x32xf32>
    %538 = math.tanh %537 : vector<2x32xf32>
    %539 = vector.extract_strided_slice %536 {offsets = [0, 32], sizes = [2, 32], strides = [1, 1]} : vector<2x96xf32> to vector<2x32xf32>
    %540 = arith.mulf %539, %522 : vector<2x32xf32>
    %541 = vector.extract_strided_slice %536 {offsets = [0, 0], sizes = [2, 32], strides = [1, 1]} : vector<2x96xf32> to vector<2x32xf32>
    %542 = arith.mulf %541, %538 : vector<2x32xf32>
    %543 = arith.addf %540, %542 : vector<2x32xf32>
    %544 = vector.extract_strided_slice %536 {offsets = [0, 64], sizes = [2, 32], strides = [1, 1]} : vector<2x96xf32> to vector<2x32xf32>
    %545 = math.tanh %543 : vector<2x32xf32>
    %546 = arith.mulf %544, %545 : vector<2x32xf32>
    %c432 = arith.constant 432 : index
    %c0_90 = arith.constant 0 : index
    %547 = vector.load %arg1[%c432, %c0_90] : memref<792x128xf32, #tpu.memory_space<vmem>>, vector<32x128xf32>
    %c464 = arith.constant 464 : index
    %c0_91 = arith.constant 0 : index
    %548 = vector.load %arg1[%c464, %c0_91] : memref<792x128xf32, #tpu.memory_space<vmem>>, vector<32x128xf32>
    %c496 = arith.constant 496 : index
    %c0_92 = arith.constant 0 : index
    %549 = vector.load %arg1[%c496, %c0_92] : memref<792x128xf32, #tpu.memory_space<vmem>>, vector<1x128xf32>
    %cst_93 = arith.constant dense<0.000000e+00> : vector<2x128xf32>
    %550 = tpu.matmul %399, %547, %cst_93 {dimension_numbers = #tpu.dot_dimension_numbers<[1], [0], [0], [1], [0, 0, 1, 1], [], []>} : vector<2x32xf32>, vector<32x128xf32>, vector<2x128xf32> -> vector<2x128xf32>
    %551 = vector.broadcast %549 : vector<1x128xf32> to vector<2x128xf32>
    %552 = arith.addf %550, %551 : vector<2x128xf32>
    %cst_94 = arith.constant dense<0.000000e+00> : vector<2x128xf32>
    %553 = tpu.matmul %375, %548, %cst_94 {dimension_numbers = #tpu.dot_dimension_numbers<[1], [0], [0], [1], [0, 0, 1, 1], [], []>} : vector<2x32xf32>, vector<32x128xf32>, vector<2x128xf32> -> vector<2x128xf32>
    %554 = arith.addf %552, %553 : vector<2x128xf32>
    %555 = vector.extract_strided_slice %554 {offsets = [0, 0], sizes = [2, 96], strides = [1, 1]} : vector<2x128xf32> to vector<2x96xf32>
    %556 = arith.negf %555 : vector<2x96xf32>
    %557 = math.exp %556 : vector<2x96xf32>
    %cst_95 = arith.constant 1.000000e+00 : f32
    %558 = vector.broadcast %cst_95 : f32 to vector<2x96xf32>
    %559 = arith.addf %558, %557 : vector<2x96xf32>
    %560 = arith.divf %558, %559 : vector<2x96xf32>
    %561 = vector.extract_strided_slice %554 {offsets = [0, 96], sizes = [2, 32], strides = [1, 1]} : vector<2x128xf32> to vector<2x32xf32>
    %562 = math.tanh %561 : vector<2x32xf32>
    %563 = vector.extract_strided_slice %560 {offsets = [0, 32], sizes = [2, 32], strides = [1, 1]} : vector<2x96xf32> to vector<2x32xf32>
    %564 = arith.mulf %563, %372 : vector<2x32xf32>
    %565 = vector.extract_strided_slice %560 {offsets = [0, 0], sizes = [2, 32], strides = [1, 1]} : vector<2x96xf32> to vector<2x32xf32>
    %566 = arith.mulf %565, %562 : vector<2x32xf32>
    %567 = arith.addf %564, %566 : vector<2x32xf32>
    %568 = vector.extract_strided_slice %560 {offsets = [0, 64], sizes = [2, 32], strides = [1, 1]} : vector<2x96xf32> to vector<2x32xf32>
    %569 = math.tanh %567 : vector<2x32xf32>
    %570 = arith.mulf %568, %569 : vector<2x32xf32>
    %cst_96 = arith.constant dense<0.000000e+00> : vector<2x128xf32>
    %571 = tpu.matmul %420, %547, %cst_96 {dimension_numbers = #tpu.dot_dimension_numbers<[1], [0], [0], [1], [0, 0, 1, 1], [], []>} : vector<2x32xf32>, vector<32x128xf32>, vector<2x128xf32> -> vector<2x128xf32>
    %572 = vector.broadcast %549 : vector<1x128xf32> to vector<2x128xf32>
    %573 = arith.addf %571, %572 : vector<2x128xf32>
    %cst_97 = arith.constant dense<0.000000e+00> : vector<2x128xf32>
    %574 = tpu.matmul %570, %548, %cst_97 {dimension_numbers = #tpu.dot_dimension_numbers<[1], [0], [0], [1], [0, 0, 1, 1], [], []>} : vector<2x32xf32>, vector<32x128xf32>, vector<2x128xf32> -> vector<2x128xf32>
    %575 = arith.addf %573, %574 : vector<2x128xf32>
    %576 = vector.extract_strided_slice %575 {offsets = [0, 0], sizes = [2, 96], strides = [1, 1]} : vector<2x128xf32> to vector<2x96xf32>
    %577 = arith.negf %576 : vector<2x96xf32>
    %578 = math.exp %577 : vector<2x96xf32>
    %cst_98 = arith.constant 1.000000e+00 : f32
    %579 = vector.broadcast %cst_98 : f32 to vector<2x96xf32>
    %580 = arith.addf %579, %578 : vector<2x96xf32>
    %581 = arith.divf %579, %580 : vector<2x96xf32>
    %582 = vector.extract_strided_slice %575 {offsets = [0, 96], sizes = [2, 32], strides = [1, 1]} : vector<2x128xf32> to vector<2x32xf32>
    %583 = math.tanh %582 : vector<2x32xf32>
    %584 = vector.extract_strided_slice %581 {offsets = [0, 32], sizes = [2, 32], strides = [1, 1]} : vector<2x96xf32> to vector<2x32xf32>
    %585 = arith.mulf %584, %567 : vector<2x32xf32>
    %586 = vector.extract_strided_slice %581 {offsets = [0, 0], sizes = [2, 32], strides = [1, 1]} : vector<2x96xf32> to vector<2x32xf32>
    %587 = arith.mulf %586, %583 : vector<2x32xf32>
    %588 = arith.addf %585, %587 : vector<2x32xf32>
    %589 = vector.extract_strided_slice %581 {offsets = [0, 64], sizes = [2, 32], strides = [1, 1]} : vector<2x96xf32> to vector<2x32xf32>
    %590 = math.tanh %588 : vector<2x32xf32>
    %591 = arith.mulf %589, %590 : vector<2x32xf32>
    %cst_99 = arith.constant dense<0.000000e+00> : vector<2x128xf32>
    %592 = tpu.matmul %441, %547, %cst_99 {dimension_numbers = #tpu.dot_dimension_numbers<[1], [0], [0], [1], [0, 0, 1, 1], [], []>} : vector<2x32xf32>, vector<32x128xf32>, vector<2x128xf32> -> vector<2x128xf32>
    %593 = vector.broadcast %549 : vector<1x128xf32> to vector<2x128xf32>
    %594 = arith.addf %592, %593 : vector<2x128xf32>
    %cst_100 = arith.constant dense<0.000000e+00> : vector<2x128xf32>
    %595 = tpu.matmul %591, %548, %cst_100 {dimension_numbers = #tpu.dot_dimension_numbers<[1], [0], [0], [1], [0, 0, 1, 1], [], []>} : vector<2x32xf32>, vector<32x128xf32>, vector<2x128xf32> -> vector<2x128xf32>
    %596 = arith.addf %594, %595 : vector<2x128xf32>
    %597 = vector.extract_strided_slice %596 {offsets = [0, 0], sizes = [2, 96], strides = [1, 1]} : vector<2x128xf32> to vector<2x96xf32>
    %598 = arith.negf %597 : vector<2x96xf32>
    %599 = math.exp %598 : vector<2x96xf32>
    %cst_101 = arith.constant 1.000000e+00 : f32
    %600 = vector.broadcast %cst_101 : f32 to vector<2x96xf32>
    %601 = arith.addf %600, %599 : vector<2x96xf32>
    %602 = arith.divf %600, %601 : vector<2x96xf32>
    %603 = vector.extract_strided_slice %596 {offsets = [0, 96], sizes = [2, 32], strides = [1, 1]} : vector<2x128xf32> to vector<2x32xf32>
    %604 = math.tanh %603 : vector<2x32xf32>
    %605 = vector.extract_strided_slice %602 {offsets = [0, 32], sizes = [2, 32], strides = [1, 1]} : vector<2x96xf32> to vector<2x32xf32>
    %606 = arith.mulf %605, %588 : vector<2x32xf32>
    %607 = vector.extract_strided_slice %602 {offsets = [0, 0], sizes = [2, 32], strides = [1, 1]} : vector<2x96xf32> to vector<2x32xf32>
    %608 = arith.mulf %607, %604 : vector<2x32xf32>
    %609 = arith.addf %606, %608 : vector<2x32xf32>
    %610 = vector.extract_strided_slice %602 {offsets = [0, 64], sizes = [2, 32], strides = [1, 1]} : vector<2x96xf32> to vector<2x32xf32>
    %611 = math.tanh %609 : vector<2x32xf32>
    %612 = arith.mulf %610, %611 : vector<2x32xf32>
    %cst_102 = arith.constant dense<0.000000e+00> : vector<2x128xf32>
    %613 = tpu.matmul %462, %547, %cst_102 {dimension_numbers = #tpu.dot_dimension_numbers<[1], [0], [0], [1], [0, 0, 1, 1], [], []>} : vector<2x32xf32>, vector<32x128xf32>, vector<2x128xf32> -> vector<2x128xf32>
    %614 = vector.broadcast %549 : vector<1x128xf32> to vector<2x128xf32>
    %615 = arith.addf %613, %614 : vector<2x128xf32>
    %cst_103 = arith.constant dense<0.000000e+00> : vector<2x128xf32>
    %616 = tpu.matmul %612, %548, %cst_103 {dimension_numbers = #tpu.dot_dimension_numbers<[1], [0], [0], [1], [0, 0, 1, 1], [], []>} : vector<2x32xf32>, vector<32x128xf32>, vector<2x128xf32> -> vector<2x128xf32>
    %617 = arith.addf %615, %616 : vector<2x128xf32>
    %618 = vector.extract_strided_slice %617 {offsets = [0, 0], sizes = [2, 96], strides = [1, 1]} : vector<2x128xf32> to vector<2x96xf32>
    %619 = arith.negf %618 : vector<2x96xf32>
    %620 = math.exp %619 : vector<2x96xf32>
    %cst_104 = arith.constant 1.000000e+00 : f32
    %621 = vector.broadcast %cst_104 : f32 to vector<2x96xf32>
    %622 = arith.addf %621, %620 : vector<2x96xf32>
    %623 = arith.divf %621, %622 : vector<2x96xf32>
    %624 = vector.extract_strided_slice %617 {offsets = [0, 96], sizes = [2, 32], strides = [1, 1]} : vector<2x128xf32> to vector<2x32xf32>
    %625 = math.tanh %624 : vector<2x32xf32>
    %626 = vector.extract_strided_slice %623 {offsets = [0, 32], sizes = [2, 32], strides = [1, 1]} : vector<2x96xf32> to vector<2x32xf32>
    %627 = arith.mulf %626, %609 : vector<2x32xf32>
    %628 = vector.extract_strided_slice %623 {offsets = [0, 0], sizes = [2, 32], strides = [1, 1]} : vector<2x96xf32> to vector<2x32xf32>
    %629 = arith.mulf %628, %625 : vector<2x32xf32>
    %630 = arith.addf %627, %629 : vector<2x32xf32>
    %631 = vector.extract_strided_slice %623 {offsets = [0, 64], sizes = [2, 32], strides = [1, 1]} : vector<2x96xf32> to vector<2x32xf32>
    %632 = math.tanh %630 : vector<2x32xf32>
    %633 = arith.mulf %631, %632 : vector<2x32xf32>
    %cst_105 = arith.constant dense<0.000000e+00> : vector<2x128xf32>
    %634 = tpu.matmul %483, %547, %cst_105 {dimension_numbers = #tpu.dot_dimension_numbers<[1], [0], [0], [1], [0, 0, 1, 1], [], []>} : vector<2x32xf32>, vector<32x128xf32>, vector<2x128xf32> -> vector<2x128xf32>
    %635 = vector.broadcast %549 : vector<1x128xf32> to vector<2x128xf32>
    %636 = arith.addf %634, %635 : vector<2x128xf32>
    %cst_106 = arith.constant dense<0.000000e+00> : vector<2x128xf32>
    %637 = tpu.matmul %633, %548, %cst_106 {dimension_numbers = #tpu.dot_dimension_numbers<[1], [0], [0], [1], [0, 0, 1, 1], [], []>} : vector<2x32xf32>, vector<32x128xf32>, vector<2x128xf32> -> vector<2x128xf32>
    %638 = arith.addf %636, %637 : vector<2x128xf32>
    %639 = vector.extract_strided_slice %638 {offsets = [0, 0], sizes = [2, 96], strides = [1, 1]} : vector<2x128xf32> to vector<2x96xf32>
    %640 = arith.negf %639 : vector<2x96xf32>
    %641 = math.exp %640 : vector<2x96xf32>
    %cst_107 = arith.constant 1.000000e+00 : f32
    %642 = vector.broadcast %cst_107 : f32 to vector<2x96xf32>
    %643 = arith.addf %642, %641 : vector<2x96xf32>
    %644 = arith.divf %642, %643 : vector<2x96xf32>
    %645 = vector.extract_strided_slice %638 {offsets = [0, 96], sizes = [2, 32], strides = [1, 1]} : vector<2x128xf32> to vector<2x32xf32>
    %646 = math.tanh %645 : vector<2x32xf32>
    %647 = vector.extract_strided_slice %644 {offsets = [0, 32], sizes = [2, 32], strides = [1, 1]} : vector<2x96xf32> to vector<2x32xf32>
    %648 = arith.mulf %647, %630 : vector<2x32xf32>
    %649 = vector.extract_strided_slice %644 {offsets = [0, 0], sizes = [2, 32], strides = [1, 1]} : vector<2x96xf32> to vector<2x32xf32>
    %650 = arith.mulf %649, %646 : vector<2x32xf32>
    %651 = arith.addf %648, %650 : vector<2x32xf32>
    %652 = vector.extract_strided_slice %644 {offsets = [0, 64], sizes = [2, 32], strides = [1, 1]} : vector<2x96xf32> to vector<2x32xf32>
    %653 = math.tanh %651 : vector<2x32xf32>
    %654 = arith.mulf %652, %653 : vector<2x32xf32>
    %cst_108 = arith.constant dense<0.000000e+00> : vector<2x128xf32>
    %655 = tpu.matmul %504, %547, %cst_108 {dimension_numbers = #tpu.dot_dimension_numbers<[1], [0], [0], [1], [0, 0, 1, 1], [], []>} : vector<2x32xf32>, vector<32x128xf32>, vector<2x128xf32> -> vector<2x128xf32>
    %656 = vector.broadcast %549 : vector<1x128xf32> to vector<2x128xf32>
    %657 = arith.addf %655, %656 : vector<2x128xf32>
    %cst_109 = arith.constant dense<0.000000e+00> : vector<2x128xf32>
    %658 = tpu.matmul %654, %548, %cst_109 {dimension_numbers = #tpu.dot_dimension_numbers<[1], [0], [0], [1], [0, 0, 1, 1], [], []>} : vector<2x32xf32>, vector<32x128xf32>, vector<2x128xf32> -> vector<2x128xf32>
    %659 = arith.addf %657, %658 : vector<2x128xf32>
    %660 = vector.extract_strided_slice %659 {offsets = [0, 0], sizes = [2, 96], strides = [1, 1]} : vector<2x128xf32> to vector<2x96xf32>
    %661 = arith.negf %660 : vector<2x96xf32>
    %662 = math.exp %661 : vector<2x96xf32>
    %cst_110 = arith.constant 1.000000e+00 : f32
    %663 = vector.broadcast %cst_110 : f32 to vector<2x96xf32>
    %664 = arith.addf %663, %662 : vector<2x96xf32>
    %665 = arith.divf %663, %664 : vector<2x96xf32>
    %666 = vector.extract_strided_slice %659 {offsets = [0, 96], sizes = [2, 32], strides = [1, 1]} : vector<2x128xf32> to vector<2x32xf32>
    %667 = math.tanh %666 : vector<2x32xf32>
    %668 = vector.extract_strided_slice %665 {offsets = [0, 32], sizes = [2, 32], strides = [1, 1]} : vector<2x96xf32> to vector<2x32xf32>
    %669 = arith.mulf %668, %651 : vector<2x32xf32>
    %670 = vector.extract_strided_slice %665 {offsets = [0, 0], sizes = [2, 32], strides = [1, 1]} : vector<2x96xf32> to vector<2x32xf32>
    %671 = arith.mulf %670, %667 : vector<2x32xf32>
    %672 = arith.addf %669, %671 : vector<2x32xf32>
    %673 = vector.extract_strided_slice %665 {offsets = [0, 64], sizes = [2, 32], strides = [1, 1]} : vector<2x96xf32> to vector<2x32xf32>
    %674 = math.tanh %672 : vector<2x32xf32>
    %675 = arith.mulf %673, %674 : vector<2x32xf32>
    %cst_111 = arith.constant dense<0.000000e+00> : vector<2x128xf32>
    %676 = tpu.matmul %525, %547, %cst_111 {dimension_numbers = #tpu.dot_dimension_numbers<[1], [0], [0], [1], [0, 0, 1, 1], [], []>} : vector<2x32xf32>, vector<32x128xf32>, vector<2x128xf32> -> vector<2x128xf32>
    %677 = vector.broadcast %549 : vector<1x128xf32> to vector<2x128xf32>
    %678 = arith.addf %676, %677 : vector<2x128xf32>
    %cst_112 = arith.constant dense<0.000000e+00> : vector<2x128xf32>
    %679 = tpu.matmul %675, %548, %cst_112 {dimension_numbers = #tpu.dot_dimension_numbers<[1], [0], [0], [1], [0, 0, 1, 1], [], []>} : vector<2x32xf32>, vector<32x128xf32>, vector<2x128xf32> -> vector<2x128xf32>
    %680 = arith.addf %678, %679 : vector<2x128xf32>
    %681 = vector.extract_strided_slice %680 {offsets = [0, 0], sizes = [2, 96], strides = [1, 1]} : vector<2x128xf32> to vector<2x96xf32>
    %682 = arith.negf %681 : vector<2x96xf32>
    %683 = math.exp %682 : vector<2x96xf32>
    %cst_113 = arith.constant 1.000000e+00 : f32
    %684 = vector.broadcast %cst_113 : f32 to vector<2x96xf32>
    %685 = arith.addf %684, %683 : vector<2x96xf32>
    %686 = arith.divf %684, %685 : vector<2x96xf32>
    %687 = vector.extract_strided_slice %680 {offsets = [0, 96], sizes = [2, 32], strides = [1, 1]} : vector<2x128xf32> to vector<2x32xf32>
    %688 = math.tanh %687 : vector<2x32xf32>
    %689 = vector.extract_strided_slice %686 {offsets = [0, 32], sizes = [2, 32], strides = [1, 1]} : vector<2x96xf32> to vector<2x32xf32>
    %690 = arith.mulf %689, %672 : vector<2x32xf32>
    %691 = vector.extract_strided_slice %686 {offsets = [0, 0], sizes = [2, 32], strides = [1, 1]} : vector<2x96xf32> to vector<2x32xf32>
    %692 = arith.mulf %691, %688 : vector<2x32xf32>
    %693 = arith.addf %690, %692 : vector<2x32xf32>
    %694 = vector.extract_strided_slice %686 {offsets = [0, 64], sizes = [2, 32], strides = [1, 1]} : vector<2x96xf32> to vector<2x32xf32>
    %695 = math.tanh %693 : vector<2x32xf32>
    %696 = arith.mulf %694, %695 : vector<2x32xf32>
    %cst_114 = arith.constant dense<0.000000e+00> : vector<2x128xf32>
    %697 = tpu.matmul %546, %547, %cst_114 {dimension_numbers = #tpu.dot_dimension_numbers<[1], [0], [0], [1], [0, 0, 1, 1], [], []>} : vector<2x32xf32>, vector<32x128xf32>, vector<2x128xf32> -> vector<2x128xf32>
    %698 = vector.broadcast %549 : vector<1x128xf32> to vector<2x128xf32>
    %699 = arith.addf %697, %698 : vector<2x128xf32>
    %cst_115 = arith.constant dense<0.000000e+00> : vector<2x128xf32>
    %700 = tpu.matmul %696, %548, %cst_115 {dimension_numbers = #tpu.dot_dimension_numbers<[1], [0], [0], [1], [0, 0, 1, 1], [], []>} : vector<2x32xf32>, vector<32x128xf32>, vector<2x128xf32> -> vector<2x128xf32>
    %701 = arith.addf %699, %700 : vector<2x128xf32>
    %702 = vector.extract_strided_slice %701 {offsets = [0, 0], sizes = [2, 96], strides = [1, 1]} : vector<2x128xf32> to vector<2x96xf32>
    %703 = arith.negf %702 : vector<2x96xf32>
    %704 = math.exp %703 : vector<2x96xf32>
    %cst_116 = arith.constant 1.000000e+00 : f32
    %705 = vector.broadcast %cst_116 : f32 to vector<2x96xf32>
    %706 = arith.addf %705, %704 : vector<2x96xf32>
    %707 = arith.divf %705, %706 : vector<2x96xf32>
    %708 = vector.extract_strided_slice %701 {offsets = [0, 96], sizes = [2, 32], strides = [1, 1]} : vector<2x128xf32> to vector<2x32xf32>
    %709 = math.tanh %708 : vector<2x32xf32>
    %710 = vector.extract_strided_slice %707 {offsets = [0, 32], sizes = [2, 32], strides = [1, 1]} : vector<2x96xf32> to vector<2x32xf32>
    %711 = arith.mulf %710, %693 : vector<2x32xf32>
    %712 = vector.extract_strided_slice %707 {offsets = [0, 0], sizes = [2, 32], strides = [1, 1]} : vector<2x96xf32> to vector<2x32xf32>
    %713 = arith.mulf %712, %709 : vector<2x32xf32>
    %714 = arith.addf %711, %713 : vector<2x32xf32>
    %715 = vector.extract_strided_slice %707 {offsets = [0, 64], sizes = [2, 32], strides = [1, 1]} : vector<2x96xf32> to vector<2x32xf32>
    %716 = math.tanh %714 : vector<2x32xf32>
    %717 = arith.mulf %715, %716 : vector<2x32xf32>
    %c504 = arith.constant 504 : index
    %c0_117 = arith.constant 0 : index
    %718 = vector.load %arg1[%c504, %c0_117] : memref<792x128xf32, #tpu.memory_space<vmem>>, vector<32x128xf32>
    %c536 = arith.constant 536 : index
    %c0_118 = arith.constant 0 : index
    %719 = vector.load %arg1[%c536, %c0_118] : memref<792x128xf32, #tpu.memory_space<vmem>>, vector<32x128xf32>
    %c568 = arith.constant 568 : index
    %c0_119 = arith.constant 0 : index
    %720 = vector.load %arg1[%c568, %c0_119] : memref<792x128xf32, #tpu.memory_space<vmem>>, vector<1x128xf32>
    %cst_120 = arith.constant dense<0.000000e+00> : vector<2x128xf32>
    %721 = tpu.matmul %570, %718, %cst_120 {dimension_numbers = #tpu.dot_dimension_numbers<[1], [0], [0], [1], [0, 0, 1, 1], [], []>} : vector<2x32xf32>, vector<32x128xf32>, vector<2x128xf32> -> vector<2x128xf32>
    %722 = vector.broadcast %720 : vector<1x128xf32> to vector<2x128xf32>
    %723 = arith.addf %721, %722 : vector<2x128xf32>
    %cst_121 = arith.constant dense<0.000000e+00> : vector<2x128xf32>
    %724 = tpu.matmul %546, %719, %cst_121 {dimension_numbers = #tpu.dot_dimension_numbers<[1], [0], [0], [1], [0, 0, 1, 1], [], []>} : vector<2x32xf32>, vector<32x128xf32>, vector<2x128xf32> -> vector<2x128xf32>
    %725 = arith.addf %723, %724 : vector<2x128xf32>
    %726 = vector.extract_strided_slice %725 {offsets = [0, 0], sizes = [2, 96], strides = [1, 1]} : vector<2x128xf32> to vector<2x96xf32>
    %727 = arith.negf %726 : vector<2x96xf32>
    %728 = math.exp %727 : vector<2x96xf32>
    %cst_122 = arith.constant 1.000000e+00 : f32
    %729 = vector.broadcast %cst_122 : f32 to vector<2x96xf32>
    %730 = arith.addf %729, %728 : vector<2x96xf32>
    %731 = arith.divf %729, %730 : vector<2x96xf32>
    %732 = vector.extract_strided_slice %725 {offsets = [0, 96], sizes = [2, 32], strides = [1, 1]} : vector<2x128xf32> to vector<2x32xf32>
    %733 = math.tanh %732 : vector<2x32xf32>
    %734 = vector.extract_strided_slice %731 {offsets = [0, 32], sizes = [2, 32], strides = [1, 1]} : vector<2x96xf32> to vector<2x32xf32>
    %735 = arith.mulf %734, %543 : vector<2x32xf32>
    %736 = vector.extract_strided_slice %731 {offsets = [0, 0], sizes = [2, 32], strides = [1, 1]} : vector<2x96xf32> to vector<2x32xf32>
    %737 = arith.mulf %736, %733 : vector<2x32xf32>
    %738 = arith.addf %735, %737 : vector<2x32xf32>
    %739 = vector.extract_strided_slice %731 {offsets = [0, 64], sizes = [2, 32], strides = [1, 1]} : vector<2x96xf32> to vector<2x32xf32>
    %740 = math.tanh %738 : vector<2x32xf32>
    %741 = arith.mulf %739, %740 : vector<2x32xf32>
    %cst_123 = arith.constant dense<0.000000e+00> : vector<2x128xf32>
    %742 = tpu.matmul %591, %718, %cst_123 {dimension_numbers = #tpu.dot_dimension_numbers<[1], [0], [0], [1], [0, 0, 1, 1], [], []>} : vector<2x32xf32>, vector<32x128xf32>, vector<2x128xf32> -> vector<2x128xf32>
    %743 = vector.broadcast %720 : vector<1x128xf32> to vector<2x128xf32>
    %744 = arith.addf %742, %743 : vector<2x128xf32>
    %cst_124 = arith.constant dense<0.000000e+00> : vector<2x128xf32>
    %745 = tpu.matmul %741, %719, %cst_124 {dimension_numbers = #tpu.dot_dimension_numbers<[1], [0], [0], [1], [0, 0, 1, 1], [], []>} : vector<2x32xf32>, vector<32x128xf32>, vector<2x128xf32> -> vector<2x128xf32>
    %746 = arith.addf %744, %745 : vector<2x128xf32>
    %747 = vector.extract_strided_slice %746 {offsets = [0, 0], sizes = [2, 96], strides = [1, 1]} : vector<2x128xf32> to vector<2x96xf32>
    %748 = arith.negf %747 : vector<2x96xf32>
    %749 = math.exp %748 : vector<2x96xf32>
    %cst_125 = arith.constant 1.000000e+00 : f32
    %750 = vector.broadcast %cst_125 : f32 to vector<2x96xf32>
    %751 = arith.addf %750, %749 : vector<2x96xf32>
    %752 = arith.divf %750, %751 : vector<2x96xf32>
    %753 = vector.extract_strided_slice %746 {offsets = [0, 96], sizes = [2, 32], strides = [1, 1]} : vector<2x128xf32> to vector<2x32xf32>
    %754 = math.tanh %753 : vector<2x32xf32>
    %755 = vector.extract_strided_slice %752 {offsets = [0, 32], sizes = [2, 32], strides = [1, 1]} : vector<2x96xf32> to vector<2x32xf32>
    %756 = arith.mulf %755, %738 : vector<2x32xf32>
    %757 = vector.extract_strided_slice %752 {offsets = [0, 0], sizes = [2, 32], strides = [1, 1]} : vector<2x96xf32> to vector<2x32xf32>
    %758 = arith.mulf %757, %754 : vector<2x32xf32>
    %759 = arith.addf %756, %758 : vector<2x32xf32>
    %760 = vector.extract_strided_slice %752 {offsets = [0, 64], sizes = [2, 32], strides = [1, 1]} : vector<2x96xf32> to vector<2x32xf32>
    %761 = math.tanh %759 : vector<2x32xf32>
    %762 = arith.mulf %760, %761 : vector<2x32xf32>
    %cst_126 = arith.constant dense<0.000000e+00> : vector<2x128xf32>
    %763 = tpu.matmul %612, %718, %cst_126 {dimension_numbers = #tpu.dot_dimension_numbers<[1], [0], [0], [1], [0, 0, 1, 1], [], []>} : vector<2x32xf32>, vector<32x128xf32>, vector<2x128xf32> -> vector<2x128xf32>
    %764 = vector.broadcast %720 : vector<1x128xf32> to vector<2x128xf32>
    %765 = arith.addf %763, %764 : vector<2x128xf32>
    %cst_127 = arith.constant dense<0.000000e+00> : vector<2x128xf32>
    %766 = tpu.matmul %762, %719, %cst_127 {dimension_numbers = #tpu.dot_dimension_numbers<[1], [0], [0], [1], [0, 0, 1, 1], [], []>} : vector<2x32xf32>, vector<32x128xf32>, vector<2x128xf32> -> vector<2x128xf32>
    %767 = arith.addf %765, %766 : vector<2x128xf32>
    %768 = vector.extract_strided_slice %767 {offsets = [0, 0], sizes = [2, 96], strides = [1, 1]} : vector<2x128xf32> to vector<2x96xf32>
    %769 = arith.negf %768 : vector<2x96xf32>
    %770 = math.exp %769 : vector<2x96xf32>
    %cst_128 = arith.constant 1.000000e+00 : f32
    %771 = vector.broadcast %cst_128 : f32 to vector<2x96xf32>
    %772 = arith.addf %771, %770 : vector<2x96xf32>
    %773 = arith.divf %771, %772 : vector<2x96xf32>
    %774 = vector.extract_strided_slice %767 {offsets = [0, 96], sizes = [2, 32], strides = [1, 1]} : vector<2x128xf32> to vector<2x32xf32>
    %775 = math.tanh %774 : vector<2x32xf32>
    %776 = vector.extract_strided_slice %773 {offsets = [0, 32], sizes = [2, 32], strides = [1, 1]} : vector<2x96xf32> to vector<2x32xf32>
    %777 = arith.mulf %776, %759 : vector<2x32xf32>
    %778 = vector.extract_strided_slice %773 {offsets = [0, 0], sizes = [2, 32], strides = [1, 1]} : vector<2x96xf32> to vector<2x32xf32>
    %779 = arith.mulf %778, %775 : vector<2x32xf32>
    %780 = arith.addf %777, %779 : vector<2x32xf32>
    %781 = vector.extract_strided_slice %773 {offsets = [0, 64], sizes = [2, 32], strides = [1, 1]} : vector<2x96xf32> to vector<2x32xf32>
    %782 = math.tanh %780 : vector<2x32xf32>
    %783 = arith.mulf %781, %782 : vector<2x32xf32>
    %cst_129 = arith.constant dense<0.000000e+00> : vector<2x128xf32>
    %784 = tpu.matmul %633, %718, %cst_129 {dimension_numbers = #tpu.dot_dimension_numbers<[1], [0], [0], [1], [0, 0, 1, 1], [], []>} : vector<2x32xf32>, vector<32x128xf32>, vector<2x128xf32> -> vector<2x128xf32>
    %785 = vector.broadcast %720 : vector<1x128xf32> to vector<2x128xf32>
    %786 = arith.addf %784, %785 : vector<2x128xf32>
    %cst_130 = arith.constant dense<0.000000e+00> : vector<2x128xf32>
    %787 = tpu.matmul %783, %719, %cst_130 {dimension_numbers = #tpu.dot_dimension_numbers<[1], [0], [0], [1], [0, 0, 1, 1], [], []>} : vector<2x32xf32>, vector<32x128xf32>, vector<2x128xf32> -> vector<2x128xf32>
    %788 = arith.addf %786, %787 : vector<2x128xf32>
    %789 = vector.extract_strided_slice %788 {offsets = [0, 0], sizes = [2, 96], strides = [1, 1]} : vector<2x128xf32> to vector<2x96xf32>
    %790 = arith.negf %789 : vector<2x96xf32>
    %791 = math.exp %790 : vector<2x96xf32>
    %cst_131 = arith.constant 1.000000e+00 : f32
    %792 = vector.broadcast %cst_131 : f32 to vector<2x96xf32>
    %793 = arith.addf %792, %791 : vector<2x96xf32>
    %794 = arith.divf %792, %793 : vector<2x96xf32>
    %795 = vector.extract_strided_slice %788 {offsets = [0, 96], sizes = [2, 32], strides = [1, 1]} : vector<2x128xf32> to vector<2x32xf32>
    %796 = math.tanh %795 : vector<2x32xf32>
    %797 = vector.extract_strided_slice %794 {offsets = [0, 32], sizes = [2, 32], strides = [1, 1]} : vector<2x96xf32> to vector<2x32xf32>
    %798 = arith.mulf %797, %780 : vector<2x32xf32>
    %799 = vector.extract_strided_slice %794 {offsets = [0, 0], sizes = [2, 32], strides = [1, 1]} : vector<2x96xf32> to vector<2x32xf32>
    %800 = arith.mulf %799, %796 : vector<2x32xf32>
    %801 = arith.addf %798, %800 : vector<2x32xf32>
    %802 = vector.extract_strided_slice %794 {offsets = [0, 64], sizes = [2, 32], strides = [1, 1]} : vector<2x96xf32> to vector<2x32xf32>
    %803 = math.tanh %801 : vector<2x32xf32>
    %804 = arith.mulf %802, %803 : vector<2x32xf32>
    %cst_132 = arith.constant dense<0.000000e+00> : vector<2x128xf32>
    %805 = tpu.matmul %654, %718, %cst_132 {dimension_numbers = #tpu.dot_dimension_numbers<[1], [0], [0], [1], [0, 0, 1, 1], [], []>} : vector<2x32xf32>, vector<32x128xf32>, vector<2x128xf32> -> vector<2x128xf32>
    %806 = vector.broadcast %720 : vector<1x128xf32> to vector<2x128xf32>
    %807 = arith.addf %805, %806 : vector<2x128xf32>
    %cst_133 = arith.constant dense<0.000000e+00> : vector<2x128xf32>
    %808 = tpu.matmul %804, %719, %cst_133 {dimension_numbers = #tpu.dot_dimension_numbers<[1], [0], [0], [1], [0, 0, 1, 1], [], []>} : vector<2x32xf32>, vector<32x128xf32>, vector<2x128xf32> -> vector<2x128xf32>
    %809 = arith.addf %807, %808 : vector<2x128xf32>
    %810 = vector.extract_strided_slice %809 {offsets = [0, 0], sizes = [2, 96], strides = [1, 1]} : vector<2x128xf32> to vector<2x96xf32>
    %811 = arith.negf %810 : vector<2x96xf32>
    %812 = math.exp %811 : vector<2x96xf32>
    %cst_134 = arith.constant 1.000000e+00 : f32
    %813 = vector.broadcast %cst_134 : f32 to vector<2x96xf32>
    %814 = arith.addf %813, %812 : vector<2x96xf32>
    %815 = arith.divf %813, %814 : vector<2x96xf32>
    %816 = vector.extract_strided_slice %809 {offsets = [0, 96], sizes = [2, 32], strides = [1, 1]} : vector<2x128xf32> to vector<2x32xf32>
    %817 = math.tanh %816 : vector<2x32xf32>
    %818 = vector.extract_strided_slice %815 {offsets = [0, 32], sizes = [2, 32], strides = [1, 1]} : vector<2x96xf32> to vector<2x32xf32>
    %819 = arith.mulf %818, %801 : vector<2x32xf32>
    %820 = vector.extract_strided_slice %815 {offsets = [0, 0], sizes = [2, 32], strides = [1, 1]} : vector<2x96xf32> to vector<2x32xf32>
    %821 = arith.mulf %820, %817 : vector<2x32xf32>
    %822 = arith.addf %819, %821 : vector<2x32xf32>
    %823 = vector.extract_strided_slice %815 {offsets = [0, 64], sizes = [2, 32], strides = [1, 1]} : vector<2x96xf32> to vector<2x32xf32>
    %824 = math.tanh %822 : vector<2x32xf32>
    %825 = arith.mulf %823, %824 : vector<2x32xf32>
    %cst_135 = arith.constant dense<0.000000e+00> : vector<2x128xf32>
    %826 = tpu.matmul %675, %718, %cst_135 {dimension_numbers = #tpu.dot_dimension_numbers<[1], [0], [0], [1], [0, 0, 1, 1], [], []>} : vector<2x32xf32>, vector<32x128xf32>, vector<2x128xf32> -> vector<2x128xf32>
    %827 = vector.broadcast %720 : vector<1x128xf32> to vector<2x128xf32>
    %828 = arith.addf %826, %827 : vector<2x128xf32>
    %cst_136 = arith.constant dense<0.000000e+00> : vector<2x128xf32>
    %829 = tpu.matmul %825, %719, %cst_136 {dimension_numbers = #tpu.dot_dimension_numbers<[1], [0], [0], [1], [0, 0, 1, 1], [], []>} : vector<2x32xf32>, vector<32x128xf32>, vector<2x128xf32> -> vector<2x128xf32>
    %830 = arith.addf %828, %829 : vector<2x128xf32>
    %831 = vector.extract_strided_slice %830 {offsets = [0, 0], sizes = [2, 96], strides = [1, 1]} : vector<2x128xf32> to vector<2x96xf32>
    %832 = arith.negf %831 : vector<2x96xf32>
    %833 = math.exp %832 : vector<2x96xf32>
    %cst_137 = arith.constant 1.000000e+00 : f32
    %834 = vector.broadcast %cst_137 : f32 to vector<2x96xf32>
    %835 = arith.addf %834, %833 : vector<2x96xf32>
    %836 = arith.divf %834, %835 : vector<2x96xf32>
    %837 = vector.extract_strided_slice %830 {offsets = [0, 96], sizes = [2, 32], strides = [1, 1]} : vector<2x128xf32> to vector<2x32xf32>
    %838 = math.tanh %837 : vector<2x32xf32>
    %839 = vector.extract_strided_slice %836 {offsets = [0, 32], sizes = [2, 32], strides = [1, 1]} : vector<2x96xf32> to vector<2x32xf32>
    %840 = arith.mulf %839, %822 : vector<2x32xf32>
    %841 = vector.extract_strided_slice %836 {offsets = [0, 0], sizes = [2, 32], strides = [1, 1]} : vector<2x96xf32> to vector<2x32xf32>
    %842 = arith.mulf %841, %838 : vector<2x32xf32>
    %843 = arith.addf %840, %842 : vector<2x32xf32>
    %844 = vector.extract_strided_slice %836 {offsets = [0, 64], sizes = [2, 32], strides = [1, 1]} : vector<2x96xf32> to vector<2x32xf32>
    %845 = math.tanh %843 : vector<2x32xf32>
    %846 = arith.mulf %844, %845 : vector<2x32xf32>
    %cst_138 = arith.constant dense<0.000000e+00> : vector<2x128xf32>
    %847 = tpu.matmul %696, %718, %cst_138 {dimension_numbers = #tpu.dot_dimension_numbers<[1], [0], [0], [1], [0, 0, 1, 1], [], []>} : vector<2x32xf32>, vector<32x128xf32>, vector<2x128xf32> -> vector<2x128xf32>
    %848 = vector.broadcast %720 : vector<1x128xf32> to vector<2x128xf32>
    %849 = arith.addf %847, %848 : vector<2x128xf32>
    %cst_139 = arith.constant dense<0.000000e+00> : vector<2x128xf32>
    %850 = tpu.matmul %846, %719, %cst_139 {dimension_numbers = #tpu.dot_dimension_numbers<[1], [0], [0], [1], [0, 0, 1, 1], [], []>} : vector<2x32xf32>, vector<32x128xf32>, vector<2x128xf32> -> vector<2x128xf32>
    %851 = arith.addf %849, %850 : vector<2x128xf32>
    %852 = vector.extract_strided_slice %851 {offsets = [0, 0], sizes = [2, 96], strides = [1, 1]} : vector<2x128xf32> to vector<2x96xf32>
    %853 = arith.negf %852 : vector<2x96xf32>
    %854 = math.exp %853 : vector<2x96xf32>
    %cst_140 = arith.constant 1.000000e+00 : f32
    %855 = vector.broadcast %cst_140 : f32 to vector<2x96xf32>
    %856 = arith.addf %855, %854 : vector<2x96xf32>
    %857 = arith.divf %855, %856 : vector<2x96xf32>
    %858 = vector.extract_strided_slice %851 {offsets = [0, 96], sizes = [2, 32], strides = [1, 1]} : vector<2x128xf32> to vector<2x32xf32>
    %859 = math.tanh %858 : vector<2x32xf32>
    %860 = vector.extract_strided_slice %857 {offsets = [0, 32], sizes = [2, 32], strides = [1, 1]} : vector<2x96xf32> to vector<2x32xf32>
    %861 = arith.mulf %860, %843 : vector<2x32xf32>
    %862 = vector.extract_strided_slice %857 {offsets = [0, 0], sizes = [2, 32], strides = [1, 1]} : vector<2x96xf32> to vector<2x32xf32>
    %863 = arith.mulf %862, %859 : vector<2x32xf32>
    %864 = arith.addf %861, %863 : vector<2x32xf32>
    %865 = vector.extract_strided_slice %857 {offsets = [0, 64], sizes = [2, 32], strides = [1, 1]} : vector<2x96xf32> to vector<2x32xf32>
    %866 = math.tanh %864 : vector<2x32xf32>
    %867 = arith.mulf %865, %866 : vector<2x32xf32>
    %cst_141 = arith.constant dense<0.000000e+00> : vector<2x128xf32>
    %868 = tpu.matmul %717, %718, %cst_141 {dimension_numbers = #tpu.dot_dimension_numbers<[1], [0], [0], [1], [0, 0, 1, 1], [], []>} : vector<2x32xf32>, vector<32x128xf32>, vector<2x128xf32> -> vector<2x128xf32>
    %869 = vector.broadcast %720 : vector<1x128xf32> to vector<2x128xf32>
    %870 = arith.addf %868, %869 : vector<2x128xf32>
    %cst_142 = arith.constant dense<0.000000e+00> : vector<2x128xf32>
    %871 = tpu.matmul %867, %719, %cst_142 {dimension_numbers = #tpu.dot_dimension_numbers<[1], [0], [0], [1], [0, 0, 1, 1], [], []>} : vector<2x32xf32>, vector<32x128xf32>, vector<2x128xf32> -> vector<2x128xf32>
    %872 = arith.addf %870, %871 : vector<2x128xf32>
    %873 = vector.extract_strided_slice %872 {offsets = [0, 0], sizes = [2, 96], strides = [1, 1]} : vector<2x128xf32> to vector<2x96xf32>
    %874 = arith.negf %873 : vector<2x96xf32>
    %875 = math.exp %874 : vector<2x96xf32>
    %cst_143 = arith.constant 1.000000e+00 : f32
    %876 = vector.broadcast %cst_143 : f32 to vector<2x96xf32>
    %877 = arith.addf %876, %875 : vector<2x96xf32>
    %878 = arith.divf %876, %877 : vector<2x96xf32>
    %879 = vector.extract_strided_slice %872 {offsets = [0, 96], sizes = [2, 32], strides = [1, 1]} : vector<2x128xf32> to vector<2x32xf32>
    %880 = math.tanh %879 : vector<2x32xf32>
    %881 = vector.extract_strided_slice %878 {offsets = [0, 32], sizes = [2, 32], strides = [1, 1]} : vector<2x96xf32> to vector<2x32xf32>
    %882 = arith.mulf %881, %864 : vector<2x32xf32>
    %883 = vector.extract_strided_slice %878 {offsets = [0, 0], sizes = [2, 32], strides = [1, 1]} : vector<2x96xf32> to vector<2x32xf32>
    %884 = arith.mulf %883, %880 : vector<2x32xf32>
    %885 = arith.addf %882, %884 : vector<2x32xf32>
    %886 = vector.extract_strided_slice %878 {offsets = [0, 64], sizes = [2, 32], strides = [1, 1]} : vector<2x96xf32> to vector<2x32xf32>
    %887 = math.tanh %885 : vector<2x32xf32>
    %888 = arith.mulf %886, %887 : vector<2x32xf32>
    %c576 = arith.constant 576 : index
    %c0_144 = arith.constant 0 : index
    %889 = vector.load %arg1[%c576, %c0_144] : memref<792x128xf32, #tpu.memory_space<vmem>>, vector<32x128xf32>
    %c608 = arith.constant 608 : index
    %c0_145 = arith.constant 0 : index
    %890 = vector.load %arg1[%c608, %c0_145] : memref<792x128xf32, #tpu.memory_space<vmem>>, vector<32x128xf32>
    %c640 = arith.constant 640 : index
    %c0_146 = arith.constant 0 : index
    %891 = vector.load %arg1[%c640, %c0_146] : memref<792x128xf32, #tpu.memory_space<vmem>>, vector<1x128xf32>
    %cst_147 = arith.constant dense<0.000000e+00> : vector<2x128xf32>
    %892 = tpu.matmul %741, %889, %cst_147 {dimension_numbers = #tpu.dot_dimension_numbers<[1], [0], [0], [1], [0, 0, 1, 1], [], []>} : vector<2x32xf32>, vector<32x128xf32>, vector<2x128xf32> -> vector<2x128xf32>
    %893 = vector.broadcast %891 : vector<1x128xf32> to vector<2x128xf32>
    %894 = arith.addf %892, %893 : vector<2x128xf32>
    %cst_148 = arith.constant dense<0.000000e+00> : vector<2x128xf32>
    %895 = tpu.matmul %717, %890, %cst_148 {dimension_numbers = #tpu.dot_dimension_numbers<[1], [0], [0], [1], [0, 0, 1, 1], [], []>} : vector<2x32xf32>, vector<32x128xf32>, vector<2x128xf32> -> vector<2x128xf32>
    %896 = arith.addf %894, %895 : vector<2x128xf32>
    %897 = vector.extract_strided_slice %896 {offsets = [0, 0], sizes = [2, 96], strides = [1, 1]} : vector<2x128xf32> to vector<2x96xf32>
    %898 = arith.negf %897 : vector<2x96xf32>
    %899 = math.exp %898 : vector<2x96xf32>
    %cst_149 = arith.constant 1.000000e+00 : f32
    %900 = vector.broadcast %cst_149 : f32 to vector<2x96xf32>
    %901 = arith.addf %900, %899 : vector<2x96xf32>
    %902 = arith.divf %900, %901 : vector<2x96xf32>
    %903 = vector.extract_strided_slice %896 {offsets = [0, 96], sizes = [2, 32], strides = [1, 1]} : vector<2x128xf32> to vector<2x32xf32>
    %904 = math.tanh %903 : vector<2x32xf32>
    %905 = vector.extract_strided_slice %902 {offsets = [0, 32], sizes = [2, 32], strides = [1, 1]} : vector<2x96xf32> to vector<2x32xf32>
    %906 = arith.mulf %905, %714 : vector<2x32xf32>
    %907 = vector.extract_strided_slice %902 {offsets = [0, 0], sizes = [2, 32], strides = [1, 1]} : vector<2x96xf32> to vector<2x32xf32>
    %908 = arith.mulf %907, %904 : vector<2x32xf32>
    %909 = arith.addf %906, %908 : vector<2x32xf32>
    %910 = vector.extract_strided_slice %902 {offsets = [0, 64], sizes = [2, 32], strides = [1, 1]} : vector<2x96xf32> to vector<2x32xf32>
    %911 = math.tanh %909 : vector<2x32xf32>
    %912 = arith.mulf %910, %911 : vector<2x32xf32>
    %cst_150 = arith.constant dense<0.000000e+00> : vector<2x128xf32>
    %913 = tpu.matmul %762, %889, %cst_150 {dimension_numbers = #tpu.dot_dimension_numbers<[1], [0], [0], [1], [0, 0, 1, 1], [], []>} : vector<2x32xf32>, vector<32x128xf32>, vector<2x128xf32> -> vector<2x128xf32>
    %914 = vector.broadcast %891 : vector<1x128xf32> to vector<2x128xf32>
    %915 = arith.addf %913, %914 : vector<2x128xf32>
    %cst_151 = arith.constant dense<0.000000e+00> : vector<2x128xf32>
    %916 = tpu.matmul %912, %890, %cst_151 {dimension_numbers = #tpu.dot_dimension_numbers<[1], [0], [0], [1], [0, 0, 1, 1], [], []>} : vector<2x32xf32>, vector<32x128xf32>, vector<2x128xf32> -> vector<2x128xf32>
    %917 = arith.addf %915, %916 : vector<2x128xf32>
    %918 = vector.extract_strided_slice %917 {offsets = [0, 0], sizes = [2, 96], strides = [1, 1]} : vector<2x128xf32> to vector<2x96xf32>
    %919 = arith.negf %918 : vector<2x96xf32>
    %920 = math.exp %919 : vector<2x96xf32>
    %cst_152 = arith.constant 1.000000e+00 : f32
    %921 = vector.broadcast %cst_152 : f32 to vector<2x96xf32>
    %922 = arith.addf %921, %920 : vector<2x96xf32>
    %923 = arith.divf %921, %922 : vector<2x96xf32>
    %924 = vector.extract_strided_slice %917 {offsets = [0, 96], sizes = [2, 32], strides = [1, 1]} : vector<2x128xf32> to vector<2x32xf32>
    %925 = math.tanh %924 : vector<2x32xf32>
    %926 = vector.extract_strided_slice %923 {offsets = [0, 32], sizes = [2, 32], strides = [1, 1]} : vector<2x96xf32> to vector<2x32xf32>
    %927 = arith.mulf %926, %909 : vector<2x32xf32>
    %928 = vector.extract_strided_slice %923 {offsets = [0, 0], sizes = [2, 32], strides = [1, 1]} : vector<2x96xf32> to vector<2x32xf32>
    %929 = arith.mulf %928, %925 : vector<2x32xf32>
    %930 = arith.addf %927, %929 : vector<2x32xf32>
    %931 = vector.extract_strided_slice %923 {offsets = [0, 64], sizes = [2, 32], strides = [1, 1]} : vector<2x96xf32> to vector<2x32xf32>
    %932 = math.tanh %930 : vector<2x32xf32>
    %933 = arith.mulf %931, %932 : vector<2x32xf32>
    %cst_153 = arith.constant dense<0.000000e+00> : vector<2x128xf32>
    %934 = tpu.matmul %783, %889, %cst_153 {dimension_numbers = #tpu.dot_dimension_numbers<[1], [0], [0], [1], [0, 0, 1, 1], [], []>} : vector<2x32xf32>, vector<32x128xf32>, vector<2x128xf32> -> vector<2x128xf32>
    %935 = vector.broadcast %891 : vector<1x128xf32> to vector<2x128xf32>
    %936 = arith.addf %934, %935 : vector<2x128xf32>
    %cst_154 = arith.constant dense<0.000000e+00> : vector<2x128xf32>
    %937 = tpu.matmul %933, %890, %cst_154 {dimension_numbers = #tpu.dot_dimension_numbers<[1], [0], [0], [1], [0, 0, 1, 1], [], []>} : vector<2x32xf32>, vector<32x128xf32>, vector<2x128xf32> -> vector<2x128xf32>
    %938 = arith.addf %936, %937 : vector<2x128xf32>
    %939 = vector.extract_strided_slice %938 {offsets = [0, 0], sizes = [2, 96], strides = [1, 1]} : vector<2x128xf32> to vector<2x96xf32>
    %940 = arith.negf %939 : vector<2x96xf32>
    %941 = math.exp %940 : vector<2x96xf32>
    %cst_155 = arith.constant 1.000000e+00 : f32
    %942 = vector.broadcast %cst_155 : f32 to vector<2x96xf32>
    %943 = arith.addf %942, %941 : vector<2x96xf32>
    %944 = arith.divf %942, %943 : vector<2x96xf32>
    %945 = vector.extract_strided_slice %938 {offsets = [0, 96], sizes = [2, 32], strides = [1, 1]} : vector<2x128xf32> to vector<2x32xf32>
    %946 = math.tanh %945 : vector<2x32xf32>
    %947 = vector.extract_strided_slice %944 {offsets = [0, 32], sizes = [2, 32], strides = [1, 1]} : vector<2x96xf32> to vector<2x32xf32>
    %948 = arith.mulf %947, %930 : vector<2x32xf32>
    %949 = vector.extract_strided_slice %944 {offsets = [0, 0], sizes = [2, 32], strides = [1, 1]} : vector<2x96xf32> to vector<2x32xf32>
    %950 = arith.mulf %949, %946 : vector<2x32xf32>
    %951 = arith.addf %948, %950 : vector<2x32xf32>
    %952 = vector.extract_strided_slice %944 {offsets = [0, 64], sizes = [2, 32], strides = [1, 1]} : vector<2x96xf32> to vector<2x32xf32>
    %953 = math.tanh %951 : vector<2x32xf32>
    %954 = arith.mulf %952, %953 : vector<2x32xf32>
    %cst_156 = arith.constant dense<0.000000e+00> : vector<2x128xf32>
    %955 = tpu.matmul %804, %889, %cst_156 {dimension_numbers = #tpu.dot_dimension_numbers<[1], [0], [0], [1], [0, 0, 1, 1], [], []>} : vector<2x32xf32>, vector<32x128xf32>, vector<2x128xf32> -> vector<2x128xf32>
    %956 = vector.broadcast %891 : vector<1x128xf32> to vector<2x128xf32>
    %957 = arith.addf %955, %956 : vector<2x128xf32>
    %cst_157 = arith.constant dense<0.000000e+00> : vector<2x128xf32>
    %958 = tpu.matmul %954, %890, %cst_157 {dimension_numbers = #tpu.dot_dimension_numbers<[1], [0], [0], [1], [0, 0, 1, 1], [], []>} : vector<2x32xf32>, vector<32x128xf32>, vector<2x128xf32> -> vector<2x128xf32>
    %959 = arith.addf %957, %958 : vector<2x128xf32>
    %960 = vector.extract_strided_slice %959 {offsets = [0, 0], sizes = [2, 96], strides = [1, 1]} : vector<2x128xf32> to vector<2x96xf32>
    %961 = arith.negf %960 : vector<2x96xf32>
    %962 = math.exp %961 : vector<2x96xf32>
    %cst_158 = arith.constant 1.000000e+00 : f32
    %963 = vector.broadcast %cst_158 : f32 to vector<2x96xf32>
    %964 = arith.addf %963, %962 : vector<2x96xf32>
    %965 = arith.divf %963, %964 : vector<2x96xf32>
    %966 = vector.extract_strided_slice %959 {offsets = [0, 96], sizes = [2, 32], strides = [1, 1]} : vector<2x128xf32> to vector<2x32xf32>
    %967 = math.tanh %966 : vector<2x32xf32>
    %968 = vector.extract_strided_slice %965 {offsets = [0, 32], sizes = [2, 32], strides = [1, 1]} : vector<2x96xf32> to vector<2x32xf32>
    %969 = arith.mulf %968, %951 : vector<2x32xf32>
    %970 = vector.extract_strided_slice %965 {offsets = [0, 0], sizes = [2, 32], strides = [1, 1]} : vector<2x96xf32> to vector<2x32xf32>
    %971 = arith.mulf %970, %967 : vector<2x32xf32>
    %972 = arith.addf %969, %971 : vector<2x32xf32>
    %973 = vector.extract_strided_slice %965 {offsets = [0, 64], sizes = [2, 32], strides = [1, 1]} : vector<2x96xf32> to vector<2x32xf32>
    %974 = math.tanh %972 : vector<2x32xf32>
    %975 = arith.mulf %973, %974 : vector<2x32xf32>
    %cst_159 = arith.constant dense<0.000000e+00> : vector<2x128xf32>
    %976 = tpu.matmul %825, %889, %cst_159 {dimension_numbers = #tpu.dot_dimension_numbers<[1], [0], [0], [1], [0, 0, 1, 1], [], []>} : vector<2x32xf32>, vector<32x128xf32>, vector<2x128xf32> -> vector<2x128xf32>
    %977 = vector.broadcast %891 : vector<1x128xf32> to vector<2x128xf32>
    %978 = arith.addf %976, %977 : vector<2x128xf32>
    %cst_160 = arith.constant dense<0.000000e+00> : vector<2x128xf32>
    %979 = tpu.matmul %975, %890, %cst_160 {dimension_numbers = #tpu.dot_dimension_numbers<[1], [0], [0], [1], [0, 0, 1, 1], [], []>} : vector<2x32xf32>, vector<32x128xf32>, vector<2x128xf32> -> vector<2x128xf32>
    %980 = arith.addf %978, %979 : vector<2x128xf32>
    %981 = vector.extract_strided_slice %980 {offsets = [0, 0], sizes = [2, 96], strides = [1, 1]} : vector<2x128xf32> to vector<2x96xf32>
    %982 = arith.negf %981 : vector<2x96xf32>
    %983 = math.exp %982 : vector<2x96xf32>
    %cst_161 = arith.constant 1.000000e+00 : f32
    %984 = vector.broadcast %cst_161 : f32 to vector<2x96xf32>
    %985 = arith.addf %984, %983 : vector<2x96xf32>
    %986 = arith.divf %984, %985 : vector<2x96xf32>
    %987 = vector.extract_strided_slice %980 {offsets = [0, 96], sizes = [2, 32], strides = [1, 1]} : vector<2x128xf32> to vector<2x32xf32>
    %988 = math.tanh %987 : vector<2x32xf32>
    %989 = vector.extract_strided_slice %986 {offsets = [0, 32], sizes = [2, 32], strides = [1, 1]} : vector<2x96xf32> to vector<2x32xf32>
    %990 = arith.mulf %989, %972 : vector<2x32xf32>
    %991 = vector.extract_strided_slice %986 {offsets = [0, 0], sizes = [2, 32], strides = [1, 1]} : vector<2x96xf32> to vector<2x32xf32>
    %992 = arith.mulf %991, %988 : vector<2x32xf32>
    %993 = arith.addf %990, %992 : vector<2x32xf32>
    %994 = vector.extract_strided_slice %986 {offsets = [0, 64], sizes = [2, 32], strides = [1, 1]} : vector<2x96xf32> to vector<2x32xf32>
    %995 = math.tanh %993 : vector<2x32xf32>
    %996 = arith.mulf %994, %995 : vector<2x32xf32>
    %cst_162 = arith.constant dense<0.000000e+00> : vector<2x128xf32>
    %997 = tpu.matmul %846, %889, %cst_162 {dimension_numbers = #tpu.dot_dimension_numbers<[1], [0], [0], [1], [0, 0, 1, 1], [], []>} : vector<2x32xf32>, vector<32x128xf32>, vector<2x128xf32> -> vector<2x128xf32>
    %998 = vector.broadcast %891 : vector<1x128xf32> to vector<2x128xf32>
    %999 = arith.addf %997, %998 : vector<2x128xf32>
    %cst_163 = arith.constant dense<0.000000e+00> : vector<2x128xf32>
    %1000 = tpu.matmul %996, %890, %cst_163 {dimension_numbers = #tpu.dot_dimension_numbers<[1], [0], [0], [1], [0, 0, 1, 1], [], []>} : vector<2x32xf32>, vector<32x128xf32>, vector<2x128xf32> -> vector<2x128xf32>
    %1001 = arith.addf %999, %1000 : vector<2x128xf32>
    %1002 = vector.extract_strided_slice %1001 {offsets = [0, 0], sizes = [2, 96], strides = [1, 1]} : vector<2x128xf32> to vector<2x96xf32>
    %1003 = arith.negf %1002 : vector<2x96xf32>
    %1004 = math.exp %1003 : vector<2x96xf32>
    %cst_164 = arith.constant 1.000000e+00 : f32
    %1005 = vector.broadcast %cst_164 : f32 to vector<2x96xf32>
    %1006 = arith.addf %1005, %1004 : vector<2x96xf32>
    %1007 = arith.divf %1005, %1006 : vector<2x96xf32>
    %1008 = vector.extract_strided_slice %1001 {offsets = [0, 96], sizes = [2, 32], strides = [1, 1]} : vector<2x128xf32> to vector<2x32xf32>
    %1009 = math.tanh %1008 : vector<2x32xf32>
    %1010 = vector.extract_strided_slice %1007 {offsets = [0, 32], sizes = [2, 32], strides = [1, 1]} : vector<2x96xf32> to vector<2x32xf32>
    %1011 = arith.mulf %1010, %993 : vector<2x32xf32>
    %1012 = vector.extract_strided_slice %1007 {offsets = [0, 0], sizes = [2, 32], strides = [1, 1]} : vector<2x96xf32> to vector<2x32xf32>
    %1013 = arith.mulf %1012, %1009 : vector<2x32xf32>
    %1014 = arith.addf %1011, %1013 : vector<2x32xf32>
    %1015 = vector.extract_strided_slice %1007 {offsets = [0, 64], sizes = [2, 32], strides = [1, 1]} : vector<2x96xf32> to vector<2x32xf32>
    %1016 = math.tanh %1014 : vector<2x32xf32>
    %1017 = arith.mulf %1015, %1016 : vector<2x32xf32>
    %cst_165 = arith.constant dense<0.000000e+00> : vector<2x128xf32>
    %1018 = tpu.matmul %867, %889, %cst_165 {dimension_numbers = #tpu.dot_dimension_numbers<[1], [0], [0], [1], [0, 0, 1, 1], [], []>} : vector<2x32xf32>, vector<32x128xf32>, vector<2x128xf32> -> vector<2x128xf32>
    %1019 = vector.broadcast %891 : vector<1x128xf32> to vector<2x128xf32>
    %1020 = arith.addf %1018, %1019 : vector<2x128xf32>
    %cst_166 = arith.constant dense<0.000000e+00> : vector<2x128xf32>
    %1021 = tpu.matmul %1017, %890, %cst_166 {dimension_numbers = #tpu.dot_dimension_numbers<[1], [0], [0], [1], [0, 0, 1, 1], [], []>} : vector<2x32xf32>, vector<32x128xf32>, vector<2x128xf32> -> vector<2x128xf32>
    %1022 = arith.addf %1020, %1021 : vector<2x128xf32>
    %1023 = vector.extract_strided_slice %1022 {offsets = [0, 0], sizes = [2, 96], strides = [1, 1]} : vector<2x128xf32> to vector<2x96xf32>
    %1024 = arith.negf %1023 : vector<2x96xf32>
    %1025 = math.exp %1024 : vector<2x96xf32>
    %cst_167 = arith.constant 1.000000e+00 : f32
    %1026 = vector.broadcast %cst_167 : f32 to vector<2x96xf32>
    %1027 = arith.addf %1026, %1025 : vector<2x96xf32>
    %1028 = arith.divf %1026, %1027 : vector<2x96xf32>
    %1029 = vector.extract_strided_slice %1022 {offsets = [0, 96], sizes = [2, 32], strides = [1, 1]} : vector<2x128xf32> to vector<2x32xf32>
    %1030 = math.tanh %1029 : vector<2x32xf32>
    %1031 = vector.extract_strided_slice %1028 {offsets = [0, 32], sizes = [2, 32], strides = [1, 1]} : vector<2x96xf32> to vector<2x32xf32>
    %1032 = arith.mulf %1031, %1014 : vector<2x32xf32>
    %1033 = vector.extract_strided_slice %1028 {offsets = [0, 0], sizes = [2, 32], strides = [1, 1]} : vector<2x96xf32> to vector<2x32xf32>
    %1034 = arith.mulf %1033, %1030 : vector<2x32xf32>
    %1035 = arith.addf %1032, %1034 : vector<2x32xf32>
    %1036 = vector.extract_strided_slice %1028 {offsets = [0, 64], sizes = [2, 32], strides = [1, 1]} : vector<2x96xf32> to vector<2x32xf32>
    %1037 = math.tanh %1035 : vector<2x32xf32>
    %1038 = arith.mulf %1036, %1037 : vector<2x32xf32>
    %cst_168 = arith.constant dense<0.000000e+00> : vector<2x128xf32>
    %1039 = tpu.matmul %888, %889, %cst_168 {dimension_numbers = #tpu.dot_dimension_numbers<[1], [0], [0], [1], [0, 0, 1, 1], [], []>} : vector<2x32xf32>, vector<32x128xf32>, vector<2x128xf32> -> vector<2x128xf32>
    %1040 = vector.broadcast %891 : vector<1x128xf32> to vector<2x128xf32>
    %1041 = arith.addf %1039, %1040 : vector<2x128xf32>
    %cst_169 = arith.constant dense<0.000000e+00> : vector<2x128xf32>
    %1042 = tpu.matmul %1038, %890, %cst_169 {dimension_numbers = #tpu.dot_dimension_numbers<[1], [0], [0], [1], [0, 0, 1, 1], [], []>} : vector<2x32xf32>, vector<32x128xf32>, vector<2x128xf32> -> vector<2x128xf32>
    %1043 = arith.addf %1041, %1042 : vector<2x128xf32>
    %1044 = vector.extract_strided_slice %1043 {offsets = [0, 0], sizes = [2, 96], strides = [1, 1]} : vector<2x128xf32> to vector<2x96xf32>
    %1045 = arith.negf %1044 : vector<2x96xf32>
    %1046 = math.exp %1045 : vector<2x96xf32>
    %cst_170 = arith.constant 1.000000e+00 : f32
    %1047 = vector.broadcast %cst_170 : f32 to vector<2x96xf32>
    %1048 = arith.addf %1047, %1046 : vector<2x96xf32>
    %1049 = arith.divf %1047, %1048 : vector<2x96xf32>
    %1050 = vector.extract_strided_slice %1043 {offsets = [0, 96], sizes = [2, 32], strides = [1, 1]} : vector<2x128xf32> to vector<2x32xf32>
    %1051 = math.tanh %1050 : vector<2x32xf32>
    %1052 = vector.extract_strided_slice %1049 {offsets = [0, 32], sizes = [2, 32], strides = [1, 1]} : vector<2x96xf32> to vector<2x32xf32>
    %1053 = arith.mulf %1052, %1035 : vector<2x32xf32>
    %1054 = vector.extract_strided_slice %1049 {offsets = [0, 0], sizes = [2, 32], strides = [1, 1]} : vector<2x96xf32> to vector<2x32xf32>
    %1055 = arith.mulf %1054, %1051 : vector<2x32xf32>
    %1056 = arith.addf %1053, %1055 : vector<2x32xf32>
    %1057 = vector.extract_strided_slice %1049 {offsets = [0, 64], sizes = [2, 32], strides = [1, 1]} : vector<2x96xf32> to vector<2x32xf32>
    %1058 = math.tanh %1056 : vector<2x32xf32>
    %1059 = arith.mulf %1057, %1058 : vector<2x32xf32>
    %c648 = arith.constant 648 : index
    %c0_171 = arith.constant 0 : index
    %1060 = vector.load %arg1[%c648, %c0_171] : memref<792x128xf32, #tpu.memory_space<vmem>>, vector<32x128xf32>
    %c680 = arith.constant 680 : index
    %c0_172 = arith.constant 0 : index
    %1061 = vector.load %arg1[%c680, %c0_172] : memref<792x128xf32, #tpu.memory_space<vmem>>, vector<32x128xf32>
    %c712 = arith.constant 712 : index
    %c0_173 = arith.constant 0 : index
    %1062 = vector.load %arg1[%c712, %c0_173] : memref<792x128xf32, #tpu.memory_space<vmem>>, vector<1x128xf32>
    %cst_174 = arith.constant dense<0.000000e+00> : vector<2x128xf32>
    %1063 = tpu.matmul %912, %1060, %cst_174 {dimension_numbers = #tpu.dot_dimension_numbers<[1], [0], [0], [1], [0, 0, 1, 1], [], []>} : vector<2x32xf32>, vector<32x128xf32>, vector<2x128xf32> -> vector<2x128xf32>
    %1064 = vector.broadcast %1062 : vector<1x128xf32> to vector<2x128xf32>
    %1065 = arith.addf %1063, %1064 : vector<2x128xf32>
    %cst_175 = arith.constant dense<0.000000e+00> : vector<2x128xf32>
    %1066 = tpu.matmul %888, %1061, %cst_175 {dimension_numbers = #tpu.dot_dimension_numbers<[1], [0], [0], [1], [0, 0, 1, 1], [], []>} : vector<2x32xf32>, vector<32x128xf32>, vector<2x128xf32> -> vector<2x128xf32>
    %1067 = arith.addf %1065, %1066 : vector<2x128xf32>
    %1068 = vector.extract_strided_slice %1067 {offsets = [0, 0], sizes = [2, 96], strides = [1, 1]} : vector<2x128xf32> to vector<2x96xf32>
    %1069 = arith.negf %1068 : vector<2x96xf32>
    %1070 = math.exp %1069 : vector<2x96xf32>
    %cst_176 = arith.constant 1.000000e+00 : f32
    %1071 = vector.broadcast %cst_176 : f32 to vector<2x96xf32>
    %1072 = arith.addf %1071, %1070 : vector<2x96xf32>
    %1073 = arith.divf %1071, %1072 : vector<2x96xf32>
    %1074 = vector.extract_strided_slice %1067 {offsets = [0, 96], sizes = [2, 32], strides = [1, 1]} : vector<2x128xf32> to vector<2x32xf32>
    %1075 = math.tanh %1074 : vector<2x32xf32>
    %1076 = vector.extract_strided_slice %1073 {offsets = [0, 32], sizes = [2, 32], strides = [1, 1]} : vector<2x96xf32> to vector<2x32xf32>
    %1077 = arith.mulf %1076, %885 : vector<2x32xf32>
    %1078 = vector.extract_strided_slice %1073 {offsets = [0, 0], sizes = [2, 32], strides = [1, 1]} : vector<2x96xf32> to vector<2x32xf32>
    %1079 = arith.mulf %1078, %1075 : vector<2x32xf32>
    %1080 = arith.addf %1077, %1079 : vector<2x32xf32>
    %1081 = vector.extract_strided_slice %1073 {offsets = [0, 64], sizes = [2, 32], strides = [1, 1]} : vector<2x96xf32> to vector<2x32xf32>
    %1082 = math.tanh %1080 : vector<2x32xf32>
    %1083 = arith.mulf %1081, %1082 : vector<2x32xf32>
    %cst_177 = arith.constant dense<0.000000e+00> : vector<2x128xf32>
    %1084 = tpu.matmul %933, %1060, %cst_177 {dimension_numbers = #tpu.dot_dimension_numbers<[1], [0], [0], [1], [0, 0, 1, 1], [], []>} : vector<2x32xf32>, vector<32x128xf32>, vector<2x128xf32> -> vector<2x128xf32>
    %1085 = vector.broadcast %1062 : vector<1x128xf32> to vector<2x128xf32>
    %1086 = arith.addf %1084, %1085 : vector<2x128xf32>
    %cst_178 = arith.constant dense<0.000000e+00> : vector<2x128xf32>
    %1087 = tpu.matmul %1083, %1061, %cst_178 {dimension_numbers = #tpu.dot_dimension_numbers<[1], [0], [0], [1], [0, 0, 1, 1], [], []>} : vector<2x32xf32>, vector<32x128xf32>, vector<2x128xf32> -> vector<2x128xf32>
    %1088 = arith.addf %1086, %1087 : vector<2x128xf32>
    %1089 = vector.extract_strided_slice %1088 {offsets = [0, 0], sizes = [2, 96], strides = [1, 1]} : vector<2x128xf32> to vector<2x96xf32>
    %1090 = arith.negf %1089 : vector<2x96xf32>
    %1091 = math.exp %1090 : vector<2x96xf32>
    %cst_179 = arith.constant 1.000000e+00 : f32
    %1092 = vector.broadcast %cst_179 : f32 to vector<2x96xf32>
    %1093 = arith.addf %1092, %1091 : vector<2x96xf32>
    %1094 = arith.divf %1092, %1093 : vector<2x96xf32>
    %1095 = vector.extract_strided_slice %1088 {offsets = [0, 96], sizes = [2, 32], strides = [1, 1]} : vector<2x128xf32> to vector<2x32xf32>
    %1096 = math.tanh %1095 : vector<2x32xf32>
    %1097 = vector.extract_strided_slice %1094 {offsets = [0, 32], sizes = [2, 32], strides = [1, 1]} : vector<2x96xf32> to vector<2x32xf32>
    %1098 = arith.mulf %1097, %1080 : vector<2x32xf32>
    %1099 = vector.extract_strided_slice %1094 {offsets = [0, 0], sizes = [2, 32], strides = [1, 1]} : vector<2x96xf32> to vector<2x32xf32>
    %1100 = arith.mulf %1099, %1096 : vector<2x32xf32>
    %1101 = arith.addf %1098, %1100 : vector<2x32xf32>
    %1102 = vector.extract_strided_slice %1094 {offsets = [0, 64], sizes = [2, 32], strides = [1, 1]} : vector<2x96xf32> to vector<2x32xf32>
    %1103 = math.tanh %1101 : vector<2x32xf32>
    %1104 = arith.mulf %1102, %1103 : vector<2x32xf32>
    %cst_180 = arith.constant dense<0.000000e+00> : vector<2x128xf32>
    %1105 = tpu.matmul %954, %1060, %cst_180 {dimension_numbers = #tpu.dot_dimension_numbers<[1], [0], [0], [1], [0, 0, 1, 1], [], []>} : vector<2x32xf32>, vector<32x128xf32>, vector<2x128xf32> -> vector<2x128xf32>
    %1106 = vector.broadcast %1062 : vector<1x128xf32> to vector<2x128xf32>
    %1107 = arith.addf %1105, %1106 : vector<2x128xf32>
    %cst_181 = arith.constant dense<0.000000e+00> : vector<2x128xf32>
    %1108 = tpu.matmul %1104, %1061, %cst_181 {dimension_numbers = #tpu.dot_dimension_numbers<[1], [0], [0], [1], [0, 0, 1, 1], [], []>} : vector<2x32xf32>, vector<32x128xf32>, vector<2x128xf32> -> vector<2x128xf32>
    %1109 = arith.addf %1107, %1108 : vector<2x128xf32>
    %1110 = vector.extract_strided_slice %1109 {offsets = [0, 0], sizes = [2, 96], strides = [1, 1]} : vector<2x128xf32> to vector<2x96xf32>
    %1111 = arith.negf %1110 : vector<2x96xf32>
    %1112 = math.exp %1111 : vector<2x96xf32>
    %cst_182 = arith.constant 1.000000e+00 : f32
    %1113 = vector.broadcast %cst_182 : f32 to vector<2x96xf32>
    %1114 = arith.addf %1113, %1112 : vector<2x96xf32>
    %1115 = arith.divf %1113, %1114 : vector<2x96xf32>
    %1116 = vector.extract_strided_slice %1109 {offsets = [0, 96], sizes = [2, 32], strides = [1, 1]} : vector<2x128xf32> to vector<2x32xf32>
    %1117 = math.tanh %1116 : vector<2x32xf32>
    %1118 = vector.extract_strided_slice %1115 {offsets = [0, 32], sizes = [2, 32], strides = [1, 1]} : vector<2x96xf32> to vector<2x32xf32>
    %1119 = arith.mulf %1118, %1101 : vector<2x32xf32>
    %1120 = vector.extract_strided_slice %1115 {offsets = [0, 0], sizes = [2, 32], strides = [1, 1]} : vector<2x96xf32> to vector<2x32xf32>
    %1121 = arith.mulf %1120, %1117 : vector<2x32xf32>
    %1122 = arith.addf %1119, %1121 : vector<2x32xf32>
    %1123 = vector.extract_strided_slice %1115 {offsets = [0, 64], sizes = [2, 32], strides = [1, 1]} : vector<2x96xf32> to vector<2x32xf32>
    %1124 = math.tanh %1122 : vector<2x32xf32>
    %1125 = arith.mulf %1123, %1124 : vector<2x32xf32>
    %cst_183 = arith.constant dense<0.000000e+00> : vector<2x128xf32>
    %1126 = tpu.matmul %975, %1060, %cst_183 {dimension_numbers = #tpu.dot_dimension_numbers<[1], [0], [0], [1], [0, 0, 1, 1], [], []>} : vector<2x32xf32>, vector<32x128xf32>, vector<2x128xf32> -> vector<2x128xf32>
    %1127 = vector.broadcast %1062 : vector<1x128xf32> to vector<2x128xf32>
    %1128 = arith.addf %1126, %1127 : vector<2x128xf32>
    %cst_184 = arith.constant dense<0.000000e+00> : vector<2x128xf32>
    %1129 = tpu.matmul %1125, %1061, %cst_184 {dimension_numbers = #tpu.dot_dimension_numbers<[1], [0], [0], [1], [0, 0, 1, 1], [], []>} : vector<2x32xf32>, vector<32x128xf32>, vector<2x128xf32> -> vector<2x128xf32>
    %1130 = arith.addf %1128, %1129 : vector<2x128xf32>
    %1131 = vector.extract_strided_slice %1130 {offsets = [0, 0], sizes = [2, 96], strides = [1, 1]} : vector<2x128xf32> to vector<2x96xf32>
    %1132 = arith.negf %1131 : vector<2x96xf32>
    %1133 = math.exp %1132 : vector<2x96xf32>
    %cst_185 = arith.constant 1.000000e+00 : f32
    %1134 = vector.broadcast %cst_185 : f32 to vector<2x96xf32>
    %1135 = arith.addf %1134, %1133 : vector<2x96xf32>
    %1136 = arith.divf %1134, %1135 : vector<2x96xf32>
    %1137 = vector.extract_strided_slice %1130 {offsets = [0, 96], sizes = [2, 32], strides = [1, 1]} : vector<2x128xf32> to vector<2x32xf32>
    %1138 = math.tanh %1137 : vector<2x32xf32>
    %1139 = vector.extract_strided_slice %1136 {offsets = [0, 32], sizes = [2, 32], strides = [1, 1]} : vector<2x96xf32> to vector<2x32xf32>
    %1140 = arith.mulf %1139, %1122 : vector<2x32xf32>
    %1141 = vector.extract_strided_slice %1136 {offsets = [0, 0], sizes = [2, 32], strides = [1, 1]} : vector<2x96xf32> to vector<2x32xf32>
    %1142 = arith.mulf %1141, %1138 : vector<2x32xf32>
    %1143 = arith.addf %1140, %1142 : vector<2x32xf32>
    %1144 = vector.extract_strided_slice %1136 {offsets = [0, 64], sizes = [2, 32], strides = [1, 1]} : vector<2x96xf32> to vector<2x32xf32>
    %1145 = math.tanh %1143 : vector<2x32xf32>
    %1146 = arith.mulf %1144, %1145 : vector<2x32xf32>
    %cst_186 = arith.constant dense<0.000000e+00> : vector<2x128xf32>
    %1147 = tpu.matmul %996, %1060, %cst_186 {dimension_numbers = #tpu.dot_dimension_numbers<[1], [0], [0], [1], [0, 0, 1, 1], [], []>} : vector<2x32xf32>, vector<32x128xf32>, vector<2x128xf32> -> vector<2x128xf32>
    %1148 = vector.broadcast %1062 : vector<1x128xf32> to vector<2x128xf32>
    %1149 = arith.addf %1147, %1148 : vector<2x128xf32>
    %cst_187 = arith.constant dense<0.000000e+00> : vector<2x128xf32>
    %1150 = tpu.matmul %1146, %1061, %cst_187 {dimension_numbers = #tpu.dot_dimension_numbers<[1], [0], [0], [1], [0, 0, 1, 1], [], []>} : vector<2x32xf32>, vector<32x128xf32>, vector<2x128xf32> -> vector<2x128xf32>
    %1151 = arith.addf %1149, %1150 : vector<2x128xf32>
    %1152 = vector.extract_strided_slice %1151 {offsets = [0, 0], sizes = [2, 96], strides = [1, 1]} : vector<2x128xf32> to vector<2x96xf32>
    %1153 = arith.negf %1152 : vector<2x96xf32>
    %1154 = math.exp %1153 : vector<2x96xf32>
    %cst_188 = arith.constant 1.000000e+00 : f32
    %1155 = vector.broadcast %cst_188 : f32 to vector<2x96xf32>
    %1156 = arith.addf %1155, %1154 : vector<2x96xf32>
    %1157 = arith.divf %1155, %1156 : vector<2x96xf32>
    %1158 = vector.extract_strided_slice %1151 {offsets = [0, 96], sizes = [2, 32], strides = [1, 1]} : vector<2x128xf32> to vector<2x32xf32>
    %1159 = math.tanh %1158 : vector<2x32xf32>
    %1160 = vector.extract_strided_slice %1157 {offsets = [0, 32], sizes = [2, 32], strides = [1, 1]} : vector<2x96xf32> to vector<2x32xf32>
    %1161 = arith.mulf %1160, %1143 : vector<2x32xf32>
    %1162 = vector.extract_strided_slice %1157 {offsets = [0, 0], sizes = [2, 32], strides = [1, 1]} : vector<2x96xf32> to vector<2x32xf32>
    %1163 = arith.mulf %1162, %1159 : vector<2x32xf32>
    %1164 = arith.addf %1161, %1163 : vector<2x32xf32>
    %1165 = vector.extract_strided_slice %1157 {offsets = [0, 64], sizes = [2, 32], strides = [1, 1]} : vector<2x96xf32> to vector<2x32xf32>
    %1166 = math.tanh %1164 : vector<2x32xf32>
    %1167 = arith.mulf %1165, %1166 : vector<2x32xf32>
    %cst_189 = arith.constant dense<0.000000e+00> : vector<2x128xf32>
    %1168 = tpu.matmul %1017, %1060, %cst_189 {dimension_numbers = #tpu.dot_dimension_numbers<[1], [0], [0], [1], [0, 0, 1, 1], [], []>} : vector<2x32xf32>, vector<32x128xf32>, vector<2x128xf32> -> vector<2x128xf32>
    %1169 = vector.broadcast %1062 : vector<1x128xf32> to vector<2x128xf32>
    %1170 = arith.addf %1168, %1169 : vector<2x128xf32>
    %cst_190 = arith.constant dense<0.000000e+00> : vector<2x128xf32>
    %1171 = tpu.matmul %1167, %1061, %cst_190 {dimension_numbers = #tpu.dot_dimension_numbers<[1], [0], [0], [1], [0, 0, 1, 1], [], []>} : vector<2x32xf32>, vector<32x128xf32>, vector<2x128xf32> -> vector<2x128xf32>
    %1172 = arith.addf %1170, %1171 : vector<2x128xf32>
    %1173 = vector.extract_strided_slice %1172 {offsets = [0, 0], sizes = [2, 96], strides = [1, 1]} : vector<2x128xf32> to vector<2x96xf32>
    %1174 = arith.negf %1173 : vector<2x96xf32>
    %1175 = math.exp %1174 : vector<2x96xf32>
    %cst_191 = arith.constant 1.000000e+00 : f32
    %1176 = vector.broadcast %cst_191 : f32 to vector<2x96xf32>
    %1177 = arith.addf %1176, %1175 : vector<2x96xf32>
    %1178 = arith.divf %1176, %1177 : vector<2x96xf32>
    %1179 = vector.extract_strided_slice %1172 {offsets = [0, 96], sizes = [2, 32], strides = [1, 1]} : vector<2x128xf32> to vector<2x32xf32>
    %1180 = math.tanh %1179 : vector<2x32xf32>
    %1181 = vector.extract_strided_slice %1178 {offsets = [0, 32], sizes = [2, 32], strides = [1, 1]} : vector<2x96xf32> to vector<2x32xf32>
    %1182 = arith.mulf %1181, %1164 : vector<2x32xf32>
    %1183 = vector.extract_strided_slice %1178 {offsets = [0, 0], sizes = [2, 32], strides = [1, 1]} : vector<2x96xf32> to vector<2x32xf32>
    %1184 = arith.mulf %1183, %1180 : vector<2x32xf32>
    %1185 = arith.addf %1182, %1184 : vector<2x32xf32>
    %1186 = vector.extract_strided_slice %1178 {offsets = [0, 64], sizes = [2, 32], strides = [1, 1]} : vector<2x96xf32> to vector<2x32xf32>
    %1187 = math.tanh %1185 : vector<2x32xf32>
    %1188 = arith.mulf %1186, %1187 : vector<2x32xf32>
    %cst_192 = arith.constant dense<0.000000e+00> : vector<2x128xf32>
    %1189 = tpu.matmul %1038, %1060, %cst_192 {dimension_numbers = #tpu.dot_dimension_numbers<[1], [0], [0], [1], [0, 0, 1, 1], [], []>} : vector<2x32xf32>, vector<32x128xf32>, vector<2x128xf32> -> vector<2x128xf32>
    %1190 = vector.broadcast %1062 : vector<1x128xf32> to vector<2x128xf32>
    %1191 = arith.addf %1189, %1190 : vector<2x128xf32>
    %cst_193 = arith.constant dense<0.000000e+00> : vector<2x128xf32>
    %1192 = tpu.matmul %1188, %1061, %cst_193 {dimension_numbers = #tpu.dot_dimension_numbers<[1], [0], [0], [1], [0, 0, 1, 1], [], []>} : vector<2x32xf32>, vector<32x128xf32>, vector<2x128xf32> -> vector<2x128xf32>
    %1193 = arith.addf %1191, %1192 : vector<2x128xf32>
    %1194 = vector.extract_strided_slice %1193 {offsets = [0, 0], sizes = [2, 96], strides = [1, 1]} : vector<2x128xf32> to vector<2x96xf32>
    %1195 = arith.negf %1194 : vector<2x96xf32>
    %1196 = math.exp %1195 : vector<2x96xf32>
    %cst_194 = arith.constant 1.000000e+00 : f32
    %1197 = vector.broadcast %cst_194 : f32 to vector<2x96xf32>
    %1198 = arith.addf %1197, %1196 : vector<2x96xf32>
    %1199 = arith.divf %1197, %1198 : vector<2x96xf32>
    %1200 = vector.extract_strided_slice %1193 {offsets = [0, 96], sizes = [2, 32], strides = [1, 1]} : vector<2x128xf32> to vector<2x32xf32>
    %1201 = math.tanh %1200 : vector<2x32xf32>
    %1202 = vector.extract_strided_slice %1199 {offsets = [0, 32], sizes = [2, 32], strides = [1, 1]} : vector<2x96xf32> to vector<2x32xf32>
    %1203 = arith.mulf %1202, %1185 : vector<2x32xf32>
    %1204 = vector.extract_strided_slice %1199 {offsets = [0, 0], sizes = [2, 32], strides = [1, 1]} : vector<2x96xf32> to vector<2x32xf32>
    %1205 = arith.mulf %1204, %1201 : vector<2x32xf32>
    %1206 = arith.addf %1203, %1205 : vector<2x32xf32>
    %1207 = vector.extract_strided_slice %1199 {offsets = [0, 64], sizes = [2, 32], strides = [1, 1]} : vector<2x96xf32> to vector<2x32xf32>
    %1208 = math.tanh %1206 : vector<2x32xf32>
    %1209 = arith.mulf %1207, %1208 : vector<2x32xf32>
    %cst_195 = arith.constant dense<0.000000e+00> : vector<2x128xf32>
    %1210 = tpu.matmul %1059, %1060, %cst_195 {dimension_numbers = #tpu.dot_dimension_numbers<[1], [0], [0], [1], [0, 0, 1, 1], [], []>} : vector<2x32xf32>, vector<32x128xf32>, vector<2x128xf32> -> vector<2x128xf32>
    %1211 = vector.broadcast %1062 : vector<1x128xf32> to vector<2x128xf32>
    %1212 = arith.addf %1210, %1211 : vector<2x128xf32>
    %cst_196 = arith.constant dense<0.000000e+00> : vector<2x128xf32>
    %1213 = tpu.matmul %1209, %1061, %cst_196 {dimension_numbers = #tpu.dot_dimension_numbers<[1], [0], [0], [1], [0, 0, 1, 1], [], []>} : vector<2x32xf32>, vector<32x128xf32>, vector<2x128xf32> -> vector<2x128xf32>
    %1214 = arith.addf %1212, %1213 : vector<2x128xf32>
    %1215 = vector.extract_strided_slice %1214 {offsets = [0, 0], sizes = [2, 96], strides = [1, 1]} : vector<2x128xf32> to vector<2x96xf32>
    %1216 = arith.negf %1215 : vector<2x96xf32>
    %1217 = math.exp %1216 : vector<2x96xf32>
    %cst_197 = arith.constant 1.000000e+00 : f32
    %1218 = vector.broadcast %cst_197 : f32 to vector<2x96xf32>
    %1219 = arith.addf %1218, %1217 : vector<2x96xf32>
    %1220 = arith.divf %1218, %1219 : vector<2x96xf32>
    %1221 = vector.extract_strided_slice %1214 {offsets = [0, 96], sizes = [2, 32], strides = [1, 1]} : vector<2x128xf32> to vector<2x32xf32>
    %1222 = math.tanh %1221 : vector<2x32xf32>
    %1223 = vector.extract_strided_slice %1220 {offsets = [0, 32], sizes = [2, 32], strides = [1, 1]} : vector<2x96xf32> to vector<2x32xf32>
    %1224 = arith.mulf %1223, %1206 : vector<2x32xf32>
    %1225 = vector.extract_strided_slice %1220 {offsets = [0, 0], sizes = [2, 32], strides = [1, 1]} : vector<2x96xf32> to vector<2x32xf32>
    %1226 = arith.mulf %1225, %1222 : vector<2x32xf32>
    %1227 = arith.addf %1224, %1226 : vector<2x32xf32>
    %1228 = vector.extract_strided_slice %1220 {offsets = [0, 64], sizes = [2, 32], strides = [1, 1]} : vector<2x96xf32> to vector<2x32xf32>
    %1229 = math.tanh %1227 : vector<2x32xf32>
    %1230 = arith.mulf %1228, %1229 : vector<2x32xf32>
    %c720 = arith.constant 720 : index
    %c0_198 = arith.constant 0 : index
    %1231 = vector.load %arg1[%c720, %c0_198] : memref<792x128xf32, #tpu.memory_space<vmem>>, vector<32x128xf32>
    %c752 = arith.constant 752 : index
    %c0_199 = arith.constant 0 : index
    %1232 = vector.load %arg1[%c752, %c0_199] : memref<792x128xf32, #tpu.memory_space<vmem>>, vector<32x128xf32>
    %c784 = arith.constant 784 : index
    %c0_200 = arith.constant 0 : index
    %1233 = vector.load %arg1[%c784, %c0_200] : memref<792x128xf32, #tpu.memory_space<vmem>>, vector<1x128xf32>
    %cst_201 = arith.constant dense<0.000000e+00> : vector<2x128xf32>
    %1234 = tpu.matmul %1083, %1231, %cst_201 {dimension_numbers = #tpu.dot_dimension_numbers<[1], [0], [0], [1], [0, 0, 1, 1], [], []>} : vector<2x32xf32>, vector<32x128xf32>, vector<2x128xf32> -> vector<2x128xf32>
    %1235 = vector.broadcast %1233 : vector<1x128xf32> to vector<2x128xf32>
    %1236 = arith.addf %1234, %1235 : vector<2x128xf32>
    %cst_202 = arith.constant dense<0.000000e+00> : vector<2x128xf32>
    %1237 = tpu.matmul %1059, %1232, %cst_202 {dimension_numbers = #tpu.dot_dimension_numbers<[1], [0], [0], [1], [0, 0, 1, 1], [], []>} : vector<2x32xf32>, vector<32x128xf32>, vector<2x128xf32> -> vector<2x128xf32>
    %1238 = arith.addf %1236, %1237 : vector<2x128xf32>
    %1239 = vector.extract_strided_slice %1238 {offsets = [0, 0], sizes = [2, 96], strides = [1, 1]} : vector<2x128xf32> to vector<2x96xf32>
    %1240 = arith.negf %1239 : vector<2x96xf32>
    %1241 = math.exp %1240 : vector<2x96xf32>
    %cst_203 = arith.constant 1.000000e+00 : f32
    %1242 = vector.broadcast %cst_203 : f32 to vector<2x96xf32>
    %1243 = arith.addf %1242, %1241 : vector<2x96xf32>
    %1244 = arith.divf %1242, %1243 : vector<2x96xf32>
    %1245 = vector.extract_strided_slice %1238 {offsets = [0, 96], sizes = [2, 32], strides = [1, 1]} : vector<2x128xf32> to vector<2x32xf32>
    %1246 = math.tanh %1245 : vector<2x32xf32>
    %1247 = vector.extract_strided_slice %1244 {offsets = [0, 32], sizes = [2, 32], strides = [1, 1]} : vector<2x96xf32> to vector<2x32xf32>
    %1248 = arith.mulf %1247, %1056 : vector<2x32xf32>
    %1249 = vector.extract_strided_slice %1244 {offsets = [0, 0], sizes = [2, 32], strides = [1, 1]} : vector<2x96xf32> to vector<2x32xf32>
    %1250 = arith.mulf %1249, %1246 : vector<2x32xf32>
    %1251 = arith.addf %1248, %1250 : vector<2x32xf32>
    %1252 = vector.extract_strided_slice %1244 {offsets = [0, 64], sizes = [2, 32], strides = [1, 1]} : vector<2x96xf32> to vector<2x32xf32>
    %1253 = math.tanh %1251 : vector<2x32xf32>
    %1254 = arith.mulf %1252, %1253 : vector<2x32xf32>
    %1255 = vector.extract_strided_slice %1254 {offsets = [0, 0], sizes = [1, 32], strides = [1, 1]} : vector<2x32xf32> to vector<1x32xf32>
    %c0_204 = arith.constant 0 : index
    %c0_205 = arith.constant 0 : index
    %1256 = vector.load %arg4[%c0_204, %c0_205] : memref<16x32xf32, #tpu.memory_space<vmem>>, vector<1x32xf32>
    tpu.vector_store %arg4[%c0_204, %c0_205], %1255 {strides = array<i32>} : memref<16x32xf32, #tpu.memory_space<vmem>>, vector<1x32xf32>,
    %1257 = vector.extract_strided_slice %1254 {offsets = [1, 0], sizes = [1, 32], strides = [1, 1]} : vector<2x32xf32> to vector<1x32xf32>
    %c8_206 = arith.constant 8 : index
    %c0_207 = arith.constant 0 : index
    %1258 = vector.load %arg4[%c8_206, %c0_207] : memref<16x32xf32, #tpu.memory_space<vmem>>, vector<1x32xf32>
    tpu.vector_store %arg4[%c8_206, %c0_207], %1257 {strides = array<i32>} : memref<16x32xf32, #tpu.memory_space<vmem>>, vector<1x32xf32>,
    %cst_208 = arith.constant dense<0.000000e+00> : vector<2x128xf32>
    %1259 = tpu.matmul %1104, %1231, %cst_208 {dimension_numbers = #tpu.dot_dimension_numbers<[1], [0], [0], [1], [0, 0, 1, 1], [], []>} : vector<2x32xf32>, vector<32x128xf32>, vector<2x128xf32> -> vector<2x128xf32>
    %1260 = vector.broadcast %1233 : vector<1x128xf32> to vector<2x128xf32>
    %1261 = arith.addf %1259, %1260 : vector<2x128xf32>
    %cst_209 = arith.constant dense<0.000000e+00> : vector<2x128xf32>
    %1262 = tpu.matmul %1254, %1232, %cst_209 {dimension_numbers = #tpu.dot_dimension_numbers<[1], [0], [0], [1], [0, 0, 1, 1], [], []>} : vector<2x32xf32>, vector<32x128xf32>, vector<2x128xf32> -> vector<2x128xf32>
    %1263 = arith.addf %1261, %1262 : vector<2x128xf32>
    %1264 = vector.extract_strided_slice %1263 {offsets = [0, 0], sizes = [2, 96], strides = [1, 1]} : vector<2x128xf32> to vector<2x96xf32>
    %1265 = arith.negf %1264 : vector<2x96xf32>
    %1266 = math.exp %1265 : vector<2x96xf32>
    %cst_210 = arith.constant 1.000000e+00 : f32
    %1267 = vector.broadcast %cst_210 : f32 to vector<2x96xf32>
    %1268 = arith.addf %1267, %1266 : vector<2x96xf32>
    %1269 = arith.divf %1267, %1268 : vector<2x96xf32>
    %1270 = vector.extract_strided_slice %1263 {offsets = [0, 96], sizes = [2, 32], strides = [1, 1]} : vector<2x128xf32> to vector<2x32xf32>
    %1271 = math.tanh %1270 : vector<2x32xf32>
    %1272 = vector.extract_strided_slice %1269 {offsets = [0, 32], sizes = [2, 32], strides = [1, 1]} : vector<2x96xf32> to vector<2x32xf32>
    %1273 = arith.mulf %1272, %1251 : vector<2x32xf32>
    %1274 = vector.extract_strided_slice %1269 {offsets = [0, 0], sizes = [2, 32], strides = [1, 1]} : vector<2x96xf32> to vector<2x32xf32>
    %1275 = arith.mulf %1274, %1271 : vector<2x32xf32>
    %1276 = arith.addf %1273, %1275 : vector<2x32xf32>
    %1277 = vector.extract_strided_slice %1269 {offsets = [0, 64], sizes = [2, 32], strides = [1, 1]} : vector<2x96xf32> to vector<2x32xf32>
    %1278 = math.tanh %1276 : vector<2x32xf32>
    %1279 = arith.mulf %1277, %1278 : vector<2x32xf32>
    %1280 = vector.extract_strided_slice %1279 {offsets = [0, 0], sizes = [1, 32], strides = [1, 1]} : vector<2x32xf32> to vector<1x32xf32>
    %c1_211 = arith.constant 1 : index
    %c0_212 = arith.constant 0 : index
    %1281 = vector.load %arg4[%c1_211, %c0_212] : memref<16x32xf32, #tpu.memory_space<vmem>>, vector<1x32xf32>
    tpu.vector_store %arg4[%c1_211, %c0_212], %1280 {strides = array<i32>} : memref<16x32xf32, #tpu.memory_space<vmem>>, vector<1x32xf32>,
    %1282 = vector.extract_strided_slice %1279 {offsets = [1, 0], sizes = [1, 32], strides = [1, 1]} : vector<2x32xf32> to vector<1x32xf32>
    %c9_213 = arith.constant 9 : index
    %c0_214 = arith.constant 0 : index
    %1283 = vector.load %arg4[%c9_213, %c0_214] : memref<16x32xf32, #tpu.memory_space<vmem>>, vector<1x32xf32>
    tpu.vector_store %arg4[%c9_213, %c0_214], %1282 {strides = array<i32>} : memref<16x32xf32, #tpu.memory_space<vmem>>, vector<1x32xf32>,
    %cst_215 = arith.constant dense<0.000000e+00> : vector<2x128xf32>
    %1284 = tpu.matmul %1125, %1231, %cst_215 {dimension_numbers = #tpu.dot_dimension_numbers<[1], [0], [0], [1], [0, 0, 1, 1], [], []>} : vector<2x32xf32>, vector<32x128xf32>, vector<2x128xf32> -> vector<2x128xf32>
    %1285 = vector.broadcast %1233 : vector<1x128xf32> to vector<2x128xf32>
    %1286 = arith.addf %1284, %1285 : vector<2x128xf32>
    %cst_216 = arith.constant dense<0.000000e+00> : vector<2x128xf32>
    %1287 = tpu.matmul %1279, %1232, %cst_216 {dimension_numbers = #tpu.dot_dimension_numbers<[1], [0], [0], [1], [0, 0, 1, 1], [], []>} : vector<2x32xf32>, vector<32x128xf32>, vector<2x128xf32> -> vector<2x128xf32>
    %1288 = arith.addf %1286, %1287 : vector<2x128xf32>
    %1289 = vector.extract_strided_slice %1288 {offsets = [0, 0], sizes = [2, 96], strides = [1, 1]} : vector<2x128xf32> to vector<2x96xf32>
    %1290 = arith.negf %1289 : vector<2x96xf32>
    %1291 = math.exp %1290 : vector<2x96xf32>
    %cst_217 = arith.constant 1.000000e+00 : f32
    %1292 = vector.broadcast %cst_217 : f32 to vector<2x96xf32>
    %1293 = arith.addf %1292, %1291 : vector<2x96xf32>
    %1294 = arith.divf %1292, %1293 : vector<2x96xf32>
    %1295 = vector.extract_strided_slice %1288 {offsets = [0, 96], sizes = [2, 32], strides = [1, 1]} : vector<2x128xf32> to vector<2x32xf32>
    %1296 = math.tanh %1295 : vector<2x32xf32>
    %1297 = vector.extract_strided_slice %1294 {offsets = [0, 32], sizes = [2, 32], strides = [1, 1]} : vector<2x96xf32> to vector<2x32xf32>
    %1298 = arith.mulf %1297, %1276 : vector<2x32xf32>
    %1299 = vector.extract_strided_slice %1294 {offsets = [0, 0], sizes = [2, 32], strides = [1, 1]} : vector<2x96xf32> to vector<2x32xf32>
    %1300 = arith.mulf %1299, %1296 : vector<2x32xf32>
    %1301 = arith.addf %1298, %1300 : vector<2x32xf32>
    %1302 = vector.extract_strided_slice %1294 {offsets = [0, 64], sizes = [2, 32], strides = [1, 1]} : vector<2x96xf32> to vector<2x32xf32>
    %1303 = math.tanh %1301 : vector<2x32xf32>
    %1304 = arith.mulf %1302, %1303 : vector<2x32xf32>
    %1305 = vector.extract_strided_slice %1304 {offsets = [0, 0], sizes = [1, 32], strides = [1, 1]} : vector<2x32xf32> to vector<1x32xf32>
    %c2_218 = arith.constant 2 : index
    %c0_219 = arith.constant 0 : index
    %1306 = vector.load %arg4[%c2_218, %c0_219] : memref<16x32xf32, #tpu.memory_space<vmem>>, vector<1x32xf32>
    tpu.vector_store %arg4[%c2_218, %c0_219], %1305 {strides = array<i32>} : memref<16x32xf32, #tpu.memory_space<vmem>>, vector<1x32xf32>,
    %1307 = vector.extract_strided_slice %1304 {offsets = [1, 0], sizes = [1, 32], strides = [1, 1]} : vector<2x32xf32> to vector<1x32xf32>
    %c10_220 = arith.constant 10 : index
    %c0_221 = arith.constant 0 : index
    %1308 = vector.load %arg4[%c10_220, %c0_221] : memref<16x32xf32, #tpu.memory_space<vmem>>, vector<1x32xf32>
    tpu.vector_store %arg4[%c10_220, %c0_221], %1307 {strides = array<i32>} : memref<16x32xf32, #tpu.memory_space<vmem>>, vector<1x32xf32>,
    %cst_222 = arith.constant dense<0.000000e+00> : vector<2x128xf32>
    %1309 = tpu.matmul %1146, %1231, %cst_222 {dimension_numbers = #tpu.dot_dimension_numbers<[1], [0], [0], [1], [0, 0, 1, 1], [], []>} : vector<2x32xf32>, vector<32x128xf32>, vector<2x128xf32> -> vector<2x128xf32>
    %1310 = vector.broadcast %1233 : vector<1x128xf32> to vector<2x128xf32>
    %1311 = arith.addf %1309, %1310 : vector<2x128xf32>
    %cst_223 = arith.constant dense<0.000000e+00> : vector<2x128xf32>
    %1312 = tpu.matmul %1304, %1232, %cst_223 {dimension_numbers = #tpu.dot_dimension_numbers<[1], [0], [0], [1], [0, 0, 1, 1], [], []>} : vector<2x32xf32>, vector<32x128xf32>, vector<2x128xf32> -> vector<2x128xf32>
    %1313 = arith.addf %1311, %1312 : vector<2x128xf32>
    %1314 = vector.extract_strided_slice %1313 {offsets = [0, 0], sizes = [2, 96], strides = [1, 1]} : vector<2x128xf32> to vector<2x96xf32>
    %1315 = arith.negf %1314 : vector<2x96xf32>
    %1316 = math.exp %1315 : vector<2x96xf32>
    %cst_224 = arith.constant 1.000000e+00 : f32
    %1317 = vector.broadcast %cst_224 : f32 to vector<2x96xf32>
    %1318 = arith.addf %1317, %1316 : vector<2x96xf32>
    %1319 = arith.divf %1317, %1318 : vector<2x96xf32>
    %1320 = vector.extract_strided_slice %1313 {offsets = [0, 96], sizes = [2, 32], strides = [1, 1]} : vector<2x128xf32> to vector<2x32xf32>
    %1321 = math.tanh %1320 : vector<2x32xf32>
    %1322 = vector.extract_strided_slice %1319 {offsets = [0, 32], sizes = [2, 32], strides = [1, 1]} : vector<2x96xf32> to vector<2x32xf32>
    %1323 = arith.mulf %1322, %1301 : vector<2x32xf32>
    %1324 = vector.extract_strided_slice %1319 {offsets = [0, 0], sizes = [2, 32], strides = [1, 1]} : vector<2x96xf32> to vector<2x32xf32>
    %1325 = arith.mulf %1324, %1321 : vector<2x32xf32>
    %1326 = arith.addf %1323, %1325 : vector<2x32xf32>
    %1327 = vector.extract_strided_slice %1319 {offsets = [0, 64], sizes = [2, 32], strides = [1, 1]} : vector<2x96xf32> to vector<2x32xf32>
    %1328 = math.tanh %1326 : vector<2x32xf32>
    %1329 = arith.mulf %1327, %1328 : vector<2x32xf32>
    %1330 = vector.extract_strided_slice %1329 {offsets = [0, 0], sizes = [1, 32], strides = [1, 1]} : vector<2x32xf32> to vector<1x32xf32>
    %c3_225 = arith.constant 3 : index
    %c0_226 = arith.constant 0 : index
    %1331 = vector.load %arg4[%c3_225, %c0_226] : memref<16x32xf32, #tpu.memory_space<vmem>>, vector<1x32xf32>
    tpu.vector_store %arg4[%c3_225, %c0_226], %1330 {strides = array<i32>} : memref<16x32xf32, #tpu.memory_space<vmem>>, vector<1x32xf32>,
    %1332 = vector.extract_strided_slice %1329 {offsets = [1, 0], sizes = [1, 32], strides = [1, 1]} : vector<2x32xf32> to vector<1x32xf32>
    %c11_227 = arith.constant 11 : index
    %c0_228 = arith.constant 0 : index
    %1333 = vector.load %arg4[%c11_227, %c0_228] : memref<16x32xf32, #tpu.memory_space<vmem>>, vector<1x32xf32>
    tpu.vector_store %arg4[%c11_227, %c0_228], %1332 {strides = array<i32>} : memref<16x32xf32, #tpu.memory_space<vmem>>, vector<1x32xf32>,
    %cst_229 = arith.constant dense<0.000000e+00> : vector<2x128xf32>
    %1334 = tpu.matmul %1167, %1231, %cst_229 {dimension_numbers = #tpu.dot_dimension_numbers<[1], [0], [0], [1], [0, 0, 1, 1], [], []>} : vector<2x32xf32>, vector<32x128xf32>, vector<2x128xf32> -> vector<2x128xf32>
    %1335 = vector.broadcast %1233 : vector<1x128xf32> to vector<2x128xf32>
    %1336 = arith.addf %1334, %1335 : vector<2x128xf32>
    %cst_230 = arith.constant dense<0.000000e+00> : vector<2x128xf32>
    %1337 = tpu.matmul %1329, %1232, %cst_230 {dimension_numbers = #tpu.dot_dimension_numbers<[1], [0], [0], [1], [0, 0, 1, 1], [], []>} : vector<2x32xf32>, vector<32x128xf32>, vector<2x128xf32> -> vector<2x128xf32>
    %1338 = arith.addf %1336, %1337 : vector<2x128xf32>
    %1339 = vector.extract_strided_slice %1338 {offsets = [0, 0], sizes = [2, 96], strides = [1, 1]} : vector<2x128xf32> to vector<2x96xf32>
    %1340 = arith.negf %1339 : vector<2x96xf32>
    %1341 = math.exp %1340 : vector<2x96xf32>
    %cst_231 = arith.constant 1.000000e+00 : f32
    %1342 = vector.broadcast %cst_231 : f32 to vector<2x96xf32>
    %1343 = arith.addf %1342, %1341 : vector<2x96xf32>
    %1344 = arith.divf %1342, %1343 : vector<2x96xf32>
    %1345 = vector.extract_strided_slice %1338 {offsets = [0, 96], sizes = [2, 32], strides = [1, 1]} : vector<2x128xf32> to vector<2x32xf32>
    %1346 = math.tanh %1345 : vector<2x32xf32>
    %1347 = vector.extract_strided_slice %1344 {offsets = [0, 32], sizes = [2, 32], strides = [1, 1]} : vector<2x96xf32> to vector<2x32xf32>
    %1348 = arith.mulf %1347, %1326 : vector<2x32xf32>
    %1349 = vector.extract_strided_slice %1344 {offsets = [0, 0], sizes = [2, 32], strides = [1, 1]} : vector<2x96xf32> to vector<2x32xf32>
    %1350 = arith.mulf %1349, %1346 : vector<2x32xf32>
    %1351 = arith.addf %1348, %1350 : vector<2x32xf32>
    %1352 = vector.extract_strided_slice %1344 {offsets = [0, 64], sizes = [2, 32], strides = [1, 1]} : vector<2x96xf32> to vector<2x32xf32>
    %1353 = math.tanh %1351 : vector<2x32xf32>
    %1354 = arith.mulf %1352, %1353 : vector<2x32xf32>
    %1355 = vector.extract_strided_slice %1354 {offsets = [0, 0], sizes = [1, 32], strides = [1, 1]} : vector<2x32xf32> to vector<1x32xf32>
    %c4_232 = arith.constant 4 : index
    %c0_233 = arith.constant 0 : index
    %1356 = vector.load %arg4[%c4_232, %c0_233] : memref<16x32xf32, #tpu.memory_space<vmem>>, vector<1x32xf32>
    tpu.vector_store %arg4[%c4_232, %c0_233], %1355 {strides = array<i32>} : memref<16x32xf32, #tpu.memory_space<vmem>>, vector<1x32xf32>,
    %1357 = vector.extract_strided_slice %1354 {offsets = [1, 0], sizes = [1, 32], strides = [1, 1]} : vector<2x32xf32> to vector<1x32xf32>
    %c12_234 = arith.constant 12 : index
    %c0_235 = arith.constant 0 : index
    %1358 = vector.load %arg4[%c12_234, %c0_235] : memref<16x32xf32, #tpu.memory_space<vmem>>, vector<1x32xf32>
    tpu.vector_store %arg4[%c12_234, %c0_235], %1357 {strides = array<i32>} : memref<16x32xf32, #tpu.memory_space<vmem>>, vector<1x32xf32>,
    %cst_236 = arith.constant dense<0.000000e+00> : vector<2x128xf32>
    %1359 = tpu.matmul %1188, %1231, %cst_236 {dimension_numbers = #tpu.dot_dimension_numbers<[1], [0], [0], [1], [0, 0, 1, 1], [], []>} : vector<2x32xf32>, vector<32x128xf32>, vector<2x128xf32> -> vector<2x128xf32>
    %1360 = vector.broadcast %1233 : vector<1x128xf32> to vector<2x128xf32>
    %1361 = arith.addf %1359, %1360 : vector<2x128xf32>
    %cst_237 = arith.constant dense<0.000000e+00> : vector<2x128xf32>
    %1362 = tpu.matmul %1354, %1232, %cst_237 {dimension_numbers = #tpu.dot_dimension_numbers<[1], [0], [0], [1], [0, 0, 1, 1], [], []>} : vector<2x32xf32>, vector<32x128xf32>, vector<2x128xf32> -> vector<2x128xf32>
    %1363 = arith.addf %1361, %1362 : vector<2x128xf32>
    %1364 = vector.extract_strided_slice %1363 {offsets = [0, 0], sizes = [2, 96], strides = [1, 1]} : vector<2x128xf32> to vector<2x96xf32>
    %1365 = arith.negf %1364 : vector<2x96xf32>
    %1366 = math.exp %1365 : vector<2x96xf32>
    %cst_238 = arith.constant 1.000000e+00 : f32
    %1367 = vector.broadcast %cst_238 : f32 to vector<2x96xf32>
    %1368 = arith.addf %1367, %1366 : vector<2x96xf32>
    %1369 = arith.divf %1367, %1368 : vector<2x96xf32>
    %1370 = vector.extract_strided_slice %1363 {offsets = [0, 96], sizes = [2, 32], strides = [1, 1]} : vector<2x128xf32> to vector<2x32xf32>
    %1371 = math.tanh %1370 : vector<2x32xf32>
    %1372 = vector.extract_strided_slice %1369 {offsets = [0, 32], sizes = [2, 32], strides = [1, 1]} : vector<2x96xf32> to vector<2x32xf32>
    %1373 = arith.mulf %1372, %1351 : vector<2x32xf32>
    %1374 = vector.extract_strided_slice %1369 {offsets = [0, 0], sizes = [2, 32], strides = [1, 1]} : vector<2x96xf32> to vector<2x32xf32>
    %1375 = arith.mulf %1374, %1371 : vector<2x32xf32>
    %1376 = arith.addf %1373, %1375 : vector<2x32xf32>
    %1377 = vector.extract_strided_slice %1369 {offsets = [0, 64], sizes = [2, 32], strides = [1, 1]} : vector<2x96xf32> to vector<2x32xf32>
    %1378 = math.tanh %1376 : vector<2x32xf32>
    %1379 = arith.mulf %1377, %1378 : vector<2x32xf32>
    %1380 = vector.extract_strided_slice %1379 {offsets = [0, 0], sizes = [1, 32], strides = [1, 1]} : vector<2x32xf32> to vector<1x32xf32>
    %c5_239 = arith.constant 5 : index
    %c0_240 = arith.constant 0 : index
    %1381 = vector.load %arg4[%c5_239, %c0_240] : memref<16x32xf32, #tpu.memory_space<vmem>>, vector<1x32xf32>
    tpu.vector_store %arg4[%c5_239, %c0_240], %1380 {strides = array<i32>} : memref<16x32xf32, #tpu.memory_space<vmem>>, vector<1x32xf32>,
    %1382 = vector.extract_strided_slice %1379 {offsets = [1, 0], sizes = [1, 32], strides = [1, 1]} : vector<2x32xf32> to vector<1x32xf32>
    %c13_241 = arith.constant 13 : index
    %c0_242 = arith.constant 0 : index
    %1383 = vector.load %arg4[%c13_241, %c0_242] : memref<16x32xf32, #tpu.memory_space<vmem>>, vector<1x32xf32>
    tpu.vector_store %arg4[%c13_241, %c0_242], %1382 {strides = array<i32>} : memref<16x32xf32, #tpu.memory_space<vmem>>, vector<1x32xf32>,
    %cst_243 = arith.constant dense<0.000000e+00> : vector<2x128xf32>
    %1384 = tpu.matmul %1209, %1231, %cst_243 {dimension_numbers = #tpu.dot_dimension_numbers<[1], [0], [0], [1], [0, 0, 1, 1], [], []>} : vector<2x32xf32>, vector<32x128xf32>, vector<2x128xf32> -> vector<2x128xf32>
    %1385 = vector.broadcast %1233 : vector<1x128xf32> to vector<2x128xf32>
    %1386 = arith.addf %1384, %1385 : vector<2x128xf32>
    %cst_244 = arith.constant dense<0.000000e+00> : vector<2x128xf32>
    %1387 = tpu.matmul %1379, %1232, %cst_244 {dimension_numbers = #tpu.dot_dimension_numbers<[1], [0], [0], [1], [0, 0, 1, 1], [], []>} : vector<2x32xf32>, vector<32x128xf32>, vector<2x128xf32> -> vector<2x128xf32>
    %1388 = arith.addf %1386, %1387 : vector<2x128xf32>
    %1389 = vector.extract_strided_slice %1388 {offsets = [0, 0], sizes = [2, 96], strides = [1, 1]} : vector<2x128xf32> to vector<2x96xf32>
    %1390 = arith.negf %1389 : vector<2x96xf32>
    %1391 = math.exp %1390 : vector<2x96xf32>
    %cst_245 = arith.constant 1.000000e+00 : f32
    %1392 = vector.broadcast %cst_245 : f32 to vector<2x96xf32>
    %1393 = arith.addf %1392, %1391 : vector<2x96xf32>
    %1394 = arith.divf %1392, %1393 : vector<2x96xf32>
    %1395 = vector.extract_strided_slice %1388 {offsets = [0, 96], sizes = [2, 32], strides = [1, 1]} : vector<2x128xf32> to vector<2x32xf32>
    %1396 = math.tanh %1395 : vector<2x32xf32>
    %1397 = vector.extract_strided_slice %1394 {offsets = [0, 32], sizes = [2, 32], strides = [1, 1]} : vector<2x96xf32> to vector<2x32xf32>
    %1398 = arith.mulf %1397, %1376 : vector<2x32xf32>
    %1399 = vector.extract_strided_slice %1394 {offsets = [0, 0], sizes = [2, 32], strides = [1, 1]} : vector<2x96xf32> to vector<2x32xf32>
    %1400 = arith.mulf %1399, %1396 : vector<2x32xf32>
    %1401 = arith.addf %1398, %1400 : vector<2x32xf32>
    %1402 = vector.extract_strided_slice %1394 {offsets = [0, 64], sizes = [2, 32], strides = [1, 1]} : vector<2x96xf32> to vector<2x32xf32>
    %1403 = math.tanh %1401 : vector<2x32xf32>
    %1404 = arith.mulf %1402, %1403 : vector<2x32xf32>
    %1405 = vector.extract_strided_slice %1404 {offsets = [0, 0], sizes = [1, 32], strides = [1, 1]} : vector<2x32xf32> to vector<1x32xf32>
    %c6_246 = arith.constant 6 : index
    %c0_247 = arith.constant 0 : index
    %1406 = vector.load %arg4[%c6_246, %c0_247] : memref<16x32xf32, #tpu.memory_space<vmem>>, vector<1x32xf32>
    tpu.vector_store %arg4[%c6_246, %c0_247], %1405 {strides = array<i32>} : memref<16x32xf32, #tpu.memory_space<vmem>>, vector<1x32xf32>,
    %1407 = vector.extract_strided_slice %1404 {offsets = [1, 0], sizes = [1, 32], strides = [1, 1]} : vector<2x32xf32> to vector<1x32xf32>
    %c14_248 = arith.constant 14 : index
    %c0_249 = arith.constant 0 : index
    %1408 = vector.load %arg4[%c14_248, %c0_249] : memref<16x32xf32, #tpu.memory_space<vmem>>, vector<1x32xf32>
    tpu.vector_store %arg4[%c14_248, %c0_249], %1407 {strides = array<i32>} : memref<16x32xf32, #tpu.memory_space<vmem>>, vector<1x32xf32>,
    %cst_250 = arith.constant dense<0.000000e+00> : vector<2x128xf32>
    %1409 = tpu.matmul %1230, %1231, %cst_250 {dimension_numbers = #tpu.dot_dimension_numbers<[1], [0], [0], [1], [0, 0, 1, 1], [], []>} : vector<2x32xf32>, vector<32x128xf32>, vector<2x128xf32> -> vector<2x128xf32>
    %1410 = vector.broadcast %1233 : vector<1x128xf32> to vector<2x128xf32>
    %1411 = arith.addf %1409, %1410 : vector<2x128xf32>
    %cst_251 = arith.constant dense<0.000000e+00> : vector<2x128xf32>
    %1412 = tpu.matmul %1404, %1232, %cst_251 {dimension_numbers = #tpu.dot_dimension_numbers<[1], [0], [0], [1], [0, 0, 1, 1], [], []>} : vector<2x32xf32>, vector<32x128xf32>, vector<2x128xf32> -> vector<2x128xf32>
    %1413 = arith.addf %1411, %1412 : vector<2x128xf32>
    %1414 = vector.extract_strided_slice %1413 {offsets = [0, 0], sizes = [2, 96], strides = [1, 1]} : vector<2x128xf32> to vector<2x96xf32>
    %1415 = arith.negf %1414 : vector<2x96xf32>
    %1416 = math.exp %1415 : vector<2x96xf32>
    %cst_252 = arith.constant 1.000000e+00 : f32
    %1417 = vector.broadcast %cst_252 : f32 to vector<2x96xf32>
    %1418 = arith.addf %1417, %1416 : vector<2x96xf32>
    %1419 = arith.divf %1417, %1418 : vector<2x96xf32>
    %1420 = vector.extract_strided_slice %1413 {offsets = [0, 96], sizes = [2, 32], strides = [1, 1]} : vector<2x128xf32> to vector<2x32xf32>
    %1421 = math.tanh %1420 : vector<2x32xf32>
    %1422 = vector.extract_strided_slice %1419 {offsets = [0, 32], sizes = [2, 32], strides = [1, 1]} : vector<2x96xf32> to vector<2x32xf32>
    %1423 = arith.mulf %1422, %1401 : vector<2x32xf32>
    %1424 = vector.extract_strided_slice %1419 {offsets = [0, 0], sizes = [2, 32], strides = [1, 1]} : vector<2x96xf32> to vector<2x32xf32>
    %1425 = arith.mulf %1424, %1421 : vector<2x32xf32>
    %1426 = arith.addf %1423, %1425 : vector<2x32xf32>
    %1427 = vector.extract_strided_slice %1419 {offsets = [0, 64], sizes = [2, 32], strides = [1, 1]} : vector<2x96xf32> to vector<2x32xf32>
    %1428 = math.tanh %1426 : vector<2x32xf32>
    %1429 = arith.mulf %1427, %1428 : vector<2x32xf32>
    %1430 = vector.extract_strided_slice %1429 {offsets = [0, 0], sizes = [1, 32], strides = [1, 1]} : vector<2x32xf32> to vector<1x32xf32>
    %c7_253 = arith.constant 7 : index
    %c0_254 = arith.constant 0 : index
    %1431 = vector.load %arg4[%c7_253, %c0_254] : memref<16x32xf32, #tpu.memory_space<vmem>>, vector<1x32xf32>
    tpu.vector_store %arg4[%c7_253, %c0_254], %1430 {strides = array<i32>} : memref<16x32xf32, #tpu.memory_space<vmem>>, vector<1x32xf32>,
    %1432 = vector.extract_strided_slice %1429 {offsets = [1, 0], sizes = [1, 32], strides = [1, 1]} : vector<2x32xf32> to vector<1x32xf32>
    %c15_255 = arith.constant 15 : index
    %c0_256 = arith.constant 0 : index
    %1433 = vector.load %arg4[%c15_255, %c0_256] : memref<16x32xf32, #tpu.memory_space<vmem>>, vector<1x32xf32>
    tpu.vector_store %arg4[%c15_255, %c0_256], %1432 {strides = array<i32>} : memref<16x32xf32, #tpu.memory_space<vmem>>, vector<1x32xf32>,
    %c0_257 = arith.constant 0 : index
    %c0_258 = arith.constant 0 : index
    %1434 = vector.load %arg4[%c0_257, %c0_258] : memref<16x32xf32, #tpu.memory_space<vmem>>, vector<16x32xf32>
    %c0_259 = arith.constant 0 : index
    %c0_260 = arith.constant 0 : index
    %1435 = vector.load %arg2[%c0_259, %c0_260] : memref<40x256xf32, #tpu.memory_space<vmem>>, vector<32x256xf32>
    %c32 = arith.constant 32 : index
    %c0_261 = arith.constant 0 : index
    %1436 = vector.load %arg2[%c32, %c0_261] : memref<40x256xf32, #tpu.memory_space<vmem>>, vector<1x256xf32>
    %cst_262 = arith.constant dense<0.000000e+00> : vector<16x256xf32>
    %1437 = tpu.matmul %1434, %1435, %cst_262 {dimension_numbers = #tpu.dot_dimension_numbers<[1], [0], [0], [1], [0, 0, 1, 1], [], []>} : vector<16x32xf32>, vector<32x256xf32>, vector<16x256xf32> -> vector<16x256xf32>
    %1438 = vector.broadcast %1436 : vector<1x256xf32> to vector<16x256xf32>
    %1439 = arith.addf %1437, %1438 : vector<16x256xf32>
    %c0_263 = arith.constant 0 : index
    %c0_264 = arith.constant 0 : index
    %1440 = vector.load %arg3[%c0_263, %c0_264] : memref<16x256xf32, #tpu.memory_space<vmem>>, vector<16x256xf32>
    tpu.vector_store %arg3[%c0_263, %c0_264], %1439 {strides = array<i32>} : memref<16x256xf32, #tpu.memory_space<vmem>>, vector<16x256xf32>,
    return
  }
}

</mosaic_0001>

<bundles_post_ra>
// kernel: model_forward.1
= control target key start
LH: loop header
LB: loop body
LE: loop exit
PB: predicated region body
PF: predicated region fallthrough
CT: control target
= control target key end

     0   :  { %8 = vsyncpa [#allocation6], 0  ;;  %s15991_s0 = inlined_call_operand.vmem [shape: s32[16], index: 0, kind: input, shape index: {}]   ;;  %s15992_s1 = inlined_call_operand.hbm [shape: f32[792,128], index: 1, kind: input, shape index: {}]   ;;  %s15993_s2 = inlined_call_operand.hbm [shape: f32[40,256], index: 2, kind: input, shape index: {}]   ;;  %s15994_s3 = inlined_call_operand.hbm [shape: f32[16,256], index: 3, kind: output, shape index: {}]  }
   0x1   :  { %9 = vsyncpa [#allocation4], 0 }
   0x2   :  { %10 = vsyncpa [#allocation9], 0 }
   0x3   :  { %11 = vsyncpa [#allocation5], 0  ;;  %s18_s14 = sshll.u32 %s15991_s0, 4  ;;  %s19_s14 = int_to_ptr.vmem [resolvable:$true] %s18_s14 }
   0x4   :  { %s14278_s15 = scalar_lea.vmem %s19_s14, 16  ;;  %p14283_p1 = scmp.lt.s32.totalorder %s19_s14, %s19_s14 }
   0x5   :  { %p14279_p0 = scmp.ne.s32.totalorder %s19_s14, %s14278_s15  ;;  %p14284_p2 = scmp.lt.s32.totalorder %s14278_s15, %s14278_s15 }
   0x7   :  { %p14285_p3 = por %p14284_p2, %p14283_p1 }
   0x9   :  { %p14286_p4 = pnand %p14285_p3, %p14279_p0 }
   0xb   :  { %14289 = shalt.err (!%p14286_p4)
}
   0xc   :  { %s14364_s16 = smov [#allocation3]   ;;  %s14365_s17 = smov [#allocation7]  }
   0xd   :  { %21 = dma.vmem_to_smem %s19_s14, 16, %s14364_s16, [#allocation6]  }
   0xe   :  { %s27_s18 = sshll.u32 %s14365_s17, 4  ;;  %s14290_s21 = scalar_lea.hbm %s15992_s1, 12672  ;;  %s28_s18 = int_to_ptr.vmem [resolvable:$true] %s27_s18 }
   0xf   :  { %p14291_p5 = scmp.ne.s32.totalorder %s15992_s1, %s14290_s21  ;;  %p14294_p6 = scmp.lt.u32.totalorder %s14290_s21, %s15992_s1 }
  0x11   :  { %p14296_p7 = pnand %p14294_p6, %p14291_p5 }
  0x13   :  { %14299 = shalt.err (!%p14296_p7)
}
  0x14   :  { %s14300_s25 = scalar_lea.vmem %s28_s18, 12672  ;;  %p14305_p9 = scmp.lt.s32.totalorder %s28_s18, %s28_s18 }
  0x15   :  { %p14301_p8 = scmp.ne.s32.totalorder %s28_s18, %s14300_s25  ;;  %p14306_p10 = scmp.lt.s32.totalorder %s14300_s25, %s14300_s25 }
  0x17   :  { %p14307_p11 = por %p14306_p10, %p14305_p9 }
  0x19   :  { %p14308_p12 = pnand %p14307_p11, %p14301_p8 }
  0x1b   :  { %14311 = shalt.err (!%p14308_p12)
}
  0x1c   :  { %s14366_s26 = smov 128   ;;  %s14367_s27 = smov 8  }
  0x1d   :  { %33 = dma.hbm_to_vmem [thread:$0]  %s15992_s1, 12672, %s28_s18, [#allocation4], %s14366_s26, %s14366_s26, %s14367_s27  }
  0x1e   :  { %s14368_s30 = smov [#allocation8]   ;;  %s14312_s7 = scalar_lea.hbm %s15993_s2, 1280 }
  0x1f   :  { %s39_s4 = sshll.u32 %s14368_s30, 4  ;;  %p14313_p13 = scmp.ne.s32.totalorder %s15993_s2, %s14312_s7  ;;  %s40_s4 = int_to_ptr.vmem [resolvable:$true] %s39_s4 }
  0x20   :  { %p14316_p0 = scmp.lt.u32.totalorder %s14312_s7, %s15993_s2 }
  0x22   :  { %p14318_p1 = pnand %p14316_p0, %p14313_p13 }
  0x24   :  { %14321 = shalt.err (!%p14318_p1)
}
  0x25   :  { %s14322_s12 = scalar_lea.vmem %s40_s4, 1280  ;;  %p14327_p3 = scmp.lt.s32.totalorder %s40_s4, %s40_s4 }
  0x26   :  { %p14323_p2 = scmp.ne.s32.totalorder %s40_s4, %s14322_s12  ;;  %p14328_p4 = scmp.lt.s32.totalorder %s14322_s12, %s14322_s12 }
  0x28   :  { %p14329_p5 = por %p14328_p4, %p14327_p3 }
  0x2a   :  { %p14330_p6 = pnand %p14329_p5, %p14323_p2 }
  0x2c   :  { %14333 = shalt.err (!%p14330_p6)
}
  0x2d   :  { %s14369_s1 = smov 256   ;;  %s14370_s13 = smov 16  }
  0x2e   :  { %45 = dma.hbm_to_vmem [thread:$0]  %s15993_s2, 1280, %s40_s4, [#allocation9], %s14369_s1, %s14369_s1, %s14370_s13  }
  0x2f   :  { %14356 = dma.done.wait [#allocation6], 16  }
  0x30   :  { %14357 = vsyncadd [#allocation6], 4294967280 }
  0x31   :  { %14358 = dma.done.wait [#allocation4], 12672  }
  0x32   :  { %14359 = vsyncadd [#allocation4], 4294954624 }
  0x33   :  { %14360 = dma.done.wait [#allocation9], 1280  }
  0x34   :  { %14361 = vsyncadd [#allocation9], 4294966016 }
  0x35   :  { %55 = sfence }
  0x36   :  { %v137_v0 = vld [vmem:[#allocation7 + $0x100] sm:$0xff]  ;;  %v138_v1 = vld [vmem:[#allocation7 + $0x108] sm:$0xff]  ;;  %v139_v2 = vld [vmem:[#allocation7 + $0x110] sm:$0xff]  ;;  %v14371_v3 = vmov 0.0|0.0   ;;  %vm14372_vm0 = vmmov 0   ;;  %v14373_v6 = vmov 0.0  }
  0x37   :  { %12851 = vmatprep.subr.bf16.mxu1 %v14371_v3  ;;  %v14428_v4 = vpack.c.bf16 %v138_v1, %v137_v0  ;;  %v140_v5 = vld [vmem:[#allocation7 + $0x118] sm:$0xff]  ;;  %11539 = vmatprep.mubr.msk.f32.mxu1 %vm14372_vm0, %v14373_v6  ;;  %s10725_s2 = sld [smem:[#allocation3 + $0x8]]  ;;  %vm65_vm1 = vcmask 1040384   ;;  %s14374_s19 = smov 32   ;;  %vm141_vm2 = vcmask 261120   ;;  %vm9360_vm3 = vcmask 253952  }
  0x38   :  { %12863 = vmatprep.subr.bf16.mxu0 %v14371_v3  ;;  %11561 = vmatprep.mubr.msk.f32.mxu0 %vm14372_vm0, %v14373_v6  ;;  %v14436_v7 = vpack.c.bf16 %v140_v5, %v139_v2  ;;  %s56_s16 = sld [smem:[#allocation3]]  ;;  %s14375_s20 = smov 64   ;;  %vm9362_vm4 = vcmask 254977  }
  0x39   :  { %12853 = vmatpush3.bf16.msra.mxu1 %v14428_v4  ;;  %12865 = vmatpush3.bf16.msra.mxu0 %v14428_v4  ;;  %s10727_s21 = sld [smem:[#allocation3 + $0x9]]  ;;  %s10729_s24 = sld [smem:[#allocation3 + $0xa]] }
  0x3a   :  { %12854 = vmatprep.subr.bf16.mxu1 %v14371_v3  ;;  %12866 = vmatprep.subr.bf16.mxu0 %v14371_v3  ;;  %s10726_s22 = sld [smem:[#allocation3 + $0x1]]  ;;  %s10728_s25 = sld [smem:[#allocation3 + $0x2]] }
  0x3b   :  { %s10731_s28 = sld [smem:[#allocation3 + $0xb]]  ;;  %s10733_s5 = sld [smem:[#allocation3 + $0xc]] }
  0x3c   :  { %s10730_s29 = sld [smem:[#allocation3 + $0x3]]  ;;  %s10732_s6 = sld [smem:[#allocation3 + $0x4]] }
  0x3d   :  { %12856 = vmatpush3.bf16.msra.mxu1 %v14436_v7  ;;  %12868 = vmatpush3.bf16.msra.mxu0 %v14436_v7  ;;  %s60_s17 = scalar_lea.vmem [#allocation7], %s10725_s2  ;;  %s10735_s9 = sld [smem:[#allocation3 + $0xd]] }
  0x3e   :  { %12857 = vmatprep.subr.bf16.mxu1 %v14371_v3  ;;  %12875 = vmatprep.subr.bf16.mxu0 %v14371_v3  ;;  %v61_v8 = vld [vmem:[%s60_s17] sm:$0x1]  ;;  %s57_s18 = scalar_lea.vmem [#allocation7], %s56_s16  ;;  %s10734_s10 = sld [smem:[#allocation3 + $0x5]] }
  0x3f   :  { %v63_v9 = vrot.slane %v61_v8, 7  ;;  %v58_v10 = vld [vmem:[%s57_s18] sm:$0x1]  ;;  %s71_s23 = scalar_lea.vmem [#allocation7], %s10727_s21  ;;  %s81_s26 = scalar_lea.vmem [#allocation7], %s10729_s24 }
  0x40   :  { %11540 = vmatmul.mubr.f32.vlgmr.msra.gmra.mrb[0].mxu1 %v14373_v6  ;;  %v72_v29 = vld [vmem:[%s71_s23] sm:$0x1]  ;;  %s68_s0 = scalar_lea.vmem [#allocation7], %s10726_s22  ;;  %s78_s27 = scalar_lea.vmem [#allocation7], %s10728_s25 }
  0x41   :  { %12859 = vmatpush3.bf16.msra.mxu1 %v14428_v4  ;;  %11550 = vmatprep.mubr.msk.f32.mxu1 %vm14372_vm0, %v14373_v6  ;;  %v66_v11 = vsel %vm65_vm1, %v58_v10, %v63_v9  ;;  %v74_v30 = vrot.slane %v72_v29, 7  ;;  %v69_v31 = vld [vmem:[%s68_s0] sm:$0x1]  ;;  %s91_s30 = scalar_lea.vmem [#allocation7], %s10731_s28  ;;  %s101_s7 = scalar_lea.vmem [#allocation7], %s10733_s5 }
  0x42   :  { %12860 = vmatprep.subr.bf16.mxu1 %v14371_v3  ;;  %v82_v50 = vld [vmem:[%s81_s26] sm:$0x1]  ;;  %s88_s4 = scalar_lea.vmem [#allocation7], %s10730_s29  ;;  %s98_s8 = scalar_lea.vmem [#allocation7], %s10732_s6 }
  0x43   :  { %v76_v32 = vsel %vm65_vm1, %v69_v31, %v74_v30  ;;  %v84_v51 = vrot.slane %v82_v50, 7  ;;  %v79_v52 = vld [vmem:[%s78_s27] sm:$0x1]  ;;  %s111_s11 = scalar_lea.vmem [#allocation7], %s10735_s9  ;;  %s10737_s14 = sld [smem:[#allocation3 + $0xe]] }
  0x44   :  { %s108_s12 = scalar_lea.vmem [#allocation7], %s10734_s10  ;;  %s10736_s15 = sld [smem:[#allocation3 + $0x6]] }
  0x45   :  { %12862 = vmatpush3.bf16.msra.mxu1 %v14436_v7  ;;  %v86_v53 = vsel %vm65_vm1, %v79_v52, %v84_v51  ;;  %s10739_s17 = sld [smem:[#allocation3 + $0xf]] }
  0x46   :  { %12869 = vmatprep.subr.bf16.mxu1 %v14371_v3  ;;  %s10738_s18 = sld [smem:[#allocation3 + $0x7]] }
  0x49   :  { %s121_s2 = scalar_lea.vmem [#allocation7], %s10737_s14 }
  0x4a   :  { %s118_s16 = scalar_lea.vmem [#allocation7], %s10736_s15 }
  0x4b   :  { %s131_s21 = scalar_lea.vmem [#allocation7], %s10739_s17 }
  0x4c   :  { %s128_s22 = scalar_lea.vmem [#allocation7], %s10738_s18 }
 0x113   :  { %v211_v12 = vpop.f32.mrb[0].mxu1 }
 0x114   :  { %v215_v13 = vadd.f32 %v211_v12, %v66_v11  ;;  %v11541_v14 = vpop.f32.mrb[1].mxu1  ;;  %v92_v11 = vld [vmem:[%s91_s30] sm:$0x1] }
 0x115   :  { %v94_v12 = vrot.slane %v92_v11, 7 }
 0x116   :  { %13760 = vtanh.f32 %v215_v13  ;;  %v10740_v16 = vmul.f32 -1.442695, %v215_v13  ;;  %v89_v13 = vld [vmem:[%s88_s4] sm:$0x1] }
 0x117   :  { %v96_v14 = vsel %vm65_vm1, %v89_v13, %v94_v12 }
 0x118   :  { %13762 = vpow2.f32 %v10740_v16 }
 0x120   :  { %v13761_v15 = vpop.eup %13760 }
 0x121   :  { %225 = vrot.lane.b32.xlu0 %v13761_v15, %s14374_s19 }
 0x122   :  { %v13763_v17 = vpop.eup %13762 }
 0x123   :  { %v219_v18 = vadd.f32 1.0, %v13763_v17 }
 0x125   :  { %13764 = vrcp.f32 %v219_v18 }
 0x12f   :  { %v13765_v19 = vpop.eup %13764 }
 0x130   :  { %v223_v22 = vmul.f32 0.0, %v13765_v19 }
 0x193   :  { %v226_v20 = vpop.permute.xlu0 %225 }
 0x194   :  { %v228_v21 = vmul.f32 %v13765_v19, %v226_v20 }
 0x196   :  { %230 = vrot.lane.b32.xlu0 %v228_v21, %s14374_s19 }
 0x208   :  { %v231_v23 = vpop.permute.xlu0 %230 }
 0x209   :  { %v233_v24 = vadd.f32 %v231_v23, %v223_v22 }
 0x20b   :  { %13766 = vtanh.f32 %v233_v24 }
 0x215   :  { %v13767_v25 = vpop.eup %13766 }
 0x216   :  { %236 = vrot.lane.b32.xlu1 %v13767_v25, %s14374_s19 }
 0x288   :  { %v237_v26 = vpop.permute.xlu1 %236 }
 0x289   :  { %v239_v27 = vmul.f32 %v13765_v19, %v237_v26 }
 0x28b   :  { %241 = vrot.lane.b32.xlu1 %v239_v27, %s14375_s20 }
 0x2fd   :  { %v14457_v28 = vpop.permute.xlu1 %241 }
 0x2fe   :  { %11551 = vmatmul.mubr.msk.f32.vlgmr.msra.gmra.mrb[2].mxu1 %vm141_vm2, %v14457_v28 }
 0x2ff   :  { %12871 = vmatpush3.bf16.msra.mxu1 %v14428_v4  ;;  %11572 = vmatprep.mubr.msk.f32.mxu1 %vm14372_vm0, %v14373_v6 }
 0x300   :  { %12872 = vmatprep.subr.bf16.mxu1 %v14371_v3 }
 0x303   :  { %12874 = vmatpush3.bf16.msra.mxu1 %v14436_v7 }
 0x304   :  { %12881 = vmatprep.subr.bf16.mxu1 %v14371_v3 }
 0x3d1   :  { %v311_v33 = vpop.f32.mrb[2].mxu1 }
 0x3d2   :  { %v315_v34 = vadd.f32 %v311_v33, %v76_v32  ;;  %v11552_v35 = vpop.f32.mrb[3].mxu1  ;;  %v102_v33 = vld [vmem:[%s101_s7] sm:$0x1] }
 0x3d3   :  { %v99_v35 = vld [vmem:[%s98_s8] sm:$0x1] }
 0x3d4   :  { %13768 = vtanh.f32 %v315_v34  ;;  %v10742_v37 = vmul.f32 -1.442695, %v315_v34  ;;  %v104_v34 = vrot.slane %v102_v33, 7 }
 0x3d6   :  { %13770 = vpow2.f32 %v10742_v37 }
 0x3de   :  { %v13769_v36 = vpop.eup %13768 }
 0x3df   :  { %325 = vrot.lane.b32.xlu0 %v13769_v36, %s14374_s19  ;;  %v106_v36 = vsel %vm65_vm1, %v99_v35, %v104_v34  ;;  %v14578_v35 = vld [vmem:[#allocation7 + $0x160] ss:$0 sm:$0xff] }
 0x3e0   :  { %v13771_v38 = vpop.eup %13770 }
 0x3e1   :  { %v319_v39 = vadd.f32 1.0, %v13771_v38 }
 0x3e3   :  { %13772 = vrcp.f32 %v319_v39 }
 0x3ed   :  { %v13773_v40 = vpop.eup %13772 }
 0x3ee   :  { %v323_v43 = vmul.f32 %v13773_v40, %v233_v24 }
 0x451   :  { %v326_v41 = vpop.permute.xlu0 %325 }
 0x452   :  { %v328_v42 = vmul.f32 %v13773_v40, %v326_v41 }
 0x454   :  { %330 = vrot.lane.b32.xlu1 %v328_v42, %s14374_s19 }
 0x4c6   :  { %v331_v44 = vpop.permute.xlu1 %330 }
 0x4c7   :  { %v333_v45 = vadd.f32 %v331_v44, %v323_v43 }
 0x4c9   :  { %13774 = vtanh.f32 %v333_v45 }
 0x4d3   :  { %v13775_v46 = vpop.eup %13774 }
 0x4d4   :  { %336 = vrot.lane.b32.xlu0 %v13775_v46, %s14374_s19 }
 0x546   :  { %v337_v47 = vpop.permute.xlu0 %336 }
 0x547   :  { %v339_v48 = vmul.f32 %v13773_v40, %v337_v47 }
 0x549   :  { %341 = vrot.lane.b32.xlu1 %v339_v48, %s14375_s20 }
 0x5bb   :  { %v14472_v49 = vpop.permute.xlu1 %341 }
 0x5bc   :  { %11562 = vmatmul.mubr.msk.f32.vlgmr.msra.gmra.mrb[0].mxu0 %vm141_vm2, %v14472_v49 }
 0x5bd   :  { %12877 = vmatpush3.bf16.msra.mxu0 %v14428_v4  ;;  %11583 = vmatprep.mubr.msk.f32.mxu0 %vm14372_vm0, %v14373_v6 }
 0x5be   :  { %12878 = vmatprep.subr.bf16.mxu0 %v14371_v3 }
 0x5c1   :  { %12880 = vmatpush3.bf16.msra.mxu0 %v14436_v7 }
 0x5c2   :  { %12887 = vmatprep.subr.bf16.mxu0 %v14371_v3 }
 0x68f   :  { %v411_v54 = vpop.f32.mrb[0].mxu0 }
 0x690   :  { %v415_v55 = vadd.f32 %v411_v54, %v86_v53  ;;  %v11563_v56 = vpop.f32.mrb[1].mxu0 }
 0x692   :  { %13776 = vtanh.f32 %v415_v55  ;;  %v10744_v58 = vmul.f32 -1.442695, %v415_v55  ;;  %v112_v55 = vld [vmem:[%s111_s11] sm:$0x1] }
 0x693   :  { %v114_v56 = vrot.slane %v112_v55, 7 }
 0x694   :  { %13778 = vpow2.f32 %v10744_v58 }
 0x69c   :  { %v13777_v57 = vpop.eup %13776 }
 0x69d   :  { %425 = vrot.lane.b32.xlu0 %v13777_v57, %s14374_s19  ;;  %v109_v57 = vld [vmem:[%s108_s12] sm:$0x1] }
 0x69e   :  { %v13779_v59 = vpop.eup %13778  ;;  %v116_v58 = vsel %vm65_vm1, %v109_v57, %v114_v56 }
 0x69f   :  { %v419_v60 = vadd.f32 1.0, %v13779_v59 }
 0x6a1   :  { %13780 = vrcp.f32 %v419_v60 }
 0x6ab   :  { %v13781_v61 = vpop.eup %13780 }
 0x6ac   :  { %v423_v0 = vmul.f32 %v13781_v61, %v333_v45 }
 0x70f   :  { %v426_v62 = vpop.permute.xlu0 %425 }
 0x710   :  { %v428_v63 = vmul.f32 %v13781_v61, %v426_v62 }
 0x712   :  { %430 = vrot.lane.b32.xlu1 %v428_v63, %s14374_s19 }
 0x784   :  { %v431_v1 = vpop.permute.xlu1 %430 }
 0x785   :  { %v433_v2 = vadd.f32 %v431_v1, %v423_v0 }
 0x787   :  { %13782 = vtanh.f32 %v433_v2 }
 0x791   :  { %v13783_v5 = vpop.eup %13782 }
 0x792   :  { %436 = vrot.lane.b32.xlu0 %v13783_v5, %s14374_s19 }
 0x804   :  { %v437_v8 = vpop.permute.xlu0 %436 }
 0x805   :  { %v439_v9 = vmul.f32 %v13781_v61, %v437_v8 }
 0x807   :  { %441 = vrot.lane.b32.xlu1 %v439_v9, %s14375_s20 }
 0x879   :  { %v14487_v10 = vpop.permute.xlu1 %441 }
 0x87a   :  { %11573 = vmatmul.mubr.msk.f32.vlgmr.msra.gmra.mrb[4].mxu1 %vm141_vm2, %v14487_v10 }
 0x87b   :  { %12883 = vmatpush3.bf16.msra.mxu1 %v14428_v4  ;;  %11594 = vmatprep.mubr.msk.f32.mxu1 %vm14372_vm0, %v14373_v6 }
 0x87c   :  { %12884 = vmatprep.subr.bf16.mxu1 %v14371_v3 }
 0x87f   :  { %12886 = vmatpush3.bf16.msra.mxu1 %v14436_v7 }
 0x880   :  { %12893 = vmatprep.subr.bf16.mxu1 %v14371_v3 }
 0x94d   :  { %v511_v15 = vpop.f32.mrb[4].mxu1 }
 0x94e   :  { %v515_v16 = vadd.f32 %v511_v15, %v96_v14  ;;  %v11574_v17 = vpop.f32.mrb[5].mxu1  ;;  %v940_v14 = vld [vmem:[#allocation7 + $0x120] sm:$0xff]  ;;  %v941_v15 = vld [vmem:[#allocation7 + $0x128] sm:$0xff] }
 0x94f   :  { %v942_v17 = vld [vmem:[#allocation7 + $0x130] sm:$0xff] }
 0x950   :  { %13784 = vtanh.f32 %v515_v16  ;;  %v10746_v19 = vmul.f32 -1.442695, %v515_v16  ;;  %v14535_v16 = vpack.c.bf16 %v941_v15, %v940_v14 }
 0x952   :  { %13786 = vpow2.f32 %v10746_v19 }
 0x95a   :  { %v13785_v18 = vpop.eup %13784 }
 0x95b   :  { %525 = vrot.lane.b32.xlu0 %v13785_v18, %s14374_s19  ;;  %v943_v18 = vld [vmem:[#allocation7 + $0x138] sm:$0xff] }
 0x95c   :  { %v13787_v20 = vpop.eup %13786 }
 0x95d   :  { %v519_v21 = vadd.f32 1.0, %v13787_v20  ;;  %v14542_v20 = vpack.c.bf16 %v943_v18, %v942_v17 }
 0x95f   :  { %13788 = vrcp.f32 %v519_v21  ;;  %v944_v21 = vld [vmem:[#allocation7 + $0x140] sm:$0xff] }
 0x969   :  { %v13789_v22 = vpop.eup %13788 }
 0x96a   :  { %v523_v25 = vmul.f32 %v13789_v22, %v433_v2 }
 0x9cd   :  { %v526_v23 = vpop.permute.xlu0 %525 }
 0x9ce   :  { %v528_v24 = vmul.f32 %v13789_v22, %v526_v23 }
 0x9d0   :  { %530 = vrot.lane.b32.xlu1 %v528_v24, %s14374_s19  ;;  %v946_v24 = vld [vmem:[#allocation7 + $0x150] sm:$0xff] }
 0xa42   :  { %v531_v26 = vpop.permute.xlu1 %530 }
 0xa43   :  { %v533_v27 = vadd.f32 %v531_v26, %v523_v25  ;;  %v947_v25 = vld [vmem:[#allocation7 + $0x158] sm:$0xff] }
 0xa44   :  { %v14554_v26 = vpack.c.bf16 %v947_v25, %v946_v24 }
 0xa45   :  { %13790 = vtanh.f32 %v533_v27 }
 0xa4f   :  { %v13791_v29 = vpop.eup %13790 }
 0xa50   :  { %536 = vrot.lane.b32.xlu0 %v13791_v29, %s14374_s19  ;;  %v119_v29 = vld [vmem:[%s118_s16] sm:$0x1] }
 0xac2   :  { %v537_v30 = vpop.permute.xlu0 %536 }
 0xac3   :  { %v539_v31 = vmul.f32 %v13789_v22, %v537_v30  ;;  %v945_v22 = vld [vmem:[#allocation7 + $0x148] sm:$0xff] }
 0xac4   :  { %v14548_v23 = vpack.c.bf16 %v945_v22, %v944_v21 }
 0xac5   :  { %541 = vrot.lane.b32.xlu1 %v539_v31, %s14375_s20 }
 0xb37   :  { %v14502_v32 = vpop.permute.xlu1 %541 }
 0xb38   :  { %11584 = vmatmul.mubr.msk.f32.vlgmr.msra.gmra.mrb[2].mxu0 %vm141_vm2, %v14502_v32 }
 0xb39   :  { %12889 = vmatpush3.bf16.msra.mxu0 %v14428_v4  ;;  %11605 = vmatprep.mubr.msk.f32.mxu0 %vm14372_vm0, %v14373_v6 }
 0xb3a   :  { %12890 = vmatprep.subr.bf16.mxu0 %v14371_v3 }
 0xb3d   :  { %12892 = vmatpush3.bf16.msra.mxu0 %v14436_v7 }
 0xb3e   :  { %12899 = vmatprep.subr.bf16.mxu0 %v14371_v3 }
 0xc0b   :  { %v611_v37 = vpop.f32.mrb[2].mxu0 }
 0xc0c   :  { %v615_v38 = vadd.f32 %v611_v37, %v106_v36  ;;  %v11585_v39 = vpop.f32.mrb[3].mxu0 }
 0xc0e   :  { %13792 = vtanh.f32 %v615_v38  ;;  %v10748_v41 = vmul.f32 -1.442695, %v615_v38 }
 0xc10   :  { %13794 = vpow2.f32 %v10748_v41 }
 0xc18   :  { %v13793_v40 = vpop.eup %13792 }
 0xc19   :  { %625 = vrot.lane.b32.xlu0 %v13793_v40, %s14374_s19 }
 0xc1a   :  { %v13795_v42 = vpop.eup %13794 }
 0xc1b   :  { %v619_v43 = vadd.f32 1.0, %v13795_v42 }
 0xc1d   :  { %13796 = vrcp.f32 %v619_v43 }
 0xc27   :  { %v13797_v44 = vpop.eup %13796 }
 0xc28   :  { %v623_v47 = vmul.f32 %v13797_v44, %v533_v27 }
 0xc8b   :  { %v626_v45 = vpop.permute.xlu0 %625 }
 0xc8c   :  { %v628_v46 = vmul.f32 %v13797_v44, %v626_v45 }
 0xc8e   :  { %630 = vrot.lane.b32.xlu1 %v628_v46, %s14374_s19 }
 0xd00   :  { %v631_v48 = vpop.permute.xlu1 %630 }
 0xd01   :  { %v633_v50 = vadd.f32 %v631_v48, %v623_v47 }
 0xd03   :  { %13798 = vtanh.f32 %v633_v50 }
 0xd0d   :  { %v13799_v51 = vpop.eup %13798 }
 0xd0e   :  { %636 = vrot.lane.b32.xlu0 %v13799_v51, %s14374_s19 }
 0xd80   :  { %v637_v52 = vpop.permute.xlu0 %636 }
 0xd81   :  { %v639_v53 = vmul.f32 %v13797_v44, %v637_v52 }
 0xd83   :  { %641 = vrot.lane.b32.xlu1 %v639_v53, %s14375_s20 }
 0xdf5   :  { %v14517_v54 = vpop.permute.xlu1 %641 }
 0xdf6   :  { %11595 = vmatmul.mubr.msk.f32.vlgmr.msra.gmra.mrb[6].mxu1 %vm141_vm2, %v14517_v54 }
 0xdf7   :  { %12895 = vmatpush3.bf16.msra.mxu1 %v14428_v4  ;;  %11616 = vmatprep.mubr.msk.f32.mxu1 %vm14372_vm0, %v14373_v6 }
 0xdf8   :  { %12896 = vmatprep.subr.bf16.mxu1 %v14371_v3 }
 0xdfb   :  { %12898 = vmatpush3.bf16.msra.mxu1 %v14436_v7 }
 0xdfc   :  { %12911 = vmatprep.subr.bf16.mxu1 %v14371_v3 }
 0xec9   :  { %v711_v59 = vpop.f32.mrb[6].mxu1 }
 0xeca   :  { %v715_v4 = vadd.f32 %v711_v59, %v116_v58  ;;  %v11596_v60 = vpop.f32.mrb[7].mxu1 }
 0xecc   :  { %13800 = vtanh.f32 %v715_v4  ;;  %v10750_v62 = vmul.f32 -1.442695, %v715_v4 }
 0xece   :  { %13802 = vpow2.f32 %v10750_v62 }
 0xed6   :  { %v13801_v61 = vpop.eup %13800 }
 0xed7   :  { %725 = vrot.lane.b32.xlu0 %v13801_v61, %s14374_s19 }
 0xed8   :  { %v13803_v7 = vpop.eup %13802 }
 0xed9   :  { %v719_v63 = vadd.f32 1.0, %v13803_v7 }
 0xedb   :  { %13804 = vrcp.f32 %v719_v63 }
 0xee5   :  { %v13805_v0 = vpop.eup %13804 }
 0xee6   :  { %v723_v5 = vmul.f32 %v13805_v0, %v633_v50 }
 0xf49   :  { %v726_v1 = vpop.permute.xlu0 %725 }
 0xf4a   :  { %v728_v2 = vmul.f32 %v13805_v0, %v726_v1 }
 0xf4c   :  { %730 = vrot.lane.b32.xlu1 %v728_v2, %s14374_s19 }
 0xfbe   :  { %v731_v8 = vpop.permute.xlu1 %730 }
 0xfbf   :  { %v14530_v9 = vadd.f32 %v731_v8, %v723_v5 }
 0xfc1   :  { %13806 = vtanh.f32 %v14530_v9 }
 0xfcb   :  { %v13807_v11 = vpop.eup %13806 }
 0xfcc   :  { %736 = vrot.lane.b32.xlu0 %v13807_v11, %s14374_s19 }
0x103e   :  { %v737_v12 = vpop.permute.xlu0 %736 }
0x103f   :  { %v739_v13 = vmul.f32 %v13805_v0, %v737_v12 }
0x1041   :  { %741 = vrot.lane.b32.xlu1 %v739_v13, %s14375_s20 }
0x10b3   :  { %v14537_v19 = vpop.permute.xlu1 %741 }
0x10b4   :  { %11606 = vmatmul.mubr.msk.f32.vlgmr.msra.gmra.mrb[4].mxu0 %vm141_vm2, %v14537_v19 }
0x10b5   :  { %12901 = vmatpush3.bf16.msra.mxu0 %v14535_v16  ;;  %11627 = vmatprep.mubr.msk.f32.mxu0 %vm14372_vm0, %v14373_v6 }
0x10b6   :  { %12902 = vmatprep.subr.bf16.mxu0 %v14371_v3 }
0x10b9   :  { %12904 = vmatpush3.bf16.msra.mxu0 %v14542_v20 }
0x10ba   :  { %12905 = vmatprep.subr.bf16.mxu0 %v14371_v3 }
0x10bc   :  { %11628 = vmatmul.mubr.msk.f32.vlgmr.msra.gmra.mrb[6].mxu0 %vm141_vm2, %v14457_v28  ;;  %v122_v28 = vld [vmem:[%s121_s2] sm:$0x1] }
0x10bd   :  { %12907 = vmatpush3.bf16.msra.mxu0 %v14548_v23  ;;  %11638 = vmatprep.mubr.msk.f32.mxu0 %vm14372_vm0, %v14373_v6  ;;  %v124_v27 = vrot.slane %v122_v28, 7 }
0x10be   :  { %12908 = vmatprep.subr.bf16.mxu0 %v14371_v3 }
0x10c1   :  { %12910 = vmatpush3.bf16.msra.mxu0 %v14554_v26 }
0x10c2   :  { %12923 = vmatprep.subr.bf16.mxu0 %v14371_v3 }
0x10c4   :  { %11639 = vmatmul.mubr.f32.vlgmr.msra.gmra.mrb[6].mxu0 %v14373_v6 }
0x10c5   :  { %12925 = vmatpush3.bf16.msra.mxu0 %v14535_v16  ;;  %11671 = vmatprep.mubr.msk.f32.mxu0 %vm14372_vm0, %v14373_v6 }
0x10c6   :  { %12926 = vmatprep.subr.bf16.mxu0 %v14371_v3 }
0x10c9   :  { %12928 = vmatpush3.bf16.msra.mxu0 %v14542_v20 }
0x10ca   :  { %12929 = vmatprep.subr.bf16.mxu0 %v14371_v3 }
0x10cc   :  { %11672 = vmatmul.mubr.msk.f32.vlgmr.msra.gmra.mrb[8].mxu0 %vm141_vm2, %v14487_v10  ;;  %v126_v10 = vsel %vm65_vm1, %v119_v29, %v124_v27 }
0x10cd   :  { %12931 = vmatpush3.bf16.msra.mxu0 %v14548_v23  ;;  %11682 = vmatprep.mubr.msk.f32.mxu0 %vm14372_vm0, %v14373_v6 }
0x10ce   :  { %12932 = vmatprep.subr.bf16.mxu0 %v14371_v3 }
0x10d1   :  { %12934 = vmatpush3.bf16.msra.mxu0 %v14554_v26 }
0x10d2   :  { %12947 = vmatprep.subr.bf16.mxu0 %v14371_v3 }
0x1187   :  { %v811_v30 = vpop.f32.mrb[4].mxu0 }
0x1188   :  { %v815_v31 = vadd.f32 %v811_v30, %v126_v10  ;;  %v11607_v33 = vpop.f32.mrb[5].mxu0 }
0x118a   :  { %13808 = vtanh.f32 %v815_v31  ;;  %v10752_v40 = vmul.f32 -1.442695, %v815_v31 }
0x1194   :  { %v13809_v34 = vpop.eup %13808 }
0x1195   :  { %825 = vrot.lane.b32.xlu0 %v13809_v34, %s14374_s19 }
0x1197   :  { %v1089_v36 = vpop.f32.mrb[6].mxu0 }
0x1198   :  { %v13579_v37 = vadd.f32 %v14578_v35, %v1089_v36  ;;  %v11640_v38 = vpop.f32.mrb[7].mxu0 }
0x119a   :  { %13810 = vtanh.f32 %v13579_v37  ;;  %v10757_v42 = vmul.f32 -1.442695, %v13579_v37 }
0x119b   :  { %13812 = vpow2.f32 %v10752_v40 }
0x119c   :  { %13814 = vpow2.f32 %v10757_v42 }
0x11a4   :  { %v13811_v39 = vpop.eup %13810 }
0x11a5   :  { %1103 = vrot.lane.b32.xlu1 %v13811_v39, %s14374_s19  ;;  %v13813_v41 = vpop.eup %13812 }
0x11a6   :  { %v819_v43 = vadd.f32 1.0, %v13813_v41  ;;  %v13815_v44 = vpop.eup %13814 }
0x11a7   :  { %v1097_v48 = vadd.f32 1.0, %v13815_v44 }
0x11a8   :  { %13816 = vrcp.f32 %v819_v43 }
0x11a9   :  { %13818 = vrcp.f32 %v1097_v48 }
0x11b2   :  { %v13817_v45 = vpop.eup %13816 }
0x11b3   :  { %v13819_v50 = vpop.eup %13818  ;;  %v823_v53 = vmul.f32 %v13817_v45, %v14530_v9 }
0x11b4   :  { %v1101_v58 = vmul.f32 0.0, %v13819_v50 }
0x1207   :  { %v826_v46 = vpop.permute.xlu0 %825 }
0x1208   :  { %v828_v47 = vmul.f32 %v13817_v45, %v826_v46 }
0x120a   :  { %830 = vrot.lane.b32.xlu0 %v828_v47, %s14374_s19 }
0x1217   :  { %v1104_v51 = vpop.permute.xlu1 %1103 }
0x1218   :  { %v1106_v52 = vmul.f32 %v13819_v50, %v1104_v51 }
0x121a   :  { %1108 = vrot.lane.b32.xlu1 %v1106_v52, %s14374_s19 }
0x127c   :  { %v831_v55 = vpop.permute.xlu0 %830 }
0x127d   :  { %v14585_v56 = vadd.f32 %v831_v55, %v823_v53 }
0x127f   :  { %13820 = vtanh.f32 %v14585_v56 }
0x1289   :  { %v13821_v57 = vpop.eup %13820 }
0x128a   :  { %836 = vrot.lane.b32.xlu0 %v13821_v57, %s14374_s19 }
0x128c   :  { %v1109_v59 = vpop.permute.xlu1 %1108 }
0x128d   :  { %v1111_v4 = vadd.f32 %v1109_v59, %v1101_v58 }
0x128f   :  { %13822 = vtanh.f32 %v1111_v4 }
0x1299   :  { %v13823_v60 = vpop.eup %13822 }
0x129a   :  { %1114 = vrot.lane.b32.xlu1 %v13823_v60, %s14374_s19 }
0x12fc   :  { %v837_v61 = vpop.permute.xlu0 %836 }
0x12fd   :  { %v839_v62 = vmul.f32 %v13817_v45, %v837_v61 }
0x12ff   :  { %841 = vrot.lane.b32.xlu0 %v839_v62, %s14375_s20 }
0x130c   :  { %v1115_v7 = vpop.permute.xlu1 %1114 }
0x130d   :  { %v1117_v63 = vmul.f32 %v13819_v50, %v1115_v7 }
0x130f   :  { %1189 = vrot.lane.b32.xlu1 %v1117_v63, %s14375_s20 }
0x1371   :  { %v14592_v0 = vpop.permute.xlu0 %841 }
0x1372   :  { %11617 = vmatmul.mubr.msk.f32.vlgmr.msra.gmra.mrb[8].mxu1 %vm141_vm2, %v14592_v0 }
0x1373   :  { %12913 = vmatpush3.bf16.msra.mxu1 %v14535_v16  ;;  %11649 = vmatprep.mubr.msk.f32.mxu1 %vm14372_vm0, %v14373_v6 }
0x1374   :  { %12914 = vmatprep.subr.bf16.mxu1 %v14371_v3 }
0x1377   :  { %12916 = vmatpush3.bf16.msra.mxu1 %v14542_v20 }
0x1378   :  { %12917 = vmatprep.subr.bf16.mxu1 %v14371_v3 }
0x137a   :  { %11650 = vmatmul.mubr.msk.f32.vlgmr.msra.gmra.mrb[10].mxu1 %vm141_vm2, %v14472_v49 }
0x137b   :  { %12919 = vmatpush3.bf16.msra.mxu1 %v14548_v23  ;;  %11660 = vmatprep.mubr.msk.f32.mxu1 %vm14372_vm0, %v14373_v6 }
0x137c   :  { %12920 = vmatprep.subr.bf16.mxu1 %v14371_v3 }
0x137f   :  { %12922 = vmatpush3.bf16.msra.mxu1 %v14554_v26 }
0x1380   :  { %12935 = vmatprep.subr.bf16.mxu1 %v14371_v3 }
0x1381   :  { %v14610_v1 = vpop.permute.xlu1 %1189 }
0x1382   :  { %11661 = vmatmul.mubr.msk.f32.vlgmr.msra.gmra.mrb[10].mxu1 %vm141_vm2, %v14610_v1 }
0x1383   :  { %12937 = vmatpush3.bf16.msra.mxu1 %v14535_v16  ;;  %11693 = vmatprep.mubr.msk.f32.mxu1 %vm14372_vm0, %v14373_v6 }
0x1384   :  { %12938 = vmatprep.subr.bf16.mxu1 %v14371_v3 }
0x1387   :  { %12940 = vmatpush3.bf16.msra.mxu1 %v14542_v20 }
0x1388   :  { %12941 = vmatprep.subr.bf16.mxu1 %v14371_v3 }
0x138a   :  { %11694 = vmatmul.mubr.msk.f32.vlgmr.msra.gmra.mrb[12].mxu1 %vm141_vm2, %v14502_v32 }
0x138b   :  { %12943 = vmatpush3.bf16.msra.mxu1 %v14548_v23  ;;  %11704 = vmatprep.mubr.msk.f32.mxu1 %vm14372_vm0, %v14373_v6 }
0x138c   :  { %12944 = vmatprep.subr.bf16.mxu1 %v14371_v3 }
0x138f   :  { %12946 = vmatpush3.bf16.msra.mxu1 %v14554_v26 }
0x1390   :  { %12959 = vmatprep.subr.bf16.mxu1 %v14371_v3 }
0x1445   :  { %v14628_v49 = vpop.f32.mrb[8].mxu1 }
0x1446   :  { %v11618_v2 = vpop.f32.mrb[9].mxu1 }
0x1455   :  { %v1259_v5 = vpop.f32.mrb[10].mxu1 }
0x1456   :  { %v13580_v8 = vadd.f32 %v14578_v35, %v1259_v5  ;;  %v11662_v9 = vpop.f32.mrb[11].mxu1 }
0x1458   :  { %13824 = vtanh.f32 %v13580_v8  ;;  %v10760_v11 = vmul.f32 -1.442695, %v13580_v8 }
0x145a   :  { %13826 = vpow2.f32 %v10760_v11 }
0x1462   :  { %v13825_v32 = vpop.eup %13824 }
0x1463   :  { %1273 = vrot.lane.b32.xlu0 %v13825_v32, %s14374_s19 }
0x1464   :  { %v13827_v12 = vpop.eup %13826 }
0x1465   :  { %v1267_v13 = vadd.f32 1.0, %v13827_v12 }
0x1467   :  { %13828 = vrcp.f32 %v1267_v13 }
0x1471   :  { %v13829_v14 = vpop.eup %13828 }
0x1472   :  { %v1271_v18 = vmul.f32 %v13829_v14, %v1111_v4 }
0x14d5   :  { %v1274_v15 = vpop.permute.xlu0 %1273 }
0x14d6   :  { %v1276_v17 = vmul.f32 %v13829_v14, %v1274_v15 }
0x14d8   :  { %1278 = vrot.lane.b32.xlu1 %v1276_v17, %s14374_s19 }
0x154a   :  { %v1279_v21 = vpop.permute.xlu1 %1278 }
0x154b   :  { %v1281_v22 = vadd.f32 %v1279_v21, %v1271_v18  ;;  %v132_v21 = vld [vmem:[%s131_s21] sm:$0x1] }
0x154d   :  { %13830 = vtanh.f32 %v1281_v22 }
0x1557   :  { %v13831_v24 = vpop.eup %13830 }
0x1558   :  { %1284 = vrot.lane.b32.xlu0 %v13831_v24, %s14374_s19  ;;  %v129_v24 = vld [vmem:[%s128_s22] sm:$0x1] }
0x15ca   :  { %v1285_v25 = vpop.permute.xlu0 %1284 }
0x15cb   :  { %v1287_v28 = vmul.f32 %v13829_v14, %v1285_v25 }
0x15cd   :  { %1359 = vrot.lane.b32.xlu1 %v1287_v28, %s14375_s20 }
0x163f   :  { %v14635_v27 = vpop.permute.xlu1 %1359 }
0x1640   :  { %11683 = vmatmul.mubr.msk.f32.vlgmr.msra.gmra.mrb[8].mxu0 %vm141_vm2, %v14635_v27 }
0x1641   :  { %12949 = vmatpush3.bf16.msra.mxu0 %v14535_v16  ;;  %11715 = vmatprep.mubr.msk.f32.mxu0 %vm14372_vm0, %v14373_v6 }
0x1642   :  { %12950 = vmatprep.subr.bf16.mxu0 %v14371_v3 }
0x1645   :  { %12952 = vmatpush3.bf16.msra.mxu0 %v14542_v20 }
0x1646   :  { %12953 = vmatprep.subr.bf16.mxu0 %v14371_v3 }
0x1648   :  { %11716 = vmatmul.mubr.msk.f32.vlgmr.msra.gmra.mrb[10].mxu0 %vm141_vm2, %v14517_v54 }
0x1649   :  { %12955 = vmatpush3.bf16.msra.mxu0 %v14548_v23  ;;  %11726 = vmatprep.mubr.msk.f32.mxu0 %vm14372_vm0, %v14373_v6 }
0x164a   :  { %12956 = vmatprep.subr.bf16.mxu0 %v14371_v3 }
0x164d   :  { %12958 = vmatpush3.bf16.msra.mxu0 %v14554_v26 }
0x164e   :  { %12971 = vmatprep.subr.bf16.mxu0 %v14371_v3 }
0x1713   :  { %v1429_v29 = vpop.f32.mrb[8].mxu0 }
0x1714   :  { %v13581_v10 = vadd.f32 %v14578_v35, %v1429_v29  ;;  %v11684_v30 = vpop.f32.mrb[9].mxu0 }
0x1716   :  { %13832 = vtanh.f32 %v13581_v10  ;;  %v10763_v54 = vmul.f32 -1.442695, %v13581_v10 }
0x1718   :  { %13834 = vpow2.f32 %v10763_v54 }
0x1720   :  { %v13833_v31 = vpop.eup %13832 }
0x1721   :  { %1443 = vrot.lane.b32.xlu0 %v13833_v31, %s14374_s19 }
0x1722   :  { %v13835_v33 = vpop.eup %13834 }
0x1723   :  { %v1437_v34 = vadd.f32 1.0, %v13835_v33 }
0x1725   :  { %13836 = vrcp.f32 %v1437_v34 }
0x172f   :  { %v13837_v36 = vpop.eup %13836 }
0x1730   :  { %v1441_v39 = vmul.f32 %v13837_v36, %v1281_v22  ;;  %v134_v22 = vrot.slane %v132_v21, 7 }
0x1732   :  { %v136_v25 = vsel %vm65_vm1, %v129_v24, %v134_v22 }
0x1733   :  { %v915_v28 = vadd.f32 %v14628_v49, %v136_v25 }
0x1735   :  { %v10754_v31 = vmul.f32 -1.442695, %v915_v28 }
0x1793   :  { %v1444_v37 = vpop.permute.xlu0 %1443 }
0x1794   :  { %v1446_v38 = vmul.f32 %v13837_v36, %v1444_v37 }
0x1796   :  { %1448 = vrot.lane.b32.xlu1 %v1446_v38, %s14374_s19 }
0x1808   :  { %v1449_v40 = vpop.permute.xlu1 %1448 }
0x1809   :  { %v1451_v41 = vadd.f32 %v1449_v40, %v1441_v39 }
0x180b   :  { %13838 = vtanh.f32 %v1451_v41 }
0x1815   :  { %v13839_v42 = vpop.eup %13838 }
0x1816   :  { %1454 = vrot.lane.b32.xlu0 %v13839_v42, %s14374_s19 }
0x1888   :  { %v1455_v43 = vpop.permute.xlu0 %1454 }
0x1889   :  { %v1457_v44 = vmul.f32 %v13837_v36, %v1455_v43 }
0x188b   :  { %1529 = vrot.lane.b32.xlu1 %v1457_v44, %s14375_s20 }
0x18fd   :  { %v14658_v45 = vpop.permute.xlu1 %1529 }
0x18fe   :  { %11705 = vmatmul.mubr.msk.f32.vlgmr.msra.gmra.mrb[12].mxu1 %vm141_vm2, %v14658_v45 }
0x18ff   :  { %12961 = vmatpush3.bf16.msra.mxu1 %v14535_v16  ;;  %11737 = vmatprep.mubr.msk.f32.mxu1 %vm14372_vm0, %v14373_v6 }
0x1900   :  { %12962 = vmatprep.subr.bf16.mxu1 %v14371_v3 }
0x1903   :  { %12964 = vmatpush3.bf16.msra.mxu1 %v14542_v20 }
0x1904   :  { %12965 = vmatprep.subr.bf16.mxu1 %v14371_v3 }
0x1906   :  { %11738 = vmatmul.mubr.msk.f32.vlgmr.msra.gmra.mrb[14].mxu1 %vm141_vm2, %v14537_v19 }
0x1907   :  { %12967 = vmatpush3.bf16.msra.mxu1 %v14548_v23  ;;  %11748 = vmatprep.mubr.msk.f32.mxu1 %vm14372_vm0, %v14373_v6 }
0x1908   :  { %12968 = vmatprep.subr.bf16.mxu1 %v14371_v3 }
0x190b   :  { %12970 = vmatpush3.bf16.msra.mxu1 %v14554_v26 }
0x190c   :  { %12983 = vmatprep.subr.bf16.mxu1 %v14371_v3 }
0x19d1   :  { %v1599_v46 = vpop.f32.mrb[12].mxu1 }
0x19d2   :  { %v13582_v47 = vadd.f32 %v14578_v35, %v1599_v46  ;;  %v11706_v48 = vpop.f32.mrb[13].mxu1 }
0x19d4   :  { %13840 = vtanh.f32 %v13582_v47  ;;  %v10766_v19 = vmul.f32 -1.442695, %v13582_v47 }
0x19d6   :  { %13842 = vpow2.f32 %v10766_v19 }
0x19de   :  { %v13841_v50 = vpop.eup %13840 }
0x19df   :  { %1613 = vrot.lane.b32.xlu0 %v13841_v50, %s14374_s19 }
0x19e0   :  { %v13843_v51 = vpop.eup %13842 }
0x19e1   :  { %v1607_v52 = vadd.f32 1.0, %v13843_v51 }
0x19e3   :  { %13844 = vrcp.f32 %v1607_v52 }
0x19ed   :  { %v13845_v53 = vpop.eup %13844 }
0x19ee   :  { %v1611_v58 = vmul.f32 %v13845_v53, %v1451_v41 }
0x1a51   :  { %v1614_v55 = vpop.permute.xlu0 %1613 }
0x1a52   :  { %v1616_v57 = vmul.f32 %v13845_v53, %v1614_v55 }
0x1a54   :  { %1618 = vrot.lane.b32.xlu1 %v1616_v57, %s14374_s19 }
0x1ac6   :  { %v1619_v59 = vpop.permute.xlu1 %1618 }
0x1ac7   :  { %v1621_v4 = vadd.f32 %v1619_v59, %v1611_v58 }
0x1ac9   :  { %13846 = vtanh.f32 %v1621_v4 }
0x1ad3   :  { %v13847_v60 = vpop.eup %13846 }
0x1ad4   :  { %1624 = vrot.lane.b32.xlu0 %v13847_v60, %s14374_s19  ;;  %v2314_v60 = vld [vmem:[#allocation7 + $0x170] sm:$0xff] }
0x1b46   :  { %v1625_v61 = vpop.permute.xlu0 %1624 }
0x1b47   :  { %v1627_v62 = vmul.f32 %v13845_v53, %v1625_v61 }
0x1b49   :  { %1699 = vrot.lane.b32.xlu1 %v1627_v62, %s14375_s20  ;;  %v2316_v62 = vld [vmem:[#allocation7 + $0x180] sm:$0xff] }
0x1bbb   :  { %v14681_v7 = vpop.permute.xlu1 %1699 }
0x1bbc   :  { %11727 = vmatmul.mubr.msk.f32.vlgmr.msra.gmra.mrb[10].mxu0 %vm141_vm2, %v14681_v7 }
0x1bbd   :  { %12973 = vmatpush3.bf16.msra.mxu0 %v14535_v16  ;;  %11759 = vmatprep.mubr.msk.f32.mxu0 %vm14372_vm0, %v14373_v6 }
0x1bbe   :  { %12974 = vmatprep.subr.bf16.mxu0 %v14371_v3 }
0x1bc1   :  { %12976 = vmatpush3.bf16.msra.mxu0 %v14542_v20 }
0x1bc2   :  { %12977 = vmatprep.subr.bf16.mxu0 %v14371_v3 }
0x1bc4   :  { %11760 = vmatmul.mubr.msk.f32.vlgmr.msra.gmra.mrb[12].mxu0 %vm141_vm2, %v14592_v0 }
0x1bc5   :  { %12979 = vmatpush3.bf16.msra.mxu0 %v14548_v23  ;;  %11770 = vmatprep.mubr.msk.f32.mxu0 %vm14372_vm0, %v14373_v6 }
0x1bc6   :  { %12980 = vmatprep.subr.bf16.mxu0 %v14371_v3 }
0x1bc9   :  { %12982 = vmatpush3.bf16.msra.mxu0 %v14554_v26 }
0x1bca   :  { %12995 = vmatprep.subr.bf16.mxu0 %v14371_v3 }
0x1c8f   :  { %v1769_v63 = vpop.f32.mrb[10].mxu0 }
0x1c90   :  { %v13583_v2 = vadd.f32 %v14578_v35, %v1769_v63  ;;  %v11728_v5 = vpop.f32.mrb[11].mxu0 }
0x1c91   :  { %v2317_v5 = vld [vmem:[#allocation7 + $0x188] sm:$0xff] }
0x1c92   :  { %13848 = vtanh.f32 %v13583_v2  ;;  %v10769_v0 = vmul.f32 -1.442695, %v13583_v2 }
0x1c94   :  { %13850 = vpow2.f32 %v10769_v0 }
0x1c9c   :  { %v13849_v8 = vpop.eup %13848 }
0x1c9d   :  { %1783 = vrot.lane.b32.xlu0 %v13849_v8, %s14374_s19  ;;  %v2318_v8 = vld [vmem:[#allocation7 + $0x190] sm:$0xff] }
0x1c9e   :  { %v13851_v9 = vpop.eup %13850  ;;  %v14756_v0 = vpack.c.bf16 %v2318_v8, %v2317_v5 }
0x1c9f   :  { %v1777_v32 = vadd.f32 1.0, %v13851_v9  ;;  %v2319_v9 = vld [vmem:[#allocation7 + $0x198] sm:$0xff] }
0x1ca1   :  { %13852 = vrcp.f32 %v1777_v32  ;;  %v2320_v32 = vld [vmem:[#allocation7 + $0x1a0] sm:$0xff] }
0x1cab   :  { %v13853_v11 = vpop.eup %13852 }
0x1cac   :  { %v1781_v14 = vmul.f32 %v13853_v11, %v1621_v4  ;;  %v2313_v4 = vld [vmem:[#allocation7 + $0x168] sm:$0xff] }
0x1cad   :  { %v14743_v61 = vpack.c.bf16 %v2314_v60, %v2313_v4 }
0x1d0f   :  { %v1784_v12 = vpop.permute.xlu0 %1783 }
0x1d10   :  { %v1786_v13 = vmul.f32 %v13853_v11, %v1784_v12 }
0x1d12   :  { %1788 = vrot.lane.b32.xlu1 %v1786_v13, %s14374_s19 }
0x1d84   :  { %v1789_v15 = vpop.permute.xlu1 %1788 }
0x1d85   :  { %v14702_v17 = vadd.f32 %v1789_v15, %v1781_v14 }
0x1d87   :  { %13854 = vtanh.f32 %v14702_v17 }
0x1d88   :  { %13856 = vtanh.f32 %v915_v28 }
0x1d89   :  { %13858 = vpow2.f32 %v10754_v31 }
0x1d91   :  { %v13855_v18 = vpop.eup %13854 }
0x1d92   :  { %1794 = vrot.lane.b32.xlu0 %v13855_v18, %s14374_s19  ;;  %v13857_v30 = vpop.eup %13856 }
0x1d93   :  { %v13859_v54 = vpop.eup %13858 }
0x1d94   :  { %v919_v33 = vadd.f32 1.0, %v13859_v54 }
0x1d96   :  { %13860 = vrcp.f32 %v919_v33 }
0x1da0   :  { %v13861_v49 = vpop.eup %13860 }
0x1da1   :  { %v923_v38 = vmul.f32 %v13861_v49, %v14585_v56 }
0x1e04   :  { %v1795_v29 = vpop.permute.xlu0 %1794 }
0x1e05   :  { %v1797_v10 = vmul.f32 %v13853_v11, %v1795_v29  ;;  %v14762_v11 = vpack.c.bf16 %v2320_v32, %v2319_v9 }
0x1e07   :  { %1869 = vrot.lane.b32.xlu1 %v1797_v10, %s14375_s20 }
0x1e0b   :  { %925 = vrot.lane.b32.xlu1 %v13857_v30, %s14374_s19 }
0x1e79   :  { %v14710_v34 = vpop.permute.xlu1 %1869 }
0x1e7a   :  { %11749 = vmatmul.mubr.msk.f32.vlgmr.msra.gmra.mrb[14].mxu1 %vm141_vm2, %v14710_v34 }
0x1e7b   :  { %12985 = vmatpush3.bf16.msra.mxu1 %v14535_v16  ;;  %11781 = vmatprep.mubr.msk.f32.mxu1 %vm14372_vm0, %v14373_v6 }
0x1e7c   :  { %12986 = vmatprep.subr.bf16.mxu1 %v14371_v3 }
0x1e7d   :  { %v926_v36 = vpop.permute.xlu1 %925 }
0x1e7e   :  { %v928_v37 = vmul.f32 %v13861_v49, %v926_v36 }
0x1e7f   :  { %12988 = vmatpush3.bf16.msra.mxu1 %v14542_v20 }
0x1e80   :  { %930 = vrot.lane.b32.xlu1 %v928_v37, %s14374_s19  ;;  %12989 = vmatprep.subr.bf16.mxu1 %v14371_v3 }
0x1ef2   :  { %v931_v39 = vpop.permute.xlu1 %930 }
0x1ef3   :  { %v14722_v40 = vadd.f32 %v931_v39, %v923_v38 }
0x1ef5   :  { %13862 = vtanh.f32 %v14722_v40 }
0x1eff   :  { %v13863_v16 = vpop.eup %13862 }
0x1f00   :  { %936 = vrot.lane.b32.xlu1 %v13863_v16, %s14374_s19 }
0x1f4d   :  { %v1939_v41 = vpop.f32.mrb[14].mxu1 }
0x1f4e   :  { %v13584_v42 = vadd.f32 %v14578_v35, %v1939_v41  ;;  %v11750_v43 = vpop.f32.mrb[15].mxu1 }
0x1f50   :  { %13864 = vtanh.f32 %v13584_v42  ;;  %v10772_v56 = vmul.f32 -1.442695, %v13584_v42 }
0x1f52   :  { %13866 = vpow2.f32 %v10772_v56 }
0x1f5a   :  { %v13865_v20 = vpop.eup %13864 }
0x1f5b   :  { %1953 = vrot.lane.b32.xlu0 %v13865_v20, %s14374_s19 }
0x1f5c   :  { %v13867_v47 = vpop.eup %13866 }
0x1f5d   :  { %v1947_v48 = vadd.f32 1.0, %v13867_v47 }
0x1f5f   :  { %13868 = vrcp.f32 %v1947_v48 }
0x1f69   :  { %v13869_v50 = vpop.eup %13868 }
0x1f6a   :  { %v1951_v53 = vmul.f32 %v13869_v50, %v14702_v17 }
0x1f72   :  { %v937_v44 = vpop.permute.xlu1 %936 }
0x1f73   :  { %v939_v46 = vmul.f32 %v13861_v49, %v937_v44 }
0x1f75   :  { %2139 = vrot.lane.b32.xlu1 %v939_v46, %s14375_s20 }
0x1fcd   :  { %v1954_v19 = vpop.permute.xlu0 %1953 }
0x1fce   :  { %v1956_v51 = vmul.f32 %v13869_v50, %v1954_v19 }
0x1fd0   :  { %1958 = vrot.lane.b32.xlu0 %v1956_v51, %s14374_s19 }
0x1fe7   :  { %v2140_v52 = vpop.permute.xlu1 %2139 }
0x1fe8   :  { %11782 = vmatmul.mubr.msk.f32.vlgmr.msra.gmra.mrb[16].mxu1 %vm141_vm2, %v2140_v52 }
0x1fe9   :  { %12991 = vmatpush3.bf16.msra.mxu1 %v14548_v23  ;;  %11792 = vmatprep.mubr.msk.f32.mxu1 %vm14372_vm0, %v14373_v6 }
0x1fea   :  { %12992 = vmatprep.subr.bf16.mxu1 %v14371_v3 }
0x1fed   :  { %12994 = vmatpush3.bf16.msra.mxu1 %v14554_v26  ;;  %v2315_v26 = vld [vmem:[#allocation7 + $0x178] sm:$0xff] }
0x1fee   :  { %13007 = vmatprep.subr.bf16.mxu1 %v14371_v3  ;;  %v14750_v2 = vpack.c.bf16 %v2316_v62, %v2315_v26 }
0x2042   :  { %v1959_v55 = vpop.permute.xlu0 %1958 }
0x2043   :  { %v14738_v57 = vadd.f32 %v1959_v55, %v1951_v53 }
0x2045   :  { %13870 = vtanh.f32 %v14738_v57 }
0x204f   :  { %v13871_v58 = vpop.eup %13870 }
0x2050   :  { %1964 = vrot.lane.b32.xlu0 %v13871_v58, %s14374_s19 }
0x20c2   :  { %v1965_v23 = vpop.permute.xlu0 %1964 }
0x20c3   :  { %v1967_v59 = vmul.f32 %v13869_v50, %v1965_v23 }
0x20c5   :  { %2039 = vrot.lane.b32.xlu0 %v1967_v59, %s14375_s20 }
0x2137   :  { %v14745_v63 = vpop.permute.xlu0 %2039 }
0x2138   :  { %11771 = vmatmul.mubr.msk.f32.vlgmr.msra.gmra.mrb[12].mxu0 %vm141_vm2, %v14745_v63 }
0x2139   :  { %12997 = vmatpush3.bf16.msra.mxu0 %v14743_v61  ;;  %11803 = vmatprep.mubr.msk.f32.mxu0 %vm14372_vm0, %v14373_v6 }
0x213a   :  { %12998 = vmatprep.subr.bf16.mxu0 %v14371_v3 }
0x213d   :  { %13000 = vmatpush3.bf16.msra.mxu0 %v14750_v2 }
0x213e   :  { %13001 = vmatprep.subr.bf16.mxu0 %v14371_v3 }
0x2140   :  { %11804 = vmatmul.mubr.msk.f32.vlgmr.msra.gmra.mrb[14].mxu0 %vm141_vm2, %v14610_v1 }
0x2141   :  { %13003 = vmatpush3.bf16.msra.mxu0 %v14756_v0  ;;  %11814 = vmatprep.mubr.msk.f32.mxu0 %vm14372_vm0, %v14373_v6 }
0x2142   :  { %13004 = vmatprep.subr.bf16.mxu0 %v14371_v3 }
0x2145   :  { %13006 = vmatpush3.bf16.msra.mxu0 %v14762_v11 }
0x2146   :  { %13019 = vmatprep.subr.bf16.mxu0 %v14371_v3 }
0x2148   :  { %11815 = vmatmul.mubr.msk.f32.vlgmr.msra.gmra.mrb[14].mxu0 %vm141_vm2, %v2140_v52 }
0x2149   :  { %13021 = vmatpush3.bf16.msra.mxu0 %v14743_v61  ;;  %11847 = vmatprep.mubr.msk.f32.mxu0 %vm14372_vm0, %v14373_v6 }
0x214a   :  { %13022 = vmatprep.subr.bf16.mxu0 %v14371_v3 }
0x214d   :  { %13024 = vmatpush3.bf16.msra.mxu0 %v14750_v2 }
0x214e   :  { %13025 = vmatprep.subr.bf16.mxu0 %v14371_v3 }
0x2150   :  { %11848 = vmatmul.mubr.msk.f32.vlgmr.msra.gmra.mrb[16].mxu0 %vm141_vm2, %v14658_v45  ;;  %v14786_v45 = vld [vmem:[#allocation7 + $0x1a8] ss:$0 sm:$0xff] }
0x2151   :  { %13027 = vmatpush3.bf16.msra.mxu0 %v14756_v0  ;;  %11858 = vmatprep.mubr.msk.f32.mxu0 %vm14372_vm0, %v14373_v6 }
0x2152   :  { %13028 = vmatprep.subr.bf16.mxu0 %v14371_v3 }
0x2155   :  { %13030 = vmatpush3.bf16.msra.mxu0 %v14762_v11 }
0x2156   :  { %13043 = vmatprep.subr.bf16.mxu0 %v14371_v3 }
0x220b   :  { %v2109_v1 = vpop.f32.mrb[12].mxu0 }
0x220c   :  { %v13585_v12 = vadd.f32 %v14578_v35, %v2109_v1  ;;  %v11772_v13 = vpop.f32.mrb[13].mxu0 }
0x220e   :  { %13872 = vtanh.f32 %v13585_v12  ;;  %v10775_v22 = vmul.f32 -1.442695, %v13585_v12 }
0x2218   :  { %v13873_v14 = vpop.eup %13872 }
0x2219   :  { %2123 = vrot.lane.b32.xlu0 %v13873_v14, %s14374_s19 }
0x221b   :  { %v2462_v15 = vpop.f32.mrb[14].mxu0 }
0x221c   :  { %v13587_v17 = vadd.f32 %v14786_v45, %v2462_v15  ;;  %v11816_v18 = vpop.f32.mrb[15].mxu0 }
0x221e   :  { %13874 = vtanh.f32 %v13587_v17  ;;  %v10782_v25 = vmul.f32 -1.442695, %v13587_v17 }
0x221f   :  { %13876 = vpow2.f32 %v10775_v22 }
0x2220   :  { %13878 = vpow2.f32 %v10782_v25 }
0x2228   :  { %v13875_v21 = vpop.eup %13874 }
0x2229   :  { %2476 = vrot.lane.b32.xlu1 %v13875_v21, %s14374_s19  ;;  %v13877_v24 = vpop.eup %13876 }
0x222a   :  { %v2117_v35 = vadd.f32 1.0, %v13877_v24  ;;  %v13879_v28 = vpop.eup %13878 }
0x222b   :  { %v2470_v31 = vadd.f32 1.0, %v13879_v28 }
0x222c   :  { %13880 = vrcp.f32 %v2117_v35 }
0x222d   :  { %13882 = vrcp.f32 %v2470_v31 }
0x2236   :  { %v13881_v29 = vpop.eup %13880 }
0x2237   :  { %v13883_v54 = vpop.eup %13882  ;;  %v2121_v36 = vmul.f32 %v13881_v29, %v14738_v57 }
0x2238   :  { %v2474_v16 = vmul.f32 %v13883_v54, %v14722_v40 }
0x228b   :  { %v2124_v10 = vpop.permute.xlu0 %2123 }
0x228c   :  { %v2126_v30 = vmul.f32 %v13881_v29, %v2124_v10 }
0x228e   :  { %2128 = vrot.lane.b32.xlu0 %v2126_v30, %s14374_s19 }
0x229b   :  { %v2477_v33 = vpop.permute.xlu1 %2476 }
0x229c   :  { %v2479_v49 = vmul.f32 %v13883_v54, %v2477_v33 }
0x229e   :  { %2481 = vrot.lane.b32.xlu1 %v2479_v49, %s14374_s19 }
0x2300   :  { %v2129_v37 = vpop.permute.xlu0 %2128 }
0x2301   :  { %v14793_v38 = vadd.f32 %v2129_v37, %v2121_v36 }
0x2303   :  { %13884 = vtanh.f32 %v14793_v38 }
0x230d   :  { %v13885_v39 = vpop.eup %13884 }
0x230e   :  { %2134 = vrot.lane.b32.xlu0 %v13885_v39, %s14374_s19 }
0x2310   :  { %v2482_v41 = vpop.permute.xlu1 %2481 }
0x2311   :  { %v2484_v42 = vadd.f32 %v2482_v41, %v2474_v16 }
0x2313   :  { %13886 = vtanh.f32 %v2484_v42 }
0x231d   :  { %v13887_v43 = vpop.eup %13886 }
0x231e   :  { %2487 = vrot.lane.b32.xlu1 %v13887_v43, %s14374_s19 }
0x2380   :  { %v2135_v20 = vpop.permute.xlu0 %2134 }
0x2381   :  { %v2137_v44 = vmul.f32 %v13881_v29, %v2135_v20 }
0x2383   :  { %2214 = vrot.lane.b32.xlu0 %v2137_v44, %s14375_s20 }
0x2390   :  { %v2488_v46 = vpop.permute.xlu1 %2487 }
0x2391   :  { %v2490_v56 = vmul.f32 %v13883_v54, %v2488_v46 }
0x2393   :  { %2562 = vrot.lane.b32.xlu1 %v2490_v56, %s14375_s20 }
0x23f5   :  { %v14801_v47 = vpop.permute.xlu0 %2214 }
0x23f6   :  { %11793 = vmatmul.mubr.msk.f32.vlgmr.msra.gmra.mrb[16].mxu1 %vm141_vm2, %v14801_v47 }
0x23f7   :  { %13009 = vmatpush3.bf16.msra.mxu1 %v14743_v61  ;;  %11825 = vmatprep.mubr.msk.f32.mxu1 %vm14372_vm0, %v14373_v6 }
0x23f8   :  { %13010 = vmatprep.subr.bf16.mxu1 %v14371_v3 }
0x23fb   :  { %13012 = vmatpush3.bf16.msra.mxu1 %v14750_v2 }
0x23fc   :  { %13013 = vmatprep.subr.bf16.mxu1 %v14371_v3 }
0x23fe   :  { %11826 = vmatmul.mubr.msk.f32.vlgmr.msra.gmra.mrb[18].mxu1 %vm141_vm2, %v14635_v27 }
0x23ff   :  { %13015 = vmatpush3.bf16.msra.mxu1 %v14756_v0  ;;  %11836 = vmatprep.mubr.msk.f32.mxu1 %vm14372_vm0, %v14373_v6 }
0x2400   :  { %13016 = vmatprep.subr.bf16.mxu1 %v14371_v3 }
0x2403   :  { %13018 = vmatpush3.bf16.msra.mxu1 %v14762_v11 }
0x2404   :  { %13031 = vmatprep.subr.bf16.mxu1 %v14371_v3 }
0x2405   :  { %v14819_v40 = vpop.permute.xlu1 %2562 }
0x2406   :  { %11837 = vmatmul.mubr.msk.f32.vlgmr.msra.gmra.mrb[18].mxu1 %vm141_vm2, %v14819_v40 }
0x2407   :  { %13033 = vmatpush3.bf16.msra.mxu1 %v14743_v61  ;;  %11869 = vmatprep.mubr.msk.f32.mxu1 %vm14372_vm0, %v14373_v6 }
0x2408   :  { %13034 = vmatprep.subr.bf16.mxu1 %v14371_v3 }
0x240b   :  { %13036 = vmatpush3.bf16.msra.mxu1 %v14750_v2 }
0x240c   :  { %13037 = vmatprep.subr.bf16.mxu1 %v14371_v3 }
0x240e   :  { %11870 = vmatmul.mubr.msk.f32.vlgmr.msra.gmra.mrb[20].mxu1 %vm141_vm2, %v14681_v7 }
0x240f   :  { %13039 = vmatpush3.bf16.msra.mxu1 %v14756_v0  ;;  %11880 = vmatprep.mubr.msk.f32.mxu1 %vm14372_vm0, %v14373_v6 }
0x2410   :  { %13040 = vmatprep.subr.bf16.mxu1 %v14371_v3 }
0x2413   :  { %13042 = vmatpush3.bf16.msra.mxu1 %v14762_v11 }
0x2414   :  { %13055 = vmatprep.subr.bf16.mxu1 %v14371_v3 }
0x24c9   :  { %v14837_v27 = vpop.f32.mrb[16].mxu1 }
0x24ca   :  { %v11794_v48 = vpop.f32.mrb[17].mxu1 }
0x24d9   :  { %v2632_v50 = vpop.f32.mrb[18].mxu1 }
0x24da   :  { %v13588_v19 = vadd.f32 %v14786_v45, %v2632_v50  ;;  %v11838_v51 = vpop.f32.mrb[19].mxu1 }
0x24dc   :  { %13888 = vtanh.f32 %v13588_v19  ;;  %v10785_v52 = vmul.f32 -1.442695, %v13588_v19 }
0x24de   :  { %13890 = vpow2.f32 %v10785_v52 }
0x24e6   :  { %v13889_v7 = vpop.eup %13888 }
0x24e7   :  { %2646 = vrot.lane.b32.xlu0 %v13889_v7, %s14374_s19 }
0x24e8   :  { %v13891_v53 = vpop.eup %13890 }
0x24e9   :  { %v2640_v55 = vadd.f32 1.0, %v13891_v53 }
0x24eb   :  { %13892 = vrcp.f32 %v2640_v55 }
0x24f5   :  { %v13893_v57 = vpop.eup %13892 }
0x24f6   :  { %v2644_v59 = vmul.f32 %v13893_v57, %v2484_v42 }
0x2559   :  { %v2647_v58 = vpop.permute.xlu0 %2646 }
0x255a   :  { %v2649_v23 = vmul.f32 %v13893_v57, %v2647_v58 }
0x255c   :  { %2651 = vrot.lane.b32.xlu1 %v2649_v23, %s14374_s19 }
0x25ce   :  { %v2652_v4 = vpop.permute.xlu1 %2651 }
0x25cf   :  { %v2654_v60 = vadd.f32 %v2652_v4, %v2644_v59  ;;  %v14272_v4 = vld [vmem:[#allocation7 + $0x160] ss:$0 sm:$0xff] }
0x25d1   :  { %13894 = vtanh.f32 %v2654_v60 }
0x25db   :  { %v13895_v26 = vpop.eup %13894 }
0x25dc   :  { %2657 = vrot.lane.b32.xlu0 %v13895_v26, %s14374_s19 }
0x264e   :  { %v2658_v62 = vpop.permute.xlu0 %2657 }
0x264f   :  { %v2660_v5 = vmul.f32 %v13893_v57, %v2658_v62 }
0x2651   :  { %2732 = vrot.lane.b32.xlu1 %v2660_v5, %s14375_s20 }
0x26c3   :  { %v14844_v8 = vpop.permute.xlu1 %2732 }
0x26c4   :  { %11859 = vmatmul.mubr.msk.f32.vlgmr.msra.gmra.mrb[16].mxu0 %vm141_vm2, %v14844_v8 }
0x26c5   :  { %13045 = vmatpush3.bf16.msra.mxu0 %v14743_v61  ;;  %11891 = vmatprep.mubr.msk.f32.mxu0 %vm14372_vm0, %v14373_v6 }
0x26c6   :  { %13046 = vmatprep.subr.bf16.mxu0 %v14371_v3 }
0x26c9   :  { %13048 = vmatpush3.bf16.msra.mxu0 %v14750_v2 }
0x26ca   :  { %13049 = vmatprep.subr.bf16.mxu0 %v14371_v3 }
0x26cc   :  { %11892 = vmatmul.mubr.msk.f32.vlgmr.msra.gmra.mrb[18].mxu0 %vm141_vm2, %v14710_v34 }
0x26cd   :  { %13051 = vmatpush3.bf16.msra.mxu0 %v14756_v0  ;;  %11902 = vmatprep.mubr.msk.f32.mxu0 %vm14372_vm0, %v14373_v6 }
0x26ce   :  { %13052 = vmatprep.subr.bf16.mxu0 %v14371_v3 }
0x26d1   :  { %13054 = vmatpush3.bf16.msra.mxu0 %v14762_v11 }
0x26d2   :  { %13067 = vmatprep.subr.bf16.mxu0 %v14371_v3 }
0x2797   :  { %v2802_v9 = vpop.f32.mrb[16].mxu0 }
0x2798   :  { %v13589_v32 = vadd.f32 %v14786_v45, %v2802_v9  ;;  %v11860_v1 = vpop.f32.mrb[17].mxu0 }
0x279a   :  { %13896 = vtanh.f32 %v13589_v32  ;;  %v10788_v34 = vmul.f32 -1.442695, %v13589_v32 }
0x279c   :  { %13898 = vpow2.f32 %v10788_v34 }
0x27a4   :  { %v13897_v12 = vpop.eup %13896 }
0x27a5   :  { %2816 = vrot.lane.b32.xlu0 %v13897_v12, %s14374_s19 }
0x27a6   :  { %v13899_v13 = vpop.eup %13898 }
0x27a7   :  { %v2810_v14 = vadd.f32 1.0, %v13899_v13 }
0x27a9   :  { %13900 = vrcp.f32 %v2810_v14 }
0x27b3   :  { %v13901_v15 = vpop.eup %13900 }
0x27b4   :  { %v2814_v21 = vmul.f32 %v13901_v15, %v2654_v60  ;;  %v13586_v60 = vadd.f32 %v14272_v4, %v14837_v27 }
0x27b6   :  { %v10778_v9 = vmul.f32 -1.442695, %v13586_v60 }
0x2817   :  { %v2817_v17 = vpop.permute.xlu0 %2816 }
0x2818   :  { %v2819_v18 = vmul.f32 %v13901_v15, %v2817_v17 }
0x281a   :  { %2821 = vrot.lane.b32.xlu1 %v2819_v18, %s14374_s19 }
0x288c   :  { %v2822_v22 = vpop.permute.xlu1 %2821 }
0x288d   :  { %v2824_v24 = vadd.f32 %v2822_v22, %v2814_v21 }
0x288f   :  { %13902 = vtanh.f32 %v2824_v24 }
0x2899   :  { %v13903_v25 = vpop.eup %13902 }
0x289a   :  { %2827 = vrot.lane.b32.xlu0 %v13903_v25, %s14374_s19 }
0x290c   :  { %v2828_v35 = vpop.permute.xlu0 %2827 }
0x290d   :  { %v2830_v28 = vmul.f32 %v13901_v15, %v2828_v35 }
0x290f   :  { %2902 = vrot.lane.b32.xlu1 %v2830_v28, %s14375_s20 }
0x2981   :  { %v14867_v29 = vpop.permute.xlu1 %2902 }
0x2982   :  { %11881 = vmatmul.mubr.msk.f32.vlgmr.msra.gmra.mrb[20].mxu1 %vm141_vm2, %v14867_v29 }
0x2983   :  { %13057 = vmatpush3.bf16.msra.mxu1 %v14743_v61  ;;  %11913 = vmatprep.mubr.msk.f32.mxu1 %vm14372_vm0, %v14373_v6 }
0x2984   :  { %13058 = vmatprep.subr.bf16.mxu1 %v14371_v3 }
0x2987   :  { %13060 = vmatpush3.bf16.msra.mxu1 %v14750_v2 }
0x2988   :  { %13061 = vmatprep.subr.bf16.mxu1 %v14371_v3 }
0x298a   :  { %11914 = vmatmul.mubr.msk.f32.vlgmr.msra.gmra.mrb[22].mxu1 %vm141_vm2, %v14745_v63 }
0x298b   :  { %13063 = vmatpush3.bf16.msra.mxu1 %v14756_v0  ;;  %11924 = vmatprep.mubr.msk.f32.mxu1 %vm14372_vm0, %v14373_v6 }
0x298c   :  { %13064 = vmatprep.subr.bf16.mxu1 %v14371_v3 }
0x298f   :  { %13066 = vmatpush3.bf16.msra.mxu1 %v14762_v11 }
0x2990   :  { %13079 = vmatprep.subr.bf16.mxu1 %v14371_v3 }
0x2a55   :  { %v2972_v10 = vpop.f32.mrb[20].mxu1 }
0x2a56   :  { %v13590_v30 = vadd.f32 %v14786_v45, %v2972_v10  ;;  %v11882_v31 = vpop.f32.mrb[21].mxu1 }
0x2a58   :  { %13904 = vtanh.f32 %v13590_v30  ;;  %v10791_v63 = vmul.f32 -1.442695, %v13590_v30 }
0x2a5a   :  { %13906 = vpow2.f32 %v10791_v63 }
0x2a62   :  { %v13905_v54 = vpop.eup %13904 }
0x2a63   :  { %2986 = vrot.lane.b32.xlu0 %v13905_v54, %s14374_s19 }
0x2a64   :  { %v13907_v33 = vpop.eup %13906 }
0x2a65   :  { %v2980_v49 = vadd.f32 1.0, %v13907_v33 }
0x2a67   :  { %13908 = vrcp.f32 %v2980_v49 }
0x2a71   :  { %v13909_v36 = vpop.eup %13908 }
0x2a72   :  { %v2984_v16 = vmul.f32 %v13909_v36, %v2824_v24 }
0x2ad5   :  { %v2987_v37 = vpop.permute.xlu0 %2986 }
0x2ad6   :  { %v2989_v39 = vmul.f32 %v13909_v36, %v2987_v37 }
0x2ad8   :  { %2991 = vrot.lane.b32.xlu1 %v2989_v39, %s14374_s19  ;;  %v3686_v39 = vld [vmem:[#allocation7 + $0x1b0] sm:$0xff] }
0x2b4a   :  { %v2992_v41 = vpop.permute.xlu1 %2991 }
0x2b4b   :  { %v2994_v42 = vadd.f32 %v2992_v41, %v2984_v16  ;;  %v3687_v16 = vld [vmem:[#allocation7 + $0x1b8] sm:$0xff] }
0x2b4c   :  { %v14947_v41 = vpack.c.bf16 %v3687_v16, %v3686_v39 }
0x2b4d   :  { %13910 = vtanh.f32 %v2994_v42 }
0x2b57   :  { %v13911_v43 = vpop.eup %13910 }
0x2b58   :  { %2997 = vrot.lane.b32.xlu0 %v13911_v43, %s14374_s19 }
0x2bca   :  { %v2998_v20 = vpop.permute.xlu0 %2997 }
0x2bcb   :  { %v3000_v44 = vmul.f32 %v13909_v36, %v2998_v20 }
0x2bcd   :  { %3072 = vrot.lane.b32.xlu1 %v3000_v44, %s14375_s20  ;;  %v3690_v44 = vld [vmem:[#allocation7 + $0x1d0] sm:$0xff] }
0x2c3f   :  { %v14890_v46 = vpop.permute.xlu1 %3072 }
0x2c40   :  { %11903 = vmatmul.mubr.msk.f32.vlgmr.msra.gmra.mrb[18].mxu0 %vm141_vm2, %v14890_v46 }
0x2c41   :  { %13069 = vmatpush3.bf16.msra.mxu0 %v14743_v61  ;;  %11935 = vmatprep.mubr.msk.f32.mxu0 %vm14372_vm0, %v14373_v6 }
0x2c42   :  { %13070 = vmatprep.subr.bf16.mxu0 %v14371_v3 }
0x2c45   :  { %13072 = vmatpush3.bf16.msra.mxu0 %v14750_v2 }
0x2c46   :  { %13073 = vmatprep.subr.bf16.mxu0 %v14371_v3 }
0x2c48   :  { %11936 = vmatmul.mubr.msk.f32.vlgmr.msra.gmra.mrb[20].mxu0 %vm141_vm2, %v14801_v47 }
0x2c49   :  { %13075 = vmatpush3.bf16.msra.mxu0 %v14756_v0  ;;  %11946 = vmatprep.mubr.msk.f32.mxu0 %vm14372_vm0, %v14373_v6 }
0x2c4a   :  { %13076 = vmatprep.subr.bf16.mxu0 %v14371_v3 }
0x2c4d   :  { %13078 = vmatpush3.bf16.msra.mxu0 %v14762_v11 }
0x2c4e   :  { %13091 = vmatprep.subr.bf16.mxu0 %v14371_v3 }
0x2d13   :  { %v3142_v56 = vpop.f32.mrb[18].mxu0 }
0x2d14   :  { %v13591_v48 = vadd.f32 %v14786_v45, %v3142_v56  ;;  %v11904_v50 = vpop.f32.mrb[19].mxu0  ;;  %v3691_v56 = vld [vmem:[#allocation7 + $0x1d8] sm:$0xff] }
0x2d15   :  { %v3692_v50 = vld [vmem:[#allocation7 + $0x1e0] sm:$0xff] }
0x2d16   :  { %13912 = vtanh.f32 %v13591_v48  ;;  %v10794_v47 = vmul.f32 -1.442695, %v13591_v48  ;;  %v14960_v48 = vpack.c.bf16 %v3691_v56, %v3690_v44 }
0x2d18   :  { %13914 = vpow2.f32 %v10794_v47 }
0x2d20   :  { %v13913_v19 = vpop.eup %13912 }
0x2d21   :  { %3156 = vrot.lane.b32.xlu0 %v13913_v19, %s14374_s19  ;;  %v3693_v19 = vld [vmem:[#allocation7 + $0x1e8] sm:$0xff] }
0x2d22   :  { %v13915_v51 = vpop.eup %13914  ;;  %v14966_v47 = vpack.c.bf16 %v3693_v19, %v3692_v50 }
0x2d23   :  { %v3150_v7 = vadd.f32 1.0, %v13915_v51 }
0x2d25   :  { %13916 = vrcp.f32 %v3150_v7 }
0x2d2f   :  { %v13917_v52 = vpop.eup %13916 }
0x2d30   :  { %v3154_v57 = vmul.f32 %v13917_v52, %v2994_v42  ;;  %v3689_v42 = vld [vmem:[#allocation7 + $0x1c8] sm:$0xff] }
0x2d93   :  { %v3157_v53 = vpop.permute.xlu0 %3156 }
0x2d94   :  { %v3159_v55 = vmul.f32 %v13917_v52, %v3157_v53 }
0x2d96   :  { %3161 = vrot.lane.b32.xlu1 %v3159_v55, %s14374_s19 }
0x2e08   :  { %v3162_v58 = vpop.permute.xlu1 %3161 }
0x2e09   :  { %v3164_v23 = vadd.f32 %v3162_v58, %v3154_v57 }
0x2e0b   :  { %13918 = vtanh.f32 %v3164_v23 }
0x2e0c   :  { %13920 = vtanh.f32 %v13586_v60 }
0x2e0d   :  { %13922 = vpow2.f32 %v10778_v9 }
0x2e15   :  { %v13919_v59 = vpop.eup %13918 }
0x2e16   :  { %3167 = vrot.lane.b32.xlu0 %v13919_v59, %s14374_s19  ;;  %v13921_v5 = vpop.eup %13920 }
0x2e17   :  { %v13923_v32 = vpop.eup %13922 }
0x2e18   :  { %v2292_v1 = vadd.f32 1.0, %v13923_v32 }
0x2e1a   :  { %13924 = vrcp.f32 %v2292_v1 }
0x2e24   :  { %v13925_v27 = vpop.eup %13924 }
0x2e25   :  { %v2296_v14 = vmul.f32 %v13925_v27, %v14793_v38 }
0x2e88   :  { %v3168_v26 = vpop.permute.xlu0 %3167 }
0x2e89   :  { %v3170_v62 = vmul.f32 %v13917_v52, %v3168_v26 }
0x2e8b   :  { %3242 = vrot.lane.b32.xlu1 %v3170_v62, %s14375_s20 }
0x2e8f   :  { %2298 = vrot.lane.b32.xlu1 %v13921_v5, %s14374_s19 }
0x2efd   :  { %v14915_v12 = vpop.permute.xlu1 %3242 }
0x2efe   :  { %11925 = vmatmul.mubr.msk.f32.vlgmr.msra.gmra.mrb[22].mxu1 %vm141_vm2, %v14915_v12 }
0x2eff   :  { %13081 = vmatpush3.bf16.msra.mxu1 %v14743_v61  ;;  %11957 = vmatprep.mubr.msk.f32.mxu1 %vm14372_vm0, %v14373_v6 }
0x2f00   :  { %13082 = vmatprep.subr.bf16.mxu1 %v14371_v3 }
0x2f01   :  { %v2299_v34 = vpop.permute.xlu1 %2298 }
0x2f02   :  { %v2301_v13 = vmul.f32 %v13925_v27, %v2299_v34 }
0x2f03   :  { %13084 = vmatpush3.bf16.msra.mxu1 %v14750_v2 }
0x2f04   :  { %2303 = vrot.lane.b32.xlu1 %v2301_v13, %s14374_s19  ;;  %13085 = vmatprep.subr.bf16.mxu1 %v14371_v3 }
0x2f76   :  { %v2304_v15 = vpop.permute.xlu1 %2303 }
0x2f77   :  { %v14927_v17 = vadd.f32 %v2304_v15, %v2296_v14 }
0x2f79   :  { %13926 = vtanh.f32 %v14927_v17 }
0x2f83   :  { %v13927_v61 = vpop.eup %13926 }
0x2f84   :  { %2309 = vrot.lane.b32.xlu1 %v13927_v61, %s14374_s19 }
0x2fd1   :  { %v3312_v18 = vpop.f32.mrb[22].mxu1 }
0x2fd2   :  { %v13592_v21 = vadd.f32 %v14786_v45, %v3312_v18  ;;  %v11926_v22 = vpop.f32.mrb[23].mxu1 }
0x2fd4   :  { %13928 = vtanh.f32 %v13592_v21  ;;  %v10797_v38 = vmul.f32 -1.442695, %v13592_v21 }
0x2fd6   :  { %13930 = vpow2.f32 %v10797_v38 }
0x2fde   :  { %v13929_v2 = vpop.eup %13928 }
0x2fdf   :  { %3326 = vrot.lane.b32.xlu0 %v13929_v2, %s14374_s19 }
0x2fe0   :  { %v13931_v35 = vpop.eup %13930 }
0x2fe1   :  { %v3320_v28 = vadd.f32 1.0, %v13931_v35 }
0x2fe3   :  { %13932 = vrcp.f32 %v3320_v28 }
0x2fed   :  { %v13933_v10 = vpop.eup %13932 }
0x2fee   :  { %v3324_v63 = vmul.f32 %v13933_v10, %v3164_v23 }
0x2ff6   :  { %v2310_v24 = vpop.permute.xlu1 %2309 }
0x2ff7   :  { %v2312_v25 = vmul.f32 %v13925_v27, %v2310_v24 }
0x2ff9   :  { %3512 = vrot.lane.b32.xlu1 %v2312_v25, %s14375_s20 }
0x3051   :  { %v3327_v30 = vpop.permute.xlu0 %3326 }
0x3052   :  { %v3329_v31 = vmul.f32 %v13933_v10, %v3327_v30 }
0x3054   :  { %3331 = vrot.lane.b32.xlu0 %v3329_v31, %s14374_s19 }
0x306b   :  { %v3513_v54 = vpop.permute.xlu1 %3512 }
0x306c   :  { %11958 = vmatmul.mubr.msk.f32.vlgmr.msra.gmra.mrb[24].mxu1 %vm141_vm2, %v3513_v54 }
0x306d   :  { %13087 = vmatpush3.bf16.msra.mxu1 %v14756_v0  ;;  %11968 = vmatprep.mubr.msk.f32.mxu1 %vm14372_vm0, %v14373_v6 }
0x306e   :  { %13088 = vmatprep.subr.bf16.mxu1 %v14371_v3 }
0x3071   :  { %13090 = vmatpush3.bf16.msra.mxu1 %v14762_v11  ;;  %v3688_v11 = vld [vmem:[#allocation7 + $0x1c0] sm:$0xff] }
0x3072   :  { %13103 = vmatprep.subr.bf16.mxu1 %v14371_v3  ;;  %v14954_v20 = vpack.c.bf16 %v3689_v42, %v3688_v11 }
0x30c6   :  { %v3332_v33 = vpop.permute.xlu0 %3331 }
0x30c7   :  { %v14942_v49 = vadd.f32 %v3332_v33, %v3324_v63 }
0x30c9   :  { %13934 = vtanh.f32 %v14942_v49 }
0x30d3   :  { %v13935_v36 = vpop.eup %13934 }
0x30d4   :  { %3337 = vrot.lane.b32.xlu0 %v13935_v36, %s14374_s19 }
0x3146   :  { %v3338_v37 = vpop.permute.xlu0 %3337 }
0x3147   :  { %v3340_v0 = vmul.f32 %v13933_v10, %v3338_v37 }
0x3149   :  { %3412 = vrot.lane.b32.xlu0 %v3340_v0, %s14375_s20 }
0x31bb   :  { %v14949_v43 = vpop.permute.xlu0 %3412 }
0x31bc   :  { %11947 = vmatmul.mubr.msk.f32.vlgmr.msra.gmra.mrb[20].mxu0 %vm141_vm2, %v14949_v43 }
0x31bd   :  { %13093 = vmatpush3.bf16.msra.mxu0 %v14947_v41  ;;  %11979 = vmatprep.mubr.msk.f32.mxu0 %vm14372_vm0, %v14373_v6 }
0x31be   :  { %13094 = vmatprep.subr.bf16.mxu0 %v14371_v3 }
0x31c1   :  { %13096 = vmatpush3.bf16.msra.mxu0 %v14954_v20 }
0x31c2   :  { %13097 = vmatprep.subr.bf16.mxu0 %v14371_v3 }
0x31c4   :  { %11980 = vmatmul.mubr.msk.f32.vlgmr.msra.gmra.mrb[22].mxu0 %vm141_vm2, %v14819_v40 }
0x31c5   :  { %13099 = vmatpush3.bf16.msra.mxu0 %v14960_v48  ;;  %11990 = vmatprep.mubr.msk.f32.mxu0 %vm14372_vm0, %v14373_v6 }
0x31c6   :  { %13100 = vmatprep.subr.bf16.mxu0 %v14371_v3 }
0x31c9   :  { %13102 = vmatpush3.bf16.msra.mxu0 %v14966_v47 }
0x31ca   :  { %13115 = vmatprep.subr.bf16.mxu0 %v14371_v3 }
0x31cc   :  { %11991 = vmatmul.mubr.msk.f32.vlgmr.msra.gmra.mrb[22].mxu0 %vm141_vm2, %v3513_v54 }
0x31cd   :  { %13117 = vmatpush3.bf16.msra.mxu0 %v14947_v41  ;;  %12023 = vmatprep.mubr.msk.f32.mxu0 %vm14372_vm0, %v14373_v6 }
0x31ce   :  { %13118 = vmatprep.subr.bf16.mxu0 %v14371_v3 }
0x31d1   :  { %13120 = vmatpush3.bf16.msra.mxu0 %v14954_v20 }
0x31d2   :  { %13121 = vmatprep.subr.bf16.mxu0 %v14371_v3 }
0x31d4   :  { %12024 = vmatmul.mubr.msk.f32.vlgmr.msra.gmra.mrb[24].mxu0 %vm141_vm2, %v14867_v29  ;;  %v14990_v29 = vld [vmem:[#allocation7 + $0x1f0] ss:$0 sm:$0xff] }
0x31d5   :  { %13123 = vmatpush3.bf16.msra.mxu0 %v14960_v48  ;;  %12034 = vmatprep.mubr.msk.f32.mxu0 %vm14372_vm0, %v14373_v6 }
0x31d6   :  { %13124 = vmatprep.subr.bf16.mxu0 %v14371_v3 }
0x31d9   :  { %13126 = vmatpush3.bf16.msra.mxu0 %v14966_v47 }
0x31da   :  { %13139 = vmatprep.subr.bf16.mxu0 %v14371_v3 }
0x328f   :  { %v3482_v40 = vpop.f32.mrb[20].mxu0 }
0x3290   :  { %v13593_v51 = vadd.f32 %v14786_v45, %v3482_v40  ;;  %v11948_v7 = vpop.f32.mrb[21].mxu0 }
0x3292   :  { %13936 = vtanh.f32 %v13593_v51  ;;  %v10800_v23 = vmul.f32 -1.442695, %v13593_v51 }
0x329c   :  { %v13937_v52 = vpop.eup %13936 }
0x329d   :  { %3496 = vrot.lane.b32.xlu0 %v13937_v52, %s14374_s19 }
0x329f   :  { %v3835_v53 = vpop.f32.mrb[22].mxu0 }
0x32a0   :  { %v13595_v55 = vadd.f32 %v14990_v29, %v3835_v53  ;;  %v11992_v57 = vpop.f32.mrb[23].mxu0 }
0x32a2   :  { %13938 = vtanh.f32 %v13595_v55  ;;  %v10807_v4 = vmul.f32 -1.442695, %v13595_v55 }
0x32a3   :  { %13940 = vpow2.f32 %v10800_v23 }
0x32a4   :  { %13942 = vpow2.f32 %v10807_v4 }
0x32ac   :  { %v13939_v58 = vpop.eup %13938 }
0x32ad   :  { %3849 = vrot.lane.b32.xlu1 %v13939_v58, %s14374_s19  ;;  %v13941_v59 = vpop.eup %13940 }
0x32ae   :  { %v3490_v45 = vadd.f32 1.0, %v13941_v59  ;;  %v13943_v60 = vpop.eup %13942 }
0x32af   :  { %v3843_v9 = vadd.f32 1.0, %v13943_v60 }
0x32b0   :  { %13944 = vrcp.f32 %v3490_v45 }
0x32b1   :  { %13946 = vrcp.f32 %v3843_v9 }
0x32ba   :  { %v13945_v26 = vpop.eup %13944 }
0x32bb   :  { %v13947_v32 = vpop.eup %13946  ;;  %v3494_v34 = vmul.f32 %v13945_v26, %v14942_v49 }
0x32bc   :  { %v3847_v61 = vmul.f32 %v13947_v32, %v14927_v17 }
0x330f   :  { %v3497_v62 = vpop.permute.xlu0 %3496 }
0x3310   :  { %v3499_v5 = vmul.f32 %v13945_v26, %v3497_v62 }
0x3312   :  { %3501 = vrot.lane.b32.xlu0 %v3499_v5, %s14374_s19 }
0x331f   :  { %v3850_v1 = vpop.permute.xlu1 %3849 }
0x3320   :  { %v3852_v27 = vmul.f32 %v13947_v32, %v3850_v1 }
0x3322   :  { %3854 = vrot.lane.b32.xlu1 %v3852_v27, %s14374_s19 }
0x3384   :  { %v3502_v13 = vpop.permute.xlu0 %3501 }
0x3385   :  { %v14997_v14 = vadd.f32 %v3502_v13, %v3494_v34 }
0x3387   :  { %13948 = vtanh.f32 %v14997_v14 }
0x3391   :  { %v13949_v15 = vpop.eup %13948 }
0x3392   :  { %3507 = vrot.lane.b32.xlu0 %v13949_v15, %s14374_s19 }
0x3394   :  { %v3855_v18 = vpop.permute.xlu1 %3854 }
0x3395   :  { %v3857_v21 = vadd.f32 %v3855_v18, %v3847_v61 }
0x3397   :  { %13950 = vtanh.f32 %v3857_v21 }
0x33a1   :  { %v13951_v22 = vpop.eup %13950 }
0x33a2   :  { %3860 = vrot.lane.b32.xlu1 %v13951_v22, %s14374_s19 }
0x3404   :  { %v3508_v2 = vpop.permute.xlu0 %3507 }
0x3405   :  { %v3510_v24 = vmul.f32 %v13945_v26, %v3508_v2 }
0x3407   :  { %3587 = vrot.lane.b32.xlu0 %v3510_v24, %s14375_s20 }
0x3414   :  { %v3861_v25 = vpop.permute.xlu1 %3860 }
0x3415   :  { %v3863_v38 = vmul.f32 %v13947_v32, %v3861_v25 }
0x3417   :  { %3935 = vrot.lane.b32.xlu1 %v3863_v38, %s14375_s20 }
0x3479   :  { %v15005_v35 = vpop.permute.xlu0 %3587 }
0x347a   :  { %11969 = vmatmul.mubr.msk.f32.vlgmr.msra.gmra.mrb[24].mxu1 %vm141_vm2, %v15005_v35 }
0x347b   :  { %13105 = vmatpush3.bf16.msra.mxu1 %v14947_v41  ;;  %12001 = vmatprep.mubr.msk.f32.mxu1 %vm14372_vm0, %v14373_v6 }
0x347c   :  { %13106 = vmatprep.subr.bf16.mxu1 %v14371_v3 }
0x347f   :  { %13108 = vmatpush3.bf16.msra.mxu1 %v14954_v20 }
0x3480   :  { %13109 = vmatprep.subr.bf16.mxu1 %v14371_v3 }
0x3482   :  { %12002 = vmatmul.mubr.msk.f32.vlgmr.msra.gmra.mrb[26].mxu1 %vm141_vm2, %v14844_v8 }
0x3483   :  { %13111 = vmatpush3.bf16.msra.mxu1 %v14960_v48  ;;  %12012 = vmatprep.mubr.msk.f32.mxu1 %vm14372_vm0, %v14373_v6 }
0x3484   :  { %13112 = vmatprep.subr.bf16.mxu1 %v14371_v3 }
0x3487   :  { %13114 = vmatpush3.bf16.msra.mxu1 %v14966_v47 }
0x3488   :  { %13127 = vmatprep.subr.bf16.mxu1 %v14371_v3 }
0x3489   :  { %v15023_v17 = vpop.permute.xlu1 %3935 }
0x348a   :  { %12013 = vmatmul.mubr.msk.f32.vlgmr.msra.gmra.mrb[26].mxu1 %vm141_vm2, %v15023_v17 }
0x348b   :  { %13129 = vmatpush3.bf16.msra.mxu1 %v14947_v41  ;;  %12045 = vmatprep.mubr.msk.f32.mxu1 %vm14372_vm0, %v14373_v6 }
0x348c   :  { %13130 = vmatprep.subr.bf16.mxu1 %v14371_v3 }
0x348f   :  { %13132 = vmatpush3.bf16.msra.mxu1 %v14954_v20 }
0x3490   :  { %13133 = vmatprep.subr.bf16.mxu1 %v14371_v3 }
0x3492   :  { %12046 = vmatmul.mubr.msk.f32.vlgmr.msra.gmra.mrb[28].mxu1 %vm141_vm2, %v14890_v46 }
0x3493   :  { %13135 = vmatpush3.bf16.msra.mxu1 %v14960_v48  ;;  %12056 = vmatprep.mubr.msk.f32.mxu1 %vm14372_vm0, %v14373_v6 }
0x3494   :  { %13136 = vmatprep.subr.bf16.mxu1 %v14371_v3 }
0x3497   :  { %13138 = vmatpush3.bf16.msra.mxu1 %v14966_v47 }
0x3498   :  { %13151 = vmatprep.subr.bf16.mxu1 %v14371_v3 }
0x354d   :  { %v15041_v8 = vpop.f32.mrb[24].mxu1 }
0x354e   :  { %v11970_v28 = vpop.f32.mrb[25].mxu1 }
0x355d   :  { %v4005_v10 = vpop.f32.mrb[26].mxu1 }
0x355e   :  { %v13596_v30 = vadd.f32 %v14990_v29, %v4005_v10  ;;  %v12014_v31 = vpop.f32.mrb[27].mxu1 }
0x3560   :  { %13952 = vtanh.f32 %v13596_v30  ;;  %v10810_v54 = vmul.f32 -1.442695, %v13596_v30 }
0x3562   :  { %13954 = vpow2.f32 %v10810_v54 }
0x356a   :  { %v13953_v46 = vpop.eup %13952 }
0x356b   :  { %4019 = vrot.lane.b32.xlu0 %v13953_v46, %s14374_s19 }
0x356c   :  { %v13955_v63 = vpop.eup %13954 }
0x356d   :  { %v4013_v33 = vadd.f32 1.0, %v13955_v63 }
0x356f   :  { %13956 = vrcp.f32 %v4013_v33 }
0x3579   :  { %v13957_v49 = vpop.eup %13956 }
0x357a   :  { %v4017_v0 = vmul.f32 %v13957_v49, %v3857_v21 }
0x35dd   :  { %v4020_v36 = vpop.permute.xlu0 %4019 }
0x35de   :  { %v4022_v37 = vmul.f32 %v13957_v49, %v4020_v36 }
0x35e0   :  { %4024 = vrot.lane.b32.xlu1 %v4022_v37, %s14374_s19 }
0x3652   :  { %v4025_v39 = vpop.permute.xlu1 %4024 }
0x3653   :  { %v4027_v16 = vadd.f32 %v4025_v39, %v4017_v0  ;;  %v14273_v39 = vld [vmem:[#allocation7 + $0x1a8] ss:$0 sm:$0xff] }
0x3655   :  { %13958 = vtanh.f32 %v4027_v16 }
0x365f   :  { %v13959_v11 = vpop.eup %13958 }
0x3660   :  { %4030 = vrot.lane.b32.xlu0 %v13959_v11, %s14374_s19 }
0x36d2   :  { %v4031_v42 = vpop.permute.xlu0 %4030 }
0x36d3   :  { %v4033_v44 = vmul.f32 %v13957_v49, %v4031_v42 }
0x36d5   :  { %4105 = vrot.lane.b32.xlu1 %v4033_v44, %s14375_s20 }
0x3747   :  { %v15048_v56 = vpop.permute.xlu1 %4105 }
0x3748   :  { %12035 = vmatmul.mubr.msk.f32.vlgmr.msra.gmra.mrb[24].mxu0 %vm141_vm2, %v15048_v56 }
0x3749   :  { %13141 = vmatpush3.bf16.msra.mxu0 %v14947_v41  ;;  %12067 = vmatprep.mubr.msk.f32.mxu0 %vm14372_vm0, %v14373_v6 }
0x374a   :  { %13142 = vmatprep.subr.bf16.mxu0 %v14371_v3 }
0x374d   :  { %13144 = vmatpush3.bf16.msra.mxu0 %v14954_v20 }
0x374e   :  { %13145 = vmatprep.subr.bf16.mxu0 %v14371_v3 }
0x3750   :  { %12068 = vmatmul.mubr.msk.f32.vlgmr.msra.gmra.mrb[26].mxu0 %vm141_vm2, %v14915_v12 }
0x3751   :  { %13147 = vmatpush3.bf16.msra.mxu0 %v14960_v48  ;;  %12078 = vmatprep.mubr.msk.f32.mxu0 %vm14372_vm0, %v14373_v6 }
0x3752   :  { %13148 = vmatprep.subr.bf16.mxu0 %v14371_v3 }
0x3755   :  { %13150 = vmatpush3.bf16.msra.mxu0 %v14966_v47 }
0x3756   :  { %13163 = vmatprep.subr.bf16.mxu0 %v14371_v3 }
0x381b   :  { %v4175_v50 = vpop.f32.mrb[24].mxu0 }
0x381c   :  { %v13597_v19 = vadd.f32 %v14990_v29, %v4175_v50  ;;  %v12036_v40 = vpop.f32.mrb[25].mxu0 }
0x381e   :  { %13960 = vtanh.f32 %v13597_v19  ;;  %v10813_v12 = vmul.f32 -1.442695, %v13597_v19 }
0x3820   :  { %13962 = vpow2.f32 %v10813_v12 }
0x3828   :  { %v13961_v51 = vpop.eup %13960 }
0x3829   :  { %4189 = vrot.lane.b32.xlu0 %v13961_v51, %s14374_s19 }
0x382a   :  { %v13963_v7 = vpop.eup %13962 }
0x382b   :  { %v4183_v52 = vadd.f32 1.0, %v13963_v7 }
0x382d   :  { %13964 = vrcp.f32 %v4183_v52 }
0x3837   :  { %v13965_v53 = vpop.eup %13964 }
0x3838   :  { %v4187_v58 = vmul.f32 %v13965_v53, %v4027_v16  ;;  %v13594_v16 = vadd.f32 %v14273_v39, %v15041_v8 }
0x383a   :  { %v10803_v50 = vmul.f32 -1.442695, %v13594_v16 }
0x389b   :  { %v4190_v55 = vpop.permute.xlu0 %4189 }
0x389c   :  { %v4192_v57 = vmul.f32 %v13965_v53, %v4190_v55 }
0x389e   :  { %4194 = vrot.lane.b32.xlu1 %v4192_v57, %s14374_s19 }
0x3910   :  { %v4195_v23 = vpop.permute.xlu1 %4194 }
0x3911   :  { %v4197_v59 = vadd.f32 %v4195_v23, %v4187_v58 }
0x3913   :  { %13966 = vtanh.f32 %v4197_v59 }
0x391d   :  { %v13967_v4 = vpop.eup %13966 }
0x391e   :  { %4200 = vrot.lane.b32.xlu0 %v13967_v4, %s14374_s19 }
0x3990   :  { %v4201_v45 = vpop.permute.xlu0 %4200 }
0x3991   :  { %v4203_v60 = vmul.f32 %v13965_v53, %v4201_v45 }
0x3993   :  { %4275 = vrot.lane.b32.xlu1 %v4203_v60, %s14375_s20 }
0x3a05   :  { %v15071_v26 = vpop.permute.xlu1 %4275 }
0x3a06   :  { %12057 = vmatmul.mubr.msk.f32.vlgmr.msra.gmra.mrb[28].mxu1 %vm141_vm2, %v15071_v26 }
0x3a07   :  { %13153 = vmatpush3.bf16.msra.mxu1 %v14947_v41  ;;  %12089 = vmatprep.mubr.msk.f32.mxu1 %vm14372_vm0, %v14373_v6 }
0x3a08   :  { %13154 = vmatprep.subr.bf16.mxu1 %v14371_v3 }
0x3a0b   :  { %13156 = vmatpush3.bf16.msra.mxu1 %v14954_v20 }
0x3a0c   :  { %13157 = vmatprep.subr.bf16.mxu1 %v14371_v3 }
0x3a0e   :  { %12090 = vmatmul.mubr.msk.f32.vlgmr.msra.gmra.mrb[30].mxu1 %vm141_vm2, %v14949_v43 }
0x3a0f   :  { %13159 = vmatpush3.bf16.msra.mxu1 %v14960_v48  ;;  %12100 = vmatprep.mubr.msk.f32.mxu1 %vm14372_vm0, %v14373_v6 }
0x3a10   :  { %13160 = vmatprep.subr.bf16.mxu1 %v14371_v3 }
0x3a13   :  { %13162 = vmatpush3.bf16.msra.mxu1 %v14966_v47 }
0x3a14   :  { %13175 = vmatprep.subr.bf16.mxu1 %v14371_v3 }
0x3ad9   :  { %v4345_v62 = vpop.f32.mrb[28].mxu1 }
0x3ada   :  { %v13598_v5 = vadd.f32 %v14990_v29, %v4345_v62  ;;  %v12058_v9 = vpop.f32.mrb[29].mxu1 }
0x3adc   :  { %13968 = vtanh.f32 %v13598_v5  ;;  %v10816_v43 = vmul.f32 -1.442695, %v13598_v5 }
0x3ade   :  { %13970 = vpow2.f32 %v10816_v43 }
0x3ae6   :  { %v13969_v32 = vpop.eup %13968 }
0x3ae7   :  { %4359 = vrot.lane.b32.xlu0 %v13969_v32, %s14374_s19 }
0x3ae8   :  { %v13971_v1 = vpop.eup %13970 }
0x3ae9   :  { %v4353_v27 = vadd.f32 1.0, %v13971_v1 }
0x3aeb   :  { %13972 = vrcp.f32 %v4353_v27 }
0x3af5   :  { %v13973_v34 = vpop.eup %13972 }
0x3af6   :  { %v4357_v61 = vmul.f32 %v13973_v34, %v4197_v59 }
0x3b59   :  { %v4360_v13 = vpop.permute.xlu0 %4359 }
0x3b5a   :  { %v4362_v15 = vmul.f32 %v13973_v34, %v4360_v13 }
0x3b5c   :  { %4364 = vrot.lane.b32.xlu1 %v4362_v15, %s14374_s19  ;;  %v5059_v15 = vld [vmem:[#allocation7 + $0x1f8] sm:$0xff] }
0x3bce   :  { %v4365_v18 = vpop.permute.xlu1 %4364 }
0x3bcf   :  { %v4367_v21 = vadd.f32 %v4365_v18, %v4357_v61  ;;  %v5060_v61 = vld [vmem:[#allocation7 + $0x200] sm:$0xff] }
0x3bd0   :  { %v15151_v18 = vpack.c.bf16 %v5060_v61, %v5059_v15 }
0x3bd1   :  { %13974 = vtanh.f32 %v4367_v21 }
0x3bdb   :  { %v13975_v22 = vpop.eup %13974 }
0x3bdc   :  { %4370 = vrot.lane.b32.xlu0 %v13975_v22, %s14374_s19 }
0x3c4e   :  { %v4371_v2 = vpop.permute.xlu0 %4370 }
0x3c4f   :  { %v4373_v24 = vmul.f32 %v13973_v34, %v4371_v2 }
0x3c51   :  { %4445 = vrot.lane.b32.xlu1 %v4373_v24, %s14375_s20  ;;  %v5063_v24 = vld [vmem:[#allocation7 + $0x218] sm:$0xff] }
0x3cc3   :  { %v15094_v25 = vpop.permute.xlu1 %4445 }
0x3cc4   :  { %12079 = vmatmul.mubr.msk.f32.vlgmr.msra.gmra.mrb[26].mxu0 %vm141_vm2, %v15094_v25 }
0x3cc5   :  { %13165 = vmatpush3.bf16.msra.mxu0 %v14947_v41  ;;  %12111 = vmatprep.mubr.msk.f32.mxu0 %vm14372_vm0, %v14373_v6 }
0x3cc6   :  { %13166 = vmatprep.subr.bf16.mxu0 %v14371_v3 }
0x3cc9   :  { %13168 = vmatpush3.bf16.msra.mxu0 %v14954_v20 }
0x3cca   :  { %13169 = vmatprep.subr.bf16.mxu0 %v14371_v3 }
0x3ccc   :  { %12112 = vmatmul.mubr.msk.f32.vlgmr.msra.gmra.mrb[28].mxu0 %vm141_vm2, %v15005_v35 }
0x3ccd   :  { %13171 = vmatpush3.bf16.msra.mxu0 %v14960_v48  ;;  %12122 = vmatprep.mubr.msk.f32.mxu0 %vm14372_vm0, %v14373_v6 }
0x3cce   :  { %13172 = vmatprep.subr.bf16.mxu0 %v14371_v3 }
0x3cd1   :  { %13174 = vmatpush3.bf16.msra.mxu0 %v14966_v47 }
0x3cd2   :  { %13187 = vmatprep.subr.bf16.mxu0 %v14371_v3 }
0x3d97   :  { %v4515_v38 = vpop.f32.mrb[26].mxu0 }
0x3d98   :  { %v13599_v28 = vadd.f32 %v14990_v29, %v4515_v38  ;;  %v12080_v10 = vpop.f32.mrb[27].mxu0  ;;  %v5064_v38 = vld [vmem:[#allocation7 + $0x220] sm:$0xff] }
0x3d99   :  { %v5065_v10 = vld [vmem:[#allocation7 + $0x228] sm:$0xff] }
0x3d9a   :  { %13976 = vtanh.f32 %v13599_v28  ;;  %v10819_v35 = vmul.f32 -1.442695, %v13599_v28  ;;  %v15164_v28 = vpack.c.bf16 %v5064_v38, %v5063_v24 }
0x3d9c   :  { %13978 = vpow2.f32 %v10819_v35 }
0x3da4   :  { %v13977_v30 = vpop.eup %13976 }
0x3da5   :  { %4529 = vrot.lane.b32.xlu0 %v13977_v30, %s14374_s19  ;;  %v5066_v30 = vld [vmem:[#allocation7 + $0x230] sm:$0xff] }
0x3da6   :  { %v13979_v31 = vpop.eup %13978  ;;  %v15170_v35 = vpack.c.bf16 %v5066_v30, %v5065_v10 }
0x3da7   :  { %v4523_v46 = vadd.f32 1.0, %v13979_v31 }
0x3da9   :  { %13980 = vrcp.f32 %v4523_v46 }
0x3db3   :  { %v13981_v54 = vpop.eup %13980 }
0x3db4   :  { %v4527_v49 = vmul.f32 %v13981_v54, %v4367_v21  ;;  %v5062_v21 = vld [vmem:[#allocation7 + $0x210] sm:$0xff] }
0x3e17   :  { %v4530_v63 = vpop.permute.xlu0 %4529 }
0x3e18   :  { %v4532_v33 = vmul.f32 %v13981_v54, %v4530_v63 }
0x3e1a   :  { %4534 = vrot.lane.b32.xlu1 %v4532_v33, %s14374_s19 }
0x3e8c   :  { %v4535_v36 = vpop.permute.xlu1 %4534 }
0x3e8d   :  { %v4537_v37 = vadd.f32 %v4535_v36, %v4527_v49 }
0x3e8f   :  { %13982 = vtanh.f32 %v4537_v37 }
0x3e90   :  { %13984 = vtanh.f32 %v13594_v16 }
0x3e91   :  { %13986 = vpow2.f32 %v10803_v50 }
0x3e99   :  { %v13983_v0 = vpop.eup %13982 }
0x3e9a   :  { %4540 = vrot.lane.b32.xlu0 %v13983_v0, %s14374_s19  ;;  %v13985_v44 = vpop.eup %13984 }
0x3e9b   :  { %v13987_v19 = vpop.eup %13986 }
0x3e9c   :  { %v3665_v40 = vadd.f32 1.0, %v13987_v19 }
0x3e9e   :  { %13988 = vrcp.f32 %v3665_v40 }
0x3ea8   :  { %v13989_v8 = vpop.eup %13988 }
0x3ea9   :  { %v3669_v52 = vmul.f32 %v13989_v8, %v14997_v14 }
0x3f0c   :  { %v4541_v11 = vpop.permute.xlu0 %4540 }
0x3f0d   :  { %v4543_v42 = vmul.f32 %v13981_v54, %v4541_v11 }
0x3f0f   :  { %4615 = vrot.lane.b32.xlu1 %v4543_v42, %s14375_s20 }
0x3f13   :  { %3671 = vrot.lane.b32.xlu1 %v13985_v44, %s14374_s19 }
0x3f81   :  { %v15119_v51 = vpop.permute.xlu1 %4615 }
0x3f82   :  { %12101 = vmatmul.mubr.msk.f32.vlgmr.msra.gmra.mrb[30].mxu1 %vm141_vm2, %v15119_v51 }
0x3f83   :  { %13177 = vmatpush3.bf16.msra.mxu1 %v14947_v41  ;;  %12133 = vmatprep.mubr.msk.f32.mxu1 %vm14372_vm0, %v14373_v6 }
0x3f84   :  { %13178 = vmatprep.subr.bf16.mxu1 %v14371_v3 }
0x3f85   :  { %v3672_v12 = vpop.permute.xlu1 %3671 }
0x3f86   :  { %v3674_v7 = vmul.f32 %v13989_v8, %v3672_v12 }
0x3f87   :  { %13180 = vmatpush3.bf16.msra.mxu1 %v14954_v20 }
0x3f88   :  { %3676 = vrot.lane.b32.xlu1 %v3674_v7, %s14374_s19  ;;  %13181 = vmatprep.subr.bf16.mxu1 %v14371_v3 }
0x3ffa   :  { %v3677_v53 = vpop.permute.xlu1 %3676 }
0x3ffb   :  { %v15131_v55 = vadd.f32 %v3677_v53, %v3669_v52 }
0x3ffd   :  { %13990 = vtanh.f32 %v15131_v55 }
0x4007   :  { %v13991_v41 = vpop.eup %13990 }
0x4008   :  { %3682 = vrot.lane.b32.xlu1 %v13991_v41, %s14374_s19 }
0x4055   :  { %v4685_v57 = vpop.f32.mrb[30].mxu1 }
0x4056   :  { %v13600_v58 = vadd.f32 %v14990_v29, %v4685_v57  ;;  %v12102_v23 = vpop.f32.mrb[31].mxu1 }
0x4058   :  { %13992 = vtanh.f32 %v13600_v58  ;;  %v10822_v14 = vmul.f32 -1.442695, %v13600_v58 }
0x405a   :  { %13994 = vpow2.f32 %v10822_v14 }
0x4062   :  { %v13993_v20 = vpop.eup %13992 }
0x4063   :  { %4699 = vrot.lane.b32.xlu0 %v13993_v20, %s14374_s19 }
0x4064   :  { %v13995_v45 = vpop.eup %13994 }
0x4065   :  { %v4693_v60 = vadd.f32 1.0, %v13995_v45 }
0x4067   :  { %13996 = vrcp.f32 %v4693_v60 }
0x4071   :  { %v13997_v62 = vpop.eup %13996 }
0x4072   :  { %v4697_v43 = vmul.f32 %v13997_v62, %v4537_v37 }
0x407a   :  { %v3683_v59 = vpop.permute.xlu1 %3682 }
0x407b   :  { %v3685_v4 = vmul.f32 %v13989_v8, %v3683_v59 }
0x407d   :  { %4885 = vrot.lane.b32.xlu1 %v3685_v4, %s14375_s20 }
0x40d5   :  { %v4700_v5 = vpop.permute.xlu0 %4699 }
0x40d6   :  { %v4702_v9 = vmul.f32 %v13997_v62, %v4700_v5 }
0x40d8   :  { %4704 = vrot.lane.b32.xlu0 %v4702_v9, %s14374_s19 }
0x40ef   :  { %v4886_v32 = vpop.permute.xlu1 %4885 }
0x40f0   :  { %12134 = vmatmul.mubr.msk.f32.vlgmr.msra.gmra.mrb[32].mxu1 %vm141_vm2, %v4886_v32 }
0x40f1   :  { %13183 = vmatpush3.bf16.msra.mxu1 %v14960_v48  ;;  %12144 = vmatprep.mubr.msk.f32.mxu1 %vm14372_vm0, %v14373_v6 }
0x40f2   :  { %13184 = vmatprep.subr.bf16.mxu1 %v14371_v3 }
0x40f5   :  { %13186 = vmatpush3.bf16.msra.mxu1 %v14966_v47  ;;  %v5061_v47 = vld [vmem:[#allocation7 + $0x208] sm:$0xff] }
0x40f6   :  { %13199 = vmatprep.subr.bf16.mxu1 %v14371_v3  ;;  %v15158_v2 = vpack.c.bf16 %v5062_v21, %v5061_v47 }
0x414a   :  { %v4705_v1 = vpop.permute.xlu0 %4704 }
0x414b   :  { %v15146_v27 = vadd.f32 %v4705_v1, %v4697_v43 }
0x414d   :  { %13998 = vtanh.f32 %v15146_v27 }
0x4157   :  { %v13999_v34 = vpop.eup %13998 }
0x4158   :  { %4710 = vrot.lane.b32.xlu0 %v13999_v34, %s14374_s19 }
0x41ca   :  { %v4711_v13 = vpop.permute.xlu0 %4710 }
0x41cb   :  { %v4713_v48 = vmul.f32 %v13997_v62, %v4711_v13 }
0x41cd   :  { %4785 = vrot.lane.b32.xlu0 %v4713_v48, %s14375_s20 }
0x423f   :  { %v15153_v22 = vpop.permute.xlu0 %4785 }
0x4240   :  { %12123 = vmatmul.mubr.msk.f32.vlgmr.msra.gmra.mrb[28].mxu0 %vm141_vm2, %v15153_v22 }
0x4241   :  { %13189 = vmatpush3.bf16.msra.mxu0 %v15151_v18  ;;  %12155 = vmatprep.mubr.msk.f32.mxu0 %vm14372_vm0, %v14373_v6 }
0x4242   :  { %13190 = vmatprep.subr.bf16.mxu0 %v14371_v3 }
0x4245   :  { %13192 = vmatpush3.bf16.msra.mxu0 %v15158_v2 }
0x4246   :  { %13193 = vmatprep.subr.bf16.mxu0 %v14371_v3 }
0x4248   :  { %12156 = vmatmul.mubr.msk.f32.vlgmr.msra.gmra.mrb[30].mxu0 %vm141_vm2, %v15023_v17 }
0x4249   :  { %13195 = vmatpush3.bf16.msra.mxu0 %v15164_v28  ;;  %12166 = vmatprep.mubr.msk.f32.mxu0 %vm14372_vm0, %v14373_v6 }
0x424a   :  { %13196 = vmatprep.subr.bf16.mxu0 %v14371_v3 }
0x424d   :  { %13198 = vmatpush3.bf16.msra.mxu0 %v15170_v35 }
0x424e   :  { %13211 = vmatprep.subr.bf16.mxu0 %v14371_v3 }
0x4250   :  { %12167 = vmatmul.mubr.msk.f32.vlgmr.msra.gmra.mrb[30].mxu0 %vm141_vm2, %v4886_v32 }
0x4251   :  { %13213 = vmatpush3.bf16.msra.mxu0 %v15151_v18  ;;  %12199 = vmatprep.mubr.msk.f32.mxu0 %vm14372_vm0, %v14373_v6 }
0x4252   :  { %13214 = vmatprep.subr.bf16.mxu0 %v14371_v3 }
0x4255   :  { %13216 = vmatpush3.bf16.msra.mxu0 %v15158_v2 }
0x4256   :  { %13217 = vmatprep.subr.bf16.mxu0 %v14371_v3 }
0x4258   :  { %12200 = vmatmul.mubr.msk.f32.vlgmr.msra.gmra.mrb[32].mxu0 %vm141_vm2, %v15071_v26  ;;  %v15194_v26 = vld [vmem:[#allocation7 + $0x238] ss:$0 sm:$0xff] }
0x4259   :  { %13219 = vmatpush3.bf16.msra.mxu0 %v15164_v28  ;;  %12210 = vmatprep.mubr.msk.f32.mxu0 %vm14372_vm0, %v14373_v6 }
0x425a   :  { %13220 = vmatprep.subr.bf16.mxu0 %v14371_v3 }
0x425d   :  { %13222 = vmatpush3.bf16.msra.mxu0 %v15170_v35 }
0x425e   :  { %13235 = vmatprep.subr.bf16.mxu0 %v14371_v3 }
0x4313   :  { %v4855_v17 = vpop.f32.mrb[28].mxu0 }
0x4314   :  { %v13601_v31 = vadd.f32 %v14990_v29, %v4855_v17  ;;  %v12124_v46 = vpop.f32.mrb[29].mxu0 }
0x4316   :  { %14000 = vtanh.f32 %v13601_v31  ;;  %v10825_v37 = vmul.f32 -1.442695, %v13601_v31 }
0x4320   :  { %v14001_v54 = vpop.eup %14000 }
0x4321   :  { %4869 = vrot.lane.b32.xlu0 %v14001_v54, %s14374_s19 }
0x4323   :  { %v5208_v63 = vpop.f32.mrb[30].mxu0 }
0x4324   :  { %v13603_v33 = vadd.f32 %v15194_v26, %v5208_v63  ;;  %v12168_v49 = vpop.f32.mrb[31].mxu0 }
0x4326   :  { %14002 = vtanh.f32 %v13603_v33  ;;  %v10832_v39 = vmul.f32 -1.442695, %v13603_v33 }
0x4327   :  { %14004 = vpow2.f32 %v10825_v37 }
0x4328   :  { %14006 = vpow2.f32 %v10832_v39 }
0x4330   :  { %v14003_v36 = vpop.eup %14002 }
0x4331   :  { %5222 = vrot.lane.b32.xlu1 %v14003_v36, %s14374_s19  ;;  %v14005_v0 = vpop.eup %14004 }
0x4332   :  { %v4863_v29 = vadd.f32 1.0, %v14005_v0  ;;  %v14007_v16 = vpop.eup %14006 }
0x4333   :  { %v5216_v50 = vadd.f32 1.0, %v14007_v16 }
0x4334   :  { %14008 = vrcp.f32 %v4863_v29 }
0x4335   :  { %14010 = vrcp.f32 %v5216_v50 }
0x433e   :  { %v14009_v11 = vpop.eup %14008 }
0x433f   :  { %v14011_v19 = vpop.eup %14010  ;;  %v4867_v12 = vmul.f32 %v14009_v11, %v15146_v27 }
0x4340   :  { %v5220_v41 = vmul.f32 %v14011_v19, %v15131_v55 }
0x4393   :  { %v4870_v42 = vpop.permute.xlu0 %4869 }
0x4394   :  { %v4872_v44 = vmul.f32 %v14009_v11, %v4870_v42 }
0x4396   :  { %4874 = vrot.lane.b32.xlu0 %v4872_v44, %s14374_s19 }
0x43a3   :  { %v5223_v40 = vpop.permute.xlu1 %5222 }
0x43a4   :  { %v5225_v8 = vmul.f32 %v14011_v19, %v5223_v40 }
0x43a6   :  { %5227 = vrot.lane.b32.xlu1 %v5225_v8, %s14374_s19 }
0x4408   :  { %v4875_v7 = vpop.permute.xlu0 %4874 }
0x4409   :  { %v15201_v52 = vadd.f32 %v4875_v7, %v4867_v12 }
0x440b   :  { %14012 = vtanh.f32 %v15201_v52 }
0x4415   :  { %v14013_v53 = vpop.eup %14012 }
0x4416   :  { %4880 = vrot.lane.b32.xlu0 %v14013_v53, %s14374_s19 }
0x4418   :  { %v5228_v57 = vpop.permute.xlu1 %5227 }
0x4419   :  { %v5230_v58 = vadd.f32 %v5228_v57, %v5220_v41 }
0x441b   :  { %14014 = vtanh.f32 %v5230_v58 }
0x4425   :  { %v14015_v23 = vpop.eup %14014 }
0x4426   :  { %5233 = vrot.lane.b32.xlu1 %v14015_v23, %s14374_s19 }
0x4488   :  { %v4881_v20 = vpop.permute.xlu0 %4880 }
0x4489   :  { %v4883_v59 = vmul.f32 %v14009_v11, %v4881_v20 }
0x448b   :  { %4960 = vrot.lane.b32.xlu0 %v4883_v59, %s14375_s20 }
0x4498   :  { %v5234_v4 = vpop.permute.xlu1 %5233 }
0x4499   :  { %v5236_v14 = vmul.f32 %v14011_v19, %v5234_v4 }
0x449b   :  { %5308 = vrot.lane.b32.xlu1 %v5236_v14, %s14375_s20 }
0x44fd   :  { %v15209_v45 = vpop.permute.xlu0 %4960 }
0x44fe   :  { %12145 = vmatmul.mubr.msk.f32.vlgmr.msra.gmra.mrb[32].mxu1 %vm141_vm2, %v15209_v45 }
0x44ff   :  { %13201 = vmatpush3.bf16.msra.mxu1 %v15151_v18  ;;  %12177 = vmatprep.mubr.msk.f32.mxu1 %vm14372_vm0, %v14373_v6 }
0x4500   :  { %13202 = vmatprep.subr.bf16.mxu1 %v14371_v3 }
0x4503   :  { %13204 = vmatpush3.bf16.msra.mxu1 %v15158_v2 }
0x4504   :  { %13205 = vmatprep.subr.bf16.mxu1 %v14371_v3 }
0x4506   :  { %12178 = vmatmul.mubr.msk.f32.vlgmr.msra.gmra.mrb[34].mxu1 %vm141_vm2, %v15048_v56 }
0x4507   :  { %13207 = vmatpush3.bf16.msra.mxu1 %v15164_v28  ;;  %12188 = vmatprep.mubr.msk.f32.mxu1 %vm14372_vm0, %v14373_v6 }
0x4508   :  { %13208 = vmatprep.subr.bf16.mxu1 %v14371_v3 }
0x450b   :  { %13210 = vmatpush3.bf16.msra.mxu1 %v15170_v35 }
0x450c   :  { %13223 = vmatprep.subr.bf16.mxu1 %v14371_v3 }
0x450d   :  { %v15227_v55 = vpop.permute.xlu1 %5308 }
0x450e   :  { %12189 = vmatmul.mubr.msk.f32.vlgmr.msra.gmra.mrb[34].mxu1 %vm141_vm2, %v15227_v55 }
0x450f   :  { %13225 = vmatpush3.bf16.msra.mxu1 %v15151_v18  ;;  %12221 = vmatprep.mubr.msk.f32.mxu1 %vm14372_vm0, %v14373_v6 }
0x4510   :  { %13226 = vmatprep.subr.bf16.mxu1 %v14371_v3 }
0x4513   :  { %13228 = vmatpush3.bf16.msra.mxu1 %v15158_v2 }
0x4514   :  { %13229 = vmatprep.subr.bf16.mxu1 %v14371_v3 }
0x4516   :  { %12222 = vmatmul.mubr.msk.f32.vlgmr.msra.gmra.mrb[36].mxu1 %vm141_vm2, %v15094_v25 }
0x4517   :  { %13231 = vmatpush3.bf16.msra.mxu1 %v15164_v28  ;;  %12232 = vmatprep.mubr.msk.f32.mxu1 %vm14372_vm0, %v14373_v6 }
0x4518   :  { %13232 = vmatprep.subr.bf16.mxu1 %v14371_v3 }
0x451b   :  { %13234 = vmatpush3.bf16.msra.mxu1 %v15170_v35 }
0x451c   :  { %13247 = vmatprep.subr.bf16.mxu1 %v14371_v3 }
0x45d1   :  { %v15245_v56 = vpop.f32.mrb[32].mxu1 }
0x45d2   :  { %v12146_v60 = vpop.f32.mrb[33].mxu1 }
0x45e1   :  { %v5378_v62 = vpop.f32.mrb[34].mxu1 }
0x45e2   :  { %v13604_v5 = vadd.f32 %v15194_v26, %v5378_v62  ;;  %v12190_v9 = vpop.f32.mrb[35].mxu1 }
0x45e4   :  { %14016 = vtanh.f32 %v13604_v5  ;;  %v10835_v32 = vmul.f32 -1.442695, %v13604_v5 }
0x45e6   :  { %14018 = vpow2.f32 %v10835_v32 }
0x45ee   :  { %v14017_v25 = vpop.eup %14016 }
0x45ef   :  { %5392 = vrot.lane.b32.xlu0 %v14017_v25, %s14374_s19 }
0x45f0   :  { %v14019_v43 = vpop.eup %14018 }
0x45f1   :  { %v5386_v1 = vadd.f32 1.0, %v14019_v43 }
0x45f3   :  { %14020 = vrcp.f32 %v5386_v1 }
0x45fd   :  { %v14021_v27 = vpop.eup %14020 }
0x45fe   :  { %v5390_v48 = vmul.f32 %v14021_v27, %v5230_v58 }
0x4661   :  { %v5393_v34 = vpop.permute.xlu0 %5392 }
0x4662   :  { %v5395_v13 = vmul.f32 %v14021_v27, %v5393_v34 }
0x4664   :  { %5397 = vrot.lane.b32.xlu1 %v5395_v13, %s14374_s19 }
0x46d6   :  { %v5398_v15 = vpop.permute.xlu1 %5397 }
0x46d7   :  { %v5400_v61 = vadd.f32 %v5398_v15, %v5390_v48  ;;  %v14274_v15 = vld [vmem:[#allocation7 + $0x1f0] ss:$0 sm:$0xff] }
0x46d9   :  { %14022 = vtanh.f32 %v5400_v61 }
0x46e3   :  { %v14023_v47 = vpop.eup %14022 }
0x46e4   :  { %5403 = vrot.lane.b32.xlu0 %v14023_v47, %s14374_s19 }
0x4756   :  { %v5404_v21 = vpop.permute.xlu0 %5403 }
0x4757   :  { %v5406_v24 = vmul.f32 %v14021_v27, %v5404_v21 }
0x4759   :  { %5478 = vrot.lane.b32.xlu1 %v5406_v24, %s14375_s20 }
0x47cb   :  { %v15252_v38 = vpop.permute.xlu1 %5478 }
0x47cc   :  { %12211 = vmatmul.mubr.msk.f32.vlgmr.msra.gmra.mrb[32].mxu0 %vm141_vm2, %v15252_v38 }
0x47cd   :  { %13237 = vmatpush3.bf16.msra.mxu0 %v15151_v18  ;;  %12243 = vmatprep.mubr.msk.f32.mxu0 %vm14372_vm0, %v14373_v6 }
0x47ce   :  { %13238 = vmatprep.subr.bf16.mxu0 %v14371_v3 }
0x47d1   :  { %13240 = vmatpush3.bf16.msra.mxu0 %v15158_v2 }
0x47d2   :  { %13241 = vmatprep.subr.bf16.mxu0 %v14371_v3 }
0x47d4   :  { %12244 = vmatmul.mubr.msk.f32.vlgmr.msra.gmra.mrb[34].mxu0 %vm141_vm2, %v15119_v51 }
0x47d5   :  { %13243 = vmatpush3.bf16.msra.mxu0 %v15164_v28  ;;  %12254 = vmatprep.mubr.msk.f32.mxu0 %vm14372_vm0, %v14373_v6 }
0x47d6   :  { %13244 = vmatprep.subr.bf16.mxu0 %v14371_v3 }
0x47d9   :  { %13246 = vmatpush3.bf16.msra.mxu0 %v15170_v35 }
0x47da   :  { %13259 = vmatprep.subr.bf16.mxu0 %v14371_v3 }
0x489f   :  { %v5548_v10 = vpop.f32.mrb[32].mxu0 }
0x48a0   :  { %v13605_v30 = vadd.f32 %v15194_v26, %v5548_v10  ;;  %v12212_v17 = vpop.f32.mrb[33].mxu0 }
0x48a2   :  { %14024 = vtanh.f32 %v13605_v30  ;;  %v10838_v51 = vmul.f32 -1.442695, %v13605_v30 }
0x48a4   :  { %14026 = vpow2.f32 %v10838_v51 }
0x48ac   :  { %v14025_v31 = vpop.eup %14024 }
0x48ad   :  { %5562 = vrot.lane.b32.xlu0 %v14025_v31, %s14374_s19 }
0x48ae   :  { %v14027_v46 = vpop.eup %14026 }
0x48af   :  { %v5556_v54 = vadd.f32 1.0, %v14027_v46 }
0x48b1   :  { %14028 = vrcp.f32 %v5556_v54 }
0x48bb   :  { %v14029_v63 = vpop.eup %14028 }
0x48bc   :  { %v5560_v36 = vmul.f32 %v14029_v63, %v5400_v61  ;;  %v13602_v61 = vadd.f32 %v14274_v15, %v15245_v56 }
0x48be   :  { %v10828_v10 = vmul.f32 -1.442695, %v13602_v61 }
0x491f   :  { %v5563_v33 = vpop.permute.xlu0 %5562 }
0x4920   :  { %v5565_v49 = vmul.f32 %v14029_v63, %v5563_v33 }
0x4922   :  { %5567 = vrot.lane.b32.xlu1 %v5565_v49, %s14374_s19 }
0x4994   :  { %v5568_v37 = vpop.permute.xlu1 %5567 }
0x4995   :  { %v5570_v0 = vadd.f32 %v5568_v37, %v5560_v36 }
0x4997   :  { %14030 = vtanh.f32 %v5570_v0 }
0x49a1   :  { %v14031_v39 = vpop.eup %14030 }
0x49a2   :  { %5573 = vrot.lane.b32.xlu0 %v14031_v39, %s14374_s19 }
0x4a14   :  { %v5574_v29 = vpop.permute.xlu0 %5573 }
0x4a15   :  { %v5576_v16 = vmul.f32 %v14029_v63, %v5574_v29 }
0x4a17   :  { %5648 = vrot.lane.b32.xlu1 %v5576_v16, %s14375_s20 }
0x4a89   :  { %v15275_v11 = vpop.permute.xlu1 %5648 }
0x4a8a   :  { %12233 = vmatmul.mubr.msk.f32.vlgmr.msra.gmra.mrb[36].mxu1 %vm141_vm2, %v15275_v11 }
0x4a8b   :  { %13249 = vmatpush3.bf16.msra.mxu1 %v15151_v18  ;;  %12265 = vmatprep.mubr.msk.f32.mxu1 %vm14372_vm0, %v14373_v6 }
0x4a8c   :  { %13250 = vmatprep.subr.bf16.mxu1 %v14371_v3 }
0x4a8f   :  { %13252 = vmatpush3.bf16.msra.mxu1 %v15158_v2 }
0x4a90   :  { %13253 = vmatprep.subr.bf16.mxu1 %v14371_v3 }
0x4a92   :  { %12266 = vmatmul.mubr.msk.f32.vlgmr.msra.gmra.mrb[38].mxu1 %vm141_vm2, %v15153_v22 }
0x4a93   :  { %13255 = vmatpush3.bf16.msra.mxu1 %v15164_v28  ;;  %12276 = vmatprep.mubr.msk.f32.mxu1 %vm14372_vm0, %v14373_v6 }
0x4a94   :  { %13256 = vmatprep.subr.bf16.mxu1 %v14371_v3 }
0x4a97   :  { %13258 = vmatpush3.bf16.msra.mxu1 %v15170_v35 }
0x4a98   :  { %13271 = vmatprep.subr.bf16.mxu1 %v14371_v3 }
0x4b5d   :  { %v5718_v42 = vpop.f32.mrb[36].mxu1 }
0x4b5e   :  { %v13606_v44 = vadd.f32 %v15194_v26, %v5718_v42  ;;  %v12234_v50 = vpop.f32.mrb[37].mxu1 }
0x4b60   :  { %14032 = vtanh.f32 %v13606_v44  ;;  %v10841_v22 = vmul.f32 -1.442695, %v13606_v44 }
0x4b62   :  { %14034 = vpow2.f32 %v10841_v22 }
0x4b6a   :  { %v14033_v19 = vpop.eup %14032 }
0x4b6b   :  { %5732 = vrot.lane.b32.xlu0 %v14033_v19, %s14374_s19 }
0x4b6c   :  { %v14035_v40 = vpop.eup %14034 }
0x4b6d   :  { %v5726_v8 = vadd.f32 1.0, %v14035_v40 }
0x4b6f   :  { %14036 = vrcp.f32 %v5726_v8 }
0x4b79   :  { %v14037_v12 = vpop.eup %14036 }
0x4b7a   :  { %v5730_v41 = vmul.f32 %v14037_v12, %v5570_v0 }
0x4bdd   :  { %v5733_v7 = vpop.permute.xlu0 %5732 }
0x4bde   :  { %v5735_v53 = vmul.f32 %v14037_v12, %v5733_v7 }
0x4be0   :  { %5737 = vrot.lane.b32.xlu1 %v5735_v53, %s14374_s19  ;;  %v6432_v53 = vld [vmem:[#allocation7 + $0x240] sm:$0xff] }
0x4c52   :  { %v5738_v57 = vpop.permute.xlu1 %5737 }
0x4c53   :  { %v5740_v58 = vadd.f32 %v5738_v57, %v5730_v41  ;;  %v6433_v41 = vld [vmem:[#allocation7 + $0x248] sm:$0xff] }
0x4c54   :  { %v15355_v57 = vpack.c.bf16 %v6433_v41, %v6432_v53 }
0x4c55   :  { %14038 = vtanh.f32 %v5740_v58 }
0x4c5f   :  { %v14039_v23 = vpop.eup %14038 }
0x4c60   :  { %5743 = vrot.lane.b32.xlu0 %v14039_v23, %s14374_s19 }
0x4cd2   :  { %v5744_v20 = vpop.permute.xlu0 %5743 }
0x4cd3   :  { %v5746_v59 = vmul.f32 %v14037_v12, %v5744_v20 }
0x4cd5   :  { %5818 = vrot.lane.b32.xlu1 %v5746_v59, %s14375_s20  ;;  %v6436_v59 = vld [vmem:[#allocation7 + $0x260] sm:$0xff] }
0x4d47   :  { %v15298_v4 = vpop.permute.xlu1 %5818 }
0x4d48   :  { %12255 = vmatmul.mubr.msk.f32.vlgmr.msra.gmra.mrb[34].mxu0 %vm141_vm2, %v15298_v4 }
0x4d49   :  { %13261 = vmatpush3.bf16.msra.mxu0 %v15151_v18  ;;  %12287 = vmatprep.mubr.msk.f32.mxu0 %vm14372_vm0, %v14373_v6 }
0x4d4a   :  { %13262 = vmatprep.subr.bf16.mxu0 %v14371_v3 }
0x4d4d   :  { %13264 = vmatpush3.bf16.msra.mxu0 %v15158_v2 }
0x4d4e   :  { %13265 = vmatprep.subr.bf16.mxu0 %v14371_v3 }
0x4d50   :  { %12288 = vmatmul.mubr.msk.f32.vlgmr.msra.gmra.mrb[36].mxu0 %vm141_vm2, %v15209_v45 }
0x4d51   :  { %13267 = vmatpush3.bf16.msra.mxu0 %v15164_v28  ;;  %12298 = vmatprep.mubr.msk.f32.mxu0 %vm14372_vm0, %v14373_v6 }
0x4d52   :  { %13268 = vmatprep.subr.bf16.mxu0 %v14371_v3 }
0x4d55   :  { %13270 = vmatpush3.bf16.msra.mxu0 %v15170_v35 }
0x4d56   :  { %13283 = vmatprep.subr.bf16.mxu0 %v14371_v3 }
0x4e1b   :  { %v5888_v14 = vpop.f32.mrb[34].mxu0 }
0x4e1c   :  { %v13607_v60 = vadd.f32 %v15194_v26, %v5888_v14  ;;  %v12256_v62 = vpop.f32.mrb[35].mxu0  ;;  %v6437_v14 = vld [vmem:[#allocation7 + $0x268] sm:$0xff] }
0x4e1d   :  { %v6438_v62 = vld [vmem:[#allocation7 + $0x270] sm:$0xff] }
0x4e1e   :  { %14040 = vtanh.f32 %v13607_v60  ;;  %v10844_v45 = vmul.f32 -1.442695, %v13607_v60  ;;  %v15368_v60 = vpack.c.bf16 %v6437_v14, %v6436_v59 }
0x4e20   :  { %14042 = vpow2.f32 %v10844_v45 }
0x4e28   :  { %v14041_v5 = vpop.eup %14040 }
0x4e29   :  { %5902 = vrot.lane.b32.xlu0 %v14041_v5, %s14374_s19  ;;  %v6439_v5 = vld [vmem:[#allocation7 + $0x278] sm:$0xff] }
0x4e2a   :  { %v14043_v9 = vpop.eup %14042  ;;  %v15374_v45 = vpack.c.bf16 %v6439_v5, %v6438_v62 }
0x4e2b   :  { %v5896_v25 = vadd.f32 1.0, %v14043_v9 }
0x4e2d   :  { %14044 = vrcp.f32 %v5896_v25 }
0x4e37   :  { %v14045_v32 = vpop.eup %14044 }
0x4e38   :  { %v5900_v27 = vmul.f32 %v14045_v32, %v5740_v58  ;;  %v6435_v58 = vld [vmem:[#allocation7 + $0x258] sm:$0xff] }
0x4e9b   :  { %v5903_v43 = vpop.permute.xlu0 %5902 }
0x4e9c   :  { %v5905_v1 = vmul.f32 %v14045_v32, %v5903_v43 }
0x4e9e   :  { %5907 = vrot.lane.b32.xlu1 %v5905_v1, %s14374_s19 }
0x4f10   :  { %v5908_v34 = vpop.permute.xlu1 %5907 }
0x4f11   :  { %v5910_v13 = vadd.f32 %v5908_v34, %v5900_v27 }
0x4f13   :  { %14046 = vtanh.f32 %v5910_v13 }
0x4f14   :  { %14048 = vtanh.f32 %v13602_v61 }
0x4f15   :  { %14050 = vpow2.f32 %v10828_v10 }
0x4f1d   :  { %v14047_v48 = vpop.eup %14046 }
0x4f1e   :  { %5913 = vrot.lane.b32.xlu0 %v14047_v48, %s14374_s19  ;;  %v14049_v24 = vpop.eup %14048 }
0x4f1f   :  { %v14051_v30 = vpop.eup %14050 }
0x4f20   :  { %v5038_v17 = vadd.f32 1.0, %v14051_v30 }
0x4f22   :  { %14052 = vrcp.f32 %v5038_v17 }
0x4f2c   :  { %v14053_v56 = vpop.eup %14052 }
0x4f2d   :  { %v5042_v54 = vmul.f32 %v14053_v56, %v15201_v52 }
0x4f90   :  { %v5914_v47 = vpop.permute.xlu0 %5913 }
0x4f91   :  { %v5916_v21 = vmul.f32 %v14045_v32, %v5914_v47 }
0x4f93   :  { %5988 = vrot.lane.b32.xlu1 %v5916_v21, %s14375_s20 }
0x4f97   :  { %5044 = vrot.lane.b32.xlu1 %v14049_v24, %s14374_s19 }
0x5005   :  { %v15323_v31 = vpop.permute.xlu1 %5988 }
0x5006   :  { %12277 = vmatmul.mubr.msk.f32.vlgmr.msra.gmra.mrb[38].mxu1 %vm141_vm2, %v15323_v31 }
0x5007   :  { %13273 = vmatpush3.bf16.msra.mxu1 %v15151_v18  ;;  %12309 = vmatprep.mubr.msk.f32.mxu1 %vm14372_vm0, %v14373_v6 }
0x5008   :  { %13274 = vmatprep.subr.bf16.mxu1 %v14371_v3 }
0x5009   :  { %v5045_v51 = vpop.permute.xlu1 %5044 }
0x500a   :  { %v5047_v46 = vmul.f32 %v14053_v56, %v5045_v51 }
0x500b   :  { %13276 = vmatpush3.bf16.msra.mxu1 %v15158_v2 }
0x500c   :  { %5049 = vrot.lane.b32.xlu1 %v5047_v46, %s14374_s19  ;;  %13277 = vmatprep.subr.bf16.mxu1 %v14371_v3 }
0x507e   :  { %v5050_v63 = vpop.permute.xlu1 %5049 }
0x507f   :  { %v15335_v33 = vadd.f32 %v5050_v63, %v5042_v54 }
0x5081   :  { %14054 = vtanh.f32 %v15335_v33 }
0x508b   :  { %v14055_v18 = vpop.eup %14054 }
0x508c   :  { %5055 = vrot.lane.b32.xlu1 %v14055_v18, %s14374_s19 }
0x50d9   :  { %v6058_v49 = vpop.f32.mrb[38].mxu1 }
0x50da   :  { %v13608_v36 = vadd.f32 %v15194_v26, %v6058_v49  ;;  %v12278_v37 = vpop.f32.mrb[39].mxu1 }
0x50dc   :  { %14056 = vtanh.f32 %v13608_v36  ;;  %v10847_v52 = vmul.f32 -1.442695, %v13608_v36 }
0x50de   :  { %14058 = vpow2.f32 %v10847_v52 }
0x50e6   :  { %v14057_v2 = vpop.eup %14056 }
0x50e7   :  { %6072 = vrot.lane.b32.xlu0 %v14057_v2, %s14374_s19 }
0x50e8   :  { %v14059_v29 = vpop.eup %14058 }
0x50e9   :  { %v6066_v16 = vadd.f32 1.0, %v14059_v29 }
0x50eb   :  { %14060 = vrcp.f32 %v6066_v16 }
0x50f5   :  { %v14061_v42 = vpop.eup %14060 }
0x50f6   :  { %v6070_v22 = vmul.f32 %v14061_v42, %v5910_v13 }
0x50fe   :  { %v5056_v0 = vpop.permute.xlu1 %5055 }
0x50ff   :  { %v5058_v39 = vmul.f32 %v14053_v56, %v5056_v0 }
0x5101   :  { %6258 = vrot.lane.b32.xlu1 %v5058_v39, %s14375_s20 }
0x5159   :  { %v6073_v44 = vpop.permute.xlu0 %6072 }
0x515a   :  { %v6075_v50 = vmul.f32 %v14061_v42, %v6073_v44 }
0x515c   :  { %6077 = vrot.lane.b32.xlu0 %v6075_v50, %s14374_s19 }
0x5173   :  { %v6259_v19 = vpop.permute.xlu1 %6258 }
0x5174   :  { %12310 = vmatmul.mubr.msk.f32.vlgmr.msra.gmra.mrb[40].mxu1 %vm141_vm2, %v6259_v19 }
0x5175   :  { %13279 = vmatpush3.bf16.msra.mxu1 %v15164_v28  ;;  %12320 = vmatprep.mubr.msk.f32.mxu1 %vm14372_vm0, %v14373_v6 }
0x5176   :  { %13280 = vmatprep.subr.bf16.mxu1 %v14371_v3 }
0x5179   :  { %13282 = vmatpush3.bf16.msra.mxu1 %v15170_v35  ;;  %v6434_v35 = vld [vmem:[#allocation7 + $0x250] sm:$0xff] }
0x517a   :  { %13295 = vmatprep.subr.bf16.mxu1 %v14371_v3  ;;  %v15362_v20 = vpack.c.bf16 %v6435_v58, %v6434_v35 }
0x51ce   :  { %v6078_v40 = vpop.permute.xlu0 %6077 }
0x51cf   :  { %v15350_v8 = vadd.f32 %v6078_v40, %v6070_v22 }
0x51d1   :  { %14062 = vtanh.f32 %v15350_v8 }
0x51db   :  { %v14063_v12 = vpop.eup %14062 }
0x51dc   :  { %6083 = vrot.lane.b32.xlu0 %v14063_v12, %s14374_s19 }
0x524e   :  { %v6084_v7 = vpop.permute.xlu0 %6083 }
0x524f   :  { %v6086_v28 = vmul.f32 %v14061_v42, %v6084_v7 }
0x5251   :  { %6158 = vrot.lane.b32.xlu0 %v6086_v28, %s14375_s20 }
0x52c3   :  { %v15357_v23 = vpop.permute.xlu0 %6158 }
0x52c4   :  { %12299 = vmatmul.mubr.msk.f32.vlgmr.msra.gmra.mrb[36].mxu0 %vm141_vm2, %v15357_v23 }
0x52c5   :  { %13285 = vmatpush3.bf16.msra.mxu0 %v15355_v57  ;;  %12331 = vmatprep.mubr.msk.f32.mxu0 %vm14372_vm0, %v14373_v6 }
0x52c6   :  { %13286 = vmatprep.subr.bf16.mxu0 %v14371_v3 }
0x52c9   :  { %13288 = vmatpush3.bf16.msra.mxu0 %v15362_v20 }
0x52ca   :  { %13289 = vmatprep.subr.bf16.mxu0 %v14371_v3 }
0x52cc   :  { %12332 = vmatmul.mubr.msk.f32.vlgmr.msra.gmra.mrb[38].mxu0 %vm141_vm2, %v15227_v55 }
0x52cd   :  { %13291 = vmatpush3.bf16.msra.mxu0 %v15368_v60  ;;  %12342 = vmatprep.mubr.msk.f32.mxu0 %vm14372_vm0, %v14373_v6 }
0x52ce   :  { %13292 = vmatprep.subr.bf16.mxu0 %v14371_v3 }
0x52d1   :  { %13294 = vmatpush3.bf16.msra.mxu0 %v15374_v45 }
0x52d2   :  { %13307 = vmatprep.subr.bf16.mxu0 %v14371_v3 }
0x52d4   :  { %12343 = vmatmul.mubr.msk.f32.vlgmr.msra.gmra.mrb[38].mxu0 %vm141_vm2, %v6259_v19 }
0x52d5   :  { %13309 = vmatpush3.bf16.msra.mxu0 %v15355_v57  ;;  %12375 = vmatprep.mubr.msk.f32.mxu0 %vm14372_vm0, %v14373_v6 }
0x52d6   :  { %13310 = vmatprep.subr.bf16.mxu0 %v14371_v3 }
0x52d9   :  { %13312 = vmatpush3.bf16.msra.mxu0 %v15362_v20 }
0x52da   :  { %13313 = vmatprep.subr.bf16.mxu0 %v14371_v3 }
0x52dc   :  { %12376 = vmatmul.mubr.msk.f32.vlgmr.msra.gmra.mrb[40].mxu0 %vm141_vm2, %v15275_v11  ;;  %v15398_v11 = vld [vmem:[#allocation7 + $0x280] ss:$0 sm:$0xff] }
0x52dd   :  { %13315 = vmatpush3.bf16.msra.mxu0 %v15368_v60  ;;  %12386 = vmatprep.mubr.msk.f32.mxu0 %vm14372_vm0, %v14373_v6 }
0x52de   :  { %13316 = vmatprep.subr.bf16.mxu0 %v14371_v3 }
0x52e1   :  { %13318 = vmatpush3.bf16.msra.mxu0 %v15374_v45 }
0x52e2   :  { %13331 = vmatprep.subr.bf16.mxu0 %v14371_v3 }
0x5397   :  { %v6228_v55 = vpop.f32.mrb[36].mxu0 }
0x5398   :  { %v13609_v9 = vadd.f32 %v15194_v26, %v6228_v55  ;;  %v12300_v25 = vpop.f32.mrb[37].mxu0 }
0x539a   :  { %14064 = vtanh.f32 %v13609_v9  ;;  %v10850_v13 = vmul.f32 -1.442695, %v13609_v9 }
0x53a4   :  { %v14065_v32 = vpop.eup %14064 }
0x53a5   :  { %6242 = vrot.lane.b32.xlu0 %v14065_v32, %s14374_s19 }
0x53a7   :  { %v6581_v43 = vpop.f32.mrb[38].mxu0 }
0x53a8   :  { %v13611_v1 = vadd.f32 %v15398_v11, %v6581_v43  ;;  %v12344_v27 = vpop.f32.mrb[39].mxu0 }
0x53aa   :  { %14066 = vtanh.f32 %v13611_v1  ;;  %v10857_v15 = vmul.f32 -1.442695, %v13611_v1 }
0x53ab   :  { %14068 = vpow2.f32 %v10850_v13 }
0x53ac   :  { %14070 = vpow2.f32 %v10857_v15 }
0x53b4   :  { %v14067_v34 = vpop.eup %14066 }
0x53b5   :  { %6595 = vrot.lane.b32.xlu1 %v14067_v34, %s14374_s19  ;;  %v14069_v48 = vpop.eup %14068 }
0x53b6   :  { %v6236_v26 = vadd.f32 1.0, %v14069_v48  ;;  %v14071_v61 = vpop.eup %14070 }
0x53b7   :  { %v6589_v10 = vadd.f32 1.0, %v14071_v61 }
0x53b8   :  { %14072 = vrcp.f32 %v6236_v26 }
0x53b9   :  { %14074 = vrcp.f32 %v6589_v10 }
0x53c2   :  { %v14073_v47 = vpop.eup %14072 }
0x53c3   :  { %v14075_v30 = vpop.eup %14074  ;;  %v6240_v51 = vmul.f32 %v14073_v47, %v15350_v8 }
0x53c4   :  { %v6593_v18 = vmul.f32 %v14075_v30, %v15335_v33 }
0x5417   :  { %v6243_v21 = vpop.permute.xlu0 %6242 }
0x5418   :  { %v6245_v24 = vmul.f32 %v14073_v47, %v6243_v21 }
0x541a   :  { %6247 = vrot.lane.b32.xlu0 %v6245_v24, %s14374_s19 }
0x5427   :  { %v6596_v17 = vpop.permute.xlu1 %6595 }
0x5428   :  { %v6598_v56 = vmul.f32 %v14075_v30, %v6596_v17 }
0x542a   :  { %6600 = vrot.lane.b32.xlu1 %v6598_v56, %s14374_s19 }
0x548c   :  { %v6248_v46 = vpop.permute.xlu0 %6247 }
0x548d   :  { %v15405_v54 = vadd.f32 %v6248_v46, %v6240_v51 }
0x548f   :  { %14076 = vtanh.f32 %v15405_v54 }
0x5499   :  { %v14077_v63 = vpop.eup %14076 }
0x549a   :  { %6253 = vrot.lane.b32.xlu0 %v14077_v63, %s14374_s19 }
0x549c   :  { %v6601_v49 = vpop.permute.xlu1 %6600 }
0x549d   :  { %v6603_v36 = vadd.f32 %v6601_v49, %v6593_v18 }
0x549f   :  { %14078 = vtanh.f32 %v6603_v36 }
0x54a9   :  { %v14079_v37 = vpop.eup %14078 }
0x54aa   :  { %6606 = vrot.lane.b32.xlu1 %v14079_v37, %s14374_s19 }
0x550c   :  { %v6254_v2 = vpop.permute.xlu0 %6253 }
0x550d   :  { %v6256_v0 = vmul.f32 %v14073_v47, %v6254_v2 }
0x550f   :  { %6333 = vrot.lane.b32.xlu0 %v6256_v0, %s14375_s20 }
0x551c   :  { %v6607_v39 = vpop.permute.xlu1 %6606 }
0x551d   :  { %v6609_v52 = vmul.f32 %v14075_v30, %v6607_v39 }
0x551f   :  { %6681 = vrot.lane.b32.xlu1 %v6609_v52, %s14375_s20 }
0x5581   :  { %v15413_v29 = vpop.permute.xlu0 %6333 }
0x5582   :  { %12321 = vmatmul.mubr.msk.f32.vlgmr.msra.gmra.mrb[40].mxu1 %vm141_vm2, %v15413_v29 }
0x5583   :  { %13297 = vmatpush3.bf16.msra.mxu1 %v15355_v57  ;;  %12353 = vmatprep.mubr.msk.f32.mxu1 %vm14372_vm0, %v14373_v6 }
0x5584   :  { %13298 = vmatprep.subr.bf16.mxu1 %v14371_v3 }
0x5587   :  { %13300 = vmatpush3.bf16.msra.mxu1 %v15362_v20 }
0x5588   :  { %13301 = vmatprep.subr.bf16.mxu1 %v14371_v3 }
0x558a   :  { %12354 = vmatmul.mubr.msk.f32.vlgmr.msra.gmra.mrb[42].mxu1 %vm141_vm2, %v15252_v38 }
0x558b   :  { %13303 = vmatpush3.bf16.msra.mxu1 %v15368_v60  ;;  %12364 = vmatprep.mubr.msk.f32.mxu1 %vm14372_vm0, %v14373_v6 }
0x558c   :  { %13304 = vmatprep.subr.bf16.mxu1 %v14371_v3 }
0x558f   :  { %13306 = vmatpush3.bf16.msra.mxu1 %v15374_v45 }
0x5590   :  { %13319 = vmatprep.subr.bf16.mxu1 %v14371_v3 }
0x5591   :  { %v15431_v33 = vpop.permute.xlu1 %6681 }
0x5592   :  { %12365 = vmatmul.mubr.msk.f32.vlgmr.msra.gmra.mrb[42].mxu1 %vm141_vm2, %v15431_v33 }
0x5593   :  { %13321 = vmatpush3.bf16.msra.mxu1 %v15355_v57  ;;  %12397 = vmatprep.mubr.msk.f32.mxu1 %vm14372_vm0, %v14373_v6 }
0x5594   :  { %13322 = vmatprep.subr.bf16.mxu1 %v14371_v3 }
0x5597   :  { %13324 = vmatpush3.bf16.msra.mxu1 %v15362_v20 }
0x5598   :  { %13325 = vmatprep.subr.bf16.mxu1 %v14371_v3 }
0x559a   :  { %12398 = vmatmul.mubr.msk.f32.vlgmr.msra.gmra.mrb[44].mxu1 %vm141_vm2, %v15298_v4 }
0x559b   :  { %13327 = vmatpush3.bf16.msra.mxu1 %v15368_v60  ;;  %12408 = vmatprep.mubr.msk.f32.mxu1 %vm14372_vm0, %v14373_v6 }
0x559c   :  { %13328 = vmatprep.subr.bf16.mxu1 %v14371_v3 }
0x559f   :  { %13330 = vmatpush3.bf16.msra.mxu1 %v15374_v45 }
0x55a0   :  { %13343 = vmatprep.subr.bf16.mxu1 %v14371_v3 }
0x5655   :  { %v15449_v38 = vpop.f32.mrb[40].mxu1 }
0x5656   :  { %v12322_v16 = vpop.f32.mrb[41].mxu1 }
0x5665   :  { %v6751_v42 = vpop.f32.mrb[42].mxu1 }
0x5666   :  { %v13612_v44 = vadd.f32 %v15398_v11, %v6751_v42  ;;  %v12366_v50 = vpop.f32.mrb[43].mxu1 }
0x5668   :  { %14080 = vtanh.f32 %v13612_v44  ;;  %v10860_v19 = vmul.f32 -1.442695, %v13612_v44 }
0x566a   :  { %14082 = vpow2.f32 %v10860_v19 }
0x5672   :  { %v14081_v4 = vpop.eup %14080 }
0x5673   :  { %6765 = vrot.lane.b32.xlu0 %v14081_v4, %s14374_s19 }
0x5674   :  { %v14083_v22 = vpop.eup %14082 }
0x5675   :  { %v6759_v40 = vadd.f32 1.0, %v14083_v22 }
0x5677   :  { %14084 = vrcp.f32 %v6759_v40 }
0x5681   :  { %v14085_v8 = vpop.eup %14084 }
0x5682   :  { %v6763_v28 = vmul.f32 %v14085_v8, %v6603_v36 }
0x56e5   :  { %v6766_v12 = vpop.permute.xlu0 %6765 }
0x56e6   :  { %v6768_v7 = vmul.f32 %v14085_v8, %v6766_v12 }
0x56e8   :  { %6770 = vrot.lane.b32.xlu1 %v6768_v7, %s14374_s19 }
0x575a   :  { %v6771_v53 = vpop.permute.xlu1 %6770 }
0x575b   :  { %v6773_v41 = vadd.f32 %v6771_v53, %v6763_v28  ;;  %v14275_v53 = vld [vmem:[#allocation7 + $0x238] ss:$0 sm:$0xff] }
0x575d   :  { %14086 = vtanh.f32 %v6773_v41 }
0x5767   :  { %v14087_v35 = vpop.eup %14086 }
0x5768   :  { %6776 = vrot.lane.b32.xlu0 %v14087_v35, %s14374_s19 }
0x57da   :  { %v6777_v58 = vpop.permute.xlu0 %6776 }
0x57db   :  { %v6779_v59 = vmul.f32 %v14085_v8, %v6777_v58 }
0x57dd   :  { %6851 = vrot.lane.b32.xlu1 %v6779_v59, %s14375_s20 }
0x584f   :  { %v15456_v14 = vpop.permute.xlu1 %6851 }
0x5850   :  { %12387 = vmatmul.mubr.msk.f32.vlgmr.msra.gmra.mrb[40].mxu0 %vm141_vm2, %v15456_v14 }
0x5851   :  { %13333 = vmatpush3.bf16.msra.mxu0 %v15355_v57  ;;  %12419 = vmatprep.mubr.msk.f32.mxu0 %vm14372_vm0, %v14373_v6 }
0x5852   :  { %13334 = vmatprep.subr.bf16.mxu0 %v14371_v3 }
0x5855   :  { %13336 = vmatpush3.bf16.msra.mxu0 %v15362_v20 }
0x5856   :  { %13337 = vmatprep.subr.bf16.mxu0 %v14371_v3 }
0x5858   :  { %12420 = vmatmul.mubr.msk.f32.vlgmr.msra.gmra.mrb[42].mxu0 %vm141_vm2, %v15323_v31 }
0x5859   :  { %13339 = vmatpush3.bf16.msra.mxu0 %v15368_v60  ;;  %12430 = vmatprep.mubr.msk.f32.mxu0 %vm14372_vm0, %v14373_v6 }
0x585a   :  { %13340 = vmatprep.subr.bf16.mxu0 %v14371_v3 }
0x585d   :  { %13342 = vmatpush3.bf16.msra.mxu0 %v15374_v45 }
0x585e   :  { %13355 = vmatprep.subr.bf16.mxu0 %v14371_v3 }
0x5923   :  { %v6921_v62 = vpop.f32.mrb[40].mxu0 }
0x5924   :  { %v13613_v5 = vadd.f32 %v15398_v11, %v6921_v62  ;;  %v12388_v55 = vpop.f32.mrb[41].mxu0 }
0x5926   :  { %14088 = vtanh.f32 %v13613_v5  ;;  %v10863_v31 = vmul.f32 -1.442695, %v13613_v5 }
0x5928   :  { %14090 = vpow2.f32 %v10863_v31 }
0x5930   :  { %v14089_v9 = vpop.eup %14088 }
0x5931   :  { %6935 = vrot.lane.b32.xlu0 %v14089_v9, %s14374_s19 }
0x5932   :  { %v14091_v25 = vpop.eup %14090 }
0x5933   :  { %v6929_v32 = vadd.f32 1.0, %v14091_v25 }
0x5935   :  { %14092 = vrcp.f32 %v6929_v32 }
0x593f   :  { %v14093_v43 = vpop.eup %14092 }
0x5940   :  { %v6933_v34 = vmul.f32 %v14093_v43, %v6773_v41  ;;  %v13610_v41 = vadd.f32 %v14275_v53, %v15449_v38 }
0x5942   :  { %v10853_v62 = vmul.f32 -1.442695, %v13610_v41 }
0x59a3   :  { %v6936_v1 = vpop.permute.xlu0 %6935 }
0x59a4   :  { %v6938_v27 = vmul.f32 %v14093_v43, %v6936_v1 }
0x59a6   :  { %6940 = vrot.lane.b32.xlu1 %v6938_v27, %s14374_s19 }
0x5a18   :  { %v6941_v13 = vpop.permute.xlu1 %6940 }
0x5a19   :  { %v6943_v48 = vadd.f32 %v6941_v13, %v6933_v34 }
0x5a1b   :  { %14094 = vtanh.f32 %v6943_v48 }
0x5a25   :  { %v14095_v15 = vpop.eup %14094 }
0x5a26   :  { %6946 = vrot.lane.b32.xlu0 %v14095_v15, %s14374_s19 }
0x5a98   :  { %v6947_v26 = vpop.permute.xlu0 %6946 }
0x5a99   :  { %v6949_v61 = vmul.f32 %v14093_v43, %v6947_v26 }
0x5a9b   :  { %7021 = vrot.lane.b32.xlu1 %v6949_v61, %s14375_s20 }
0x5b0d   :  { %v15479_v47 = vpop.permute.xlu1 %7021 }
0x5b0e   :  { %12409 = vmatmul.mubr.msk.f32.vlgmr.msra.gmra.mrb[44].mxu1 %vm141_vm2, %v15479_v47 }
0x5b0f   :  { %13345 = vmatpush3.bf16.msra.mxu1 %v15355_v57  ;;  %12441 = vmatprep.mubr.msk.f32.mxu1 %vm14372_vm0, %v14373_v6 }
0x5b10   :  { %13346 = vmatprep.subr.bf16.mxu1 %v14371_v3 }
0x5b13   :  { %13348 = vmatpush3.bf16.msra.mxu1 %v15362_v20 }
0x5b14   :  { %13349 = vmatprep.subr.bf16.mxu1 %v14371_v3 }
0x5b16   :  { %12442 = vmatmul.mubr.msk.f32.vlgmr.msra.gmra.mrb[46].mxu1 %vm141_vm2, %v15357_v23 }
0x5b17   :  { %13351 = vmatpush3.bf16.msra.mxu1 %v15368_v60  ;;  %12452 = vmatprep.mubr.msk.f32.mxu1 %vm14372_vm0, %v14373_v6 }
0x5b18   :  { %13352 = vmatprep.subr.bf16.mxu1 %v14371_v3 }
0x5b1b   :  { %13354 = vmatpush3.bf16.msra.mxu1 %v15374_v45 }
0x5b1c   :  { %13367 = vmatprep.subr.bf16.mxu1 %v14371_v3 }
0x5be1   :  { %v7091_v21 = vpop.f32.mrb[44].mxu1 }
0x5be2   :  { %v13614_v24 = vadd.f32 %v15398_v11, %v7091_v21  ;;  %v12410_v10 = vpop.f32.mrb[45].mxu1 }
0x5be4   :  { %14096 = vtanh.f32 %v13614_v24  ;;  %v10866_v23 = vmul.f32 -1.442695, %v13614_v24 }
0x5be6   :  { %14098 = vpow2.f32 %v10866_v23 }
0x5bee   :  { %v14097_v30 = vpop.eup %14096 }
0x5bef   :  { %7105 = vrot.lane.b32.xlu0 %v14097_v30, %s14374_s19 }
0x5bf0   :  { %v14099_v17 = vpop.eup %14098 }
0x5bf1   :  { %v7099_v56 = vadd.f32 1.0, %v14099_v17 }
0x5bf3   :  { %14100 = vrcp.f32 %v7099_v56 }
0x5bfd   :  { %v14101_v51 = vpop.eup %14100 }
0x5bfe   :  { %v7103_v18 = vmul.f32 %v14101_v51, %v6943_v48 }
0x5c61   :  { %v7106_v46 = vpop.permute.xlu0 %7105 }
0x5c62   :  { %v7108_v63 = vmul.f32 %v14101_v51, %v7106_v46 }
0x5c64   :  { %7110 = vrot.lane.b32.xlu1 %v7108_v63, %s14374_s19  ;;  %v7805_v63 = vld [vmem:[#allocation7 + $0x288] sm:$0xff] }
0x5cd6   :  { %v7111_v49 = vpop.permute.xlu1 %7110 }
0x5cd7   :  { %v7113_v36 = vadd.f32 %v7111_v49, %v7103_v18  ;;  %v7806_v18 = vld [vmem:[#allocation7 + $0x290] sm:$0xff] }
0x5cd8   :  { %v15559_v49 = vpack.c.bf16 %v7806_v18, %v7805_v63 }
0x5cd9   :  { %14102 = vtanh.f32 %v7113_v36 }
0x5ce3   :  { %v14103_v37 = vpop.eup %14102 }
0x5ce4   :  { %7116 = vrot.lane.b32.xlu0 %v14103_v37, %s14374_s19 }
0x5d56   :  { %v7117_v2 = vpop.permute.xlu0 %7116 }
0x5d57   :  { %v7119_v0 = vmul.f32 %v14101_v51, %v7117_v2 }
0x5d59   :  { %7191 = vrot.lane.b32.xlu1 %v7119_v0, %s14375_s20  ;;  %v7809_v0 = vld [vmem:[#allocation7 + $0x2a8] sm:$0xff] }
0x5dcb   :  { %v15502_v39 = vpop.permute.xlu1 %7191 }
0x5dcc   :  { %12431 = vmatmul.mubr.msk.f32.vlgmr.msra.gmra.mrb[42].mxu0 %vm141_vm2, %v15502_v39 }
0x5dcd   :  { %13357 = vmatpush3.bf16.msra.mxu0 %v15355_v57  ;;  %12463 = vmatprep.mubr.msk.f32.mxu0 %vm14372_vm0, %v14373_v6 }
0x5dce   :  { %13358 = vmatprep.subr.bf16.mxu0 %v14371_v3 }
0x5dd1   :  { %13360 = vmatpush3.bf16.msra.mxu0 %v15362_v20 }
0x5dd2   :  { %13361 = vmatprep.subr.bf16.mxu0 %v14371_v3 }
0x5dd4   :  { %12464 = vmatmul.mubr.msk.f32.vlgmr.msra.gmra.mrb[44].mxu0 %vm141_vm2, %v15413_v29 }
0x5dd5   :  { %13363 = vmatpush3.bf16.msra.mxu0 %v15368_v60  ;;  %12474 = vmatprep.mubr.msk.f32.mxu0 %vm14372_vm0, %v14373_v6 }
0x5dd6   :  { %13364 = vmatprep.subr.bf16.mxu0 %v14371_v3 }
0x5dd9   :  { %13366 = vmatpush3.bf16.msra.mxu0 %v15374_v45 }
0x5dda   :  { %13379 = vmatprep.subr.bf16.mxu0 %v14371_v3 }
0x5e9f   :  { %v7261_v52 = vpop.f32.mrb[42].mxu0 }
0x5ea0   :  { %v13615_v16 = vadd.f32 %v15398_v11, %v7261_v52  ;;  %v12432_v42 = vpop.f32.mrb[43].mxu0  ;;  %v7810_v52 = vld [vmem:[#allocation7 + $0x2b0] sm:$0xff] }
0x5ea1   :  { %v7811_v42 = vld [vmem:[#allocation7 + $0x2b8] sm:$0xff] }
0x5ea2   :  { %14104 = vtanh.f32 %v13615_v16  ;;  %v10869_v29 = vmul.f32 -1.442695, %v13615_v16  ;;  %v15572_v16 = vpack.c.bf16 %v7810_v52, %v7809_v0 }
0x5ea4   :  { %14106 = vpow2.f32 %v10869_v29 }
0x5eac   :  { %v14105_v44 = vpop.eup %14104 }
0x5ead   :  { %7275 = vrot.lane.b32.xlu0 %v14105_v44, %s14374_s19  ;;  %v7812_v44 = vld [vmem:[#allocation7 + $0x2c0] sm:$0xff] }
0x5eae   :  { %v14107_v50 = vpop.eup %14106  ;;  %v15578_v29 = vpack.c.bf16 %v7812_v44, %v7811_v42 }
0x5eaf   :  { %v7269_v4 = vadd.f32 1.0, %v14107_v50 }
0x5eb1   :  { %14108 = vrcp.f32 %v7269_v4 }
0x5ebb   :  { %v14109_v19 = vpop.eup %14108 }
0x5ebc   :  { %v7273_v8 = vmul.f32 %v14109_v19, %v7113_v36  ;;  %v7808_v36 = vld [vmem:[#allocation7 + $0x2a0] sm:$0xff] }
0x5f1f   :  { %v7276_v22 = vpop.permute.xlu0 %7275 }
0x5f20   :  { %v7278_v40 = vmul.f32 %v14109_v19, %v7276_v22 }
0x5f22   :  { %7280 = vrot.lane.b32.xlu1 %v7278_v40, %s14374_s19 }
0x5f94   :  { %v7281_v12 = vpop.permute.xlu1 %7280 }
0x5f95   :  { %v7283_v7 = vadd.f32 %v7281_v12, %v7273_v8 }
0x5f97   :  { %14110 = vtanh.f32 %v7283_v7 }
0x5f98   :  { %14112 = vtanh.f32 %v13610_v41 }
0x5f99   :  { %14114 = vpow2.f32 %v10853_v62 }
0x5fa1   :  { %v14111_v28 = vpop.eup %14110 }
0x5fa2   :  { %7286 = vrot.lane.b32.xlu0 %v14111_v28, %s14374_s19  ;;  %v14113_v59 = vpop.eup %14112 }
0x5fa3   :  { %v14115_v5 = vpop.eup %14114 }
0x5fa4   :  { %v6411_v55 = vadd.f32 1.0, %v14115_v5 }
0x5fa6   :  { %14116 = vrcp.f32 %v6411_v55 }
0x5fb0   :  { %v14117_v38 = vpop.eup %14116 }
0x5fb1   :  { %v6415_v32 = vmul.f32 %v14117_v38, %v15405_v54 }
0x6014   :  { %v7287_v35 = vpop.permute.xlu0 %7286 }
0x6015   :  { %v7289_v58 = vmul.f32 %v14109_v19, %v7287_v35 }
0x6017   :  { %7361 = vrot.lane.b32.xlu1 %v7289_v58, %s14375_s20 }
0x601b   :  { %6417 = vrot.lane.b32.xlu1 %v14113_v59, %s14374_s19 }
0x6089   :  { %v15527_v9 = vpop.permute.xlu1 %7361 }
0x608a   :  { %12453 = vmatmul.mubr.msk.f32.vlgmr.msra.gmra.mrb[46].mxu1 %vm141_vm2, %v15527_v9 }
0x608b   :  { %13369 = vmatpush3.bf16.msra.mxu1 %v15355_v57  ;;  %12485 = vmatprep.mubr.msk.f32.mxu1 %vm14372_vm0, %v14373_v6 }
0x608c   :  { %13370 = vmatprep.subr.bf16.mxu1 %v14371_v3 }
0x608d   :  { %v6418_v31 = vpop.permute.xlu1 %6417 }
0x608e   :  { %v6420_v25 = vmul.f32 %v14117_v38, %v6418_v31 }
0x608f   :  { %13372 = vmatpush3.bf16.msra.mxu1 %v15362_v20 }
0x6090   :  { %6422 = vrot.lane.b32.xlu1 %v6420_v25, %s14374_s19  ;;  %13373 = vmatprep.subr.bf16.mxu1 %v14371_v3 }
0x6102   :  { %v6423_v43 = vpop.permute.xlu1 %6422 }
0x6103   :  { %v15539_v1 = vadd.f32 %v6423_v43, %v6415_v32 }
0x6105   :  { %14118 = vtanh.f32 %v15539_v1 }
0x610f   :  { %v14119_v57 = vpop.eup %14118 }
0x6110   :  { %6428 = vrot.lane.b32.xlu1 %v14119_v57, %s14374_s19 }
0x615d   :  { %v7431_v27 = vpop.f32.mrb[46].mxu1 }
0x615e   :  { %v13616_v34 = vadd.f32 %v15398_v11, %v7431_v27  ;;  %v12454_v13 = vpop.f32.mrb[47].mxu1 }
0x6160   :  { %14120 = vtanh.f32 %v13616_v34  ;;  %v10872_v54 = vmul.f32 -1.442695, %v13616_v34 }
0x6162   :  { %14122 = vpow2.f32 %v10872_v54 }
0x616a   :  { %v14121_v20 = vpop.eup %14120 }
0x616b   :  { %7445 = vrot.lane.b32.xlu0 %v14121_v20, %s14374_s19 }
0x616c   :  { %v14123_v26 = vpop.eup %14122 }
0x616d   :  { %v7439_v61 = vadd.f32 1.0, %v14123_v26 }
0x616f   :  { %14124 = vrcp.f32 %v7439_v61 }
0x6179   :  { %v14125_v21 = vpop.eup %14124 }
0x617a   :  { %v7443_v23 = vmul.f32 %v14125_v21, %v7283_v7 }
0x6182   :  { %v6429_v48 = vpop.permute.xlu1 %6428 }
0x6183   :  { %v6431_v15 = vmul.f32 %v14117_v38, %v6429_v48 }
0x6185   :  { %7631 = vrot.lane.b32.xlu1 %v6431_v15, %s14375_s20 }
0x61dd   :  { %v7446_v24 = vpop.permute.xlu0 %7445 }
0x61de   :  { %v7448_v10 = vmul.f32 %v14125_v21, %v7446_v24 }
0x61e0   :  { %7450 = vrot.lane.b32.xlu0 %v7448_v10, %s14374_s19 }
0x61f7   :  { %v7632_v30 = vpop.permute.xlu1 %7631 }
0x61f8   :  { %12486 = vmatmul.mubr.msk.f32.vlgmr.msra.gmra.mrb[48].mxu1 %vm141_vm2, %v7632_v30 }
0x61f9   :  { %13375 = vmatpush3.bf16.msra.mxu1 %v15368_v60  ;;  %12496 = vmatprep.mubr.msk.f32.mxu1 %vm14372_vm0, %v14373_v6 }
0x61fa   :  { %13376 = vmatprep.subr.bf16.mxu1 %v14371_v3 }
0x61fd   :  { %13378 = vmatpush3.bf16.msra.mxu1 %v15374_v45  ;;  %v7807_v45 = vld [vmem:[#allocation7 + $0x298] sm:$0xff] }
0x61fe   :  { %13391 = vmatprep.subr.bf16.mxu1 %v14371_v3  ;;  %v15566_v2 = vpack.c.bf16 %v7808_v36, %v7807_v45 }
0x6252   :  { %v7451_v17 = vpop.permute.xlu0 %7450 }
0x6253   :  { %v15554_v56 = vadd.f32 %v7451_v17, %v7443_v23 }
0x6255   :  { %14126 = vtanh.f32 %v15554_v56 }
0x625f   :  { %v14127_v51 = vpop.eup %14126 }
0x6260   :  { %7456 = vrot.lane.b32.xlu0 %v14127_v51, %s14374_s19 }
0x62d2   :  { %v7457_v46 = vpop.permute.xlu0 %7456 }
0x62d3   :  { %v7459_v60 = vmul.f32 %v14125_v21, %v7457_v46 }
0x62d5   :  { %7531 = vrot.lane.b32.xlu0 %v7459_v60, %s14375_s20 }
0x6347   :  { %v15561_v37 = vpop.permute.xlu0 %7531 }
0x6348   :  { %12475 = vmatmul.mubr.msk.f32.vlgmr.msra.gmra.mrb[44].mxu0 %vm141_vm2, %v15561_v37 }
0x6349   :  { %13381 = vmatpush3.bf16.msra.mxu0 %v15559_v49  ;;  %12507 = vmatprep.mubr.msk.f32.mxu0 %vm14372_vm0, %v14373_v6 }
0x634a   :  { %13382 = vmatprep.subr.bf16.mxu0 %v14371_v3 }
0x634d   :  { %13384 = vmatpush3.bf16.msra.mxu0 %v15566_v2 }
0x634e   :  { %13385 = vmatprep.subr.bf16.mxu0 %v14371_v3 }
0x6350   :  { %12508 = vmatmul.mubr.msk.f32.vlgmr.msra.gmra.mrb[46].mxu0 %vm141_vm2, %v15431_v33 }
0x6351   :  { %13387 = vmatpush3.bf16.msra.mxu0 %v15572_v16  ;;  %12518 = vmatprep.mubr.msk.f32.mxu0 %vm14372_vm0, %v14373_v6 }
0x6352   :  { %13388 = vmatprep.subr.bf16.mxu0 %v14371_v3 }
0x6355   :  { %13390 = vmatpush3.bf16.msra.mxu0 %v15578_v29 }
0x6356   :  { %13403 = vmatprep.subr.bf16.mxu0 %v14371_v3 }
0x6358   :  { %12519 = vmatmul.mubr.msk.f32.vlgmr.msra.gmra.mrb[46].mxu0 %vm141_vm2, %v7632_v30 }
0x6359   :  { %13405 = vmatpush3.bf16.msra.mxu0 %v15559_v49  ;;  %12551 = vmatprep.mubr.msk.f32.mxu0 %vm14372_vm0, %v14373_v6 }
0x635a   :  { %13406 = vmatprep.subr.bf16.mxu0 %v14371_v3 }
0x635d   :  { %13408 = vmatpush3.bf16.msra.mxu0 %v15566_v2 }
0x635e   :  { %13409 = vmatprep.subr.bf16.mxu0 %v14371_v3 }
0x6360   :  { %12552 = vmatmul.mubr.msk.f32.vlgmr.msra.gmra.mrb[48].mxu0 %vm141_vm2, %v15479_v47  ;;  %v15602_v47 = vld [vmem:[#allocation7 + $0x2c8] ss:$0 sm:$0xff] }
0x6361   :  { %13411 = vmatpush3.bf16.msra.mxu0 %v15572_v16  ;;  %12562 = vmatprep.mubr.msk.f32.mxu0 %vm14372_vm0, %v14373_v6 }
0x6362   :  { %13412 = vmatprep.subr.bf16.mxu0 %v14371_v3 }
0x6365   :  { %13414 = vmatpush3.bf16.msra.mxu0 %v15578_v29 }
0x6366   :  { %13427 = vmatprep.subr.bf16.mxu0 %v14371_v3 }
0x641b   :  { %v7601_v33 = vpop.f32.mrb[44].mxu0 }
0x641c   :  { %v13617_v50 = vadd.f32 %v15398_v11, %v7601_v33  ;;  %v12476_v4 = vpop.f32.mrb[45].mxu0 }
0x641e   :  { %14128 = vtanh.f32 %v13617_v50  ;;  %v10875_v7 = vmul.f32 -1.442695, %v13617_v50 }
0x6428   :  { %v14129_v19 = vpop.eup %14128 }
0x6429   :  { %7615 = vrot.lane.b32.xlu0 %v14129_v19, %s14374_s19 }
0x642b   :  { %v7954_v22 = vpop.f32.mrb[46].mxu0 }
0x642c   :  { %v13619_v40 = vadd.f32 %v15602_v47, %v7954_v22  ;;  %v12520_v8 = vpop.f32.mrb[47].mxu0 }
0x642e   :  { %14130 = vtanh.f32 %v13619_v40  ;;  %v10882_v53 = vmul.f32 -1.442695, %v13619_v40 }
0x642f   :  { %14132 = vpow2.f32 %v10875_v7 }
0x6430   :  { %14134 = vpow2.f32 %v10882_v53 }
0x6438   :  { %v14131_v12 = vpop.eup %14130 }
0x6439   :  { %7968 = vrot.lane.b32.xlu1 %v14131_v12, %s14374_s19  ;;  %v14133_v28 = vpop.eup %14132 }
0x643a   :  { %v7609_v11 = vadd.f32 1.0, %v14133_v28  ;;  %v14135_v41 = vpop.eup %14134 }
0x643b   :  { %v7962_v62 = vadd.f32 1.0, %v14135_v41 }
0x643c   :  { %14136 = vrcp.f32 %v7609_v11 }
0x643d   :  { %14138 = vrcp.f32 %v7962_v62 }
0x6446   :  { %v14137_v35 = vpop.eup %14136 }
0x6447   :  { %v14139_v5 = vpop.eup %14138  ;;  %v7613_v31 = vmul.f32 %v14137_v35, %v15554_v56 }
0x6448   :  { %v7966_v57 = vmul.f32 %v14139_v5, %v15539_v1 }
0x649b   :  { %v7616_v58 = vpop.permute.xlu0 %7615 }
0x649c   :  { %v7618_v59 = vmul.f32 %v14137_v35, %v7616_v58 }
0x649e   :  { %7620 = vrot.lane.b32.xlu0 %v7618_v59, %s14374_s19 }
0x64ab   :  { %v7969_v55 = vpop.permute.xlu1 %7968 }
0x64ac   :  { %v7971_v38 = vmul.f32 %v14139_v5, %v7969_v55 }
0x64ae   :  { %7973 = vrot.lane.b32.xlu1 %v7971_v38, %s14374_s19 }
0x6510   :  { %v7621_v25 = vpop.permute.xlu0 %7620 }
0x6511   :  { %v15609_v32 = vadd.f32 %v7621_v25, %v7613_v31 }
0x6513   :  { %14140 = vtanh.f32 %v15609_v32 }
0x651d   :  { %v14141_v43 = vpop.eup %14140 }
0x651e   :  { %7626 = vrot.lane.b32.xlu0 %v14141_v43, %s14374_s19 }
0x6520   :  { %v7974_v27 = vpop.permute.xlu1 %7973 }
0x6521   :  { %v7976_v34 = vadd.f32 %v7974_v27, %v7966_v57 }
0x6523   :  { %14142 = vtanh.f32 %v7976_v34 }
0x652d   :  { %v14143_v13 = vpop.eup %14142 }
0x652e   :  { %7979 = vrot.lane.b32.xlu1 %v14143_v13, %s14374_s19 }
0x6590   :  { %v7627_v20 = vpop.permute.xlu0 %7626 }
0x6591   :  { %v7629_v48 = vmul.f32 %v14137_v35, %v7627_v20 }
0x6593   :  { %7706 = vrot.lane.b32.xlu0 %v7629_v48, %s14375_s20 }
0x65a0   :  { %v7980_v15 = vpop.permute.xlu1 %7979 }
0x65a1   :  { %v7982_v54 = vmul.f32 %v14139_v5, %v7980_v15 }
0x65a3   :  { %8054 = vrot.lane.b32.xlu1 %v7982_v54, %s14375_s20 }
0x6605   :  { %v15617_v26 = vpop.permute.xlu0 %7706 }
0x6606   :  { %12497 = vmatmul.mubr.msk.f32.vlgmr.msra.gmra.mrb[48].mxu1 %vm141_vm2, %v15617_v26 }
0x6607   :  { %13393 = vmatpush3.bf16.msra.mxu1 %v15559_v49  ;;  %12529 = vmatprep.mubr.msk.f32.mxu1 %vm14372_vm0, %v14373_v6 }
0x6608   :  { %13394 = vmatprep.subr.bf16.mxu1 %v14371_v3 }
0x660b   :  { %13396 = vmatpush3.bf16.msra.mxu1 %v15566_v2 }
0x660c   :  { %13397 = vmatprep.subr.bf16.mxu1 %v14371_v3 }
0x660e   :  { %12530 = vmatmul.mubr.msk.f32.vlgmr.msra.gmra.mrb[50].mxu1 %vm141_vm2, %v15456_v14 }
0x660f   :  { %13399 = vmatpush3.bf16.msra.mxu1 %v15572_v16  ;;  %12540 = vmatprep.mubr.msk.f32.mxu1 %vm14372_vm0, %v14373_v6 }
0x6610   :  { %13400 = vmatprep.subr.bf16.mxu1 %v14371_v3 }
0x6613   :  { %13402 = vmatpush3.bf16.msra.mxu1 %v15578_v29 }
0x6614   :  { %13415 = vmatprep.subr.bf16.mxu1 %v14371_v3 }
0x6615   :  { %v15635_v1 = vpop.permute.xlu1 %8054 }
0x6616   :  { %12541 = vmatmul.mubr.msk.f32.vlgmr.msra.gmra.mrb[50].mxu1 %vm141_vm2, %v15635_v1 }
0x6617   :  { %13417 = vmatpush3.bf16.msra.mxu1 %v15559_v49  ;;  %12573 = vmatprep.mubr.msk.f32.mxu1 %vm14372_vm0, %v14373_v6 }
0x6618   :  { %13418 = vmatprep.subr.bf16.mxu1 %v14371_v3 }
0x661b   :  { %13420 = vmatpush3.bf16.msra.mxu1 %v15566_v2 }
0x661c   :  { %13421 = vmatprep.subr.bf16.mxu1 %v14371_v3 }
0x661e   :  { %12574 = vmatmul.mubr.msk.f32.vlgmr.msra.gmra.mrb[52].mxu1 %vm141_vm2, %v15502_v39 }
0x661f   :  { %13423 = vmatpush3.bf16.msra.mxu1 %v15572_v16  ;;  %12584 = vmatprep.mubr.msk.f32.mxu1 %vm14372_vm0, %v14373_v6 }
0x6620   :  { %13424 = vmatprep.subr.bf16.mxu1 %v14371_v3 }
0x6623   :  { %13426 = vmatpush3.bf16.msra.mxu1 %v15578_v29 }
0x6624   :  { %13439 = vmatprep.subr.bf16.mxu1 %v14371_v3 }
0x66d9   :  { %v15653_v14 = vpop.f32.mrb[48].mxu1 }
0x66da   :  { %v12498_v61 = vpop.f32.mrb[49].mxu1 }
0x66e9   :  { %v8124_v21 = vpop.f32.mrb[50].mxu1 }
0x66ea   :  { %v13620_v24 = vadd.f32 %v15602_v47, %v8124_v21  ;;  %v12542_v10 = vpop.f32.mrb[51].mxu1 }
0x66ec   :  { %14144 = vtanh.f32 %v13620_v24  ;;  %v10885_v30 = vmul.f32 -1.442695, %v13620_v24 }
0x66ee   :  { %14146 = vpow2.f32 %v10885_v30 }
0x66f6   :  { %v14145_v39 = vpop.eup %14144 }
0x66f7   :  { %8138 = vrot.lane.b32.xlu0 %v14145_v39, %s14374_s19 }
0x66f8   :  { %v14147_v23 = vpop.eup %14146 }
0x66f9   :  { %v8132_v17 = vadd.f32 1.0, %v14147_v23 }
0x66fb   :  { %14148 = vrcp.f32 %v8132_v17 }
0x6705   :  { %v14149_v56 = vpop.eup %14148 }
0x6706   :  { %v8136_v60 = vmul.f32 %v14149_v56, %v7976_v34 }
0x6769   :  { %v8139_v51 = vpop.permute.xlu0 %8138 }
0x676a   :  { %v8141_v46 = vmul.f32 %v14149_v56, %v8139_v51 }
0x676c   :  { %8143 = vrot.lane.b32.xlu1 %v8141_v46, %s14374_s19 }
0x67de   :  { %v8144_v63 = vpop.permute.xlu1 %8143 }
0x67df   :  { %v8146_v18 = vadd.f32 %v8144_v63, %v8136_v60  ;;  %v14276_v63 = vld [vmem:[#allocation7 + $0x280] ss:$0 sm:$0xff] }
0x67e1   :  { %14150 = vtanh.f32 %v8146_v18 }
0x67eb   :  { %v14151_v45 = vpop.eup %14150 }
0x67ec   :  { %8149 = vrot.lane.b32.xlu0 %v14151_v45, %s14374_s19 }
0x685e   :  { %v8150_v36 = vpop.permute.xlu0 %8149 }
0x685f   :  { %v8152_v0 = vmul.f32 %v14149_v56, %v8150_v36 }
0x6861   :  { %8224 = vrot.lane.b32.xlu1 %v8152_v0, %s14375_s20 }
0x68d3   :  { %v15660_v52 = vpop.permute.xlu1 %8224 }
0x68d4   :  { %12563 = vmatmul.mubr.msk.f32.vlgmr.msra.gmra.mrb[48].mxu0 %vm141_vm2, %v15660_v52 }
0x68d5   :  { %13429 = vmatpush3.bf16.msra.mxu0 %v15559_v49  ;;  %12595 = vmatprep.mubr.msk.f32.mxu0 %vm14372_vm0, %v14373_v6 }
0x68d6   :  { %13430 = vmatprep.subr.bf16.mxu0 %v14371_v3 }
0x68d9   :  { %13432 = vmatpush3.bf16.msra.mxu0 %v15566_v2 }
0x68da   :  { %13433 = vmatprep.subr.bf16.mxu0 %v14371_v3 }
0x68dc   :  { %12596 = vmatmul.mubr.msk.f32.vlgmr.msra.gmra.mrb[50].mxu0 %vm141_vm2, %v15527_v9 }
0x68dd   :  { %13435 = vmatpush3.bf16.msra.mxu0 %v15572_v16  ;;  %12606 = vmatprep.mubr.msk.f32.mxu0 %vm14372_vm0, %v14373_v6 }
0x68de   :  { %13436 = vmatprep.subr.bf16.mxu0 %v14371_v3 }
0x68e1   :  { %13438 = vmatpush3.bf16.msra.mxu0 %v15578_v29 }
0x68e2   :  { %13451 = vmatprep.subr.bf16.mxu0 %v14371_v3 }
0x69a7   :  { %v8294_v42 = vpop.f32.mrb[48].mxu0 }
0x69a8   :  { %v13621_v44 = vadd.f32 %v15602_v47, %v8294_v42  ;;  %v12564_v33 = vpop.f32.mrb[49].mxu0 }
0x69aa   :  { %14152 = vtanh.f32 %v13621_v44  ;;  %v10888_v9 = vmul.f32 -1.442695, %v13621_v44 }
0x69ac   :  { %14154 = vpow2.f32 %v10888_v9 }
0x69b4   :  { %v14153_v50 = vpop.eup %14152 }
0x69b5   :  { %8308 = vrot.lane.b32.xlu0 %v14153_v50, %s14374_s19 }
0x69b6   :  { %v14155_v4 = vpop.eup %14154 }
0x69b7   :  { %v8302_v19 = vadd.f32 1.0, %v14155_v4 }
0x69b9   :  { %14156 = vrcp.f32 %v8302_v19 }
0x69c3   :  { %v14157_v22 = vpop.eup %14156 }
0x69c4   :  { %v8306_v12 = vmul.f32 %v14157_v22, %v8146_v18  ;;  %v13618_v18 = vadd.f32 %v14276_v63, %v15653_v14 }
0x69c6   :  { %v10878_v42 = vmul.f32 -1.442695, %v13618_v18 }
0x6a27   :  { %v8309_v40 = vpop.permute.xlu0 %8308 }
0x6a28   :  { %v8311_v8 = vmul.f32 %v14157_v22, %v8309_v40 }
0x6a2a   :  { %8313 = vrot.lane.b32.xlu1 %v8311_v8, %s14374_s19 }
0x6a9c   :  { %v8314_v7 = vpop.permute.xlu1 %8313 }
0x6a9d   :  { %v8316_v28 = vadd.f32 %v8314_v7, %v8306_v12 }
0x6a9f   :  { %14158 = vtanh.f32 %v8316_v28 }
0x6aa9   :  { %v14159_v53 = vpop.eup %14158 }
0x6aaa   :  { %8319 = vrot.lane.b32.xlu0 %v14159_v53, %s14374_s19 }
0x6b1c   :  { %v8320_v11 = vpop.permute.xlu0 %8319 }
0x6b1d   :  { %v8322_v41 = vmul.f32 %v14157_v22, %v8320_v11 }
0x6b1f   :  { %8394 = vrot.lane.b32.xlu1 %v8322_v41, %s14375_s20 }
0x6b91   :  { %v15683_v35 = vpop.permute.xlu1 %8394 }
0x6b92   :  { %12585 = vmatmul.mubr.msk.f32.vlgmr.msra.gmra.mrb[52].mxu1 %vm141_vm2, %v15683_v35 }
0x6b93   :  { %13441 = vmatpush3.bf16.msra.mxu1 %v15559_v49  ;;  %12617 = vmatprep.mubr.msk.f32.mxu1 %vm14372_vm0, %v14373_v6 }
0x6b94   :  { %13442 = vmatprep.subr.bf16.mxu1 %v14371_v3 }
0x6b97   :  { %13444 = vmatpush3.bf16.msra.mxu1 %v15566_v2 }
0x6b98   :  { %13445 = vmatprep.subr.bf16.mxu1 %v14371_v3 }
0x6b9a   :  { %12618 = vmatmul.mubr.msk.f32.vlgmr.msra.gmra.mrb[54].mxu1 %vm141_vm2, %v15561_v37 }
0x6b9b   :  { %13447 = vmatpush3.bf16.msra.mxu1 %v15572_v16  ;;  %12628 = vmatprep.mubr.msk.f32.mxu1 %vm14372_vm0, %v14373_v6 }
0x6b9c   :  { %13448 = vmatprep.subr.bf16.mxu1 %v14371_v3 }
0x6b9f   :  { %13450 = vmatpush3.bf16.msra.mxu1 %v15578_v29 }
0x6ba0   :  { %13463 = vmatprep.subr.bf16.mxu1 %v14371_v3 }
0x6c65   :  { %v8464_v58 = vpop.f32.mrb[52].mxu1 }
0x6c66   :  { %v13622_v59 = vadd.f32 %v15602_v47, %v8464_v58  ;;  %v12586_v62 = vpop.f32.mrb[53].mxu1 }
0x6c68   :  { %14160 = vtanh.f32 %v13622_v59  ;;  %v10891_v37 = vmul.f32 -1.442695, %v13622_v59 }
0x6c6a   :  { %14162 = vpow2.f32 %v10891_v37 }
0x6c72   :  { %v14161_v5 = vpop.eup %14160 }
0x6c73   :  { %8478 = vrot.lane.b32.xlu0 %v14161_v5, %s14374_s19 }
0x6c74   :  { %v14163_v55 = vpop.eup %14162 }
0x6c75   :  { %v8472_v38 = vadd.f32 1.0, %v14163_v55 }
0x6c77   :  { %14164 = vrcp.f32 %v8472_v38 }
0x6c81   :  { %v14165_v31 = vpop.eup %14164 }
0x6c82   :  { %v8476_v57 = vmul.f32 %v14165_v31, %v8316_v28 }
0x6ce5   :  { %v8479_v25 = vpop.permute.xlu0 %8478 }
0x6ce6   :  { %v8481_v43 = vmul.f32 %v14165_v31, %v8479_v25 }
0x6ce8   :  { %8483 = vrot.lane.b32.xlu1 %v8481_v43, %s14374_s19  ;;  %v9178_v43 = vld [vmem:[#allocation7 + $0x2d0] sm:$0xff] }
0x6d5a   :  { %v8484_v27 = vpop.permute.xlu1 %8483 }
0x6d5b   :  { %v8486_v34 = vadd.f32 %v8484_v27, %v8476_v57  ;;  %v9179_v57 = vld [vmem:[#allocation7 + $0x2d8] sm:$0xff] }
0x6d5c   :  { %v15763_v27 = vpack.c.bf16 %v9179_v57, %v9178_v43 }
0x6d5d   :  { %14166 = vtanh.f32 %v8486_v34 }
0x6d67   :  { %v14167_v13 = vpop.eup %14166 }
0x6d68   :  { %8489 = vrot.lane.b32.xlu0 %v14167_v13, %s14374_s19 }
0x6dda   :  { %v8490_v20 = vpop.permute.xlu0 %8489 }
0x6ddb   :  { %v8492_v48 = vmul.f32 %v14165_v31, %v8490_v20 }
0x6ddd   :  { %8564 = vrot.lane.b32.xlu1 %v8492_v48, %s14375_s20  ;;  %v9182_v48 = vld [vmem:[#allocation7 + $0x2f0] sm:$0xff] }
0x6e4f   :  { %v15706_v15 = vpop.permute.xlu1 %8564 }
0x6e50   :  { %12607 = vmatmul.mubr.msk.f32.vlgmr.msra.gmra.mrb[50].mxu0 %vm141_vm2, %v15706_v15 }
0x6e51   :  { %13453 = vmatpush3.bf16.msra.mxu0 %v15559_v49  ;;  %12639 = vmatprep.mubr.msk.f32.mxu0 %vm14372_vm0, %v14373_v6 }
0x6e52   :  { %13454 = vmatprep.subr.bf16.mxu0 %v14371_v3 }
0x6e55   :  { %13456 = vmatpush3.bf16.msra.mxu0 %v15566_v2 }
0x6e56   :  { %13457 = vmatprep.subr.bf16.mxu0 %v14371_v3 }
0x6e58   :  { %12640 = vmatmul.mubr.msk.f32.vlgmr.msra.gmra.mrb[52].mxu0 %vm141_vm2, %v15617_v26 }
0x6e59   :  { %13459 = vmatpush3.bf16.msra.mxu0 %v15572_v16  ;;  %12650 = vmatprep.mubr.msk.f32.mxu0 %vm14372_vm0, %v14373_v6 }
0x6e5a   :  { %13460 = vmatprep.subr.bf16.mxu0 %v14371_v3 }
0x6e5d   :  { %13462 = vmatpush3.bf16.msra.mxu0 %v15578_v29 }
0x6e5e   :  { %13475 = vmatprep.subr.bf16.mxu0 %v14371_v3 }
0x6f23   :  { %v8634_v54 = vpop.f32.mrb[50].mxu0 }
0x6f24   :  { %v13623_v61 = vadd.f32 %v15602_v47, %v8634_v54  ;;  %v12608_v21 = vpop.f32.mrb[51].mxu0  ;;  %v9183_v54 = vld [vmem:[#allocation7 + $0x2f8] sm:$0xff] }
0x6f25   :  { %v9184_v21 = vld [vmem:[#allocation7 + $0x300] sm:$0xff] }
0x6f26   :  { %14168 = vtanh.f32 %v13623_v61  ;;  %v10894_v26 = vmul.f32 -1.442695, %v13623_v61  ;;  %v15776_v61 = vpack.c.bf16 %v9183_v54, %v9182_v48 }
0x6f28   :  { %14170 = vpow2.f32 %v10894_v26 }
0x6f30   :  { %v14169_v24 = vpop.eup %14168 }
0x6f31   :  { %8648 = vrot.lane.b32.xlu0 %v14169_v24, %s14374_s19  ;;  %v9185_v24 = vld [vmem:[#allocation7 + $0x308] sm:$0xff] }
0x6f32   :  { %v14171_v10 = vpop.eup %14170  ;;  %v15782_v26 = vpack.c.bf16 %v9185_v24, %v9184_v21 }
0x6f33   :  { %v8642_v39 = vadd.f32 1.0, %v14171_v10 }
0x6f35   :  { %14172 = vrcp.f32 %v8642_v39 }
0x6f3f   :  { %v14173_v30 = vpop.eup %14172 }
0x6f40   :  { %v8646_v56 = vmul.f32 %v14173_v30, %v8486_v34  ;;  %v9181_v34 = vld [vmem:[#allocation7 + $0x2e8] sm:$0xff] }
0x6fa3   :  { %v8649_v23 = vpop.permute.xlu0 %8648 }
0x6fa4   :  { %v8651_v17 = vmul.f32 %v14173_v30, %v8649_v23 }
0x6fa6   :  { %8653 = vrot.lane.b32.xlu1 %v8651_v17, %s14374_s19 }
0x7018   :  { %v8654_v51 = vpop.permute.xlu1 %8653 }
0x7019   :  { %v8656_v46 = vadd.f32 %v8654_v51, %v8646_v56 }
0x701b   :  { %14174 = vtanh.f32 %v8656_v46 }
0x701c   :  { %14176 = vtanh.f32 %v13618_v18 }
0x701d   :  { %14178 = vpow2.f32 %v10878_v42 }
0x7025   :  { %v14175_v60 = vpop.eup %14174 }
0x7026   :  { %8659 = vrot.lane.b32.xlu0 %v14175_v60, %s14374_s19  ;;  %v14177_v0 = vpop.eup %14176 }
0x7027   :  { %v14179_v44 = vpop.eup %14178 }
0x7028   :  { %v7784_v33 = vadd.f32 1.0, %v14179_v44 }
0x702a   :  { %14180 = vrcp.f32 %v7784_v33 }
0x7034   :  { %v14181_v14 = vpop.eup %14180 }
0x7035   :  { %v7788_v19 = vmul.f32 %v14181_v14, %v15609_v32 }
0x7098   :  { %v8660_v45 = vpop.permute.xlu0 %8659 }
0x7099   :  { %v8662_v36 = vmul.f32 %v14173_v30, %v8660_v45 }
0x709b   :  { %8734 = vrot.lane.b32.xlu1 %v8662_v36, %s14375_s20 }
0x709f   :  { %7790 = vrot.lane.b32.xlu1 %v14177_v0, %s14374_s19 }
0x710d   :  { %v15731_v50 = vpop.permute.xlu1 %8734 }
0x710e   :  { %12629 = vmatmul.mubr.msk.f32.vlgmr.msra.gmra.mrb[54].mxu1 %vm141_vm2, %v15731_v50 }
0x710f   :  { %13465 = vmatpush3.bf16.msra.mxu1 %v15559_v49  ;;  %12661 = vmatprep.mubr.msk.f32.mxu1 %vm14372_vm0, %v14373_v6 }
0x7110   :  { %13466 = vmatprep.subr.bf16.mxu1 %v14371_v3 }
0x7111   :  { %v7791_v9 = vpop.permute.xlu1 %7790 }
0x7112   :  { %v7793_v4 = vmul.f32 %v14181_v14, %v7791_v9 }
0x7113   :  { %13468 = vmatpush3.bf16.msra.mxu1 %v15566_v2 }
0x7114   :  { %7795 = vrot.lane.b32.xlu1 %v7793_v4, %s14374_s19  ;;  %13469 = vmatprep.subr.bf16.mxu1 %v14371_v3 }
0x7186   :  { %v7796_v22 = vpop.permute.xlu1 %7795 }
0x7187   :  { %v15743_v40 = vadd.f32 %v7796_v22, %v7788_v19 }
0x7189   :  { %14182 = vtanh.f32 %v15743_v40 }
0x7193   :  { %v14183_v49 = vpop.eup %14182 }
0x7194   :  { %7801 = vrot.lane.b32.xlu1 %v14183_v49, %s14374_s19 }
0x71e1   :  { %v8804_v8 = vpop.f32.mrb[54].mxu1 }
0x71e2   :  { %v13624_v12 = vadd.f32 %v15602_v47, %v8804_v8  ;;  %v12630_v7 = vpop.f32.mrb[55].mxu1 }
0x71e4   :  { %14184 = vtanh.f32 %v13624_v12  ;;  %v10897_v32 = vmul.f32 -1.442695, %v13624_v12 }
0x71e6   :  { %14186 = vpow2.f32 %v10897_v32 }
0x71ee   :  { %v14185_v2 = vpop.eup %14184 }
0x71ef   :  { %8818 = vrot.lane.b32.xlu0 %v14185_v2, %s14374_s19 }
0x71f0   :  { %v14187_v11 = vpop.eup %14186 }
0x71f1   :  { %v8812_v41 = vadd.f32 1.0, %v14187_v11 }
0x71f3   :  { %14188 = vrcp.f32 %v8812_v41 }
0x71fd   :  { %v14189_v58 = vpop.eup %14188 }
0x71fe   :  { %v8816_v37 = vmul.f32 %v14189_v58, %v8656_v46 }
0x7206   :  { %v7802_v28 = vpop.permute.xlu1 %7801 }
0x7207   :  { %v7804_v53 = vmul.f32 %v14181_v14, %v7802_v28 }
0x7209   :  { %9004 = vrot.lane.b32.xlu1 %v7804_v53, %s14375_s20 }
0x7261   :  { %v8819_v59 = vpop.permute.xlu0 %8818 }
0x7262   :  { %v8821_v62 = vmul.f32 %v14189_v58, %v8819_v59 }
0x7264   :  { %8823 = vrot.lane.b32.xlu0 %v8821_v62, %s14374_s19 }
0x727b   :  { %v9005_v5 = vpop.permute.xlu1 %9004 }
0x727c   :  { %12662 = vmatmul.mubr.msk.f32.vlgmr.msra.gmra.mrb[56].mxu1 %vm141_vm2, %v9005_v5 }
0x727d   :  { %13471 = vmatpush3.bf16.msra.mxu1 %v15572_v16  ;;  %12672 = vmatprep.mubr.msk.f32.mxu1 %vm14372_vm0, %v14373_v6 }
0x727e   :  { %13472 = vmatprep.subr.bf16.mxu1 %v14371_v3 }
0x7281   :  { %13474 = vmatpush3.bf16.msra.mxu1 %v15578_v29  ;;  %v9180_v29 = vld [vmem:[#allocation7 + $0x2e0] sm:$0xff] }
0x7282   :  { %13487 = vmatprep.subr.bf16.mxu1 %v14371_v3  ;;  %v15770_v20 = vpack.c.bf16 %v9181_v34, %v9180_v29 }
0x72d6   :  { %v8824_v55 = vpop.permute.xlu0 %8823 }
0x72d7   :  { %v15758_v38 = vadd.f32 %v8824_v55, %v8816_v37 }
0x72d9   :  { %14190 = vtanh.f32 %v15758_v38 }
0x72e3   :  { %v14191_v31 = vpop.eup %14190 }
0x72e4   :  { %8829 = vrot.lane.b32.xlu0 %v14191_v31, %s14374_s19 }
0x7356   :  { %v8830_v25 = vpop.permute.xlu0 %8829 }
0x7357   :  { %v8832_v16 = vmul.f32 %v14189_v58, %v8830_v25 }
0x7359   :  { %8904 = vrot.lane.b32.xlu0 %v8832_v16, %s14375_s20 }
0x73cb   :  { %v15765_v13 = vpop.permute.xlu0 %8904 }
0x73cc   :  { %12651 = vmatmul.mubr.msk.f32.vlgmr.msra.gmra.mrb[52].mxu0 %vm141_vm2, %v15765_v13 }
0x73cd   :  { %13477 = vmatpush3.bf16.msra.mxu0 %v15763_v27  ;;  %12683 = vmatprep.mubr.msk.f32.mxu0 %vm14372_vm0, %v14373_v6 }
0x73ce   :  { %13478 = vmatprep.subr.bf16.mxu0 %v14371_v3 }
0x73d1   :  { %13480 = vmatpush3.bf16.msra.mxu0 %v15770_v20 }
0x73d2   :  { %13481 = vmatprep.subr.bf16.mxu0 %v14371_v3 }
0x73d4   :  { %12684 = vmatmul.mubr.msk.f32.vlgmr.msra.gmra.mrb[54].mxu0 %vm141_vm2, %v15635_v1 }
0x73d5   :  { %13483 = vmatpush3.bf16.msra.mxu0 %v15776_v61  ;;  %12694 = vmatprep.mubr.msk.f32.mxu0 %vm14372_vm0, %v14373_v6 }
0x73d6   :  { %13484 = vmatprep.subr.bf16.mxu0 %v14371_v3 }
0x73d9   :  { %13486 = vmatpush3.bf16.msra.mxu0 %v15782_v26 }
0x73da   :  { %13499 = vmatprep.subr.bf16.mxu0 %v14371_v3 }
0x73dc   :  { %12695 = vmatmul.mubr.msk.f32.vlgmr.msra.gmra.mrb[54].mxu0 %vm141_vm2, %v9005_v5 }
0x73dd   :  { %13501 = vmatpush3.bf16.msra.mxu0 %v15763_v27  ;;  %12727 = vmatprep.mubr.msk.f32.mxu0 %vm14372_vm0, %v14373_v6 }
0x73de   :  { %13502 = vmatprep.subr.bf16.mxu0 %v14371_v3 }
0x73e1   :  { %13504 = vmatpush3.bf16.msra.mxu0 %v15770_v20 }
0x73e2   :  { %13505 = vmatprep.subr.bf16.mxu0 %v14371_v3 }
0x73e4   :  { %12728 = vmatmul.mubr.msk.f32.vlgmr.msra.gmra.mrb[56].mxu0 %vm141_vm2, %v15683_v35  ;;  %v15806_v35 = vld [vmem:[#allocation7 + $0x310] ss:$0 sm:$0xff] }
0x73e5   :  { %13507 = vmatpush3.bf16.msra.mxu0 %v15776_v61  ;;  %12738 = vmatprep.mubr.msk.f32.mxu0 %vm14372_vm0, %v14373_v6 }
0x73e6   :  { %13508 = vmatprep.subr.bf16.mxu0 %v14371_v3 }
0x73e9   :  { %13510 = vmatpush3.bf16.msra.mxu0 %v15782_v26 }
0x73ea   :  { %13523 = vmatprep.subr.bf16.mxu0 %v14371_v3 }
0x749f   :  { %v8974_v1 = vpop.f32.mrb[52].mxu0 }
0x74a0   :  { %v13625_v10 = vadd.f32 %v15602_v47, %v8974_v1  ;;  %v12652_v39 = vpop.f32.mrb[53].mxu0 }
0x74a2   :  { %14192 = vtanh.f32 %v13625_v10  ;;  %v10900_v46 = vmul.f32 -1.442695, %v13625_v10 }
0x74ac   :  { %v14193_v30 = vpop.eup %14192 }
0x74ad   :  { %8988 = vrot.lane.b32.xlu0 %v14193_v30, %s14374_s19 }
0x74af   :  { %v9327_v23 = vpop.f32.mrb[54].mxu0 }
0x74b0   :  { %v13627_v17 = vadd.f32 %v15806_v35, %v9327_v23  ;;  %v12696_v56 = vpop.f32.mrb[55].mxu0 }
0x74b2   :  { %14194 = vtanh.f32 %v13627_v17  ;;  %v10907_v63 = vmul.f32 -1.442695, %v13627_v17 }
0x74b3   :  { %14196 = vpow2.f32 %v10900_v46 }
0x74b4   :  { %14198 = vpow2.f32 %v10907_v63 }
0x74bc   :  { %v14195_v51 = vpop.eup %14194 }
0x74bd   :  { %9341 = vrot.lane.b32.xlu1 %v14195_v51, %s14374_s19  ;;  %v14197_v60 = vpop.eup %14196 }
0x74be   :  { %v8982_v47 = vadd.f32 1.0, %v14197_v60  ;;  %v14199_v18 = vpop.eup %14198 }
0x74bf   :  { %v9335_v42 = vadd.f32 1.0, %v14199_v18 }
0x74c0   :  { %14200 = vrcp.f32 %v8982_v47 }
0x74c1   :  { %14202 = vrcp.f32 %v9335_v42 }
0x74ca   :  { %v14201_v45 = vpop.eup %14200 }
0x74cb   :  { %v14203_v44 = vpop.eup %14202  ;;  %v8986_v9 = vmul.f32 %v14201_v45, %v15758_v38 }
0x74cc   :  { %v9339_v49 = vmul.f32 %v14203_v44, %v15743_v40 }
0x751f   :  { %v8989_v36 = vpop.permute.xlu0 %8988 }
0x7520   :  { %v8991_v0 = vmul.f32 %v14201_v45, %v8989_v36 }
0x7522   :  { %8993 = vrot.lane.b32.xlu0 %v8991_v0, %s14374_s19 }
0x752f   :  { %v9342_v33 = vpop.permute.xlu1 %9341 }
0x7530   :  { %v9344_v14 = vmul.f32 %v14203_v44, %v9342_v33 }
0x7532   :  { %9346 = vrot.lane.b32.xlu1 %v9344_v14, %s14374_s19 }
0x7594   :  { %v8994_v4 = vpop.permute.xlu0 %8993 }
0x7595   :  { %v15813_v19 = vadd.f32 %v8994_v4, %v8986_v9 }
0x7597   :  { %14204 = vtanh.f32 %v15813_v19 }
0x75a1   :  { %v14205_v22 = vpop.eup %14204 }
0x75a2   :  { %8999 = vrot.lane.b32.xlu0 %v14205_v22, %s14374_s19 }
0x75a4   :  { %v9347_v8 = vpop.permute.xlu1 %9346 }
0x75a5   :  { %v9349_v12 = vadd.f32 %v9347_v8, %v9339_v49 }
0x75a7   :  { %14206 = vtanh.f32 %v9349_v12 }
0x75b1   :  { %v14207_v7 = vpop.eup %14206 }
0x75b2   :  { %9352 = vrot.lane.b32.xlu1 %v14207_v7, %s14374_s19 }
0x7614   :  { %v9000_v2 = vpop.permute.xlu0 %8999 }
0x7615   :  { %v9002_v28 = vmul.f32 %v14201_v45, %v9000_v2 }
0x7617   :  { %9079 = vrot.lane.b32.xlu0 %v9002_v28, %s14375_s20 }
0x7624   :  { %v9353_v53 = vpop.permute.xlu1 %9352 }
0x7625   :  { %v9355_v32 = vmul.f32 %v14203_v44, %v9353_v53 }
0x7627   :  { %9357 = vrot.lane.b32.xlu1 %v9355_v32, %s14375_s20 }
0x7689   :  { %v15821_v11 = vpop.permute.xlu0 %9079 }
0x768a   :  { %12673 = vmatmul.mubr.msk.f32.vlgmr.msra.gmra.mrb[56].mxu1 %vm141_vm2, %v15821_v11 }
0x768b   :  { %13489 = vmatpush3.bf16.msra.mxu1 %v15763_v27  ;;  %12705 = vmatprep.mubr.msk.f32.mxu1 %vm14372_vm0, %v14373_v6 }
0x768c   :  { %13490 = vmatprep.subr.bf16.mxu1 %v14371_v3 }
0x768f   :  { %13492 = vmatpush3.bf16.msra.mxu1 %v15770_v20 }
0x7690   :  { %13493 = vmatprep.subr.bf16.mxu1 %v14371_v3 }
0x7692   :  { %12706 = vmatmul.mubr.msk.f32.vlgmr.msra.gmra.mrb[58].mxu1 %vm141_vm2, %v15660_v52 }
0x7693   :  { %13495 = vmatpush3.bf16.msra.mxu1 %v15776_v61  ;;  %12716 = vmatprep.mubr.msk.f32.mxu1 %vm14372_vm0, %v14373_v6 }
0x7694   :  { %13496 = vmatprep.subr.bf16.mxu1 %v14371_v3 }
0x7697   :  { %13498 = vmatpush3.bf16.msra.mxu1 %v15782_v26 }
0x7698   :  { %13511 = vmatprep.subr.bf16.mxu1 %v14371_v3 }
0x7699   :  { %v9358_v40 = vpop.permute.xlu1 %9357 }
0x769a   :  { %9361 = vst.msk [vmem:[#allocation2] sm:$0x1] %vm9360_vm3, %v9358_v40  ;;  %12717 = vmatmul.mubr.msk.f32.vlgmr.msra.gmra.mrb[58].mxu1 %vm141_vm2, %v9358_v40 }
0x769b   :  { %9363 = vst.msk [vmem:[#allocation2 + $0x7] sm:$0x2] %vm9362_vm4, %v9358_v40  ;;  %13513 = vmatpush3.bf16.msra.mxu1 %v15763_v27  ;;  %12749 = vmatprep.mubr.msk.f32.mxu1 %vm14372_vm0, %v14373_v6 }
0x769c   :  { %13514 = vmatprep.subr.bf16.mxu1 %v14371_v3 }
0x769f   :  { %13516 = vmatpush3.bf16.msra.mxu1 %v15770_v20 }
0x76a0   :  { %13517 = vmatprep.subr.bf16.mxu1 %v14371_v3 }
0x76a2   :  { %12750 = vmatmul.mubr.msk.f32.vlgmr.msra.gmra.mrb[60].mxu1 %vm141_vm2, %v15706_v15 }
0x76a3   :  { %13519 = vmatpush3.bf16.msra.mxu1 %v15776_v61  ;;  %12760 = vmatprep.mubr.msk.f32.mxu1 %vm14372_vm0, %v14373_v6 }
0x76a4   :  { %13520 = vmatprep.subr.bf16.mxu1 %v14371_v3 }
0x76a7   :  { %13522 = vmatpush3.bf16.msra.mxu1 %v15782_v26 }
0x76a8   :  { %13535 = vmatprep.subr.bf16.mxu1 %v14371_v3 }
0x775d   :  { %v15856_v52 = vpop.f32.mrb[56].mxu1 }
0x775e   :  { %v12674_v41 = vpop.f32.mrb[57].mxu1 }
0x776d   :  { %v9502_v58 = vpop.f32.mrb[58].mxu1 }
0x776e   :  { %v13628_v59 = vadd.f32 %v15806_v35, %v9502_v58  ;;  %v12718_v62 = vpop.f32.mrb[59].mxu1 }
0x7770   :  { %14208 = vtanh.f32 %v13628_v59  ;;  %v10910_v5 = vmul.f32 -1.442695, %v13628_v59 }
0x7772   :  { %14210 = vpow2.f32 %v10910_v5 }
0x777a   :  { %v14209_v15 = vpop.eup %14208 }
0x777b   :  { %9516 = vrot.lane.b32.xlu0 %v14209_v15, %s14374_s19 }
0x777c   :  { %v14211_v37 = vpop.eup %14210 }
0x777d   :  { %v9510_v55 = vadd.f32 1.0, %v14211_v37 }
0x777f   :  { %14212 = vrcp.f32 %v9510_v55 }
0x7789   :  { %v14213_v38 = vpop.eup %14212 }
0x778a   :  { %v9514_v16 = vmul.f32 %v14213_v38, %v9349_v12 }
0x77ed   :  { %v9517_v31 = vpop.permute.xlu0 %9516 }
0x77ee   :  { %v9519_v25 = vmul.f32 %v14213_v38, %v9517_v31 }
0x77f0   :  { %9521 = vrot.lane.b32.xlu1 %v9519_v25, %s14374_s19 }
0x7862   :  { %v9522_v43 = vpop.permute.xlu1 %9521 }
0x7863   :  { %v9524_v57 = vadd.f32 %v9522_v43, %v9514_v16 }
0x7865   :  { %14214 = vtanh.f32 %v9524_v57 }
0x786f   :  { %v14215_v29 = vpop.eup %14214 }
0x7870   :  { %9527 = vrot.lane.b32.xlu0 %v14215_v29, %s14374_s19 }
0x78e2   :  { %v9528_v34 = vpop.permute.xlu0 %9527 }
0x78e3   :  { %v9530_v48 = vmul.f32 %v14213_v38, %v9528_v34 }
0x78e5   :  { %9532 = vrot.lane.b32.xlu1 %v9530_v48, %s14375_s20 }
0x7957   :  { %v9533_v54 = vpop.permute.xlu1 %9532 }
0x7958   :  { %9535 = vst.msk [vmem:[#allocation2 + $0x1] sm:$0x1] %vm9360_vm3, %v9533_v54  ;;  %12739 = vmatmul.mubr.msk.f32.vlgmr.msra.gmra.mrb[56].mxu0 %vm141_vm2, %v9533_v54 }
0x7959   :  { %9536 = vst.msk [vmem:[#allocation2 + $0x8] sm:$0x2] %vm9362_vm4, %v9533_v54  ;;  %13525 = vmatpush3.bf16.msra.mxu0 %v15763_v27  ;;  %12771 = vmatprep.mubr.msk.f32.mxu0 %vm14372_vm0, %v14373_v6 }
0x795a   :  { %13526 = vmatprep.subr.bf16.mxu0 %v14371_v3 }
0x795d   :  { %13528 = vmatpush3.bf16.msra.mxu0 %v15770_v20 }
0x795e   :  { %13529 = vmatprep.subr.bf16.mxu0 %v14371_v3 }
0x7960   :  { %12772 = vmatmul.mubr.msk.f32.vlgmr.msra.gmra.mrb[58].mxu0 %vm141_vm2, %v15731_v50 }
0x7961   :  { %13531 = vmatpush3.bf16.msra.mxu0 %v15776_v61  ;;  %12782 = vmatprep.mubr.msk.f32.mxu0 %vm14372_vm0, %v14373_v6 }
0x7962   :  { %13532 = vmatprep.subr.bf16.mxu0 %v14371_v3 }
0x7965   :  { %13534 = vmatpush3.bf16.msra.mxu0 %v15782_v26 }
0x7966   :  { %13547 = vmatprep.subr.bf16.mxu0 %v14371_v3 }
0x7a2b   :  { %v9675_v21 = vpop.f32.mrb[56].mxu0 }
0x7a2c   :  { %v13629_v24 = vadd.f32 %v15806_v35, %v9675_v21  ;;  %v12740_v1 = vpop.f32.mrb[57].mxu0 }
0x7a2e   :  { %14216 = vtanh.f32 %v13629_v24  ;;  %v10913_v50 = vmul.f32 -1.442695, %v13629_v24 }
0x7a30   :  { %14218 = vpow2.f32 %v10913_v50 }
0x7a38   :  { %v14217_v10 = vpop.eup %14216 }
0x7a39   :  { %9689 = vrot.lane.b32.xlu0 %v14217_v10, %s14374_s19 }
0x7a3a   :  { %v14219_v39 = vpop.eup %14218 }
0x7a3b   :  { %v9683_v30 = vadd.f32 1.0, %v14219_v39 }
0x7a3d   :  { %14220 = vrcp.f32 %v9683_v30 }
0x7a47   :  { %v14221_v23 = vpop.eup %14220 }
0x7a48   :  { %v9687_v51 = vmul.f32 %v14221_v23, %v9524_v57 }
0x7aab   :  { %v9690_v17 = vpop.permute.xlu0 %9689 }
0x7aac   :  { %v9692_v56 = vmul.f32 %v14221_v23, %v9690_v17 }
0x7aae   :  { %9694 = vrot.lane.b32.xlu1 %v9692_v56, %s14374_s19 }
0x7b20   :  { %v9695_v46 = vpop.permute.xlu1 %9694 }
0x7b21   :  { %v9697_v60 = vadd.f32 %v9695_v46, %v9687_v51 }
0x7b23   :  { %14222 = vtanh.f32 %v9697_v60 }
0x7b2d   :  { %v14223_v63 = vpop.eup %14222 }
0x7b2e   :  { %9700 = vrot.lane.b32.xlu0 %v14223_v63, %s14374_s19 }
0x7ba0   :  { %v9701_v47 = vpop.permute.xlu0 %9700 }
0x7ba1   :  { %v9703_v18 = vmul.f32 %v14221_v23, %v9701_v47  ;;  %v14277_v23 = vld [vmem:[#allocation7 + $0x2c8] ss:$0 sm:$0xff] }
0x7ba2   :  { %v13626_v17 = vadd.f32 %v14277_v23, %v15856_v52 }
0x7ba3   :  { %9705 = vrot.lane.b32.xlu1 %v9703_v18, %s14375_s20 }
0x7ba4   :  { %v10903_v46 = vmul.f32 -1.442695, %v13626_v17 }
0x7c15   :  { %v9706_v45 = vpop.permute.xlu1 %9705 }
0x7c16   :  { %9708 = vst.msk [vmem:[#allocation2 + $0x2] sm:$0x1] %vm9360_vm3, %v9706_v45  ;;  %12761 = vmatmul.mubr.msk.f32.vlgmr.msra.gmra.mrb[60].mxu1 %vm141_vm2, %v9706_v45 }
0x7c17   :  { %9709 = vst.msk [vmem:[#allocation2 + $0x9] sm:$0x2] %vm9362_vm4, %v9706_v45  ;;  %13537 = vmatpush3.bf16.msra.mxu1 %v15763_v27  ;;  %12793 = vmatprep.mubr.msk.f32.mxu1 %vm14372_vm0, %v14373_v6 }
0x7c18   :  { %13538 = vmatprep.subr.bf16.mxu1 %v14371_v3 }
0x7c1b   :  { %13540 = vmatpush3.bf16.msra.mxu1 %v15770_v20 }
0x7c1c   :  { %13541 = vmatprep.subr.bf16.mxu1 %v14371_v3 }
0x7c1e   :  { %12794 = vmatmul.mubr.msk.f32.vlgmr.msra.gmra.mrb[62].mxu1 %vm141_vm2, %v15765_v13 }
0x7c1f   :  { %13543 = vmatpush3.bf16.msra.mxu1 %v15776_v61  ;;  %12804 = vmatprep.mubr.msk.f32.mxu1 %vm14372_vm0, %v14373_v6 }
0x7c20   :  { %13544 = vmatprep.subr.bf16.mxu1 %v14371_v3 }
0x7c23   :  { %13546 = vmatpush3.bf16.msra.mxu1 %v15782_v26 }
0x7c24   :  { %13559 = vmatprep.subr.bf16.mxu1 %v14371_v3 }
0x7ce9   :  { %v9848_v36 = vpop.f32.mrb[60].mxu1 }
0x7cea   :  { %v13630_v0 = vadd.f32 %v15806_v35, %v9848_v36  ;;  %v12762_v42 = vpop.f32.mrb[61].mxu1 }
0x7cec   :  { %14224 = vtanh.f32 %v13630_v0  ;;  %v10916_v13 = vmul.f32 -1.442695, %v13630_v0 }
0x7cee   :  { %14226 = vpow2.f32 %v10916_v13 }
0x7cf6   :  { %v14225_v44 = vpop.eup %14224 }
0x7cf7   :  { %9862 = vrot.lane.b32.xlu0 %v14225_v44, %s14374_s19 }
0x7cf8   :  { %v14227_v33 = vpop.eup %14226 }
0x7cf9   :  { %v9856_v14 = vadd.f32 1.0, %v14227_v33 }
0x7cfb   :  { %14228 = vrcp.f32 %v9856_v14 }
0x7d05   :  { %v14229_v9 = vpop.eup %14228 }
0x7d06   :  { %v9860_v49 = vmul.f32 %v14229_v9, %v9697_v60 }
0x7d69   :  { %v9863_v4 = vpop.permute.xlu0 %9862 }
0x7d6a   :  { %v9865_v22 = vmul.f32 %v14229_v9, %v9863_v4 }
0x7d6c   :  { %9867 = vrot.lane.b32.xlu1 %v9865_v22, %s14374_s19 }
0x7dde   :  { %v9868_v8 = vpop.permute.xlu1 %9867 }
0x7ddf   :  { %v9870_v12 = vadd.f32 %v9868_v8, %v9860_v49 }
0x7de1   :  { %14230 = vtanh.f32 %v9870_v12 }
0x7deb   :  { %v14231_v7 = vpop.eup %14230 }
0x7dec   :  { %9873 = vrot.lane.b32.xlu0 %v14231_v7, %s14374_s19 }
0x7e5e   :  { %v9874_v2 = vpop.permute.xlu0 %9873 }
0x7e5f   :  { %v9876_v28 = vmul.f32 %v14229_v9, %v9874_v2 }
0x7e61   :  { %9878 = vrot.lane.b32.xlu1 %v9876_v28, %s14375_s20 }
0x7ed3   :  { %v9879_v53 = vpop.permute.xlu1 %9878 }
0x7ed4   :  { %9881 = vst.msk [vmem:[#allocation2 + $0x3] sm:$0x1] %vm9360_vm3, %v9879_v53  ;;  %12783 = vmatmul.mubr.msk.f32.vlgmr.msra.gmra.mrb[58].mxu0 %vm141_vm2, %v9879_v53 }
0x7ed5   :  { %9882 = vst.msk [vmem:[#allocation2 + $0xa] sm:$0x2] %vm9362_vm4, %v9879_v53  ;;  %13549 = vmatpush3.bf16.msra.mxu0 %v15763_v27  ;;  %12815 = vmatprep.mubr.msk.f32.mxu0 %vm14372_vm0, %v14373_v6 }
0x7ed6   :  { %13550 = vmatprep.subr.bf16.mxu0 %v14371_v3 }
0x7ed9   :  { %13552 = vmatpush3.bf16.msra.mxu0 %v15770_v20 }
0x7eda   :  { %13553 = vmatprep.subr.bf16.mxu0 %v14371_v3 }
0x7edc   :  { %12816 = vmatmul.mubr.msk.f32.vlgmr.msra.gmra.mrb[60].mxu0 %vm141_vm2, %v15821_v11 }
0x7edd   :  { %13555 = vmatpush3.bf16.msra.mxu0 %v15776_v61  ;;  %12826 = vmatprep.mubr.msk.f32.mxu0 %vm14372_vm0, %v14373_v6 }
0x7ede   :  { %13556 = vmatprep.subr.bf16.mxu0 %v14371_v3 }
0x7ee1   :  { %13558 = vmatpush3.bf16.msra.mxu0 %v15782_v26 }
0x7fa7   :  { %v10021_v32 = vpop.f32.mrb[58].mxu0 }
0x7fa8   :  { %v13631_v40 = vadd.f32 %v15806_v35, %v10021_v32  ;;  %v12784_v41 = vpop.f32.mrb[59].mxu0 }
0x7faa   :  { %14232 = vtanh.f32 %v13631_v40  ;;  %v10919_v59 = vmul.f32 -1.442695, %v13631_v40 }
0x7fac   :  { %14234 = vpow2.f32 %v10919_v59 }
0x7fb4   :  { %v14233_v58 = vpop.eup %14232 }
0x7fb5   :  { %10035 = vrot.lane.b32.xlu0 %v14233_v58, %s14374_s19 }
0x7fb6   :  { %v14235_v11 = vpop.eup %14234 }
0x7fb7   :  { %v10029_v62 = vadd.f32 1.0, %v14235_v11 }
0x7fb9   :  { %14236 = vrcp.f32 %v10029_v62 }
0x7fc3   :  { %v14237_v15 = vpop.eup %14236 }
0x7fc4   :  { %v10033_v55 = vmul.f32 %v14237_v15, %v9870_v12 }
0x8027   :  { %v10036_v5 = vpop.permute.xlu0 %10035 }
0x8028   :  { %v10038_v37 = vmul.f32 %v14237_v15, %v10036_v5 }
0x802a   :  { %10040 = vrot.lane.b32.xlu1 %v10038_v37, %s14374_s19 }
0x809c   :  { %v10041_v38 = vpop.permute.xlu1 %10040 }
0x809d   :  { %v10043_v31 = vadd.f32 %v10041_v38, %v10033_v55 }
0x809f   :  { %14238 = vtanh.f32 %v10043_v31 }
0x80a9   :  { %v14239_v25 = vpop.eup %14238 }
0x80aa   :  { %10046 = vrot.lane.b32.xlu0 %v14239_v25, %s14374_s19 }
0x811c   :  { %v10047_v16 = vpop.permute.xlu0 %10046 }
0x811d   :  { %v10049_v43 = vmul.f32 %v14237_v15, %v10047_v16 }
0x811f   :  { %10051 = vrot.lane.b32.xlu1 %v10049_v43, %s14375_s20 }
0x8191   :  { %v10052_v57 = vpop.permute.xlu1 %10051 }
0x8192   :  { %10054 = vst.msk [vmem:[#allocation2 + $0x4] sm:$0x1] %vm9360_vm3, %v10052_v57  ;;  %12805 = vmatmul.mubr.msk.f32.vlgmr.msra.gmra.mrb[62].mxu1 %vm141_vm2, %v10052_v57 }
0x8193   :  { %10055 = vst.msk [vmem:[#allocation2 + $0xb] sm:$0x2] %vm9362_vm4, %v10052_v57  ;;  %13561 = vmatpush3.bf16.msra.mxu1 %v15763_v27  ;;  %12837 = vmatprep.mubr.msk.f32.mxu1 %vm14372_vm0, %v14373_v6 }
0x8194   :  { %13562 = vmatprep.subr.bf16.mxu1 %v14371_v3 }
0x8197   :  { %13564 = vmatpush3.bf16.msra.mxu1 %v15770_v20 }
0x8198   :  { %13565 = vmatprep.subr.bf16.mxu1 %v14371_v3 }
0x8265   :  { %v10194_v29 = vpop.f32.mrb[62].mxu1 }
0x8266   :  { %v13632_v34 = vadd.f32 %v15806_v35, %v10194_v29  ;;  %v12806_v48 = vpop.f32.mrb[63].mxu1 }
0x8267   :  { %v10585_v48 = vld [vmem:[#allocation8 + $0x18] sm:$0xff] }
0x8268   :  { %14240 = vtanh.f32 %v13632_v34  ;;  %v10922_v21 = vmul.f32 -1.442695, %v13632_v34  ;;  %v10583_v34 = vld [vmem:[#allocation8 + $0x8] sm:$0xff] }
0x826a   :  { %14242 = vpow2.f32 %v10922_v21  ;;  %v10582_v21 = vld [vmem:[#allocation8] sm:$0xff] }
0x8272   :  { %v14241_v54 = vpop.eup %14240 }
0x8273   :  { %10208 = vrot.lane.b32.xlu0 %v14241_v54, %s14374_s19  ;;  %v13571_v54 = vpack.c.bf16 %v10585_v48, %v10583_v34 }
0x8274   :  { %v14243_v27 = vpop.eup %14242 }
0x8275   :  { %v10202_v24 = vadd.f32 1.0, %v14243_v27  ;;  %v10584_v27 = vld [vmem:[#allocation8 + $0x10] sm:$0xff]  ;;  %13572 = vmatprep.subr.bf16.mxu0 %v13571_v54 }
0x8277   :  { %14244 = vrcp.f32 %v10202_v24  ;;  %v13573_v24 = vpack.c.bf16 %v10584_v27, %v10582_v21 }
0x8281   :  { %v14245_v1 = vpop.eup %14244 }
0x8282   :  { %v10206_v20 = vmul.f32 %v14245_v1, %v10043_v31 }
0x82e5   :  { %v10209_v10 = vpop.permute.xlu0 %10208 }
0x82e6   :  { %v10211_v50 = vmul.f32 %v14245_v1, %v10209_v10  ;;  %v10589_v10 = vld [vmem:[#allocation8 + $0x38] sm:$0xff] }
0x82e8   :  { %10213 = vrot.lane.b32.xlu1 %v10211_v50, %s14374_s19  ;;  %v10586_v50 = vld [vmem:[#allocation8 + $0x20] sm:$0xff] }
0x835a   :  { %v10214_v39 = vpop.permute.xlu1 %10213 }
0x835b   :  { %v10216_v30 = vadd.f32 %v10214_v39, %v10206_v20  ;;  %v10588_v39 = vld [vmem:[#allocation8 + $0x30] sm:$0xff] }
0x835d   :  { %14246 = vtanh.f32 %v10216_v30 }
0x835e   :  { %14248 = vtanh.f32 %v13626_v17 }
0x835f   :  { %14250 = vpow2.f32 %v10903_v46 }
0x8367   :  { %v14247_v56 = vpop.eup %14246 }
0x8368   :  { %10219 = vrot.lane.b32.xlu0 %v14247_v56, %s14374_s19  ;;  %v14249_v51 = vpop.eup %14248 }
0x8369   :  { %v14251_v60 = vpop.eup %14250 }
0x836a   :  { %v9157_v63 = vadd.f32 1.0, %v14251_v60  ;;  %v10593_v60 = vlaneseq }
0x836c   :  { %9163 = vrot.lane.b32.xlu0 %v14249_v51, %s14374_s19  ;;  %14252 = vrcp.f32 %v9157_v63  ;;  %v10594_v63 = vshrl.u32 %v10593_v60, 7 }
0x8376   :  { %v14253_v45 = vpop.eup %14252 }
0x8377   :  { %v9161_v42 = vmul.f32 %v14253_v45, %v15813_v19 }
0x83da   :  { %v10220_v47 = vpop.permute.xlu0 %10219 }
0x83db   :  { %v10222_v18 = vmul.f32 %v14245_v1, %v10220_v47  ;;  %v10587_v1 = vld [vmem:[#allocation8 + $0x28] sm:$0xff]  ;;  %v10595_v47 = vsub.s32 0, %v10594_v63 }
0x83dc   :  { %v13575_v20 = vpack.c.bf16 %v10589_v10, %v10587_v1 }
0x83dd   :  { %10224 = vrot.lane.b32.xlu1 %v10222_v18, %s14375_s20  ;;  %v10591_v18 = vld [vmem:[#allocation8 + $0x40] ss:$8 sm:$0x3] }
0x83de   :  { %v9164_v36 = vpop.permute.xlu0 %9163 }
0x83df   :  { %v9166_v52 = vmul.f32 %v14253_v45, %v9164_v36  ;;  %v10596_v36 = vrot.slane %v10591_v18, %v10595_v47 }
0x83e1   :  { %9168 = vrot.lane.b32.xlu0 %v9166_v52, %s14374_s19 }
0x844f   :  { %v10225_v0 = vpop.permute.xlu1 %10224 }
0x8450   :  { %10227 = vst.msk [vmem:[#allocation2 + $0x5] sm:$0x1] %vm9360_vm3, %v10225_v0  ;;  %12827 = vmatmul.mubr.msk.f32.vlgmr.msra.gmra.mrb[60].mxu0 %vm141_vm2, %v10225_v0 }
0x8451   :  { %10228 = vst.msk [vmem:[#allocation2 + $0xc] sm:$0x2] %vm9362_vm4, %v10225_v0  ;;  %10673 = vmatprep.mubr.f32.mxu0 %v14373_v6  ;;  %13574 = vmatpush1.bf16.msra.mxu0 %v13573_v24 }
0x8452   :  { %13576 = vmatprep.subr.bf16.mxu0 %v13575_v20 }
0x8453   :  { %v9169_v44 = vpop.permute.xlu0 %9168 }
0x8454   :  { %v9171_v13 = vadd.f32 %v9169_v44, %v9161_v42 }
0x8456   :  { %14254 = vtanh.f32 %v9171_v13 }
0x8460   :  { %v14255_v33 = vpop.eup %14254 }
0x8461   :  { %9174 = vrot.lane.b32.xlu0 %v14255_v33, %s14374_s19 }
0x84d3   :  { %v9175_v14 = vpop.permute.xlu0 %9174 }
0x84d4   :  { %v9177_v9 = vmul.f32 %v14253_v45, %v9175_v14  ;;  %v10599_v45 = vsub.s32 1, %v10594_v63 }
0x84d6   :  { %10403 = vrot.lane.b32.xlu0 %v9177_v9, %s14375_s20  ;;  %v10600_v52 = vrot.slane %v10591_v18, %v10599_v45 }
0x8523   :  { %v10367_v4 = vpop.f32.mrb[60].mxu0 }
0x8524   :  { %v13633_v22 = vadd.f32 %v15806_v35, %v10367_v4  ;;  %v12828_v49 = vpop.f32.mrb[61].mxu0 }
0x8526   :  { %14256 = vtanh.f32 %v13633_v22  ;;  %v10925_v19 = vmul.f32 -1.442695, %v13633_v22 }
0x8528   :  { %14258 = vpow2.f32 %v10925_v19 }
0x8530   :  { %v14257_v8 = vpop.eup %14256 }
0x8531   :  { %10381 = vrot.lane.b32.xlu1 %v14257_v8, %s14374_s19 }
0x8532   :  { %v14259_v7 = vpop.eup %14258 }
0x8533   :  { %v10375_v2 = vadd.f32 1.0, %v14259_v7 }
0x8535   :  { %14260 = vrcp.f32 %v10375_v2 }
0x853f   :  { %v14261_v28 = vpop.eup %14260 }
0x8540   :  { %v10379_v40 = vmul.f32 %v14261_v28, %v10216_v30  ;;  %v13577_v30 = vpack.c.bf16 %v10588_v39, %v10586_v50 }
0x8542   :  { %13578 = vmatpush1.bf16.msra.mxu0 %v13577_v30 }
0x8548   :  { %v10404_v12 = vpop.permute.xlu0 %10403 }
0x8549   :  { %12838 = vmatmul.mubr.msk.f32.vlgmr.msra.gmra.mrb[64].mxu1 %vm141_vm2, %v10404_v12 }
0x854a   :  { %13567 = vmatpush3.bf16.msra.mxu1 %v15776_v61  ;;  %12848 = vmatprep.mubr.msk.f32.mxu1 %vm14372_vm0, %v14373_v6 }
0x854b   :  { %13568 = vmatprep.subr.bf16.mxu1 %v14371_v3 }
0x854e   :  { %13570 = vmatpush3.bf16.msra.mxu1 %v15782_v26 }
0x85a3   :  { %v10382_v53 = vpop.permute.xlu1 %10381 }
0x85a4   :  { %v10384_v32 = vmul.f32 %v14261_v28, %v10382_v53 }
0x85a6   :  { %10386 = vrot.lane.b32.xlu1 %v10384_v32, %s14374_s19 }
0x8618   :  { %v10387_v41 = vpop.permute.xlu1 %10386 }
0x8619   :  { %v10389_v61 = vadd.f32 %v10387_v41, %v10379_v40 }
0x861b   :  { %14262 = vtanh.f32 %v10389_v61 }
0x8625   :  { %v14263_v58 = vpop.eup %14262 }
0x8626   :  { %10392 = vrot.lane.b32.xlu1 %v14263_v58, %s14374_s19 }
0x8698   :  { %v10393_v3 = vpop.permute.xlu1 %10392 }
0x8699   :  { %v10395_v59 = vmul.f32 %v14261_v28, %v10393_v3 }
0x869b   :  { %10397 = vrot.lane.b32.xlu1 %v10395_v59, %s14375_s20 }
0x870d   :  { %v10398_v26 = vpop.permute.xlu1 %10397 }
0x870e   :  { %10400 = vst.msk [vmem:[#allocation2 + $0x6] sm:$0x1] %vm9360_vm3, %v10398_v26  ;;  %12849 = vmatmul.mubr.msk.f32.vlgmr.msra.gmra.mrb[64].mxu1 %vm141_vm2, %v10398_v26 }
0x870f   :  { %10401 = vst.msk [vmem:[#allocation2 + $0xd] sm:$0x2] %vm9362_vm4, %v10398_v26 }
0x87e1   :  { %v10545_v11 = vpop.f32.mrb[64].mxu1 }
0x87e2   :  { %v13634_v62 = vadd.f32 %v15806_v35, %v10545_v11  ;;  %v12850_v15 = vpop.f32.mrb[65].mxu1 }
0x87e4   :  { %14264 = vtanh.f32 %v13634_v62  ;;  %v10928_v37 = vmul.f32 -1.442695, %v13634_v62 }
0x87e6   :  { %14266 = vpow2.f32 %v10928_v37 }
0x87ee   :  { %v14265_v5 = vpop.eup %14264 }
0x87ef   :  { %10559 = vrot.lane.b32.xlu0 %v14265_v5, %s14374_s19 }
0x87f0   :  { %v14267_v55 = vpop.eup %14266 }
0x87f1   :  { %v10553_v38 = vadd.f32 1.0, %v14267_v55 }
0x87f3   :  { %14268 = vrcp.f32 %v10553_v38 }
0x87fd   :  { %v14269_v31 = vpop.eup %14268 }
0x87fe   :  { %v10557_v43 = vmul.f32 %v14269_v31, %v10389_v61 }
0x8861   :  { %v10560_v25 = vpop.permute.xlu0 %10559 }
0x8862   :  { %v10562_v16 = vmul.f32 %v14269_v31, %v10560_v25 }
0x8864   :  { %10564 = vrot.lane.b32.xlu1 %v10562_v16, %s14374_s19 }
0x88d6   :  { %v10565_v57 = vpop.permute.xlu1 %10564 }
0x88d7   :  { %v10567_v29 = vadd.f32 %v10565_v57, %v10557_v43 }
0x88d9   :  { %14270 = vtanh.f32 %v10567_v29 }
0x88e3   :  { %v14271_v35 = vpop.eup %14270 }
0x88e4   :  { %10570 = vrot.lane.b32.xlu0 %v14271_v35, %s14374_s19  ;;  %s14376_s19 = smov [#allocation10]  }
0x8956   :  { %v10571_v23 = vpop.permute.xlu0 %10570 }
0x8957   :  { %v10573_v17 = vmul.f32 %v14269_v31, %v10571_v23 }
0x8959   :  { %10575 = vrot.lane.b32.xlu1 %v10573_v17, %s14375_s20  ;;  %s10695_s20 = sshll.u32 %s14376_s19, 4  ;;  %s10696_s20 = int_to_ptr.vmem [resolvable:$true] %s10695_s20 }
0x895a   :  { %s14334_s23 = scalar_lea.vmem %s10696_s20, 512  ;;  %p14339_p8 = scmp.lt.s32.totalorder %s10696_s20, %s10696_s20 }
0x895b   :  { %p14335_p7 = scmp.ne.s32.totalorder %s10696_s20, %s14334_s23  ;;  %p14340_p9 = scmp.lt.s32.totalorder %s14334_s23, %s14334_s23 }
0x895d   :  { %p14341_p10 = por %p14340_p9, %p14339_p8 }
0x895f   :  { %p14342_p11 = pnand %p14341_p10, %p14335_p7 }
0x89cb   :  { %v10576_v56 = vpop.permute.xlu1 %10575 }
0x89cc   :  { %10578 = vst.msk [vmem:[#allocation2 + $0x7] sm:$0x1] %vm9360_vm3, %v10576_v56 }
0x89cd   :  { %10579 = vst.msk [vmem:[#allocation2 + $0xe] sm:$0x2] %vm9362_vm4, %v10576_v56 }
0x89d3   :  { %v10580_v51 = vld [vmem:[#allocation2] sm:$0xff] }
0x89d4   :  { %10929 = vmatmul.mubr.msk.f32.vlgmr.msra.gmra.mrb[62].mxu0 %vm141_vm2, %v10580_v51  ;;  %v10581_v46 = vld [vmem:[#allocation2 + $0x8] sm:$0xff] }
0x89d5   :  { %10679 = vmatprep.mubr.f32.mxu0 %v14373_v6 }
0x89d8   :  { %10930 = vmatmul.mubr.msk.f32.gmra.mrb[64].mxu0 %vm141_vm2, %v10581_v46 }
0x8aa7   :  { %v10675_v0 = vpop.f32.mrb[62].mxu0 }
0x8aa8   :  { %v10676_v42 = vadd.f32 %v10675_v0, %v10596_v36  ;;  %v10677_v44 = vpop.f32.mrb[63].mxu0 }
0x8aa9   :  { %v10678_v13 = vadd.f32 %v10677_v44, %v10600_v52 }
0x8aaa   :  { %10686 = vst [vmem:[#allocation10] sm:$0xff] %v10676_v42 }
0x8aab   :  { %10687 = vst [vmem:[#allocation10 + $0x8] sm:$0xff] %v10678_v13  ;;  %v10681_v33 = vpop.f32.mrb[64].mxu0 }
0x8aac   :  { %v10682_v6 = vadd.f32 %v10681_v33, %v10596_v36  ;;  %v10683_v14 = vpop.f32.mrb[65].mxu0 }
0x8aad   :  { %v10684_v9 = vadd.f32 %v10683_v14, %v10600_v52 }
0x8aae   :  { %10688 = vst [vmem:[#allocation10 + $0x10] sm:$0xff] %v10682_v6 }
0x8aaf   :  { %10689 = vst [vmem:[#allocation10 + $0x18] sm:$0xff] %v10684_v9 }
0x8ab0   :  { %14345 = shalt.err (!%p14342_p11)
}
0x8ab1   :  { %s14346_s25 = scalar_lea.hbm %s15994_s3, 512 }
0x8ab2   :  { %p14347_p12 = scmp.ne.s32.totalorder %s15994_s3, %s14346_s25  ;;  %p14350_p13 = scmp.lt.u32.totalorder %s14346_s25, %s15994_s3 }
0x8ab4   :  { %p14352_p0 = pnand %p14350_p13, %p14347_p12 }
0x8ab6   :  { %14355 = shalt.err (!%p14352_p0)
}
0x8ab7   :  { %10701 = dma.vmem_to_hbm [thread:$0]  %s10696_s20, 512, %s15994_s3, [#allocation5], %s14369_s1, %s14369_s1, %s14370_s13  }
0x8ab8   :  { %14362 = dma.done.wait [#allocation5], 512  }
0x8ab9   :  { %14363 = vsyncadd [#allocation5], 4294966784 }
0x8aba   :  { %10705 = vsyncpa [#allocation4], 1 }
0x8abb   :  { %10706 = vsyncpa [#allocation9], 1 }
0x8abc   :  { %10707 = vsyncpa [#allocation5], 1 }
0x8abd   :  { %10708 = vsyncpa [#allocation6], 1 }

</bundles_post_ra>
